<compile_context>
chip_gen: v6e
topology: v6e:2x2x1
jax: 0.10.0
libtpu: 0.0.40
codegen_flags: <defaults>
</compile_context>

<pallas_src>
import functools

import jax
import jax.numpy as jnp
from jax.experimental import pallas as pl
from jax.experimental.pallas import tpu as pltpu


# ---------------------------------------------------------------------------
# Kernel 1: both resblock2_child blocks fused (per batch element)
# ---------------------------------------------------------------------------
def _children_kernel(x_ref, w1_ref, b1_ref, w2_ref, b2_ref, lm_ref, rm_ref,
                     o_ref, ypad_ref, *, H, W, n_child, slope):
    HW = H * W
    pad = W + 1                    # zero rows above/below the flattened image
    zeros_pad = jnp.zeros((pad, ypad_ref.shape[1]), ypad_ref.dtype)
    ypad_ref[0:pad, :] = zeros_pad
    ypad_ref[pad + HW:pad + HW + pad, :] = zeros_pad

    lm = lm_ref[...]               # (HW, 1) bf16, 0 where w == 0
    rm = rm_ref[...]               # (HW, 1) bf16, 0 where w == W-1

    xin = x_ref[0]                 # (HW, 128) bf16
    x_f32 = xin.astype(jnp.float32)
    cout = o_ref.shape[2]          # 128

    for i in range(n_child):
        # conv1 (1x1, 128->64) + BN shift + LeakyReLU, kept in VMEM.
        h1 = jnp.dot(xin, w1_ref[i], preferred_element_type=jnp.float32)
        h1 = h1 + b1_ref[i]                         # (HW, 64) f32
        y1 = jnp.maximum(h1, slope * h1)
        ypad_ref[pad:pad + HW, :] = y1              # interior of padded scratch

        # conv2 (3x3, pad=1) as 9 shifted matmuls over the padded scratch.
        # content row p lives at ypad row (W+1)+p; tap (dy,dx) reads rows
        # starting at (dy+1)*W + (dx+1); dx=+-1 taps need column masks.
        acc = jnp.zeros((HW, cout), jnp.float32)
        tap = 0
        for dy in (-1, 0, 1):
            for dx in (-1, 0, 1):
                start = (dy + 1) * W + (dx + 1)
                slab = ypad_ref[start:start + HW, :].astype(jnp.bfloat16)
                if dx == -1:
                    slab = slab * lm
                elif dx == 1:
                    slab = slab * rm
                acc = acc + jnp.dot(slab, w2_ref[i * 9 + tap],
                                    preferred_element_type=jnp.float32)
                tap += 1

        y2 = acc + b2_ref[i]                        # BN shift
        y2 = jnp.maximum(y2, slope * y2)            # LeakyReLU
        x_f32 = x_f32 + y2                          # residual add (f32)
        xin = x_f32.astype(jnp.bfloat16)

    o_ref[0] = xin                                  # bf16 inter-stage output


def _children_call(x, prep, lm, rm, H, W):
    N, HW, C = x.shape
    kernel = functools.partial(_children_kernel, H=H, W=W, n_child=2, slope=0.1)
    return pl.pallas_call(
        kernel,
        out_shape=jax.ShapeDtypeStruct((N, HW, C), jnp.bfloat16),
        grid=(N,),
        in_specs=[
            pl.BlockSpec((1, HW, C), lambda n: (n, 0, 0)),
            pl.BlockSpec(prep["w1"].shape, lambda n: (0, 0, 0)),
            pl.BlockSpec(prep["b1"].shape, lambda n: (0, 0, 0)),
            pl.BlockSpec(prep["w2"].shape, lambda n: (0, 0, 0)),
            pl.BlockSpec(prep["b2"].shape, lambda n: (0, 0, 0)),
            pl.BlockSpec(lm.shape, lambda n: (0, 0)),
            pl.BlockSpec(rm.shape, lambda n: (0, 0)),
        ],
        out_specs=pl.BlockSpec((1, HW, C), lambda n: (n, 0, 0)),
        scratch_shapes=[pltpu.VMEM((HW + 2 * W + 2, 64), jnp.float32)],
        compiler_params=pltpu.CompilerParams(
            dimension_semantics=("parallel",)),
    )(x, prep["w1"], prep["b1"], prep["w2"], prep["b2"], lm, rm)


# ---------------------------------------------------------------------------
# Kernel 2: conv_extra (3x3 stride 2) as a fused 2x2 conv on the space-to-depth
# input (4*128 = 512 channels), + BN shift + LeakyReLU.
# ---------------------------------------------------------------------------
def _extra_kernel(s_ref, w_ref, b_ref, lm_ref, o_ref, spad_ref, *, Ho, Wo, slope):
    HWo = Ho * Wo
    pad = Wo + 1
    spad_ref[0:pad, :] = jnp.zeros((pad, spad_ref.shape[1]), spad_ref.dtype)
    spad_ref[pad:pad + HWo, :] = s_ref[0].astype(spad_ref.dtype)

    lm = lm_ref[...]                               # (HWo, 1) bf16, 0 where w'==0
    cout = o_ref.shape[2]                          # 256
    acc = jnp.zeros((HWo, cout), jnp.float32)
    for t, (A, B) in enumerate(((0, 0), (0, 1), (1, 0), (1, 1))):
        start = A * Wo + B                         # flat shift on the s2d grid
        slab = spad_ref[start:start + HWo, :].astype(jnp.bfloat16)
        if B == 0:                                 # left-edge column mask
            slab = slab * lm
        acc = acc + jnp.dot(slab, w_ref[t], preferred_element_type=jnp.float32)

    y = acc + b_ref[...]
    y = jnp.maximum(y, slope * y)
    o_ref[0] = y.astype(o_ref.dtype)


def _extra_call(s, prep, lm2, Ho, Wo):
    N, HWo, CK = s.shape                            # CK = 512
    kernel = functools.partial(_extra_kernel, Ho=Ho, Wo=Wo, slope=0.1)
    return pl.pallas_call(
        kernel,
        out_shape=jax.ShapeDtypeStruct((N, HWo, 256), jnp.float32),
        grid=(N,),
        in_specs=[
            pl.BlockSpec((1, HWo, CK), lambda n: (n, 0, 0)),
            pl.BlockSpec(prep["we"].shape, lambda n: (0, 0, 0)),
            pl.BlockSpec(prep["be"].shape, lambda n: (0, 0)),
            pl.BlockSpec(lm2.shape, lambda n: (0, 0)),
        ],
        out_specs=pl.BlockSpec((1, HWo, 256), lambda n: (n, 0, 0)),
        scratch_shapes=[pltpu.VMEM((HWo + Wo + 1, CK), jnp.float32)],
        compiler_params=pltpu.CompilerParams(
            dimension_semantics=("parallel",)),
    )(s, prep["we"], prep["be"], lm2)


# ---------------------------------------------------------------------------
# One-time parameter preparation (outside jit): BN folding, layout, bf16 cast.
# ---------------------------------------------------------------------------
def prepare_params(p, eps=1e-5):
    def fold(g, b, m, v):
        s = g / jnp.sqrt(v + eps)
        return s, b - m * s

    w1s, b1s, w2s, b2s = [], [], [], []
    for i in range(2):
        s1, sh1 = fold(p[f"c{i}_g1"], p[f"c{i}_b1"], p[f"c{i}_m1"], p[f"c{i}_v1"])
        w1 = p[f"c{i}_w1"][:, :, 0, 0]                       # (cout=64, cin=128)
        w1 = (w1 * s1[:, None]).T                            # (128, 64), scale folded
        w1s.append(w1)
        b1s.append(sh1[None, :])                             # (1, 64)

        s2, sh2 = fold(p[f"c{i}_g2"], p[f"c{i}_b2"], p[f"c{i}_m2"], p[f"c{i}_v2"])
        w2 = p[f"c{i}_w2"] * s2[:, None, None, None]         # (128, 64, 3, 3)
        w2 = jnp.transpose(w2, (2, 3, 1, 0)).reshape(9, 64, 128)  # [kh*3+kw, cin, cout]
        w2s.append(w2)
        b2s.append(sh2[None, :])                             # (1, 128)

    se, she = fold(p["e_g"], p["e_b"], p["e_m"], p["e_v"])
    we3 = p["e_w"] * se[:, None, None, None]                 # (256, 128, 3, 3)
    we3 = jnp.transpose(we3, (2, 3, 1, 0))                   # (kh, kw, cin, cout)

    # Build the 2x2 space-to-depth weight: W2x2[A,B] is (512, 256), rows indexed
    # by (row-parity a, col-parity b, cin).  Tap kh -> (A,a): 0->(0,1), 1->(1,0),
    # 2->(1,1); same mapping for kw -> (B,b).
    row_map = {0: [(1, 0)], 1: [(0, 1), (1, 2)]}
    w2x2 = jnp.zeros((2, 2, 2, 2, 128, 256), jnp.float32)
    for A in (0, 1):
        for B in (0, 1):
            for a, kh in row_map[A]:
                for b, kw in row_map[B]:
                    w2x2 = w2x2.at[A, B, a, b].set(we3[kh, kw])
    w2x2 = w2x2.reshape(4, 512, 256)                         # tap = A*2 + B

    return {
        "w1": jnp.stack(w1s).astype(jnp.bfloat16),           # (2, 128, 64)
        "b1": jnp.stack(b1s).astype(jnp.float32),            # (2, 1, 64)
        "w2": jnp.concatenate(w2s, axis=0).astype(jnp.bfloat16),  # (18, 64, 128)
        "b2": jnp.stack(b2s).astype(jnp.float32),            # (2, 1, 128)
        "we": w2x2.astype(jnp.bfloat16),                     # (4, 512, 256)
        "be": she[None, :].astype(jnp.float32),              # (1, 256)
    }


# ---------------------------------------------------------------------------
# Module forward (NCHW boundary to match PyTorch; flattened NHWC internally)
# ---------------------------------------------------------------------------
def resblock2_forward(x_nchw, prep):
    # TODO(synk): BatchNorm is eval-mode (running stats folded); the PyTorch
    # module defaults to train mode (batch statistics), which would not match.
    N, C, H, W = x_nchw.shape
    assert C == 128 and H % 2 == 0 and W % 2 == 0
    HW = H * W
    Ho, Wo = H // 2, W // 2

    # TODO(synk): if the surrounding graph can stay NHWC, these boundary
    # transposes (one HBM pass each) can be dropped.
    x = jnp.transpose(x_nchw, (0, 2, 3, 1)).reshape(N, HW, C).astype(jnp.bfloat16)

    # Column masks for the 3x3 pad=1 conv (constant-folded by XLA at compile).
    col = jax.lax.broadcasted_iota(jnp.int32, (HW, 1), 0) % W
    lm = (col != 0).astype(jnp.bfloat16)
    rm = (col != W - 1).astype(jnp.bfloat16)

    # Both resblock2_child blocks, fully fused.
    y = _children_call(x, prep, lm, rm, H, W)                # (N, HW, 128) bf16

    # Space-to-depth permutation (one small XLA pass, no expansion): turns the
    # stride-2 3x3 conv into a 2x2 stride-1 conv on 512 channels.
    # TODO(synk): could be folded into the kernels via a sublane->lane repack.
    s = (y.reshape(N, Ho, 2, Wo, 2, C)
           .transpose(0, 1, 3, 2, 4, 5)
           .reshape(N, Ho * Wo, 4 * C))

    col2 = jax.lax.broadcasted_iota(jnp.int32, (Ho * Wo, 1), 0) % Wo
    lm2 = (col2 != 0).astype(jnp.bfloat16)

    out = _extra_call(s, prep, lm2, Ho, Wo)                  # (N, Ho*Wo, 256) f32
    return jnp.transpose(out.reshape(N, Ho, Wo, 256), (0, 3, 1, 2))


# ---------------------------------------------------------------------------
# Pure-JAX reference (bf16 MXU inputs in the Pallas path -> loose tolerance)
# ---------------------------------------------------------------------------
def _conv_ref(x, w, stride, pad):
    return jax.lax.conv_general_dilated(
        x, w, window_strides=(stride, stride),
        padding=((pad, pad), (pad, pad)),
        dimension_numbers=("NCHW", "OIHW", "NCHW"))


def _bn_lrelu_ref(y, g, b, m, v, eps=1e-5, slope=0.1):
    scale = (g / jnp.sqrt(v + eps)).reshape(1, -1, 1, 1)
    shift = (b - m * (g / jnp.sqrt(v + eps))).reshape(1, -1, 1, 1)
    y = y * scale + shift
    return jnp.where(y > 0, y, slope * y)


def resblock2_reference(x, p):
    for i in range(2):
        y = _bn_lrelu_ref(_conv_ref(x, p[f"c{i}_w1"], 1, 0),
                          p[f"c{i}_g1"], p[f"c{i}_b1"], p[f"c{i}_m1"], p[f"c{i}_v1"])
        y = _bn_lrelu_ref(_conv_ref(y, p[f"c{i}_w2"], 1, 1),
                          p[f"c{i}_g2"], p[f"c{i}_b2"], p[f"c{i}_m2"], p[f"c{i}_v2"])
        x = x + y
    return _bn_lrelu_ref(_conv_ref(x, p["e_w"], 2, 1),
                         p["e_g"], p["e_b"], p["e_m"], p["e_v"])


# ---------------------------------------------------------------------------
# Deterministic synthetic parameters
# ---------------------------------------------------------------------------
def init_params(key):
    ks = jax.random.split(key, 16)
    p = {}
    k = 0
    for i in range(2):
        p[f"c{i}_w1"] = 0.05 * jax.random.normal(ks[k], (64, 128, 1, 1), jnp.float32); k += 1
        p[f"c{i}_w2"] = 0.03 * jax.random.normal(ks[k], (128, 64, 3, 3), jnp.float32); k += 1
        p[f"c{i}_g1"] = 1.0 + 0.1 * jax.random.normal(ks[k], (64,), jnp.float32); k += 1
        p[f"c{i}_b1"] = 0.1 * jax.random.normal(ks[k], (64,), jnp.float32); k += 1
        p[f"c{i}_m1"] = jnp.zeros((64,), jnp.float32)
        p[f"c{i}_v1"] = jnp.ones((64,), jnp.float32)
        p[f"c{i}_g2"] = 1.0 + 0.1 * jax.random.normal(ks[k], (128,), jnp.float32); k += 1
        p[f"c{i}_b2"] = 0.1 * jax.random.normal(ks[k], (128,), jnp.float32); k += 1
        p[f"c{i}_m2"] = jnp.zeros((128,), jnp.float32)
        p[f"c{i}_v2"] = jnp.ones((128,), jnp.float32)
    p["e_w"] = 0.02 * jax.random.normal(ks[k], (256, 128, 3, 3), jnp.float32); k += 1
    p["e_g"] = 1.0 + 0.1 * jax.random.normal(ks[k], (256,), jnp.float32); k += 1
    p["e_b"] = 0.1 * jax.random.normal(ks[k], (256,), jnp.float32); k += 1
    p["e_m"] = jnp.zeros((256,), jnp.float32)
    p["e_v"] = jnp.ones((256,), jnp.float32)
    return p


if __name__ == "__main__":
    key = jax.random.PRNGKey(0)
    pkey, xkey = jax.random.split(key)
    params = init_params(pkey)
    prep = prepare_params(params)          # one-time BN fold / pack / bf16 cast

    # Input consistent with the module: N=2, C=128 (conv1 requires 128), 16x16.
    x = jax.random.normal(xkey, (2, 128, 16, 16), jnp.float32)

    fwd = jax.jit(resblock2_forward)
    out = jax.block_until_ready(fwd(x, prep))

    assert out.shape == (2, 256, 8, 8), out.shape
    assert bool(jnp.all(jnp.isfinite(out)))

    ref = jax.block_until_ready(jax.jit(resblock2_reference)(x, params))
    max_err = float(jnp.max(jnp.abs(out - ref)))
    assert bool(jnp.allclose(out, ref, rtol=5e-2, atol=5e-2)), max_err

    print("KERNEL_OK")
</pallas_src>

<mosaic_0001>
module attributes {stable_mosaic.version = 11 : i64} {
  func.func @_children_kernel(%arg0: i32, %arg1: memref<1x256x128xbf16, #tpu.memory_space<vmem>>, %arg2: memref<2x128x64xbf16, #tpu.memory_space<vmem>>, %arg3: memref<2x1x64xf32, #tpu.memory_space<vmem>>, %arg4: memref<18x64x128xbf16, #tpu.memory_space<vmem>>, %arg5: memref<2x1x128xf32, #tpu.memory_space<vmem>>, %arg6: memref<256x1xbf16, #tpu.memory_space<vmem>>, %arg7: memref<256x1xbf16, #tpu.memory_space<vmem>>, %arg8: memref<1x256x128xbf16, #tpu.memory_space<vmem>>, %arg9: memref<290x64xf32, #tpu.memory_space<vmem>>) attributes {dimension_semantics = [#tpu.dimension_semantics<parallel>], iteration_bounds = array<i64: 2>, scalar_prefetch = 0 : i64, scratch_operands = 1 : i64, tpu.core_type = #tpu.core_type<tc>, window_params = [{transform_indices = @transform_0, window_bounds = array<i64: 1, 256, 128>}, {pipeline_mode = #tpu.pipeline_mode<synchronous>, transform_indices = @transform_1, window_bounds = array<i64: 2, 128, 64>}, {pipeline_mode = #tpu.pipeline_mode<synchronous>, transform_indices = @transform_2, window_bounds = array<i64: 2, 1, 64>}, {pipeline_mode = #tpu.pipeline_mode<synchronous>, transform_indices = @transform_3, window_bounds = array<i64: 18, 64, 128>}, {pipeline_mode = #tpu.pipeline_mode<synchronous>, transform_indices = @transform_4, window_bounds = array<i64: 2, 1, 128>}, {pipeline_mode = #tpu.pipeline_mode<synchronous>, transform_indices = @transform_5, window_bounds = array<i64: 256, 1>}, {pipeline_mode = #tpu.pipeline_mode<synchronous>, transform_indices = @transform_6, window_bounds = array<i64: 256, 1>}, {transform_indices = @transform_7, window_bounds = array<i64: 1, 256, 128>}]} {
    %cst = arith.constant 0.000000e+00 : f32
    %0 = vector.broadcast %cst : f32 to vector<17x64xf32>
    %c0 = arith.constant 0 : index
    %c0_0 = arith.constant 0 : index
    %1 = vector.load %arg9[%c0, %c0_0] : memref<290x64xf32, #tpu.memory_space<vmem>>, vector<17x64xf32>
    tpu.vector_store %arg9[%c0, %c0_0], %0 {strides = array<i32>} : memref<290x64xf32, #tpu.memory_space<vmem>>, vector<17x64xf32>,
    %c273 = arith.constant 273 : index
    %c0_1 = arith.constant 0 : index
    %2 = vector.load %arg9[%c273, %c0_1] : memref<290x64xf32, #tpu.memory_space<vmem>>, vector<17x64xf32>
    tpu.vector_store %arg9[%c273, %c0_1], %0 {strides = array<i32>} : memref<290x64xf32, #tpu.memory_space<vmem>>, vector<17x64xf32>,
    %c0_2 = arith.constant 0 : index
    %c0_3 = arith.constant 0 : index
    %3 = vector.load %arg6[%c0_2, %c0_3] : memref<256x1xbf16, #tpu.memory_space<vmem>>, vector<256x1xbf16>
    %c0_4 = arith.constant 0 : index
    %c0_5 = arith.constant 0 : index
    %4 = vector.load %arg7[%c0_4, %c0_5] : memref<256x1xbf16, #tpu.memory_space<vmem>>, vector<256x1xbf16>
    %c0_6 = arith.constant 0 : index
    %c0_7 = arith.constant 0 : index
    %c0_8 = arith.constant 0 : index
    %5 = vector.load %arg1[%c0_6, %c0_7, %c0_8] : memref<1x256x128xbf16, #tpu.memory_space<vmem>>, vector<1x256x128xbf16>
    %6 = vector.shape_cast %5 : vector<1x256x128xbf16> to vector<256x128xbf16>
    %7 = arith.extf %6 : vector<256x128xbf16> to vector<256x128xf32>
    %c0_9 = arith.constant 0 : index
    %c0_10 = arith.constant 0 : index
    %c0_11 = arith.constant 0 : index
    %8 = vector.load %arg2[%c0_9, %c0_10, %c0_11] : memref<2x128x64xbf16, #tpu.memory_space<vmem>>, vector<1x128x64xbf16>
    %9 = vector.shape_cast %8 : vector<1x128x64xbf16> to vector<128x64xbf16>
    %cst_12 = arith.constant dense<0.000000e+00> : vector<256x64xf32>
    %10 = tpu.matmul %6, %9, %cst_12 {dimension_numbers = #tpu.dot_dimension_numbers<[1], [0], [0], [1], [0, 0, 1, 1], [], []>} : vector<256x128xbf16>, vector<128x64xbf16>, vector<256x64xf32> -> vector<256x64xf32>
    %c0_13 = arith.constant 0 : index
    %c0_14 = arith.constant 0 : index
    %c0_15 = arith.constant 0 : index
    %11 = vector.load %arg3[%c0_13, %c0_14, %c0_15] : memref<2x1x64xf32, #tpu.memory_space<vmem>>, vector<1x1x64xf32>
    %12 = vector.shape_cast %11 : vector<1x1x64xf32> to vector<1x64xf32>
    %13 = vector.broadcast %12 : vector<1x64xf32> to vector<256x64xf32>
    %14 = arith.addf %10, %13 : vector<256x64xf32>
    %cst_16 = arith.constant 1.000000e-01 : f32
    %15 = vector.broadcast %cst_16 : f32 to vector<256x64xf32>
    %16 = arith.mulf %15, %14 : vector<256x64xf32>
    %17 = arith.maximumf %14, %16 : vector<256x64xf32>
    %c17 = arith.constant 17 : index
    %c0_17 = arith.constant 0 : index
    %18 = vector.load %arg9[%c17, %c0_17] : memref<290x64xf32, #tpu.memory_space<vmem>>, vector<256x64xf32>
    tpu.vector_store %arg9[%c17, %c0_17], %17 {strides = array<i32>} : memref<290x64xf32, #tpu.memory_space<vmem>>, vector<256x64xf32>,
    %cst_18 = arith.constant 0.000000e+00 : f32
    %19 = vector.broadcast %cst_18 : f32 to vector<256x128xf32>
    %c0_19 = arith.constant 0 : index
    %c0_20 = arith.constant 0 : index
    %20 = vector.load %arg9[%c0_19, %c0_20] : memref<290x64xf32, #tpu.memory_space<vmem>>, vector<256x64xf32>
    %21 = arith.truncf %20 : vector<256x64xf32> to vector<256x64xbf16>
    %22 = vector.broadcast %3 : vector<256x1xbf16> to vector<256x64xbf16>
    %23 = arith.mulf %21, %22 : vector<256x64xbf16>
    %c0_21 = arith.constant 0 : index
    %c0_22 = arith.constant 0 : index
    %c0_23 = arith.constant 0 : index
    %24 = vector.load %arg4[%c0_21, %c0_22, %c0_23] : memref<18x64x128xbf16, #tpu.memory_space<vmem>>, vector<1x64x128xbf16>
    %25 = vector.shape_cast %24 : vector<1x64x128xbf16> to vector<64x128xbf16>
    %cst_24 = arith.constant dense<0.000000e+00> : vector<256x128xf32>
    %26 = tpu.matmul %23, %25, %cst_24 {dimension_numbers = #tpu.dot_dimension_numbers<[1], [0], [0], [1], [0, 0, 1, 1], [], []>} : vector<256x64xbf16>, vector<64x128xbf16>, vector<256x128xf32> -> vector<256x128xf32>
    %27 = arith.addf %19, %26 : vector<256x128xf32>
    %c1 = arith.constant 1 : index
    %c0_25 = arith.constant 0 : index
    %28 = vector.load %arg9[%c1, %c0_25] : memref<290x64xf32, #tpu.memory_space<vmem>>, vector<256x64xf32>
    %29 = arith.truncf %28 : vector<256x64xf32> to vector<256x64xbf16>
    %c1_26 = arith.constant 1 : index
    %c0_27 = arith.constant 0 : index
    %c0_28 = arith.constant 0 : index
    %30 = vector.load %arg4[%c1_26, %c0_27, %c0_28] : memref<18x64x128xbf16, #tpu.memory_space<vmem>>, vector<1x64x128xbf16>
    %31 = vector.shape_cast %30 : vector<1x64x128xbf16> to vector<64x128xbf16>
    %cst_29 = arith.constant dense<0.000000e+00> : vector<256x128xf32>
    %32 = tpu.matmul %29, %31, %cst_29 {dimension_numbers = #tpu.dot_dimension_numbers<[1], [0], [0], [1], [0, 0, 1, 1], [], []>} : vector<256x64xbf16>, vector<64x128xbf16>, vector<256x128xf32> -> vector<256x128xf32>
    %33 = arith.addf %27, %32 : vector<256x128xf32>
    %c2 = arith.constant 2 : index
    %c0_30 = arith.constant 0 : index
    %34 = vector.load %arg9[%c2, %c0_30] : memref<290x64xf32, #tpu.memory_space<vmem>>, vector<256x64xf32>
    %35 = arith.truncf %34 : vector<256x64xf32> to vector<256x64xbf16>
    %36 = vector.broadcast %4 : vector<256x1xbf16> to vector<256x64xbf16>
    %37 = arith.mulf %35, %36 : vector<256x64xbf16>
    %c2_31 = arith.constant 2 : index
    %c0_32 = arith.constant 0 : index
    %c0_33 = arith.constant 0 : index
    %38 = vector.load %arg4[%c2_31, %c0_32, %c0_33] : memref<18x64x128xbf16, #tpu.memory_space<vmem>>, vector<1x64x128xbf16>
    %39 = vector.shape_cast %38 : vector<1x64x128xbf16> to vector<64x128xbf16>
    %cst_34 = arith.constant dense<0.000000e+00> : vector<256x128xf32>
    %40 = tpu.matmul %37, %39, %cst_34 {dimension_numbers = #tpu.dot_dimension_numbers<[1], [0], [0], [1], [0, 0, 1, 1], [], []>} : vector<256x64xbf16>, vector<64x128xbf16>, vector<256x128xf32> -> vector<256x128xf32>
    %41 = arith.addf %33, %40 : vector<256x128xf32>
    %c16 = arith.constant 16 : index
    %c0_35 = arith.constant 0 : index
    %42 = vector.load %arg9[%c16, %c0_35] : memref<290x64xf32, #tpu.memory_space<vmem>>, vector<256x64xf32>
    %43 = arith.truncf %42 : vector<256x64xf32> to vector<256x64xbf16>
    %44 = vector.broadcast %3 : vector<256x1xbf16> to vector<256x64xbf16>
    %45 = arith.mulf %43, %44 : vector<256x64xbf16>
    %c3 = arith.constant 3 : index
    %c0_36 = arith.constant 0 : index
    %c0_37 = arith.constant 0 : index
    %46 = vector.load %arg4[%c3, %c0_36, %c0_37] : memref<18x64x128xbf16, #tpu.memory_space<vmem>>, vector<1x64x128xbf16>
    %47 = vector.shape_cast %46 : vector<1x64x128xbf16> to vector<64x128xbf16>
    %cst_38 = arith.constant dense<0.000000e+00> : vector<256x128xf32>
    %48 = tpu.matmul %45, %47, %cst_38 {dimension_numbers = #tpu.dot_dimension_numbers<[1], [0], [0], [1], [0, 0, 1, 1], [], []>} : vector<256x64xbf16>, vector<64x128xbf16>, vector<256x128xf32> -> vector<256x128xf32>
    %49 = arith.addf %41, %48 : vector<256x128xf32>
    %c17_39 = arith.constant 17 : index
    %c0_40 = arith.constant 0 : index
    %50 = vector.load %arg9[%c17_39, %c0_40] : memref<290x64xf32, #tpu.memory_space<vmem>>, vector<256x64xf32>
    %51 = arith.truncf %50 : vector<256x64xf32> to vector<256x64xbf16>
    %c4 = arith.constant 4 : index
    %c0_41 = arith.constant 0 : index
    %c0_42 = arith.constant 0 : index
    %52 = vector.load %arg4[%c4, %c0_41, %c0_42] : memref<18x64x128xbf16, #tpu.memory_space<vmem>>, vector<1x64x128xbf16>
    %53 = vector.shape_cast %52 : vector<1x64x128xbf16> to vector<64x128xbf16>
    %cst_43 = arith.constant dense<0.000000e+00> : vector<256x128xf32>
    %54 = tpu.matmul %51, %53, %cst_43 {dimension_numbers = #tpu.dot_dimension_numbers<[1], [0], [0], [1], [0, 0, 1, 1], [], []>} : vector<256x64xbf16>, vector<64x128xbf16>, vector<256x128xf32> -> vector<256x128xf32>
    %55 = arith.addf %49, %54 : vector<256x128xf32>
    %c18 = arith.constant 18 : index
    %c0_44 = arith.constant 0 : index
    %56 = vector.load %arg9[%c18, %c0_44] : memref<290x64xf32, #tpu.memory_space<vmem>>, vector<256x64xf32>
    %57 = arith.truncf %56 : vector<256x64xf32> to vector<256x64xbf16>
    %58 = vector.broadcast %4 : vector<256x1xbf16> to vector<256x64xbf16>
    %59 = arith.mulf %57, %58 : vector<256x64xbf16>
    %c5 = arith.constant 5 : index
    %c0_45 = arith.constant 0 : index
    %c0_46 = arith.constant 0 : index
    %60 = vector.load %arg4[%c5, %c0_45, %c0_46] : memref<18x64x128xbf16, #tpu.memory_space<vmem>>, vector<1x64x128xbf16>
    %61 = vector.shape_cast %60 : vector<1x64x128xbf16> to vector<64x128xbf16>
    %cst_47 = arith.constant dense<0.000000e+00> : vector<256x128xf32>
    %62 = tpu.matmul %59, %61, %cst_47 {dimension_numbers = #tpu.dot_dimension_numbers<[1], [0], [0], [1], [0, 0, 1, 1], [], []>} : vector<256x64xbf16>, vector<64x128xbf16>, vector<256x128xf32> -> vector<256x128xf32>
    %63 = arith.addf %55, %62 : vector<256x128xf32>
    %c32 = arith.constant 32 : index
    %c0_48 = arith.constant 0 : index
    %64 = vector.load %arg9[%c32, %c0_48] : memref<290x64xf32, #tpu.memory_space<vmem>>, vector<256x64xf32>
    %65 = arith.truncf %64 : vector<256x64xf32> to vector<256x64xbf16>
    %66 = vector.broadcast %3 : vector<256x1xbf16> to vector<256x64xbf16>
    %67 = arith.mulf %65, %66 : vector<256x64xbf16>
    %c6 = arith.constant 6 : index
    %c0_49 = arith.constant 0 : index
    %c0_50 = arith.constant 0 : index
    %68 = vector.load %arg4[%c6, %c0_49, %c0_50] : memref<18x64x128xbf16, #tpu.memory_space<vmem>>, vector<1x64x128xbf16>
    %69 = vector.shape_cast %68 : vector<1x64x128xbf16> to vector<64x128xbf16>
    %cst_51 = arith.constant dense<0.000000e+00> : vector<256x128xf32>
    %70 = tpu.matmul %67, %69, %cst_51 {dimension_numbers = #tpu.dot_dimension_numbers<[1], [0], [0], [1], [0, 0, 1, 1], [], []>} : vector<256x64xbf16>, vector<64x128xbf16>, vector<256x128xf32> -> vector<256x128xf32>
    %71 = arith.addf %63, %70 : vector<256x128xf32>
    %c33 = arith.constant 33 : index
    %c0_52 = arith.constant 0 : index
    %72 = vector.load %arg9[%c33, %c0_52] : memref<290x64xf32, #tpu.memory_space<vmem>>, vector<256x64xf32>
    %73 = arith.truncf %72 : vector<256x64xf32> to vector<256x64xbf16>
    %c7 = arith.constant 7 : index
    %c0_53 = arith.constant 0 : index
    %c0_54 = arith.constant 0 : index
    %74 = vector.load %arg4[%c7, %c0_53, %c0_54] : memref<18x64x128xbf16, #tpu.memory_space<vmem>>, vector<1x64x128xbf16>
    %75 = vector.shape_cast %74 : vector<1x64x128xbf16> to vector<64x128xbf16>
    %cst_55 = arith.constant dense<0.000000e+00> : vector<256x128xf32>
    %76 = tpu.matmul %73, %75, %cst_55 {dimension_numbers = #tpu.dot_dimension_numbers<[1], [0], [0], [1], [0, 0, 1, 1], [], []>} : vector<256x64xbf16>, vector<64x128xbf16>, vector<256x128xf32> -> vector<256x128xf32>
    %77 = arith.addf %71, %76 : vector<256x128xf32>
    %c34 = arith.constant 34 : index
    %c0_56 = arith.constant 0 : index
    %78 = vector.load %arg9[%c34, %c0_56] : memref<290x64xf32, #tpu.memory_space<vmem>>, vector<256x64xf32>
    %79 = arith.truncf %78 : vector<256x64xf32> to vector<256x64xbf16>
    %80 = vector.broadcast %4 : vector<256x1xbf16> to vector<256x64xbf16>
    %81 = arith.mulf %79, %80 : vector<256x64xbf16>
    %c8 = arith.constant 8 : index
    %c0_57 = arith.constant 0 : index
    %c0_58 = arith.constant 0 : index
    %82 = vector.load %arg4[%c8, %c0_57, %c0_58] : memref<18x64x128xbf16, #tpu.memory_space<vmem>>, vector<1x64x128xbf16>
    %83 = vector.shape_cast %82 : vector<1x64x128xbf16> to vector<64x128xbf16>
    %cst_59 = arith.constant dense<0.000000e+00> : vector<256x128xf32>
    %84 = tpu.matmul %81, %83, %cst_59 {dimension_numbers = #tpu.dot_dimension_numbers<[1], [0], [0], [1], [0, 0, 1, 1], [], []>} : vector<256x64xbf16>, vector<64x128xbf16>, vector<256x128xf32> -> vector<256x128xf32>
    %85 = arith.addf %77, %84 : vector<256x128xf32>
    %c0_60 = arith.constant 0 : index
    %c0_61 = arith.constant 0 : index
    %c0_62 = arith.constant 0 : index
    %86 = vector.load %arg5[%c0_60, %c0_61, %c0_62] : memref<2x1x128xf32, #tpu.memory_space<vmem>>, vector<1x1x128xf32>
    %87 = vector.shape_cast %86 : vector<1x1x128xf32> to vector<1x128xf32>
    %88 = vector.broadcast %87 : vector<1x128xf32> to vector<256x128xf32>
    %89 = arith.addf %85, %88 : vector<256x128xf32>
    %cst_63 = arith.constant 1.000000e-01 : f32
    %90 = vector.broadcast %cst_63 : f32 to vector<256x128xf32>
    %91 = arith.mulf %90, %89 : vector<256x128xf32>
    %92 = arith.maximumf %89, %91 : vector<256x128xf32>
    %93 = arith.addf %7, %92 : vector<256x128xf32>
    %94 = arith.truncf %93 : vector<256x128xf32> to vector<256x128xbf16>
    %c1_64 = arith.constant 1 : index
    %c0_65 = arith.constant 0 : index
    %c0_66 = arith.constant 0 : index
    %95 = vector.load %arg2[%c1_64, %c0_65, %c0_66] : memref<2x128x64xbf16, #tpu.memory_space<vmem>>, vector<1x128x64xbf16>
    %96 = vector.shape_cast %95 : vector<1x128x64xbf16> to vector<128x64xbf16>
    %cst_67 = arith.constant dense<0.000000e+00> : vector<256x64xf32>
    %97 = tpu.matmul %94, %96, %cst_67 {dimension_numbers = #tpu.dot_dimension_numbers<[1], [0], [0], [1], [0, 0, 1, 1], [], []>} : vector<256x128xbf16>, vector<128x64xbf16>, vector<256x64xf32> -> vector<256x64xf32>
    %c1_68 = arith.constant 1 : index
    %c0_69 = arith.constant 0 : index
    %c0_70 = arith.constant 0 : index
    %98 = vector.load %arg3[%c1_68, %c0_69, %c0_70] : memref<2x1x64xf32, #tpu.memory_space<vmem>>, vector<1x1x64xf32>
    %99 = vector.shape_cast %98 : vector<1x1x64xf32> to vector<1x64xf32>
    %100 = vector.broadcast %99 : vector<1x64xf32> to vector<256x64xf32>
    %101 = arith.addf %97, %100 : vector<256x64xf32>
    %cst_71 = arith.constant 1.000000e-01 : f32
    %102 = vector.broadcast %cst_71 : f32 to vector<256x64xf32>
    %103 = arith.mulf %102, %101 : vector<256x64xf32>
    %104 = arith.maximumf %101, %103 : vector<256x64xf32>
    %c17_72 = arith.constant 17 : index
    %c0_73 = arith.constant 0 : index
    %105 = vector.load %arg9[%c17_72, %c0_73] : memref<290x64xf32, #tpu.memory_space<vmem>>, vector<256x64xf32>
    tpu.vector_store %arg9[%c17_72, %c0_73], %104 {strides = array<i32>} : memref<290x64xf32, #tpu.memory_space<vmem>>, vector<256x64xf32>,
    %cst_74 = arith.constant 0.000000e+00 : f32
    %106 = vector.broadcast %cst_74 : f32 to vector<256x128xf32>
    %c0_75 = arith.constant 0 : index
    %c0_76 = arith.constant 0 : index
    %107 = vector.load %arg9[%c0_75, %c0_76] : memref<290x64xf32, #tpu.memory_space<vmem>>, vector<256x64xf32>
    %108 = arith.truncf %107 : vector<256x64xf32> to vector<256x64xbf16>
    %109 = vector.broadcast %3 : vector<256x1xbf16> to vector<256x64xbf16>
    %110 = arith.mulf %108, %109 : vector<256x64xbf16>
    %c9 = arith.constant 9 : index
    %c0_77 = arith.constant 0 : index
    %c0_78 = arith.constant 0 : index
    %111 = vector.load %arg4[%c9, %c0_77, %c0_78] : memref<18x64x128xbf16, #tpu.memory_space<vmem>>, vector<1x64x128xbf16>
    %112 = vector.shape_cast %111 : vector<1x64x128xbf16> to vector<64x128xbf16>
    %cst_79 = arith.constant dense<0.000000e+00> : vector<256x128xf32>
    %113 = tpu.matmul %110, %112, %cst_79 {dimension_numbers = #tpu.dot_dimension_numbers<[1], [0], [0], [1], [0, 0, 1, 1], [], []>} : vector<256x64xbf16>, vector<64x128xbf16>, vector<256x128xf32> -> vector<256x128xf32>
    %114 = arith.addf %106, %113 : vector<256x128xf32>
    %c1_80 = arith.constant 1 : index
    %c0_81 = arith.constant 0 : index
    %115 = vector.load %arg9[%c1_80, %c0_81] : memref<290x64xf32, #tpu.memory_space<vmem>>, vector<256x64xf32>
    %116 = arith.truncf %115 : vector<256x64xf32> to vector<256x64xbf16>
    %c10 = arith.constant 10 : index
    %c0_82 = arith.constant 0 : index
    %c0_83 = arith.constant 0 : index
    %117 = vector.load %arg4[%c10, %c0_82, %c0_83] : memref<18x64x128xbf16, #tpu.memory_space<vmem>>, vector<1x64x128xbf16>
    %118 = vector.shape_cast %117 : vector<1x64x128xbf16> to vector<64x128xbf16>
    %cst_84 = arith.constant dense<0.000000e+00> : vector<256x128xf32>
    %119 = tpu.matmul %116, %118, %cst_84 {dimension_numbers = #tpu.dot_dimension_numbers<[1], [0], [0], [1], [0, 0, 1, 1], [], []>} : vector<256x64xbf16>, vector<64x128xbf16>, vector<256x128xf32> -> vector<256x128xf32>
    %120 = arith.addf %114, %119 : vector<256x128xf32>
    %c2_85 = arith.constant 2 : index
    %c0_86 = arith.constant 0 : index
    %121 = vector.load %arg9[%c2_85, %c0_86] : memref<290x64xf32, #tpu.memory_space<vmem>>, vector<256x64xf32>
    %122 = arith.truncf %121 : vector<256x64xf32> to vector<256x64xbf16>
    %123 = vector.broadcast %4 : vector<256x1xbf16> to vector<256x64xbf16>
    %124 = arith.mulf %122, %123 : vector<256x64xbf16>
    %c11 = arith.constant 11 : index
    %c0_87 = arith.constant 0 : index
    %c0_88 = arith.constant 0 : index
    %125 = vector.load %arg4[%c11, %c0_87, %c0_88] : memref<18x64x128xbf16, #tpu.memory_space<vmem>>, vector<1x64x128xbf16>
    %126 = vector.shape_cast %125 : vector<1x64x128xbf16> to vector<64x128xbf16>
    %cst_89 = arith.constant dense<0.000000e+00> : vector<256x128xf32>
    %127 = tpu.matmul %124, %126, %cst_89 {dimension_numbers = #tpu.dot_dimension_numbers<[1], [0], [0], [1], [0, 0, 1, 1], [], []>} : vector<256x64xbf16>, vector<64x128xbf16>, vector<256x128xf32> -> vector<256x128xf32>
    %128 = arith.addf %120, %127 : vector<256x128xf32>
    %c16_90 = arith.constant 16 : index
    %c0_91 = arith.constant 0 : index
    %129 = vector.load %arg9[%c16_90, %c0_91] : memref<290x64xf32, #tpu.memory_space<vmem>>, vector<256x64xf32>
    %130 = arith.truncf %129 : vector<256x64xf32> to vector<256x64xbf16>
    %131 = vector.broadcast %3 : vector<256x1xbf16> to vector<256x64xbf16>
    %132 = arith.mulf %130, %131 : vector<256x64xbf16>
    %c12 = arith.constant 12 : index
    %c0_92 = arith.constant 0 : index
    %c0_93 = arith.constant 0 : index
    %133 = vector.load %arg4[%c12, %c0_92, %c0_93] : memref<18x64x128xbf16, #tpu.memory_space<vmem>>, vector<1x64x128xbf16>
    %134 = vector.shape_cast %133 : vector<1x64x128xbf16> to vector<64x128xbf16>
    %cst_94 = arith.constant dense<0.000000e+00> : vector<256x128xf32>
    %135 = tpu.matmul %132, %134, %cst_94 {dimension_numbers = #tpu.dot_dimension_numbers<[1], [0], [0], [1], [0, 0, 1, 1], [], []>} : vector<256x64xbf16>, vector<64x128xbf16>, vector<256x128xf32> -> vector<256x128xf32>
    %136 = arith.addf %128, %135 : vector<256x128xf32>
    %c17_95 = arith.constant 17 : index
    %c0_96 = arith.constant 0 : index
    %137 = vector.load %arg9[%c17_95, %c0_96] : memref<290x64xf32, #tpu.memory_space<vmem>>, vector<256x64xf32>
    %138 = arith.truncf %137 : vector<256x64xf32> to vector<256x64xbf16>
    %c13 = arith.constant 13 : index
    %c0_97 = arith.constant 0 : index
    %c0_98 = arith.constant 0 : index
    %139 = vector.load %arg4[%c13, %c0_97, %c0_98] : memref<18x64x128xbf16, #tpu.memory_space<vmem>>, vector<1x64x128xbf16>
    %140 = vector.shape_cast %139 : vector<1x64x128xbf16> to vector<64x128xbf16>
    %cst_99 = arith.constant dense<0.000000e+00> : vector<256x128xf32>
    %141 = tpu.matmul %138, %140, %cst_99 {dimension_numbers = #tpu.dot_dimension_numbers<[1], [0], [0], [1], [0, 0, 1, 1], [], []>} : vector<256x64xbf16>, vector<64x128xbf16>, vector<256x128xf32> -> vector<256x128xf32>
    %142 = arith.addf %136, %141 : vector<256x128xf32>
    %c18_100 = arith.constant 18 : index
    %c0_101 = arith.constant 0 : index
    %143 = vector.load %arg9[%c18_100, %c0_101] : memref<290x64xf32, #tpu.memory_space<vmem>>, vector<256x64xf32>
    %144 = arith.truncf %143 : vector<256x64xf32> to vector<256x64xbf16>
    %145 = vector.broadcast %4 : vector<256x1xbf16> to vector<256x64xbf16>
    %146 = arith.mulf %144, %145 : vector<256x64xbf16>
    %c14 = arith.constant 14 : index
    %c0_102 = arith.constant 0 : index
    %c0_103 = arith.constant 0 : index
    %147 = vector.load %arg4[%c14, %c0_102, %c0_103] : memref<18x64x128xbf16, #tpu.memory_space<vmem>>, vector<1x64x128xbf16>
    %148 = vector.shape_cast %147 : vector<1x64x128xbf16> to vector<64x128xbf16>
    %cst_104 = arith.constant dense<0.000000e+00> : vector<256x128xf32>
    %149 = tpu.matmul %146, %148, %cst_104 {dimension_numbers = #tpu.dot_dimension_numbers<[1], [0], [0], [1], [0, 0, 1, 1], [], []>} : vector<256x64xbf16>, vector<64x128xbf16>, vector<256x128xf32> -> vector<256x128xf32>
    %150 = arith.addf %142, %149 : vector<256x128xf32>
    %c32_105 = arith.constant 32 : index
    %c0_106 = arith.constant 0 : index
    %151 = vector.load %arg9[%c32_105, %c0_106] : memref<290x64xf32, #tpu.memory_space<vmem>>, vector<256x64xf32>
    %152 = arith.truncf %151 : vector<256x64xf32> to vector<256x64xbf16>
    %153 = vector.broadcast %3 : vector<256x1xbf16> to vector<256x64xbf16>
    %154 = arith.mulf %152, %153 : vector<256x64xbf16>
    %c15 = arith.constant 15 : index
    %c0_107 = arith.constant 0 : index
    %c0_108 = arith.constant 0 : index
    %155 = vector.load %arg4[%c15, %c0_107, %c0_108] : memref<18x64x128xbf16, #tpu.memory_space<vmem>>, vector<1x64x128xbf16>
    %156 = vector.shape_cast %155 : vector<1x64x128xbf16> to vector<64x128xbf16>
    %cst_109 = arith.constant dense<0.000000e+00> : vector<256x128xf32>
    %157 = tpu.matmul %154, %156, %cst_109 {dimension_numbers = #tpu.dot_dimension_numbers<[1], [0], [0], [1], [0, 0, 1, 1], [], []>} : vector<256x64xbf16>, vector<64x128xbf16>, vector<256x128xf32> -> vector<256x128xf32>
    %158 = arith.addf %150, %157 : vector<256x128xf32>
    %c33_110 = arith.constant 33 : index
    %c0_111 = arith.constant 0 : index
    %159 = vector.load %arg9[%c33_110, %c0_111] : memref<290x64xf32, #tpu.memory_space<vmem>>, vector<256x64xf32>
    %160 = arith.truncf %159 : vector<256x64xf32> to vector<256x64xbf16>
    %c16_112 = arith.constant 16 : index
    %c0_113 = arith.constant 0 : index
    %c0_114 = arith.constant 0 : index
    %161 = vector.load %arg4[%c16_112, %c0_113, %c0_114] : memref<18x64x128xbf16, #tpu.memory_space<vmem>>, vector<1x64x128xbf16>
    %162 = vector.shape_cast %161 : vector<1x64x128xbf16> to vector<64x128xbf16>
    %cst_115 = arith.constant dense<0.000000e+00> : vector<256x128xf32>
    %163 = tpu.matmul %160, %162, %cst_115 {dimension_numbers = #tpu.dot_dimension_numbers<[1], [0], [0], [1], [0, 0, 1, 1], [], []>} : vector<256x64xbf16>, vector<64x128xbf16>, vector<256x128xf32> -> vector<256x128xf32>
    %164 = arith.addf %158, %163 : vector<256x128xf32>
    %c34_116 = arith.constant 34 : index
    %c0_117 = arith.constant 0 : index
    %165 = vector.load %arg9[%c34_116, %c0_117] : memref<290x64xf32, #tpu.memory_space<vmem>>, vector<256x64xf32>
    %166 = arith.truncf %165 : vector<256x64xf32> to vector<256x64xbf16>
    %167 = vector.broadcast %4 : vector<256x1xbf16> to vector<256x64xbf16>
    %168 = arith.mulf %166, %167 : vector<256x64xbf16>
    %c17_118 = arith.constant 17 : index
    %c0_119 = arith.constant 0 : index
    %c0_120 = arith.constant 0 : index
    %169 = vector.load %arg4[%c17_118, %c0_119, %c0_120] : memref<18x64x128xbf16, #tpu.memory_space<vmem>>, vector<1x64x128xbf16>
    %170 = vector.shape_cast %169 : vector<1x64x128xbf16> to vector<64x128xbf16>
    %cst_121 = arith.constant dense<0.000000e+00> : vector<256x128xf32>
    %171 = tpu.matmul %168, %170, %cst_121 {dimension_numbers = #tpu.dot_dimension_numbers<[1], [0], [0], [1], [0, 0, 1, 1], [], []>} : vector<256x64xbf16>, vector<64x128xbf16>, vector<256x128xf32> -> vector<256x128xf32>
    %172 = arith.addf %164, %171 : vector<256x128xf32>
    %c1_122 = arith.constant 1 : index
    %c0_123 = arith.constant 0 : index
    %c0_124 = arith.constant 0 : index
    %173 = vector.load %arg5[%c1_122, %c0_123, %c0_124] : memref<2x1x128xf32, #tpu.memory_space<vmem>>, vector<1x1x128xf32>
    %174 = vector.shape_cast %173 : vector<1x1x128xf32> to vector<1x128xf32>
    %175 = vector.broadcast %174 : vector<1x128xf32> to vector<256x128xf32>
    %176 = arith.addf %172, %175 : vector<256x128xf32>
    %cst_125 = arith.constant 1.000000e-01 : f32
    %177 = vector.broadcast %cst_125 : f32 to vector<256x128xf32>
    %178 = arith.mulf %177, %176 : vector<256x128xf32>
    %179 = arith.maximumf %176, %178 : vector<256x128xf32>
    %180 = arith.addf %93, %179 : vector<256x128xf32>
    %181 = arith.truncf %180 : vector<256x128xf32> to vector<256x128xbf16>
    %c0_126 = arith.constant 0 : index
    %c0_127 = arith.constant 0 : index
    %c0_128 = arith.constant 0 : index
    %182 = vector.load %arg8[%c0_126, %c0_127, %c0_128] : memref<1x256x128xbf16, #tpu.memory_space<vmem>>, vector<1x256x128xbf16>
    %183 = vector.shape_cast %182 : vector<1x256x128xbf16> to vector<256x128xbf16>
    %184 = vector.shape_cast %181 : vector<256x128xbf16> to vector<1x256x128xbf16>
    tpu.vector_store %arg8[%c0_126, %c0_127, %c0_128], %184 {strides = array<i32>} : memref<1x256x128xbf16, #tpu.memory_space<vmem>>, vector<1x256x128xbf16>,
    return
  }
  func.func @transform_0(%arg0: i32) -> (i32, i32, i32) {
    %c0_i32 = arith.constant 0 : i32
    %c0_i32_0 = arith.constant 0 : i32
    %c0_i32_1 = arith.constant 0 : i32
    return %arg0, %c0_i32, %c0_i32_0 : i32, i32, i32
  }
  func.func @transform_1(%arg0: i32) -> (i32, i32, i32) {
    %c0_i32 = arith.constant 0 : i32
    %c0_i32_0 = arith.constant 0 : i32
    %c0_i32_1 = arith.constant 0 : i32
    %c0_i32_2 = arith.constant 0 : i32
    return %c0_i32, %c0_i32_0, %c0_i32_1 : i32, i32, i32
  }
  func.func @transform_2(%arg0: i32) -> (i32, i32, i32) {
    %c0_i32 = arith.constant 0 : i32
    %c0_i32_0 = arith.constant 0 : i32
    %c0_i32_1 = arith.constant 0 : i32
    %c0_i32_2 = arith.constant 0 : i32
    return %c0_i32, %c0_i32_0, %c0_i32_1 : i32, i32, i32
  }
  func.func @transform_3(%arg0: i32) -> (i32, i32, i32) {
    %c0_i32 = arith.constant 0 : i32
    %c0_i32_0 = arith.constant 0 : i32
    %c0_i32_1 = arith.constant 0 : i32
    %c0_i32_2 = arith.constant 0 : i32
    return %c0_i32, %c0_i32_0, %c0_i32_1 : i32, i32, i32
  }
  func.func @transform_4(%arg0: i32) -> (i32, i32, i32) {
    %c0_i32 = arith.constant 0 : i32
    %c0_i32_0 = arith.constant 0 : i32
    %c0_i32_1 = arith.constant 0 : i32
    %c0_i32_2 = arith.constant 0 : i32
    return %c0_i32, %c0_i32_0, %c0_i32_1 : i32, i32, i32
  }
  func.func @transform_5(%arg0: i32) -> (i32, i32) {
    %c0_i32 = arith.constant 0 : i32
    %c0_i32_0 = arith.constant 0 : i32
    %c0_i32_1 = arith.constant 0 : i32
    return %c0_i32, %c0_i32_0 : i32, i32
  }
  func.func @transform_6(%arg0: i32) -> (i32, i32) {
    %c0_i32 = arith.constant 0 : i32
    %c0_i32_0 = arith.constant 0 : i32
    %c0_i32_1 = arith.constant 0 : i32
    return %c0_i32, %c0_i32_0 : i32, i32
  }
  func.func @transform_7(%arg0: i32) -> (i32, i32, i32) {
    %c0_i32 = arith.constant 0 : i32
    %c0_i32_0 = arith.constant 0 : i32
    %c0_i32_1 = arith.constant 0 : i32
    return %arg0, %c0_i32, %c0_i32_0 : i32, i32, i32
  }
}

module attributes {stable_mosaic.version = 11 : i64} {
  func.func @_extra_kernel(%arg0: i32, %arg1: memref<1x64x512xbf16, #tpu.memory_space<vmem>>, %arg2: memref<4x512x256xbf16, #tpu.memory_space<vmem>>, %arg3: memref<1x256xf32, #tpu.memory_space<vmem>>, %arg4: memref<64x1xbf16, #tpu.memory_space<vmem>>, %arg5: memref<1x64x256xf32, #tpu.memory_space<vmem>>, %arg6: memref<73x512xf32, #tpu.memory_space<vmem>>) attributes {dimension_semantics = [#tpu.dimension_semantics<parallel>], iteration_bounds = array<i64: 2>, scalar_prefetch = 0 : i64, scratch_operands = 1 : i64, tpu.core_type = #tpu.core_type<tc>, window_params = [{transform_indices = @transform_0, window_bounds = array<i64: 1, 64, 512>}, {pipeline_mode = #tpu.pipeline_mode<synchronous>, transform_indices = @transform_1, window_bounds = array<i64: 4, 512, 256>}, {pipeline_mode = #tpu.pipeline_mode<synchronous>, transform_indices = @transform_2, window_bounds = array<i64: 1, 256>}, {pipeline_mode = #tpu.pipeline_mode<synchronous>, transform_indices = @transform_3, window_bounds = array<i64: 64, 1>}, {transform_indices = @transform_4, window_bounds = array<i64: 1, 64, 256>}]} {
    %cst = arith.constant 0.000000e+00 : f32
    %0 = vector.broadcast %cst : f32 to vector<9x512xf32>
    %c0 = arith.constant 0 : index
    %c0_0 = arith.constant 0 : index
    %1 = vector.load %arg6[%c0, %c0_0] : memref<73x512xf32, #tpu.memory_space<vmem>>, vector<9x512xf32>
    tpu.vector_store %arg6[%c0, %c0_0], %0 {strides = array<i32>} : memref<73x512xf32, #tpu.memory_space<vmem>>, vector<9x512xf32>,
    %c0_1 = arith.constant 0 : index
    %c0_2 = arith.constant 0 : index
    %c0_3 = arith.constant 0 : index
    %2 = vector.load %arg1[%c0_1, %c0_2, %c0_3] : memref<1x64x512xbf16, #tpu.memory_space<vmem>>, vector<1x64x512xbf16>
    %3 = vector.shape_cast %2 : vector<1x64x512xbf16> to vector<64x512xbf16>
    %4 = arith.extf %3 : vector<64x512xbf16> to vector<64x512xf32>
    %c9 = arith.constant 9 : index
    %c0_4 = arith.constant 0 : index
    %5 = vector.load %arg6[%c9, %c0_4] : memref<73x512xf32, #tpu.memory_space<vmem>>, vector<64x512xf32>
    tpu.vector_store %arg6[%c9, %c0_4], %4 {strides = array<i32>} : memref<73x512xf32, #tpu.memory_space<vmem>>, vector<64x512xf32>,
    %c0_5 = arith.constant 0 : index
    %c0_6 = arith.constant 0 : index
    %6 = vector.load %arg4[%c0_5, %c0_6] : memref<64x1xbf16, #tpu.memory_space<vmem>>, vector<64x1xbf16>
    %cst_7 = arith.constant 0.000000e+00 : f32
    %7 = vector.broadcast %cst_7 : f32 to vector<64x256xf32>
    %c0_8 = arith.constant 0 : index
    %c0_9 = arith.constant 0 : index
    %8 = vector.load %arg6[%c0_8, %c0_9] : memref<73x512xf32, #tpu.memory_space<vmem>>, vector<64x512xf32>
    %9 = arith.truncf %8 : vector<64x512xf32> to vector<64x512xbf16>
    %10 = vector.broadcast %6 : vector<64x1xbf16> to vector<64x512xbf16>
    %11 = arith.mulf %9, %10 : vector<64x512xbf16>
    %c0_10 = arith.constant 0 : index
    %c0_11 = arith.constant 0 : index
    %c0_12 = arith.constant 0 : index
    %12 = vector.load %arg2[%c0_10, %c0_11, %c0_12] : memref<4x512x256xbf16, #tpu.memory_space<vmem>>, vector<1x512x256xbf16>
    %13 = vector.shape_cast %12 : vector<1x512x256xbf16> to vector<512x256xbf16>
    %cst_13 = arith.constant dense<0.000000e+00> : vector<64x256xf32>
    %14 = tpu.matmul %11, %13, %cst_13 {dimension_numbers = #tpu.dot_dimension_numbers<[1], [0], [0], [1], [0, 0, 1, 1], [], []>} : vector<64x512xbf16>, vector<512x256xbf16>, vector<64x256xf32> -> vector<64x256xf32>
    %15 = arith.addf %7, %14 : vector<64x256xf32>
    %c1 = arith.constant 1 : index
    %c0_14 = arith.constant 0 : index
    %16 = vector.load %arg6[%c1, %c0_14] : memref<73x512xf32, #tpu.memory_space<vmem>>, vector<64x512xf32>
    %17 = arith.truncf %16 : vector<64x512xf32> to vector<64x512xbf16>
    %c1_15 = arith.constant 1 : index
    %c0_16 = arith.constant 0 : index
    %c0_17 = arith.constant 0 : index
    %18 = vector.load %arg2[%c1_15, %c0_16, %c0_17] : memref<4x512x256xbf16, #tpu.memory_space<vmem>>, vector<1x512x256xbf16>
    %19 = vector.shape_cast %18 : vector<1x512x256xbf16> to vector<512x256xbf16>
    %cst_18 = arith.constant dense<0.000000e+00> : vector<64x256xf32>
    %20 = tpu.matmul %17, %19, %cst_18 {dimension_numbers = #tpu.dot_dimension_numbers<[1], [0], [0], [1], [0, 0, 1, 1], [], []>} : vector<64x512xbf16>, vector<512x256xbf16>, vector<64x256xf32> -> vector<64x256xf32>
    %21 = arith.addf %15, %20 : vector<64x256xf32>
    %c8 = arith.constant 8 : index
    %c0_19 = arith.constant 0 : index
    %22 = vector.load %arg6[%c8, %c0_19] : memref<73x512xf32, #tpu.memory_space<vmem>>, vector<64x512xf32>
    %23 = arith.truncf %22 : vector<64x512xf32> to vector<64x512xbf16>
    %24 = vector.broadcast %6 : vector<64x1xbf16> to vector<64x512xbf16>
    %25 = arith.mulf %23, %24 : vector<64x512xbf16>
    %c2 = arith.constant 2 : index
    %c0_20 = arith.constant 0 : index
    %c0_21 = arith.constant 0 : index
    %26 = vector.load %arg2[%c2, %c0_20, %c0_21] : memref<4x512x256xbf16, #tpu.memory_space<vmem>>, vector<1x512x256xbf16>
    %27 = vector.shape_cast %26 : vector<1x512x256xbf16> to vector<512x256xbf16>
    %cst_22 = arith.constant dense<0.000000e+00> : vector<64x256xf32>
    %28 = tpu.matmul %25, %27, %cst_22 {dimension_numbers = #tpu.dot_dimension_numbers<[1], [0], [0], [1], [0, 0, 1, 1], [], []>} : vector<64x512xbf16>, vector<512x256xbf16>, vector<64x256xf32> -> vector<64x256xf32>
    %29 = arith.addf %21, %28 : vector<64x256xf32>
    %c9_23 = arith.constant 9 : index
    %c0_24 = arith.constant 0 : index
    %30 = vector.load %arg6[%c9_23, %c0_24] : memref<73x512xf32, #tpu.memory_space<vmem>>, vector<64x512xf32>
    %31 = arith.truncf %30 : vector<64x512xf32> to vector<64x512xbf16>
    %c3 = arith.constant 3 : index
    %c0_25 = arith.constant 0 : index
    %c0_26 = arith.constant 0 : index
    %32 = vector.load %arg2[%c3, %c0_25, %c0_26] : memref<4x512x256xbf16, #tpu.memory_space<vmem>>, vector<1x512x256xbf16>
    %33 = vector.shape_cast %32 : vector<1x512x256xbf16> to vector<512x256xbf16>
    %cst_27 = arith.constant dense<0.000000e+00> : vector<64x256xf32>
    %34 = tpu.matmul %31, %33, %cst_27 {dimension_numbers = #tpu.dot_dimension_numbers<[1], [0], [0], [1], [0, 0, 1, 1], [], []>} : vector<64x512xbf16>, vector<512x256xbf16>, vector<64x256xf32> -> vector<64x256xf32>
    %35 = arith.addf %29, %34 : vector<64x256xf32>
    %c0_28 = arith.constant 0 : index
    %c0_29 = arith.constant 0 : index
    %36 = vector.load %arg3[%c0_28, %c0_29] : memref<1x256xf32, #tpu.memory_space<vmem>>, vector<1x256xf32>
    %37 = vector.broadcast %36 : vector<1x256xf32> to vector<64x256xf32>
    %38 = arith.addf %35, %37 : vector<64x256xf32>
    %cst_30 = arith.constant 1.000000e-01 : f32
    %39 = vector.broadcast %cst_30 : f32 to vector<64x256xf32>
    %40 = arith.mulf %39, %38 : vector<64x256xf32>
    %41 = arith.maximumf %38, %40 : vector<64x256xf32>
    %c0_31 = arith.constant 0 : index
    %c0_32 = arith.constant 0 : index
    %c0_33 = arith.constant 0 : index
    %42 = vector.load %arg5[%c0_31, %c0_32, %c0_33] : memref<1x64x256xf32, #tpu.memory_space<vmem>>, vector<1x64x256xf32>
    %43 = vector.shape_cast %42 : vector<1x64x256xf32> to vector<64x256xf32>
    %44 = vector.shape_cast %41 : vector<64x256xf32> to vector<1x64x256xf32>
    tpu.vector_store %arg5[%c0_31, %c0_32, %c0_33], %44 {strides = array<i32>} : memref<1x64x256xf32, #tpu.memory_space<vmem>>, vector<1x64x256xf32>,
    return
  }
  func.func @transform_0(%arg0: i32) -> (i32, i32, i32) {
    %c0_i32 = arith.constant 0 : i32
    %c0_i32_0 = arith.constant 0 : i32
    %c0_i32_1 = arith.constant 0 : i32
    return %arg0, %c0_i32, %c0_i32_0 : i32, i32, i32
  }
  func.func @transform_1(%arg0: i32) -> (i32, i32, i32) {
    %c0_i32 = arith.constant 0 : i32
    %c0_i32_0 = arith.constant 0 : i32
    %c0_i32_1 = arith.constant 0 : i32
    %c0_i32_2 = arith.constant 0 : i32
    return %c0_i32, %c0_i32_0, %c0_i32_1 : i32, i32, i32
  }
  func.func @transform_2(%arg0: i32) -> (i32, i32) {
    %c0_i32 = arith.constant 0 : i32
    %c0_i32_0 = arith.constant 0 : i32
    %c0_i32_1 = arith.constant 0 : i32
    return %c0_i32, %c0_i32_0 : i32, i32
  }
  func.func @transform_3(%arg0: i32) -> (i32, i32) {
    %c0_i32 = arith.constant 0 : i32
    %c0_i32_0 = arith.constant 0 : i32
    %c0_i32_1 = arith.constant 0 : i32
    return %c0_i32, %c0_i32_0 : i32, i32
  }
  func.func @transform_4(%arg0: i32) -> (i32, i32, i32) {
    %c0_i32 = arith.constant 0 : i32
    %c0_i32_0 = arith.constant 0 : i32
    %c0_i32_1 = arith.constant 0 : i32
    return %arg0, %c0_i32, %c0_i32_0 : i32, i32, i32
  }
}

</mosaic_0001>

<bundles_post_ra>
// kernel: resblock2_forward.3
= control target key start
LH: loop header
LB: loop body
LE: loop exit
PB: predicated region body
PF: predicated region fallthrough
CT: control target
= control target key end

     0   :  { %9 = vsyncpa [#allocation4], 0  ;;  %s6149_s0 = inlined_call_operand.vmem [shape: bf16[2,64,512], index: 0, kind: input, shape index: {}]   ;;  %s6150_s1 = inlined_call_operand.vmem [shape: bf16[4,512,256], index: 1, kind: input, shape index: {}]   ;;  %s6151_s2 = inlined_call_operand.vmem [shape: f32[1,256], index: 2, kind: input, shape index: {}]   ;;  %s6152_s3 = inlined_call_operand.vmem [shape: bf16[64,1], index: 3, kind: input, shape index: {}]   ;;  %s6153_s4 = inlined_call_operand.hbm [shape: f32[2,64,256], index: 4, kind: output, shape index: {}]  }
   0x1   :  { %11 = vsyncpa [#allocation4 + $0x1], 0  ;;  %s4374_s15 = smov 0   ;;  %s4376_s16 = smov 0  }
   0x2   :  { %s4378_s17 = smov 0   ;;  %s4380_s18 = smov 0  }
   0x3 LB: > { %s4395_s19 = sadd.s32 4294967295, %s4341_s18   ;;  %s3385_s20 = sadd.s32 4294967294, %s4341_s18   ;;  %s4341_s18 = sphi %s4380_s18, %s6244_s18   ;;  %s4337_s17 = sphi %s4378_s17, %s6243_s17   ;;  %s4333_s16 = sphi %s4376_s16, %s6242_s16   ;;  %s4329_s15 = sphi %s4374_s15, %s6241_s15  }
   0x4   : > { %s4399_s21 = sadd.s32 1, %s4341_s18   ;;  %s113_s22 = sadd.s32 1, %s4337_s17 }
   0x5   : > { %s110_s23 = ssub.s32 %s4341_s18, %s4399_s21  ;;  %p123_p0 = scmp.ne.s32.totalorder %s4337_s17, %s4333_s16 }
   0x6   : > { %p111_p1 = scmp.eq.s32.totalorder %s110_s23, 0  ;;  %p124_p2 = scmp.eq.s32.totalorder %s4395_s19, 1 }
   0x7   : > { %p129_p3 = scmp.ne.s32.totalorder %s4333_s16, %s4329_s15  ;;  %p130_p4 = scmp.eq.s32.totalorder %s3385_s20, 1 }
   0x8   : > { %s4410_s24 = scalar_select %p111_p1, %s4337_s17, %s113_s22  }
   0x9   : > { %p4412_p5 = por %p124_p2, %p123_p0  ;;  %p4416_p6 = por %p130_p4, %p129_p3 }
   0xa   : > { %p3388_p7 = scmp.ge.s32.totalorder %s4341_s18, 1  ;;  %p165_p8 = scmp.lt.s32.totalorder %s4341_s18, 3 }
   0xc   : > { %p166_p9 = pnand %p3388_p7, %p165_p8 }
   0xe   : > { %169 = sbr.rel (%p166_p9) target bundleno = 532 (0x214), region = 36 }
  0x13   : > { %v419_v0 = vld [vmem:[%s6152_s3 + $0x8] sm:$0xf]  ;;  %v417_v1 = vld [vmem:[%s6152_s3] sm:$0xf]  ;;  %v4343_v2 = vmov 0   ;;  %v4344_v6 = vmov 0.0  }
  0x14   : > { %3896 = vset.pattern.permute.xlu1 %v4343_v2  ;;  %3895 = vset.pattern.permute.xlu0 %v4343_v2  ;;  %v3897_v3 = vld [vmem:[%s6150_s1 + $0x274] ss:$8 sps:$4 sm:$0xff]   ;;  %v3901_v5 = vld [vmem:[%s6150_s1 + $0x270] ss:$8 sps:$4 sm:$0xff]   ;;  %197 = vst [vmem:[#allocation2 + $0xd0] sm:$0xff] %v4344_v6  ;;  %196 = vst [vmem:[#allocation2 + $0xb0] sm:$0xff] %v4344_v6 }
  0x15   : > { %499 = vperm.xlu1 %3896, %v419_v0   ;;  %475 = vperm.xlu0 %3895, %v417_v1   ;;  %v3899_v4 = vld [vmem:[%s6150_s1 + $0x374] ss:$8 sps:$4 sm:$0xff]   ;;  %201 = vst [vmem:[#allocation2 + $0x38] sm:$0x1] %v4344_v6  ;;  %198 = vst [vmem:[#allocation2 + $0x10] sm:$0xff] %v4344_v6  ;;  %p191_p10 = scmp.lt.s32.totalorder %s4395_s19, 1 }
  0x16   : > { %199 = vst [vmem:[#allocation2 + $0x48] sm:$0xff] %v4344_v6  ;;  %200 = vst [vmem:[#allocation2 + $0x120] sm:$0x1] %v4344_v6  ;;  %1275 = vmatprep.subr.bf16.mxu0 %v3897_v3  ;;  %v3902_v7 = vld [vmem:[%s6150_s1 + $0x370] ss:$8 sps:$4 sm:$0xff]   ;;  %1348 = vmatprep.subr.bf16.mxu1 %v3899_v4  ;;  %vm284_vm0 = vcmask 1040384  }
  0x17   : > { %202 = vst [vmem:[#allocation2 + $0xf8] sm:$0x1] %v4344_v6  ;;  %203 = vst [vmem:[#allocation2 + $0x100] sm:$0x1] %v4344_v6  ;;  %v420_v8 = vld [vmem:[%s6152_s3 + $0xc] sm:$0xf]  ;;  %1276 = vmatpush1.bf16.msra.mxu0 %v3901_v5  ;;  %1349 = vmatpush1.bf16.msra.mxu1 %v3902_v7 }
  0x18   : > { %v418_v9 = vld [vmem:[%s6152_s3 + $0x4] sm:$0xf]  ;;  %v3907_v12 = vld [vmem:[%s6150_s1 + $0x260] ss:$8 sps:$4 sm:$0xff]   ;;  %v422_v14 = vld [vmem:[%s6152_s3 + $0x14] sm:$0xf] }
  0x19   : > { %v3903_v10 = vld [vmem:[%s6150_s1 + $0x264] ss:$8 sps:$4 sm:$0xff]   ;;  %511 = vperm.xlu1 %3896, %v420_v8   ;;  %487 = vperm.xlu0 %3895, %v418_v9   ;;  %v3908_v13 = vld [vmem:[%s6150_s1 + $0x360] ss:$8 sps:$4 sm:$0xff]   ;;  %v421_v15 = vld [vmem:[%s6152_s3 + $0x10] sm:$0xf] }
  0x1a   : > { %v3905_v11 = vld [vmem:[%s6150_s1 + $0x364] ss:$8 sps:$4 sm:$0xff]   ;;  %1277 = vmatprep.subr.bf16.mxu0 %v3903_v10  ;;  %v3909_v16 = vld [vmem:[%s6150_s1 + $0x254] ss:$8 sps:$4 sm:$0xff]   ;;  %v3913_v18 = vld [vmem:[%s6150_s1 + $0x250] ss:$8 sps:$4 sm:$0xff]  }
  0x1b   : > { %1350 = vmatprep.subr.bf16.mxu1 %v3905_v11  ;;  %1278 = vmatpush1.bf16.msra.mxu0 %v3907_v12  ;;  %v3911_v17 = vld [vmem:[%s6150_s1 + $0x354] ss:$8 sps:$4 sm:$0xff]   ;;  %v3914_v19 = vld [vmem:[%s6150_s1 + $0x350] ss:$8 sps:$4 sm:$0xff]   ;;  %v3915_v22 = vld [vmem:[%s6150_s1 + $0x244] ss:$8 sps:$4 sm:$0xff]  }
  0x1c   : > { %1351 = vmatpush1.bf16.msra.mxu1 %v3908_v13  ;;  %v424_v20 = vld [vmem:[%s6152_s3 + $0x1c] sm:$0xf]  ;;  %v423_v21 = vld [vmem:[%s6152_s3 + $0x18] sm:$0xf]  ;;  %1279 = vmatprep.subr.bf16.mxu0 %v3909_v16  ;;  %v3917_v23 = vld [vmem:[%s6150_s1 + $0x344] ss:$8 sps:$4 sm:$0xff]  }
  0x1d   : > { %535 = vperm.xlu1 %3896, %v422_v14   ;;  %523 = vperm.xlu0 %3895, %v421_v15   ;;  %v3919_v24 = vld [vmem:[%s6150_s1 + $0x240] ss:$8 sps:$4 sm:$0xff]   ;;  %v3921_v26 = vld [vmem:[%s6150_s1 + $0x234] ss:$8 sps:$4 sm:$0xff]   ;;  %v3925_v28 = vld [vmem:[%s6150_s1 + $0x230] ss:$8 sps:$4 sm:$0xff]  }
  0x1e   : > { %1352 = vmatprep.subr.bf16.mxu1 %v3911_v17  ;;  %v3920_v25 = vld [vmem:[%s6150_s1 + $0x340] ss:$8 sps:$4 sm:$0xff]   ;;  %v3923_v27 = vld [vmem:[%s6150_s1 + $0x334] ss:$8 sps:$4 sm:$0xff]   ;;  %v3926_v29 = vld [vmem:[%s6150_s1 + $0x330] ss:$8 sps:$4 sm:$0xff]  }
  0x1f   : > { %1280 = vmatpush1.bf16.msra.mxu0 %v3913_v18  ;;  %v3927_v30 = vld [vmem:[%s6150_s1 + $0x224] ss:$8 sps:$4 sm:$0xff]   ;;  %v3931_v32 = vld [vmem:[%s6150_s1 + $0x220] ss:$8 sps:$4 sm:$0xff]   ;;  %v3933_v34 = vld [vmem:[%s6150_s1 + $0x214] ss:$8 sps:$4 sm:$0xff]  }
  0x20   : > { %1353 = vmatpush1.bf16.msra.mxu1 %v3914_v19  ;;  %1281 = vmatprep.subr.bf16.mxu0 %v3915_v22  ;;  %v3929_v31 = vld [vmem:[%s6150_s1 + $0x324] ss:$8 sps:$4 sm:$0xff]   ;;  %v3932_v33 = vld [vmem:[%s6150_s1 + $0x320] ss:$8 sps:$4 sm:$0xff]   ;;  %v3935_v35 = vld [vmem:[%s6150_s1 + $0x314] ss:$8 sps:$4 sm:$0xff]  }
  0x21   : > { %559 = vperm.xlu1 %3896, %v424_v20   ;;  %547 = vperm.xlu0 %3895, %v423_v21   ;;  %v3937_v36 = vld [vmem:[%s6150_s1 + $0x210] ss:$8 sps:$4 sm:$0xff]   ;;  %v3939_v38 = vld [vmem:[%s6150_s1 + $0x204] ss:$8 sps:$4 sm:$0xff]   ;;  %v3943_v40 = vld [vmem:[%s6150_s1 + $0x200] ss:$8 sps:$4 sm:$0xff]  }
  0x22   : > { %1354 = vmatprep.subr.bf16.mxu1 %v3917_v23  ;;  %v3938_v37 = vld [vmem:[%s6150_s1 + $0x310] ss:$8 sps:$4 sm:$0xff]   ;;  %v3941_v39 = vld [vmem:[%s6150_s1 + $0x304] ss:$8 sps:$4 sm:$0xff]   ;;  %v3944_v41 = vld [vmem:[%s6150_s1 + $0x300] ss:$8 sps:$4 sm:$0xff]  }
  0x23   : > { %1282 = vmatpush1.bf16.msra.mxu0 %v3919_v24  ;;  %v3945_v42 = vld [vmem:[%s6150_s1 + $0x2f4] ss:$8 sps:$4 sm:$0xff]   ;;  %v3949_v44 = vld [vmem:[%s6150_s1 + $0x2f0] ss:$8 sps:$4 sm:$0xff]   ;;  %v3951_v46 = vld [vmem:[%s6150_s1 + $0x2e4] ss:$8 sps:$4 sm:$0xff]  }
  0x24   : > { %1355 = vmatpush1.bf16.msra.mxu1 %v3920_v25  ;;  %1283 = vmatprep.subr.bf16.mxu0 %v3921_v26  ;;  %v3947_v43 = vld [vmem:[%s6150_s1 + $0x3f4] ss:$8 sps:$4 sm:$0xff]   ;;  %v3950_v45 = vld [vmem:[%s6150_s1 + $0x3f0] ss:$8 sps:$4 sm:$0xff]   ;;  %v3953_v47 = vld [vmem:[%s6150_s1 + $0x3e4] ss:$8 sps:$4 sm:$0xff]  }
  0x25   : > { %1356 = vmatprep.subr.bf16.mxu1 %v3923_v27  ;;  %s192_s8 = scalar_select %p191_p10, %s4395_s19, 1  ;;  %v3955_v48 = vld [vmem:[%s6150_s1 + $0x2e0] ss:$8 sps:$4 sm:$0xff]   ;;  %v3957_v50 = vld [vmem:[%s6150_s1 + $0x2d4] ss:$8 sps:$4 sm:$0xff]  }
  0x26   : > { %v3956_v49 = vld [vmem:[%s6150_s1 + $0x3e0] ss:$8 sps:$4 sm:$0xff]   ;;  %v3959_v51 = vld [vmem:[%s6150_s1 + $0x3d4] ss:$8 sps:$4 sm:$0xff]   ;;  %v3961_v52 = vld [vmem:[%s6150_s1 + $0x2d0] ss:$8 sps:$4 sm:$0xff]  }
  0x27   : > { %1284 = vmatpush1.bf16.msra.mxu0 %v3925_v28  ;;  %s3849_s28 = sshll.u32 %s192_s8, 7  ;;  %v3962_v53 = vld [vmem:[%s6150_s1 + $0x3d0] ss:$8 sps:$4 sm:$0xff]   ;;  %v3963_v54 = vld [vmem:[%s6150_s1 + $0x2c4] ss:$8 sps:$4 sm:$0xff]   ;;  %s188_s20 = sand.u32 1, %s4333_s16  }
  0x28   : > { %1357 = vmatpush1.bf16.msra.mxu1 %v3926_v29  ;;  %1285 = vmatprep.subr.bf16.mxu0 %v3927_v30  ;;  %v3965_v55 = vld [vmem:[%s6150_s1 + $0x3c4] ss:$8 sps:$4 sm:$0xff]   ;;  %s4597_s8 = scalar_lea.vmem %s6149_s0, %s3849_s28  ;;  %v3967_v56 = vld [vmem:[%s6150_s1 + $0x2c0] ss:$8 sps:$4 sm:$0xff]   ;;  %v3969_v58 = vld [vmem:[%s6150_s1 + $0x2b4] ss:$8 sps:$4 sm:$0xff]  }
  0x29   : > { %1358 = vmatprep.subr.bf16.mxu1 %v3929_v31  ;;  %v3968_v57 = vld [vmem:[%s6150_s1 + $0x3c0] ss:$8 sps:$4 sm:$0xff]   ;;  %v206_v60 = vld [vmem:[%s4597_s8 + $0x10] sm:$0xff]  ;;  %v207_v7 = vld [vmem:[%s4597_s8 + $0x18] sm:$0xff]  ;;  %vm794_vm1 = vsmask.f32 7424 }
  0x2a   : > { %v204_v59 = vld [vmem:[%s4597_s8] sm:$0xff]  ;;  %v3971_v61 = vld [vmem:[%s6150_s1 + $0x3b4] ss:$8 sps:$4 sm:$0xff]   ;;  %v225_v0 = vunpack.c.h.bf16 %v206_v60  ;;  %v205_v1 = vld [vmem:[%s4597_s8 + $0x8] sm:$0xff]  ;;  %v224_v3 = vunpack.c.l.bf16 %v206_v60  ;;  %v227_v16 = vunpack.c.h.bf16 %v207_v7  ;;  %v226_v30 = vunpack.c.l.bf16 %v207_v7  ;;  %s3389_s22 = sshll.u32 %s188_s20, 7  ;;  %s4346_s6 = smov [#allocation3]  }
  0x2b   : > { %1286 = vmatpush1.bf16.msra.mxu0 %v3931_v32  ;;  %v208_v62 = vld [vmem:[%s4597_s8 + $0x20] sm:$0xff]  ;;  %v221_v63 = vunpack.c.h.bf16 %v204_v59  ;;  %v220_v2 = vunpack.c.l.bf16 %v204_v59  ;;  %v3973_v4 = vld [vmem:[%s6150_s1 + $0x2b0] ss:$8 sps:$4 sm:$0xff]   ;;  %v209_v8 = vld [vmem:[%s4597_s8 + $0x28] sm:$0xff]  ;;  %v223_v9 = vunpack.c.h.bf16 %v205_v1  ;;  %v222_v11 = vunpack.c.l.bf16 %v205_v1  ;;  %s6036_s23 = scalar_lea.vmem [#allocation3], %s3389_s22  ;;  %s4285_s7 = sshll.u32 %s4346_s6, 4  ;;  %s4286_s7 = int_to_ptr.vmem [resolvable:$false] %s4285_s7 }
  0x2c   : > { %1359 = vmatpush1.bf16.msra.mxu1 %v3932_v33  ;;  %1287 = vmatprep.subr.bf16.mxu0 %v3933_v34  ;;  %v229_v5 = vunpack.c.h.bf16 %v208_v62  ;;  %v228_v10 = vunpack.c.l.bf16 %v208_v62  ;;  %v3974_v12 = vld [vmem:[%s6150_s1 + $0x3b0] ss:$8 sps:$4 sm:$0xff]   ;;  %v3975_v13 = vld [vmem:[%s6150_s1 + $0x2a4] ss:$8 sps:$4 sm:$0xff]   ;;  %v291_v15 = vrot.slane %v225_v0, 7  ;;  %v231_v17 = vunpack.c.h.bf16 %v209_v8  ;;  %s3323_s27 = sshll.u32 %s6036_s23, 4  ;;  %s6103_s27 = int_to_ptr.vmem [resolvable:$true] %s3323_s27 }
  0x2d   : > { %1360 = vmatprep.subr.bf16.mxu1 %v3935_v35  ;;  %v286_v14 = vrot.slane %v221_v63, 7  ;;  %v288_v19 = vrot.slane %v223_v9, 7  ;;  %v285_v20 = vrot.slane %v220_v2, 7  ;;  %v289_v21 = vrot.slane %v224_v3, 7  ;;  %v3977_v22 = vld [vmem:[%s6150_s1 + $0x3a4] ss:$8 sps:$4 sm:$0xff]   ;;  %p4288_p0 = scmp.lt.s32.totalorder %s6103_s27, %s4286_s7 }
  0x2e   : > { %v4626_v18 = vrot.slane %v229_v5, 7  ;;  %v295_v24 = vrot.slane %v227_v16, 7  ;;  %v4634_v25 = vrot.slane %v231_v17, 7  ;;  %v4636_v26 = vrot.slane %v228_v10, 7  ;;  %v3979_v27 = vld [vmem:[%s6150_s1 + $0x2a0] ss:$8 sps:$4 sm:$0xff]  }
  0x2f   : > { %1288 = vmatpush1.bf16.msra.mxu0 %v3937_v36  ;;  %v4632_v23 = vsel %vm284_vm0, %v286_v14, %v291_v15  ;;  %382 = vst [vmem:[#allocation2 + $0x38] sm:$0xfe] %v286_v14  ;;  %384 = vst [vmem:[#allocation2 + $0x100] sm:$0xfe] %v288_v19  ;;  %v4647_v29 = vsel %vm284_vm0, %v285_v20, %v289_v21  ;;  %v230_v31 = vunpack.c.l.bf16 %v209_v8  ;;  %v3980_v32 = vld [vmem:[%s6150_s1 + $0x3a0] ss:$8 sps:$4 sm:$0xff]  }
  0x30   : > { %1361 = vmatpush1.bf16.msra.mxu1 %v3938_v37  ;;  %1289 = vmatprep.subr.bf16.mxu0 %v3939_v38  ;;  %6163 = vst [vmem:[#allocation6_spill] sm:$0xff] %v4632_v23  ;;  %v4643_v28 = vsel %vm284_vm0, %v291_v15, %v4626_v18  ;;  %386 = vst [vmem:[#allocation2 + $0x108] sm:$0xff] %v4632_v23  ;;  %v4658_v34 = vsel %vm284_vm0, %v288_v19, %v295_v24  ;;  %v3981_v37 = vld [vmem:[%s6150_s1 + $0x294] ss:$8 sps:$4 sm:$0xff]   ;;  %v3992_v63 = vld [vmem:[%s6150_s1 + $0x380] ss:$8 sps:$4 sm:$0xff]  }
  0x31   : > { %1362 = vmatprep.subr.bf16.mxu1 %v3941_v39  ;;  %381 = vst [vmem:[#allocation2 + $0x120] sm:$0xfe] %v285_v20  ;;  %390 = vst [vmem:[#allocation2 + $0xc8] sm:$0xff] %v4643_v28  ;;  %v4655_v33 = vpack.c.bf16 %v4643_v28, %v4632_v23  ;;  %v4662_v35 = vsel %vm284_vm0, %v295_v24, %v4634_v25  ;;  %v4666_v36 = vsel %vm284_vm0, %v289_v21, %v4636_v26  ;;  %v3983_v38 = vld [vmem:[%s6150_s1 + $0x394] ss:$8 sps:$4 sm:$0xff]   ;;  %s4281_s5 = scalar_lea.vmem %s6103_s27, 2048 }
  0x32   : > { %6164 = vst [vmem:[#allocation7_spill] sm:$0xff] %v4658_v34  ;;  %385 = vst [vmem:[#allocation2 + $0x80] sm:$0xff] %v4647_v29  ;;  %v4679_v39 = vpack.c.bf16 %v4662_v35, %v4658_v34  ;;  %v3995_v14 = vld [vmem:[%s6150_s1 + $0x74] ss:$8 sps:$4 sm:$0xff]   ;;  %p4282_p11 = scmp.ne.s32.totalorder %s6103_s27, %s4281_s5  ;;  %s4287_s9 = scalar_lea.vmem %s4286_s7, 4096 }
  0x33   : > { %1290 = vmatpush1.bf16.msra.mxu0 %v3943_v40  ;;  %388 = vst [vmem:[#allocation2 + $0xf0] sm:$0xff] %v4658_v34  ;;  %392 = vst [vmem:[#allocation2 + $0x20] sm:$0xff] %v4662_v35  ;;  %v4684_v40 = vpack.c.bf16 %v4666_v36, %v4647_v29  ;;  %v3998_v19 = vld [vmem:[%s6150_s1 + $0x174] ss:$8 sps:$4 sm:$0xff]   ;;  %p4289_p1 = scmp.lt.s32.totalorder %s4287_s9, %s4281_s5 }
  0x34   : > { %1363 = vmatpush1.bf16.msra.mxu1 %v3944_v41  ;;  %1291 = vmatprep.subr.bf16.mxu0 %v3945_v42  ;;  %389 = vst [vmem:[#allocation2 + $0x18] sm:$0xff] %v4666_v36  ;;  %v287_v41 = vrot.slane %v222_v11, 7  ;;  %v293_v42 = vrot.slane %v226_v30, 7  ;;  %v218_v3 = vld [vmem:[%s4597_s8 + $0x70] sm:$0xff]  ;;  %p4283_p12 = pnand %p4282_p11, %p4412_p5 }
  0x35   : > { %1364 = vmatprep.subr.bf16.mxu1 %v3947_v43  ;;  %v3985_v43 = vld [vmem:[%s6150_s1 + $0x290] ss:$8 sps:$4 sm:$0xff]   ;;  %p4290_p2 = por %p4289_p1, %p4288_p0 }
  0x36   : > { %383 = vst [vmem:[#allocation2 + $0xf8] sm:$0xfe] %v287_v41  ;;  %v4718_v59 = vld [vmem:[#allocation2 + $0x100] sm:$0xff]  ;;  %p4284_p13 = pneg %p4283_p12 }
  0x37   : > { %1292 = vmatpush2.bf16.msra.mxu0 %v3949_v44  ;;  %v674_v44 = vld [vmem:[#allocation2 + $0xd0] sm:$0xfe]  ;;  %6166 = vst [vmem:[#allocation9_spill] sm:$0xff] %v4718_v59  ;;  %v4754_v20 = vpack.c.bf16 %v4718_v59, %v4344_v6 }
  0x38   : > { %1365 = vmatpush2.bf16.msra.mxu1 %v3950_v45  ;;  %1293 = vmatprep.subr.bf16.mxu0 %v3951_v46  ;;  %v4689_v45 = vrot.slane %v230_v31, 7  ;;  %v3986_v46 = vld [vmem:[%s6150_s1 + $0x390] ss:$8 sps:$4 sm:$0xff]   ;;  %v4720_v60 = vld [vmem:[#allocation2 + $0x120] sm:$0xff]  ;;  %p4291_p3 = pnand %p4290_p2, %p4284_p13 }
  0x39   : > { %1366 = vmatprep.subr.bf16.mxu1 %v3953_v47  ;;  %v3987_v47 = vld [vmem:[%s6150_s1 + $0x284] ss:$8 sps:$4 sm:$0xff]   ;;  %v4758_v21 = vpack.c.bf16 %v4720_v60, %v4344_v6 }
  0x3b   : > { %1294 = vmatpush2.bf16.msra.mxu0 %v3955_v48  ;;  %v815_v48 = vshll.u32 %v4655_v33, 16 }
  0x3c   : > { %1367 = vmatpush2.bf16.msra.mxu1 %v3956_v49  ;;  %1295 = vmatprep.subr.bf16.mxu0 %v3957_v50  ;;  %v676_v49 = vld [vmem:[#allocation2 + $0x48] sm:$0xfe]  ;;  %v4699_v50 = vsel %vm284_vm0, %v287_v41, %v293_v42 }
  0x3d   : > { %1368 = vmatprep.subr.bf16.mxu1 %v3959_v51  ;;  %v839_v51 = vshll.u32 %v4679_v39, 16  ;;  %387 = vst [vmem:[#allocation2 + $0x138] sm:$0xff] %v4699_v50  ;;  %v4733_v0 = vrot.slane %v815_v48, 1  ;;  %v712_v1 = vpack.c.bf16 %v4718_v59, %v676_v49  ;;  %v4746_v16 = vld [vmem:[#allocation2 + $0xf8] sm:$0xff]  ;;  %v248_v59 = vunpack.c.l.bf16 %v218_v3 }
  0x3f   : > { %1296 = vmatpush2.bf16.msra.mxu0 %v3961_v52  ;;  %v673_v52 = vld [vmem:[#allocation2 + $0xb0] sm:$0xfe]  ;;  %v4739_v8 = vrot.slane %v839_v51, 1  ;;  %v832_v10 = vshrl.u32 %v712_v1, 16  ;;  %v834_v11 = vshll.u32 %v712_v1, 16 }
  0x40   : > { %1369 = vmatpush2.bf16.msra.mxu1 %v3962_v53  ;;  %1297 = vmatprep.subr.bf16.mxu0 %v3963_v54  ;;  %v803_v53 = vshll.u32 %v4684_v40, 16  ;;  %v4705_v54 = vsel %vm284_vm0, %v293_v42, %v4689_v45  ;;  %v709_v2 = vpack.c.bf16 %v4720_v60, %v673_v52 }
  0x41   : > { %1370 = vmatprep.subr.bf16.mxu1 %v3965_v55  ;;  %v3989_v55 = vld [vmem:[%s6150_s1 + $0x384] ss:$8 sps:$4 sm:$0xff]   ;;  %391 = vst [vmem:[#allocation2 + $0x70] sm:$0xff] %v4705_v54 }
  0x42   : > { %v4741_v9 = vrot.slane %v803_v53, 1  ;;  %v3996_v53 = vld [vmem:[%s6150_s1 + $0x170] ss:$8 sps:$4 sm:$0xff]  }
  0x43   : > { %1298 = vmatpush2.bf16.msra.mxu0 %v3967_v56  ;;  %v4711_v56 = vld [vmem:[#allocation2 + $0x38] sm:$0xff] }
  0x44   : > { %1371 = vmatpush2.bf16.msra.mxu1 %v3968_v57  ;;  %1299 = vmatprep.subr.bf16.mxu0 %v3969_v58  ;;  %6165 = vst [vmem:[#allocation8_spill] sm:$0xff] %v4711_v56  ;;  %v3991_v57 = vld [vmem:[%s6150_s1 + $0x280] ss:$8 sps:$4 sm:$0xff]   ;;  %v710_v58 = vpack.c.bf16 %v4711_v56, %v674_v44  ;;  %v4728_v62 = vpack.c.bf16 %v4711_v56, %v4344_v6  ;;  %v3993_v44 = vld [vmem:[%s6150_s1 + $0x70] ss:$8 sps:$4 sm:$0xff]  }
  0x45   : > { %1372 = vmatprep.subr.bf16.mxu1 %v3971_v61  ;;  %v4724_v61 = vpack.c.bf16 %v4705_v54, %v4699_v50 }
  0x46   : > { %v808_v5 = vshrl.u32 %v710_v58, 16  ;;  %v810_v7 = vshll.u32 %v710_v58, 16  ;;  %v4004_v58 = vld [vmem:[%s6150_s1 + $0x164] ss:$8 sps:$4 sm:$0xff]  }
  0x47   : > { %1300 = vmatpush2.bf16.msra.mxu0 %v3973_v4  ;;  %v675_v4 = vld [vmem:[#allocation2 + $0x10] sm:$0xfe]  ;;  %v827_v17 = vshll.u32 %v4724_v61, 16 }
  0x48   : > { %1373 = vmatpush2.bf16.msra.mxu1 %v3974_v12  ;;  %1301 = vmatprep.subr.bf16.mxu0 %v3975_v13  ;;  %v796_v12 = vshrl.u32 %v709_v2, 16  ;;  %v798_v13 = vshll.u32 %v709_v2, 16  ;;  %v812_v15 = vrot.slane %v810_v7, 1  ;;  %v4002_v2 = vld [vmem:[%s6150_s1 + $0x160] ss:$8 sps:$4 sm:$0xff]   ;;  %v843_v7 = vshrl.u32 %v4684_v40, 16 }
  0x49   : > { %1374 = vmatprep.subr.bf16.mxu1 %v3977_v22  ;;  %v836_v22 = vrot.slane %v834_v11, 1  ;;  %v829_v52 = vrot.slane %v827_v17, 1  ;;  %v4005_v11 = vld [vmem:[%s6150_s1 + $0x50] ss:$8 sps:$4 sm:$0xff]  }
  0x4a   : > { %v800_v24 = vrot.slane %v798_v13, 1  ;;  %v813_v31 = vor.u32 %v812_v15, %v808_v5  ;;  %v867_v5 = vshrl.u32 %v4679_v39, 16  ;;  %v4013_v39 = vld [vmem:[%s6150_s1 + $0x44] ss:$8 sps:$4 sm:$0xff]   ;;  %v4008_v40 = vld [vmem:[%s6150_s1 + $0x150] ss:$8 sps:$4 sm:$0xff]  }
  0x4b   : > { %1302 = vmatpush2.bf16.msra.mxu0 %v3979_v27  ;;  %v711_v27 = vpack.c.bf16 %v4746_v16, %v675_v4  ;;  %v851_v4 = vshrl.u32 %v4655_v33, 16  ;;  %v4010_v33 = vld [vmem:[%s6150_s1 + $0x154] ss:$8 sps:$4 sm:$0xff]  }
  0x4c   : > { %1375 = vmatpush2.bf16.msra.mxu1 %v3980_v32  ;;  %1303 = vmatprep.subr.bf16.mxu0 %v3981_v37  ;;  %v4765_v32 = vpack.c.bf16 %v4746_v16, %v4344_v6  ;;  %v801_v41 = vor.u32 %v800_v24, %v796_v12  ;;  %v4001_v6 = vld [vmem:[%s6150_s1 + $0x64] ss:$8 sps:$4 sm:$0xff]   ;;  %v4011_v12 = vld [vmem:[%s6150_s1 + $0x40] ss:$8 sps:$4 sm:$0xff]   ;;  %v210_v13 = vld [vmem:[%s4597_s8 + $0x30] sm:$0xff] }
  0x4d   : > { %1376 = vmatprep.subr.bf16.mxu1 %v3983_v38  ;;  %v837_v38 = vor.u32 %v836_v22, %v832_v10  ;;  %v820_v42 = vshrl.u32 %v711_v27, 16  ;;  %v859_v10 = vshrl.u32 %v4724_v61, 16  ;;  %v4821_v15 = vor.u32 %v851_v4, %v4733_v0  ;;  %v211_v17 = vld [vmem:[%s4597_s8 + $0x38] sm:$0xff] }
  0x4e   : > { %v806_v49 = vsel %vm794_vm1, %v801_v41, %v4741_v9  ;;  %v4828_v22 = vor.u32 %v843_v7, %v4741_v9  ;;  %v235_v41 = vunpack.c.h.bf16 %v211_v17  ;;  %v4025_v7 = vld [vmem:[%s6150_s1 + $0x24] ss:$8 sps:$4 sm:$0xff]  }
  0x4f   : > { %1304 = vmatpush2.bf16.msra.mxu0 %v3985_v43  ;;  %v822_v43 = vshll.u32 %v711_v27, 16  ;;  %v842_v48 = vsel %vm794_vm1, %v837_v38, %v4739_v8  ;;  %v4830_v24 = vor.u32 %v859_v10, %v829_v52  ;;  %v233_v27 = vunpack.c.h.bf16 %v210_v13  ;;  %v213_v38 = vld [vmem:[%s4597_s8 + $0x48] sm:$0xff] }
  0x50   : > { %1377 = vmatpush2.bf16.msra.mxu1 %v3986_v46  ;;  %1305 = vmatprep.subr.bf16.mxu0 %v3987_v47  ;;  %v818_v46 = vsel %vm794_vm1, %v813_v31, %v4733_v0  ;;  %v4016_v0 = vld [vmem:[%s6150_s1 + $0x144] ss:$8 sps:$4 sm:$0xff]   ;;  %v239_v9 = vunpack.c.h.bf16 %v213_v38 }
  0x51   : > { %1378 = vmatprep.subr.bf16.mxu1 %v3989_v55  ;;  %1307 = vmatprep.mubr.bf16.mxu0 %v818_v46  ;;  %v824_v51 = vrot.slane %v822_v43, 1  ;;  %v238_v46 = vunpack.c.l.bf16 %v213_v38  ;;  %v4930_v38 = vld [vmem:[%s4597_s8 + $0x58] sm:$0xff] }
  0x52   : > { %1380 = vmatprep.mubr.bf16.mxu1 %v842_v48 }
  0x53   : > { %1306 = vmatpush2.bf16.msra.mxu0 %v3991_v57  ;;  %v825_v55 = vor.u32 %v824_v51, %v820_v42  ;;  %v3999_v57 = vld [vmem:[%s6150_s1 + $0x60] ss:$8 sps:$4 sm:$0xff]   ;;  %v232_v42 = vunpack.c.l.bf16 %v210_v13  ;;  %v4911_v13 = vld [vmem:[%s4597_s8 + $0x50] sm:$0xff] }
  0x54   : > { %1379 = vmatpush2.bf16.msra.mxu1 %v3992_v63  ;;  %1741 = vmatprep.subr.bf16.mxu0 %v3995_v14  ;;  %v4007_v63 = vld [vmem:[%s6150_s1 + $0x54] ss:$8 sps:$4 sm:$0xff]   ;;  %v212_v14 = vld [vmem:[%s4597_s8 + $0x40] sm:$0xff] }
  0x55   : > { %1814 = vmatprep.subr.bf16.mxu1 %v3998_v19  ;;  %v830_v1 = vsel %vm794_vm1, %v825_v55, %v829_v52  ;;  %v4825_v19 = vor.u32 %v867_v5, %v4739_v8  ;;  %v237_v31 = vunpack.c.h.bf16 %v212_v14  ;;  %v4019_v8 = vld [vmem:[%s6150_s1 + $0x34] ss:$8 sps:$4 sm:$0xff]   ;;  %v236_v43 = vunpack.c.l.bf16 %v212_v14  ;;  %v4014_v52 = vld [vmem:[%s6150_s1 + $0x140] ss:$8 sps:$4 sm:$0xff]  }
  0x56   : > { %1308 = vmatmul.mubr.bf16.vlgmr.msra.gmra.mxu0 %v806_v49  ;;  %v311_v49 = vrot.slane %v235_v41, 7  ;;  %v305_v51 = vrot.slane %v232_v42, 7  ;;  %v4933_v41 = vld [vmem:[%s4597_s8 + $0x68] sm:$0xff] }
  0x57   : > { %1742 = vmatpush1.bf16.msra.mxu0 %v3993_v44  ;;  %1381 = vmatmul.mubr.bf16.vlgmr.msra.gmra.mxu1 %v830_v1  ;;  %v234_v44 = vunpack.c.l.bf16 %v211_v17  ;;  %v4839_v48 = vrot.slane %v237_v31, 7  ;;  %v4846_v55 = vrot.slane %v236_v43, 7  ;;  %v4022_v1 = vld [vmem:[%s6150_s1 + $0x134] ss:$8 sps:$4 sm:$0xff]   ;;  %v241_v31 = vunpack.c.h.bf16 %v4911_v13  ;;  %v4028_v42 = vld [vmem:[%s6150_s1 + $0x124] ss:$8 sps:$4 sm:$0xff]  }
  0x58   : > { %1743 = vmatprep.subr.bf16.mxu0 %v4001_v6  ;;  %1815 = vmatpush1.bf16.msra.mxu1 %v3996_v53  ;;  %v307_v6 = vrot.slane %v233_v27, 7  ;;  %v4844_v53 = vrot.slane %v239_v9, 7  ;;  %v4866_v5 = vsel %vm284_vm0, %v4634_v25, %v311_v49  ;;  %v4884_v25 = vsel %vm284_vm0, %v4636_v26, %v305_v51  ;;  %v4926_v27 = vld [vmem:[%s4597_s8 + $0x60] sm:$0xff] }
  0x59   : > { %1816 = vmatprep.subr.bf16.mxu1 %v4004_v58  ;;  %v4848_v58 = vrot.slane %v238_v46, 7  ;;  %396 = vst [vmem:[#allocation2 + $0x98] sm:$0xff] %v4866_v5  ;;  %v4899_v26 = vsel %vm284_vm0, %v305_v51, %v4846_v55  ;;  %393 = vst [vmem:[#allocation2 + $0x128] sm:$0xff] %v4884_v25  ;;  %v243_v43 = vunpack.c.h.bf16 %v4930_v38  ;;  %v323_v51 = vrot.slane %v241_v31, 7 }
  0x5a   : > { %v4862_v4 = vsel %vm284_vm0, %v307_v6, %v4839_v48  ;;  %v4879_v10 = vsel %vm284_vm0, %v311_v49, %v4844_v53  ;;  %397 = vst [vmem:[#allocation2 + $0xa8] sm:$0xff] %v4899_v26  ;;  %v4917_v17 = vpack.c.bf16 %v4899_v26, %v4884_v25 }
  0x5b   : > { %1744 = vmatpush1.bf16.msra.mxu0 %v3999_v57  ;;  %v309_v57 = vrot.slane %v234_v44, 7  ;;  %398 = vst [vmem:[#allocation2 + $0x90] sm:$0xff] %v4862_v4  ;;  %400 = vst [vmem:[#allocation2 + $0x88] sm:$0xff] %v4879_v10  ;;  %v4031_v44 = vld [vmem:[%s6150_s1 + $0x14] ss:$8 sps:$4 sm:$0xff]   ;;  %v327_v47 = vrot.slane %v243_v43, 7  ;;  %v4961_v31 = vsel %vm284_vm0, %v4839_v48, %v323_v51 }
  0x5c   : > { %1745 = vmatprep.subr.bf16.mxu0 %v4007_v63  ;;  %1817 = vmatpush1.bf16.msra.mxu1 %v4002_v2  ;;  %v4017_v63 = vld [vmem:[%s6150_s1 + $0x30] ss:$8 sps:$4 sm:$0xff]   ;;  %v4858_v2 = vsel %vm284_vm0, %v4626_v18, %v307_v6  ;;  %v847_v6 = vshll.u32 %v4917_v17, 16  ;;  %402 = vst [vmem:[#allocation2 + $0x118] sm:$0xff] %v4961_v31 }
  0x5d   : > { %1818 = vmatprep.subr.bf16.mxu1 %v4010_v33  ;;  %394 = vst [vmem:[#allocation2 + $0x110] sm:$0xff] %v4858_v2  ;;  %v4875_v18 = vpack.c.bf16 %v4862_v4, %v4858_v2  ;;  %v4023_v33 = vld [vmem:[%s6150_s1 + $0x20] ss:$8 sps:$4 sm:$0xff]  }
  0x5e   : > { %v4955_v37 = vrot.slane %v847_v6, 1 }
  0x5f   : > { %1746 = vmatpush1.bf16.msra.mxu0 %v4005_v11  ;;  %v4020_v11 = vld [vmem:[%s6150_s1 + $0x130] ss:$8 sps:$4 sm:$0xff]   ;;  %v855_v14 = vshll.u32 %v4875_v18, 16  ;;  %v883_v9 = vshrl.u32 %v4875_v18, 16 }
  0x60   : > { %1747 = vmatprep.subr.bf16.mxu0 %v4013_v39  ;;  %1819 = vmatpush1.bf16.msra.mxu1 %v4008_v40  ;;  %v4895_v39 = vpack.c.bf16 %v4879_v10, %v4866_v5  ;;  %v4904_v40 = vsel %vm284_vm0, %v4689_v45, %v309_v57 }
  0x61   : > { %1820 = vmatprep.subr.bf16.mxu1 %v4016_v0  ;;  %395 = vst [vmem:[#allocation2 + $0x8] sm:$0xff] %v4904_v40  ;;  %v857_v46 = vrot.slane %v855_v14, 1 }
  0x62   : > { %v871_v0 = vshll.u32 %v4895_v39, 16 }
  0x63   : > { %1748 = vmatpush1.bf16.msra.mxu0 %v4011_v12  ;;  %v4908_v12 = vsel %vm284_vm0, %v309_v57, %v4848_v58 }
  0x64   : > { %1749 = vmatprep.subr.bf16.mxu0 %v4019_v8  ;;  %399 = vst [vmem:[#allocation2 + $0xe0] sm:$0xff] %v4908_v12  ;;  %v4923_v45 = vpack.c.bf16 %v4908_v12, %v4904_v40  ;;  %1821 = vmatpush1.bf16.msra.mxu1 %v4014_v52  ;;  %v245_v8 = vunpack.c.h.bf16 %v4926_v27  ;;  %v873_v52 = vrot.slane %v871_v0, 1  ;;  %v4029_v0 = vld [vmem:[%s6150_s1 + $0x10] ss:$8 sps:$4 sm:$0xff]  }
  0x65   : > { %1822 = vmatprep.subr.bf16.mxu1 %v4022_v1  ;;  %v4026_v1 = vld [vmem:[%s6150_s1 + $0x120] ss:$8 sps:$4 sm:$0xff]  }
  0x66   : > { %6167 = vst [vmem:[#allocation10_spill] sm:$0xff] %v4923_v45  ;;  %v863_v49 = vshll.u32 %v4923_v45, 16  ;;  %v4947_v57 = vrot.slane %v245_v8, 7  ;;  %v4034_v8 = vld [vmem:[%s6150_s1 + $0x114] ss:$8 sps:$4 sm:$0xff]  }
  0x67   : > { %1750 = vmatpush1.bf16.msra.mxu0 %v4017_v63  ;;  %v247_v63 = vunpack.c.h.bf16 %v4933_v41 }
  0x68   : > { %1751 = vmatprep.subr.bf16.mxu0 %v4025_v7  ;;  %v858_v7 = vsel %vm794_vm1, %v4821_v15, %v857_v46  ;;  %v4957_v14 = vrot.slane %v863_v49, 1  ;;  %1823 = vmatpush1.bf16.msra.mxu1 %v4020_v11  ;;  %v874_v15 = vsel %vm794_vm1, %v4825_v19, %v873_v52  ;;  %v4973_v43 = vsel %vm284_vm0, %v323_v51, %v4947_v57  ;;  %v4037_v11 = vld [vmem:[%s6150_s1 + $0x4] ss:$8 sps:$4 sm:$0xff]  }
  0x69   : > { %v4976_v48 = vrot.slane %v247_v63, 7  ;;  %1824 = vmatprep.subr.bf16.mxu1 %v4028_v42  ;;  %406 = vst [vmem:[#allocation2 + $0x130] sm:$0xff] %v4973_v43  ;;  %v4990_v6 = vpack.c.bf16 %v4973_v43, %v4961_v31  ;;  %v899_v42 = vshrl.u32 %v4895_v39, 16  ;;  %1317 = vmatprep.mubr.bf16.mxu0 %v858_v7  ;;  %v240_v49 = vunpack.c.l.bf16 %v4911_v13  ;;  %v4035_v63 = vld [vmem:[%s6150_s1] ss:$8 sps:$4 sm:$0xff]  }
  0x6a   : > { %v866_v19 = vsel %vm794_vm1, %v4830_v24, %v4957_v14  ;;  %1390 = vmatprep.mubr.bf16.mxu1 %v874_v15  ;;  %v244_v51 = vunpack.c.l.bf16 %v4926_v27  ;;  %v885_v7 = vor.u32 %v883_v9, %v857_v46  ;;  %v4040_v13 = vld [vmem:[%s6150_s1 + $0x104] ss:$8 sps:$4 sm:$0xff]   ;;  %v242_v46 = vunpack.c.l.bf16 %v4930_v38 }
  0x6b   : > { %1752 = vmatpush1.bf16.msra.mxu0 %v4023_v33  ;;  %v850_v33 = vsel %vm794_vm1, %v4828_v22, %v4955_v37  ;;  %v4998_v22 = vsel %vm284_vm0, %v4844_v53, %v327_v47  ;;  %v5002_v24 = vsel %vm284_vm0, %v327_v47, %v4976_v48  ;;  %1391 = vmatmul.mubr.bf16.gmra.mxu1 %v866_v19  ;;  %v887_v15 = vshll.u32 %v4990_v6, 16  ;;  %v4043_v19 = vld [vmem:[%s6150_s1 + $0xf4] ss:$8 sps:$4 sm:$0xff]  }
  0x6c   : > { %1753 = vmatprep.subr.bf16.mxu0 %v4031_v44  ;;  %v4032_v44 = vld [vmem:[%s6150_s1 + $0x110] ss:$8 sps:$4 sm:$0xff]   ;;  %1318 = vmatmul.mubr.bf16.gmra.mxu0 %v850_v33  ;;  %404 = vst [vmem:[#allocation2 + $0xa0] sm:$0xff] %v4998_v22  ;;  %408 = vst [vmem:[#allocation2 + $0xe8] sm:$0xff] %v5002_v24  ;;  %v5014_v47 = vpack.c.bf16 %v5002_v24, %v4998_v22  ;;  %v875_v53 = vshrl.u32 %v4917_v17, 16  ;;  %v321_v27 = vrot.slane %v240_v49, 7  ;;  %v246_v33 = vunpack.c.l.bf16 %v4933_v41 }
  0x6d   : > { %1825 = vmatpush1.bf16.msra.mxu1 %v4026_v1  ;;  %v5020_v9 = vrot.slane %v244_v51, 7  ;;  %v5027_v1 = vrot.slane %v887_v15, 1  ;;  %v325_v41 = vrot.slane %v242_v46, 7 }
  0x6e   : > { %1826 = vmatprep.subr.bf16.mxu1 %v4034_v8  ;;  %v903_v30 = vshll.u32 %v5014_v47, 16  ;;  %v5033_v49 = vsel %vm284_vm0, %v4846_v55, %v321_v27  ;;  %v5039_v8 = vrot.slane %v246_v33, 7  ;;  %v4049_v33 = vld [vmem:[%s6150_s1 + $0xe4] ss:$8 sps:$4 sm:$0xff]  }
  0x6f   : > { %1754 = vmatpush1.bf16.msra.mxu0 %v4029_v0  ;;  %v901_v0 = vor.u32 %v899_v42, %v873_v52  ;;  %v5037_v38 = vsel %vm284_vm0, %v321_v27, %v5020_v9  ;;  %v890_v51 = vsel %vm794_vm1, %v885_v7, %v5027_v1  ;;  %401 = vst [vmem:[#allocation2 + $0xc0] sm:$0xff] %v5033_v49  ;;  %v891_v52 = vshrl.u32 %v4923_v45, 16  ;;  %v4038_v42 = vld [vmem:[%s6150_s1 + $0x100] ss:$8 sps:$4 sm:$0xff]  }
  0x70   : > { %1755 = vmatprep.subr.bf16.mxu0 %v4037_v11  ;;  %v219_v11 = vld [vmem:[%s4597_s8 + $0x78] sm:$0xff]  ;;  %v5044_v15 = vrot.slane %v903_v30, 1  ;;  %405 = vst [vmem:[#allocation2 + $0x68] sm:$0xff] %v5037_v38  ;;  %v5050_v55 = vpack.c.bf16 %v5037_v38, %v5033_v49  ;;  %v877_v7 = vor.u32 %v875_v53, %v4955_v37  ;;  %v5062_v27 = vsel %vm284_vm0, %v4848_v58, %v325_v41  ;;  %s3850_s8 = sshll.u32 %s4395_s19, 11  ;;  %s6109_s19 = scalar_lea.sflag [#allocation4], %s188_s20 }
  0x71   : > { %1827 = vmatpush1.bf16.msra.mxu1 %v4032_v44  ;;  %v4041_v30 = vld [vmem:[%s6150_s1 + $0xf0] ss:$8 sps:$4 sm:$0xff]   ;;  %v5066_v46 = vsel %vm284_vm0, %v325_v41, %v5039_v8  ;;  %v249_v44 = vunpack.c.h.bf16 %v218_v3  ;;  %403 = vst [vmem:[#allocation2 + $0xd8] sm:$0xff] %v5062_v27  ;;  %1327 = vmatprep.mubr.bf16.mxu0 %v890_v51  ;;  %v893_v56 = vor.u32 %v891_v52, %v4957_v14  ;;  %v4052_v51 = vld [vmem:[%s6150_s1 + $0x1e4] ss:$8 sps:$4 sm:$0xff]   ;;  %s6101_s30 = scalar_lea.hbm %s6153_s4, %s3850_s8 }
  0x72   : > { %1828 = vmatprep.subr.bf16.mxu1 %v4040_v13  ;;  %v906_v37 = vsel %vm794_vm1, %v901_v0, %v5044_v15  ;;  %v879_v58 = vshll.u32 %v5050_v55, 16  ;;  %407 = vst [vmem:[#allocation2 + $0x50] sm:$0xff] %v5066_v46  ;;  %v5081_v53 = vpack.c.bf16 %v5066_v46, %v5062_v27  ;;  %v251_v13 = vunpack.c.h.bf16 %v219_v11  ;;  %v4047_v0 = vld [vmem:[%s6150_s1 + $0xe0] ss:$8 sps:$4 sm:$0xff]   ;;  %v4055_v14 = vld [vmem:[%s6150_s1 + $0xd4] ss:$8 sps:$4 sm:$0xff]  }
  0x73   : > { %1756 = vmatpush1.bf16.msra.mxu0 %v4035_v63  ;;  %v4046_v63 = vld [vmem:[%s6150_s1 + $0x1f4] ss:$8 sps:$4 sm:$0xff]   ;;  %1400 = vmatprep.mubr.bf16.mxu1 %v906_v37  ;;  %v339_v41 = vrot.slane %v249_v44, 7  ;;  %v337_v44 = vrot.slane %v248_v59, 7  ;;  %v250_v37 = vunpack.c.l.bf16 %v219_v11 }
  0x74   : > { %1757 = vmatprep.subr.bf16.mxu0 %v4043_v19  ;;  %v4044_v19 = vld [vmem:[%s6150_s1 + $0x1f0] ss:$8 sps:$4 sm:$0xff]   ;;  %v5089_v34 = vrot.slane %v879_v58, 1  ;;  %v895_v23 = vshll.u32 %v5081_v53, 16  ;;  %v343_v45 = vrot.slane %v251_v13, 7 }
  0x75   : > { %1829 = vmatpush1.bf16.msra.mxu1 %v4038_v42  ;;  %v5098_v3 = vsel %vm284_vm0, %v4947_v57, %v339_v41  ;;  %414 = vst [vmem:[#allocation2] sm:$0x1] %v339_v41  ;;  %v5115_v59 = vsel %vm284_vm0, %v5020_v9, %v337_v44  ;;  %413 = vst [vmem:[#allocation2 + $0x28] sm:$0x1] %v337_v44  ;;  %v341_v11 = vrot.slane %v250_v37, 7 }
  0x76   : > { %1830 = vmatprep.subr.bf16.mxu1 %v4046_v63  ;;  %v882_v52 = vsel %vm794_vm1, %v877_v7, %v5089_v34  ;;  %v5105_v42 = vrot.slane %v895_v23, 1  ;;  %410 = vst [vmem:[#allocation2 + $0x78] sm:$0xff] %v5098_v3  ;;  %v5110_v57 = vsel %vm284_vm0, %v4976_v48, %v343_v45  ;;  %416 = vst [vmem:[#allocation2 + $0x60] sm:$0x1] %v343_v45  ;;  %v4053_v63 = vld [vmem:[%s6150_s1 + $0xd0] ss:$8 sps:$4 sm:$0xff]  }
  0x77   : > { %1758 = vmatpush2.bf16.msra.mxu0 %v4041_v30  ;;  %412 = vst [vmem:[#allocation2 + $0x40] sm:$0xff] %v5110_v57  ;;  %v4050_v30 = vld [vmem:[%s6150_s1 + $0x1e0] ss:$8 sps:$4 sm:$0xff]   ;;  %409 = vst [vmem:[#allocation2 + $0x58] sm:$0xff] %v5115_v59  ;;  %v4058_v58 = vld [vmem:[%s6150_s1 + $0x1d4] ss:$8 sps:$4 sm:$0xff]  }
  0x78   : > { %1759 = vmatprep.subr.bf16.mxu0 %v4049_v33  ;;  %1328 = vmatmul.mubr.bf16.gmra.mxu0 %v882_v52  ;;  %v898_v48 = vsel %vm794_vm1, %v893_v56, %v5105_v42  ;;  %v5136_v56 = vsel %vm284_vm0, %v5039_v8, %v341_v11  ;;  %415 = vst [vmem:[#allocation2 + $0xb8] sm:$0x1] %v341_v11  ;;  %v4061_v13 = vld [vmem:[%s6150_s1 + $0xc4] ss:$8 sps:$4 sm:$0xff]   ;;  %v4059_v52 = vld [vmem:[%s6150_s1 + $0xc0] ss:$8 sps:$4 sm:$0xff]  }
  0x79   : > { %1831 = vmatpush2.bf16.msra.mxu1 %v4044_v19  ;;  %411 = vst [vmem:[#allocation2 + $0x30] sm:$0xff] %v5136_v56  ;;  %v915_v11 = vshrl.u32 %v4990_v6, 16  ;;  %v931_v23 = vshrl.u32 %v5014_v47, 16  ;;  %v4068_v9 = vld [vmem:[%s6150_s1 + $0x1b0] ss:$8 sps:$4 sm:$0xff]  }
  0x7a   : > { %1832 = vmatprep.subr.bf16.mxu1 %v4052_v51  ;;  %1401 = vmatmul.mubr.bf16.gmra.mxu1 %v898_v48  ;;  %v4064_v48 = vld [vmem:[%s6150_s1 + $0x1c4] ss:$8 sps:$4 sm:$0xff]   ;;  %v907_v51 = vshrl.u32 %v5050_v55, 16 }
  0x7b   : > { %1760 = vmatpush2.bf16.msra.mxu0 %v4047_v0  ;;  %v4056_v0 = vld [vmem:[%s6150_s1 + $0x1d0] ss:$8 sps:$4 sm:$0xff]   ;;  %v917_v19 = vor.u32 %v915_v11, %v5027_v1  ;;  %v4070_v1 = vld [vmem:[%s6150_s1 + $0x1b4] ss:$8 sps:$4 sm:$0xff]  }
  0x7c   : > { %1761 = vmatprep.subr.bf16.mxu0 %v4055_v14  ;;  %v4067_v14 = vld [vmem:[%s6150_s1 + $0xb4] ss:$8 sps:$4 sm:$0xff]   ;;  %v909_v11 = vor.u32 %v907_v51, %v5089_v34 }
  0x7d   : > { %1833 = vmatpush2.bf16.msra.mxu1 %v4050_v30  ;;  %v706_v45 = vld [vmem:[#allocation2 + $0x78] sm:$0x1] }
  0x7e   : > { %1834 = vmatprep.subr.bf16.mxu1 %v4058_v58  ;;  %v726_v37 = vpack.c.bf16 %v706_v45, %v706_v45  ;;  %v708_v44 = vld [vmem:[#allocation2 + $0x40] sm:$0x1]  ;;  %v705_v30 = vld [vmem:[#allocation2 + $0x58] sm:$0x1]  ;;  %v923_v58 = vshrl.u32 %v5081_v53, 16 }
  0x7f   : > { %1762 = vmatpush2.bf16.msra.mxu0 %v4053_v63  ;;  %v728_v41 = vpack.c.bf16 %v708_v44, %v708_v44  ;;  %v4062_v63 = vld [vmem:[%s6150_s1 + $0x1c0] ss:$8 sps:$4 sm:$0xff]   ;;  %v725_v33 = vpack.c.bf16 %v705_v30, %v705_v30  ;;  %v4065_v45 = vld [vmem:[%s6150_s1 + $0xb0] ss:$8 sps:$4 sm:$0xff]  }
  0x80   : > { %1763 = vmatprep.subr.bf16.mxu0 %v4061_v13  ;;  %v919_v8 = vshll.u32 %v726_v37, 16  ;;  %v933_v13 = vor.u32 %v931_v23, %v5044_v15  ;;  %v707_v7 = vld [vmem:[#allocation2 + $0x30] sm:$0x1] }
  0x81   : > { %1835 = vmatpush2.bf16.msra.mxu1 %v4056_v0  ;;  %v935_v44 = vshll.u32 %v728_v41, 16  ;;  %v911_v30 = vshll.u32 %v725_v33, 16  ;;  %v727_v0 = vpack.c.bf16 %v707_v7, %v707_v7  ;;  %v925_v41 = vor.u32 %v923_v58, %v5105_v42  ;;  %v4071_v7 = vld [vmem:[%s6150_s1 + $0xa0] ss:$8 sps:$4 sm:$0xff]   ;;  %v4076_v42 = vld [vmem:[%s6150_s1 + $0x1a4] ss:$8 sps:$4 sm:$0xff]  }
  0x82   : > { %1836 = vmatprep.subr.bf16.mxu1 %v4064_v48  ;;  %v921_v37 = vrot.slane %v919_v8, 1  ;;  %v4073_v48 = vld [vmem:[%s6150_s1 + $0xa4] ss:$8 sps:$4 sm:$0xff]   ;;  %v481_v58 = vlaneseq }
  0x83   : > { %1764 = vmatpush2.bf16.msra.mxu0 %v4059_v52  ;;  %v937_v52 = vrot.slane %v935_v44, 1  ;;  %v913_v23 = vrot.slane %v911_v30, 1  ;;  %v4077_v44 = vld [vmem:[%s6150_s1 + $0x90] ss:$8 sps:$4 sm:$0xff]   ;;  %v4085_v30 = vld [vmem:[%s6150_s1 + $0x84] ss:$8 sps:$4 sm:$0xff]  }
  0x84   : > { %1765 = vmatprep.subr.bf16.mxu0 %v4067_v14  ;;  %v922_v15 = vsel %vm794_vm1, %v917_v19, %v921_v37  ;;  %v927_v14 = vshll.u32 %v727_v0, 16  ;;  %v4345_v19 = vmov 839922192   ;;  %v4080_v0 = vld [vmem:[%s6150_s1 + $0x190] ss:$8 sps:$4 sm:$0xff]  }
  0x85   : > { %1837 = vmatpush2.bf16.msra.mxu1 %v4062_v63  ;;  %v938_v34 = vsel %vm794_vm1, %v933_v13, %v937_v52  ;;  %1337 = vmatprep.mubr.bf16.mxu0 %v922_v15  ;;  %v914_v33 = vsel %vm794_vm1, %v909_v11, %v913_v23  ;;  %v479_v51 = vunpack.c.l.s4 %v4345_v19  ;;  %v4079_v63 = vld [vmem:[%s6150_s1 + $0x94] ss:$8 sps:$4 sm:$0xff]   ;;  %v4074_v13 = vld [vmem:[%s6150_s1 + $0x1a0] ss:$8 sps:$4 sm:$0xff]   ;;  %v5218_v11 = vshrl.u32 %v481_v58, 7 }
  0x86   : > { %1838 = vmatprep.subr.bf16.mxu1 %v4070_v1  ;;  %v929_v8 = vrot.slane %v927_v14, 1  ;;  %1410 = vmatprep.mubr.bf16.mxu1 %v938_v34  ;;  %v4082_v1 = vld [vmem:[%s6150_s1 + $0x194] ss:$8 sps:$4 sm:$0xff]   ;;  %v4088_v23 = vld [vmem:[%s6150_s1 + $0x184] ss:$8 sps:$4 sm:$0xff]  }
  0x87   : > { %1766 = vmatpush2.bf16.msra.mxu0 %v4065_v45  ;;  %v480_v37 = vunpack.c.0.s8 %v479_v51  ;;  %6168 = vst [vmem:[#allocation11_spill] sm:$0xff] %v5218_v11  ;;  %v4091_v14 = vld [vmem:[%s6150_s1 + $0x474] ss:$8 sps:$4 sm:$0xff]   ;;  %v5239_v34 = vld [vmem:[#allocation2 + $0x108] sm:$0xff]  ;;  %v5245_v51 = vld [vmem:[#allocation2 + $0x20] sm:$0xff] }
  0x88   : > { %1338 = vmatmul.mubr.bf16.gmra.mxu0 %v914_v33  ;;  %v930_v45 = vsel %vm794_vm1, %v925_v41, %v929_v8  ;;  %1767 = vmatprep.subr.bf16.mxu0 %v4073_v48  ;;  %v4086_v48 = vld [vmem:[%s6150_s1 + $0x180] ss:$8 sps:$4 sm:$0xff]   ;;  %v5243_v8 = vld [vmem:[#allocation2 + $0xf0] sm:$0xff] }
  0x89   : > { %1839 = vmatpush2.bf16.msra.mxu1 %v4068_v9  ;;  %v4083_v9 = vld [vmem:[%s6150_s1 + $0x80] ss:$8 sps:$4 sm:$0xff]   ;;  %v483_v41 = vsub.s32 %v480_v37, %v5218_v11  ;;  %v4089_v37 = vld [vmem:[%s6150_s1 + $0x470] ss:$8 sps:$4 sm:$0xff]  }
  0x8a   : > { %1411 = vmatmul.mubr.bf16.gmra.mxu1 %v930_v45  ;;  %1840 = vmatprep.subr.bf16.mxu1 %v4076_v42  ;;  %v5241_v33 = vld [vmem:[#allocation2 + $0xc8] sm:$0xff] }
  0x8b   : > { %1768 = vmatpush2.bf16.msra.mxu0 %v4071_v7  ;;  %v4095_v11 = vld [vmem:[%s6150_s1 + $0x460] ss:$8 sps:$4 sm:$0xff]  }
  0x8c   : > { %1769 = vmatprep.subr.bf16.mxu0 %v4079_v63 }
  0x8d   : > { %1841 = vmatpush2.bf16.msra.mxu1 %v4074_v13  ;;  %v4094_v13 = vld [vmem:[%s6150_s1 + $0x574] ss:$8 sps:$4 sm:$0xff]  }
  0x8e   : > { %1842 = vmatprep.subr.bf16.mxu1 %v4082_v1 }
  0x8f   : > { %1770 = vmatpush2.bf16.msra.mxu0 %v4077_v44 }
  0x90   : > { %v500_v52 = vpop.permute.xlu1 %499  ;;  %v476_v15 = vpop.permute.xlu0 %475  ;;  %1771 = vmatprep.subr.bf16.mxu0 %v4085_v30  ;;  %v462_v30 = vpack.c.bf16 %v5241_v33, %v5239_v34 }
  0x91   : > { %v508_v7 = vrot.slane %v500_v52, %v483_v41  ;;  %1843 = vmatpush2.bf16.msra.mxu1 %v4080_v0  ;;  %v484_v58 = vrot.slane %v476_v15, %v483_v41  ;;  %v464_v0 = vpack.c.bf16 %v5245_v51, %v5243_v8 }
  0x92   : > { %1844 = vmatprep.subr.bf16.mxu1 %v4088_v23  ;;  %v5263_v23 = vld [vmem:[#allocation2 + $0x18] sm:$0xff] }
  0x93   : > { %1772 = vmatpush2.bf16.msra.mxu0 %v4083_v9  ;;  %v5261_v9 = vld [vmem:[#allocation2 + $0x80] sm:$0xff] }
  0x94   : > { %v512_v42 = vpop.permute.xlu1 %511  ;;  %v488_v19 = vpop.permute.xlu0 %487  ;;  %2308 = vmatprep.subr.bf16.mxu0 %v4091_v14 }
  0x95   : > { %v520_v63 = vrot.slane %v512_v42, %v483_v41  ;;  %v496_v45 = vrot.slane %v488_v19, %v483_v41  ;;  %1845 = vmatpush2.bf16.msra.mxu1 %v4086_v48 }
  0x96   : > { %2381 = vmatprep.subr.bf16.mxu1 %v4094_v13 }
  0x97   : > { %v5250_v44 = vcombine.low %v508_v7, %v520_v63  ;;  %v5252_v1 = vcombine.low %v484_v58, %v496_v45  ;;  %v4092_v58 = vld [vmem:[%s6150_s1 + $0x570] ss:$8 sps:$4 sm:$0xff]   ;;  %v4097_v45 = vld [vmem:[%s6150_s1 + $0x464] ss:$8 sps:$4 sm:$0xff]  }
  0x98   : > { %v536_v52 = vpop.permute.xlu1 %535  ;;  %v524_v15 = vpop.permute.xlu0 %523 }
  0x99   : > { %v544_v14 = vrot.slane %v536_v52, %v483_v41  ;;  %v532_v7 = vrot.slane %v524_v15, %v483_v41  ;;  %v594_v42 = vmul.bf16 %v5252_v1, %v4728_v62  ;;  %v596_v19 = vmul.bf16 %v5252_v1, %v4754_v20  ;;  %v4100_v62 = vld [vmem:[%s6150_s1 + $0x564] ss:$8 sps:$4 sm:$0xff]  }
  0x9a   : > { %v593_v63 = vmul.bf16 %v5252_v1, %v4758_v21  ;;  %v595_v48 = vmul.bf16 %v5252_v1, %v4765_v32  ;;  %v598_v20 = vmul.bf16 %v5250_v44, %v462_v30  ;;  %v600_v13 = vmul.bf16 %v5250_v44, %v464_v0 }
  0x9b   : > { %1773 = vmatprep.mubr.bf16.mxu0 %v594_v42  ;;  %1846 = vmatprep.mubr.bf16.mxu1 %v596_v19  ;;  %v461_v21 = vpack.c.bf16 %v5263_v23, %v5261_v9  ;;  %v5286_v52 = vcombine.low %v532_v7, %v544_v14  ;;  %v6169_v42 = vpack.c.bf16 %v4647_v29, %v4720_v60  ;;  %v4098_v14 = vld [vmem:[%s6150_s1 + $0x560] ss:$8 sps:$4 sm:$0xff]   ;;  %v4103_v7 = vld [vmem:[%s6150_s1 + $0x454] ss:$8 sps:$4 sm:$0xff]  }
  0x9c   : > { %v560_v32 = vpop.permute.xlu1 %559  ;;  %v548_v15 = vpop.permute.xlu0 %547  ;;  %1774 = vmatmul.mubr.bf16.vlgmr.msra.gmra.mxu0 %v593_v63  ;;  %1847 = vmatmul.mubr.bf16.vlgmr.msra.gmra.mxu1 %v595_v48  ;;  %v4106_v29 = vld [vmem:[%s6150_s1 + $0x554] ss:$8 sps:$4 sm:$0xff]   ;;  %v4101_v63 = vld [vmem:[%s6150_s1 + $0x450] ss:$8 sps:$4 sm:$0xff]   ;;  %v599_v48 = vmul.bf16 %v5250_v44, %v4724_v61 }
  0x9d   : > { %v5295_v30 = vmul.bf16 %v5252_v1, %v6169_v42  ;;  %v568_v0 = vrot.slane %v560_v32, %v483_v41  ;;  %v556_v19 = vrot.slane %v548_v15, %v483_v41  ;;  %2309 = vmatpush1.bf16.msra.mxu0 %v4089_v37  ;;  %2382 = vmatpush1.bf16.msra.mxu1 %v4092_v58  ;;  %v6181_v15 = vld [vmem:[#allocation10_spill] sm:$0xff] }
  0x9e   : > { %2310 = vmatprep.subr.bf16.mxu0 %v4097_v45  ;;  %2383 = vmatprep.subr.bf16.mxu1 %v4100_v62  ;;  %v597_v41 = vmul.bf16 %v5250_v44, %v461_v21  ;;  %v6170_v37 = vpack.c.bf16 %v4699_v50, %v4746_v16  ;;  %v6171_v45 = vpack.c.bf16 %v4884_v25, %v4666_v36  ;;  %v4104_v36 = vld [vmem:[%s6150_s1 + $0x550] ss:$8 sps:$4 sm:$0xff]  }
  0x9f   : > { %v5306_v60 = vcombine.low %v556_v19, %v568_v0  ;;  %1783 = vmatprep.mubr.bf16.mxu0 %v598_v20  ;;  %1856 = vmatprep.mubr.bf16.mxu1 %v600_v13  ;;  %v6172_v20 = vpack.c.bf16 %v4904_v40, %v4705_v54  ;;  %v6173_v16 = vpack.c.bf16 %v4961_v31, %v4862_v4  ;;  %v4109_v40 = vld [vmem:[%s6150_s1 + $0x444] ss:$8 sps:$4 sm:$0xff]  }
  0xa0   : > { %v5313_v58 = vmul.bf16 %v5252_v1, %v6170_v37  ;;  %v5324_v62 = vmul.bf16 %v5250_v44, %v6171_v45  ;;  %v6174_v54 = vpack.c.bf16 %v4998_v22, %v4879_v10  ;;  %v6175_v4 = vpack.c.bf16 %v5033_v49, %v4899_v26  ;;  %v4112_v31 = vld [vmem:[%s6150_s1 + $0x544] ss:$8 sps:$4 sm:$0xff]  }
  0xa1   : > { %v5330_v50 = vmul.bf16 %v5250_v44, %v6172_v20  ;;  %v5336_v13 = vmul.bf16 %v5286_v52, %v6173_v16  ;;  %2311 = vmatpush1.bf16.msra.mxu0 %v4095_v11  ;;  %2384 = vmatpush1.bf16.msra.mxu1 %v4098_v14  ;;  %v6176_v10 = vpack.c.bf16 %v5062_v27, %v4908_v12  ;;  %v4121_v0 = vld [vmem:[%s6150_s1 + $0x424] ss:$8 sps:$4 sm:$0xff]   ;;  %v6183_v16 = vld [vmem:[#allocation8_spill] sm:$0xff] }
  0xa2   : > { %2312 = vmatprep.subr.bf16.mxu0 %v4103_v7  ;;  %2385 = vmatprep.subr.bf16.mxu1 %v4106_v29  ;;  %v5345_v61 = vmul.bf16 %v5286_v52, %v6174_v54  ;;  %v5351_v25 = vmul.bf16 %v5286_v52, %v6175_v4  ;;  %v6177_v26 = vpack.c.bf16 %v5098_v3, %v4973_v43  ;;  %v4124_v19 = vld [vmem:[%s6150_s1 + $0x524] ss:$8 sps:$4 sm:$0xff]   ;;  %v4127_v29 = vld [vmem:[%s6150_s1 + $0x414] ss:$8 sps:$4 sm:$0xff]  }
  0xa3   : > { %v5363_v22 = vmul.bf16 %v5286_v52, %v6176_v10  ;;  %v6178_v11 = vpack.c.bf16 %v5110_v57, %v5002_v24  ;;  %v6179_v32 = vpack.c.bf16 %v5115_v59, %v5037_v38  ;;  %v602_v43 = vmul.bf16 %v5286_v52, %v4875_v18  ;;  %v4107_v24 = vld [vmem:[%s6150_s1 + $0x440] ss:$8 sps:$4 sm:$0xff]   ;;  %v4115_v18 = vld [vmem:[%s6150_s1 + $0x434] ss:$8 sps:$4 sm:$0xff]   ;;  %v4116_v59 = vld [vmem:[%s6150_s1 + $0x530] ss:$8 sps:$4 sm:$0xff]  }
  0xa4   : > { %v5369_v49 = vmul.bf16 %v5306_v60, %v6177_v26  ;;  %1784 = vmatmul.mubr.bf16.gmra.mxu0 %v597_v41  ;;  %1857 = vmatmul.mubr.bf16.gmra.mxu1 %v599_v48  ;;  %v604_v27 = vmul.bf16 %v5286_v52, %v4895_v39  ;;  %v6180_v3 = vpack.c.bf16 %v5136_v56, %v5066_v46  ;;  %v4110_v57 = vld [vmem:[%s6150_s1 + $0x540] ss:$8 sps:$4 sm:$0xff]   ;;  %v4118_v39 = vld [vmem:[%s6150_s1 + $0x534] ss:$8 sps:$4 sm:$0xff]   ;;  %v4113_v46 = vld [vmem:[%s6150_s1 + $0x430] ss:$8 sps:$4 sm:$0xff]  }
  0xa5   : > { %v5375_v21 = vmul.bf16 %v5306_v60, %v6178_v11  ;;  %v5381_v12 = vmul.bf16 %v5306_v60, %v6179_v32  ;;  %2313 = vmatpush1.bf16.msra.mxu0 %v4101_v63  ;;  %2386 = vmatpush1.bf16.msra.mxu1 %v4104_v36  ;;  %v601_v56 = vmul.bf16 %v5286_v52, %v4917_v17  ;;  %v4119_v17 = vld [vmem:[%s6150_s1 + $0x420] ss:$8 sps:$4 sm:$0xff]   ;;  %v4128_v41 = vld [vmem:[%s6150_s1 + $0x510] ss:$8 sps:$4 sm:$0xff]   ;;  %v4133_v48 = vld [vmem:[%s6150_s1 + $0x404] ss:$8 sps:$4 sm:$0xff]  }
  0xa6   : > { %v5394_v38 = vmul.bf16 %v5306_v60, %v6180_v3  ;;  %1793 = vmatprep.mubr.bf16.mxu0 %v602_v43  ;;  %1866 = vmatprep.mubr.bf16.mxu1 %v604_v27  ;;  %v603_v42 = vmul.bf16 %v5286_v52, %v6181_v15  ;;  %v606_v14 = vmul.bf16 %v5306_v60, %v4990_v6  ;;  %v4122_v52 = vld [vmem:[%s6150_s1 + $0x520] ss:$8 sps:$4 sm:$0xff]   ;;  %v4130_v6 = vld [vmem:[%s6150_s1 + $0x514] ss:$8 sps:$4 sm:$0xff]   ;;  %v4136_v45 = vld [vmem:[%s6150_s1 + $0x504] ss:$8 sps:$4 sm:$0xff]  }
  0xa7   : > { %2314 = vmatprep.subr.bf16.mxu0 %v4109_v40  ;;  %2387 = vmatprep.subr.bf16.mxu1 %v4112_v31  ;;  %v608_v7 = vmul.bf16 %v5306_v60, %v5014_v47  ;;  %v4125_v47 = vld [vmem:[%s6150_s1 + $0x410] ss:$8 sps:$4 sm:$0xff]   ;;  %v605_v37 = vmul.bf16 %v5306_v60, %v5050_v55  ;;  %v607_v63 = vmul.bf16 %v5306_v60, %v5081_v53  ;;  %v6182_v20 = vld [vmem:[#allocation6_spill] sm:$0xff]  ;;  %v6185_v4 = vld [vmem:[#allocation7_spill] sm:$0xff] }
  0xa8   : > { %v6184_v36 = vpack.c.bf16 %v6182_v20, %v6183_v16  ;;  %v6186_v55 = vld [vmem:[#allocation9_spill] sm:$0xff]  ;;  %v4131_v60 = vld [vmem:[%s6150_s1 + $0x400] ss:$8 sps:$4 sm:$0xff]   ;;  %v4145_v32 = vld [vmem:[%s6150_s1 + $0x4e4] ss:$8 sps:$4 sm:$0xff]  }
  0xa9   : > { %2315 = vmatpush1.bf16.msra.mxu0 %v4107_v24  ;;  %2388 = vmatpush1.bf16.msra.mxu1 %v4110_v57  ;;  %v6187_v40 = vpack.c.bf16 %v6185_v4, %v6186_v55  ;;  %v4134_v31 = vld [vmem:[%s6150_s1 + $0x500] ss:$8 sps:$4 sm:$0xff]   ;;  %v4139_v10 = vld [vmem:[%s6150_s1 + $0x4f4] ss:$8 sps:$4 sm:$0xff]   ;;  %v4137_v26 = vld [vmem:[%s6150_s1 + $0x4f0] ss:$8 sps:$4 sm:$0xff]   ;;  %v6188_v55 = vpack.c.bf16 %v4858_v2, %v4643_v28 }
  0xaa   : > { %2316 = vmatprep.subr.bf16.mxu0 %v4115_v18  ;;  %2389 = vmatprep.subr.bf16.mxu1 %v4118_v39  ;;  %v1908_v54 = vmul.bf16 %v5252_v1, %v6184_v36  ;;  %v4140_v11 = vld [vmem:[%s6150_s1 + $0x5f0] ss:$8 sps:$4 sm:$0xff]   ;;  %v4148_v43 = vld [vmem:[%s6150_s1 + $0x5e4] ss:$8 sps:$4 sm:$0xff]   ;;  %v4143_v27 = vld [vmem:[%s6150_s1 + $0x4e0] ss:$8 sps:$4 sm:$0xff]  }
  0xab   : > { %v1910_v53 = vmul.bf16 %v5252_v1, %v6187_v40  ;;  %v4142_v1 = vld [vmem:[%s6150_s1 + $0x5f4] ss:$8 sps:$4 sm:$0xff]   ;;  %v4146_v24 = vld [vmem:[%s6150_s1 + $0x5e0] ss:$8 sps:$4 sm:$0xff]   ;;  %v4149_v18 = vld [vmem:[%s6150_s1 + $0x4d0] ss:$8 sps:$4 sm:$0xff]   ;;  %v1912_v40 = vmul.bf16 %v5250_v44, %v6188_v55 }
  0xac   : > { %1794 = vmatmul.mubr.bf16.gmra.mxu0 %v601_v56  ;;  %1867 = vmatmul.mubr.bf16.gmra.mxu1 %v603_v42  ;;  %v4151_v3 = vld [vmem:[%s6150_s1 + $0x4d4] ss:$8 sps:$4 sm:$0xff]   ;;  %v4152_v39 = vld [vmem:[%s6150_s1 + $0x5d0] ss:$8 sps:$4 sm:$0xff]   ;;  %v4155_v56 = vld [vmem:[%s6150_s1 + $0x4c0] ss:$8 sps:$4 sm:$0xff]  }
  0xad   : > { %2317 = vmatpush1.bf16.msra.mxu0 %v4113_v46  ;;  %2390 = vmatpush1.bf16.msra.mxu1 %v4116_v59  ;;  %v4154_v57 = vld [vmem:[%s6150_s1 + $0x5d4] ss:$8 sps:$4 sm:$0xff]   ;;  %v4157_v46 = vld [vmem:[%s6150_s1 + $0x4c4] ss:$8 sps:$4 sm:$0xff]   ;;  %v4158_v15 = vld [vmem:[%s6150_s1 + $0x5c0] ss:$8 sps:$4 sm:$0xff]  }
  0xae   : > { %1803 = vmatprep.mubr.bf16.mxu0 %v606_v14  ;;  %1876 = vmatprep.mubr.bf16.mxu1 %v608_v7  ;;  %v4160_v59 = vld [vmem:[%s6150_s1 + $0x5c4] ss:$8 sps:$4 sm:$0xff]   ;;  %v4163_v42 = vld [vmem:[%s6150_s1 + $0x4b4] ss:$8 sps:$4 sm:$0xff]   ;;  %v4164_v14 = vld [vmem:[%s6150_s1 + $0x5b0] ss:$8 sps:$4 sm:$0xff]  }
  0xaf   : > { %2318 = vmatprep.subr.bf16.mxu0 %v4121_v0  ;;  %2391 = vmatprep.subr.bf16.mxu1 %v4124_v19  ;;  %v4166_v0 = vld [vmem:[%s6150_s1 + $0x5b4] ss:$8 sps:$4 sm:$0xff]   ;;  %v4161_v19 = vld [vmem:[%s6150_s1 + $0x4b0] ss:$8 sps:$4 sm:$0xff]   ;;  %v4169_v7 = vld [vmem:[%s6150_s1 + $0x4a4] ss:$8 sps:$4 sm:$0xff]  }
  0xb0   : > { %v4182_v20 = vld [vmem:[%s6150_s1 + $0x580] ss:$8 sps:$4 sm:$0xff]   ;;  %v4187_v16 = vld [vmem:[%s6150_s1 + $0x674] ss:$8 sps:$4 sm:$0xff]   ;;  %v4188_v4 = vld [vmem:[%s6150_s1 + $0x770] ss:$8 sps:$4 sm:$0xff]  }
  0xb1   : > { %2319 = vmatpush1.bf16.msra.mxu0 %v4119_v17  ;;  %2392 = vmatpush1.bf16.msra.mxu1 %v4122_v52  ;;  %v4172_v17 = vld [vmem:[%s6150_s1 + $0x5a4] ss:$8 sps:$4 sm:$0xff]   ;;  %v4167_v52 = vld [vmem:[%s6150_s1 + $0x4a0] ss:$8 sps:$4 sm:$0xff]   ;;  %v4190_v36 = vld [vmem:[%s6150_s1 + $0x774] ss:$8 sps:$4 sm:$0xff]  }
  0xb2   : > { %2320 = vmatprep.subr.bf16.mxu0 %v4127_v29  ;;  %2393 = vmatprep.subr.bf16.mxu1 %v4130_v6  ;;  %v4170_v29 = vld [vmem:[%s6150_s1 + $0x5a0] ss:$8 sps:$4 sm:$0xff]   ;;  %v4175_v6 = vld [vmem:[%s6150_s1 + $0x494] ss:$8 sps:$4 sm:$0xff]  }
  0xb3   : > { %v4191_v28 = vld [vmem:[%s6150_s1 + $0x660] ss:$8 sps:$4 sm:$0xff]   ;;  %v4199_v2 = vld [vmem:[%s6150_s1 + $0x654] ss:$8 sps:$4 sm:$0xff]  }
  0xb4   : > { %1804 = vmatmul.mubr.bf16.gmra.mxu0 %v605_v37  ;;  %1877 = vmatmul.mubr.bf16.gmra.mxu1 %v607_v63  ;;  %v4176_v37 = vld [vmem:[%s6150_s1 + $0x590] ss:$8 sps:$4 sm:$0xff]   ;;  %v4181_v63 = vld [vmem:[%s6150_s1 + $0x484] ss:$8 sps:$4 sm:$0xff]   ;;  %v4247_v55 = vld [vmem:[%s6150_s1 + $0x6d4] ss:$8 sps:$4 sm:$0xff]  }
  0xb5   : > { %2321 = vmatpush1.bf16.msra.mxu0 %v4125_v47  ;;  %2394 = vmatpush1.bf16.msra.mxu1 %v4128_v41  ;;  %v4178_v47 = vld [vmem:[%s6150_s1 + $0x594] ss:$8 sps:$4 sm:$0xff]   ;;  %v4173_v41 = vld [vmem:[%s6150_s1 + $0x490] ss:$8 sps:$4 sm:$0xff]  }
  0xb6   : > { %2340 = vmatprep.mubr.bf16.mxu0 %v1908_v54  ;;  %2413 = vmatprep.mubr.bf16.mxu1 %v1910_v53  ;;  %v4185_v54 = vld [vmem:[%s6150_s1 + $0x670] ss:$8 sps:$4 sm:$0xff]   ;;  %v6189_v53 = vpack.c.bf16 %v4866_v5, %v4662_v35  ;;  %v4194_v35 = vld [vmem:[%s6150_s1 + $0x760] ss:$8 sps:$4 sm:$0xff]   ;;  %v4202_v5 = vld [vmem:[%s6150_s1 + $0x754] ss:$8 sps:$4 sm:$0xff]  }
  0xb7   : > { %2322 = vmatprep.subr.bf16.mxu0 %v4133_v48  ;;  %2395 = vmatprep.subr.bf16.mxu1 %v4136_v45  ;;  %v4184_v48 = vld [vmem:[%s6150_s1 + $0x584] ss:$8 sps:$4 sm:$0xff]   ;;  %v4179_v45 = vld [vmem:[%s6150_s1 + $0x480] ss:$8 sps:$4 sm:$0xff]  }
  0xb9   : > { %2323 = vmatpush1.bf16.msra.mxu0 %v4131_v60  ;;  %2396 = vmatpush1.bf16.msra.mxu1 %v4134_v31  ;;  %v1914_v60 = vmul.bf16 %v5250_v44, %v6189_v53  ;;  %v4193_v31 = vld [vmem:[%s6150_s1 + $0x664] ss:$8 sps:$4 sm:$0xff]   ;;  %v2471_v44 = vld [vmem:[#allocation2 + $0x38] sm:$0xfe] }
  0xba   : > { %2324 = vmatprep.subr.bf16.mxu0 %v4139_v10  ;;  %2397 = vmatprep.subr.bf16.mxu1 %v4142_v1  ;;  %v4196_v10 = vld [vmem:[%s6150_s1 + $0x764] ss:$8 sps:$4 sm:$0xff]   ;;  %v4200_v1 = vld [vmem:[%s6150_s1 + $0x750] ss:$8 sps:$4 sm:$0xff]  }
  0xbb   : > { %v4245_v53 = vld [vmem:[%s6150_s1 + $0x6d0] ss:$8 sps:$4 sm:$0xff]  }
  0xbd   : > { %2325 = vmatpush2.bf16.msra.mxu0 %v4137_v26  ;;  %2398 = vmatpush2.bf16.msra.mxu1 %v4140_v11  ;;  %v2483_v26 = vld [vmem:[#allocation2 + $0x110] sm:$0xff]  ;;  %v2507_v11 = vpack.c.bf16 %v5239_v34, %v2471_v44 }
  0xbe   : > { %2326 = vmatprep.subr.bf16.mxu0 %v4145_v32  ;;  %2399 = vmatprep.subr.bf16.mxu1 %v4148_v43  ;;  %v4205_v43 = vld [vmem:[%s6150_s1 + $0x644] ss:$8 sps:$4 sm:$0xff]   ;;  %v5622_v34 = vpack.c.bf16 %v2483_v26, %v5241_v33  ;;  %v4211_v33 = vld [vmem:[%s6150_s1 + $0x634] ss:$8 sps:$4 sm:$0xff]   ;;  %v4260_v26 = vld [vmem:[%s6150_s1 + $0x7b0] ss:$8 sps:$4 sm:$0xff]  }
  0xbf   : > { %v4262_v44 = vld [vmem:[%s6150_s1 + $0x7b4] ss:$8 sps:$4 sm:$0xff]  }
  0xc1   : > { %2327 = vmatpush2.bf16.msra.mxu0 %v4143_v27  ;;  %2400 = vmatpush2.bf16.msra.mxu1 %v4146_v24  ;;  %v4208_v27 = vld [vmem:[%s6150_s1 + $0x744] ss:$8 sps:$4 sm:$0xff]   ;;  %v2485_v24 = vld [vmem:[#allocation2 + $0x98] sm:$0xff] }
  0xc2   : > { %2328 = vmatprep.subr.bf16.mxu0 %v4151_v3  ;;  %2401 = vmatprep.subr.bf16.mxu1 %v4154_v57  ;;  %v4206_v3 = vld [vmem:[%s6150_s1 + $0x740] ss:$8 sps:$4 sm:$0xff]   ;;  %v4209_v57 = vld [vmem:[%s6150_s1 + $0x630] ss:$8 sps:$4 sm:$0xff]  }
  0xc5   : > { %2329 = vmatpush2.bf16.msra.mxu0 %v4149_v18  ;;  %2402 = vmatpush2.bf16.msra.mxu1 %v4152_v39  ;;  %v2604_v18 = vshrl.u32 %v2507_v11, 16  ;;  %v2611_v39 = vshll.u32 %v5622_v34, 16 }
  0xc6   : > { %2330 = vmatprep.subr.bf16.mxu0 %v4157_v46  ;;  %2403 = vmatprep.subr.bf16.mxu1 %v4160_v59 }
  0xc9   : > { %2331 = vmatpush2.bf16.msra.mxu0 %v4155_v56  ;;  %2404 = vmatpush2.bf16.msra.mxu1 %v4158_v15 }
  0xca   : > { %2332 = vmatprep.subr.bf16.mxu0 %v4163_v42  ;;  %2405 = vmatprep.subr.bf16.mxu1 %v4166_v0  ;;  %v4217_v42 = vld [vmem:[%s6150_s1 + $0x624] ss:$8 sps:$4 sm:$0xff]  }
  0xcb   : > { %v4220_v0 = vld [vmem:[%s6150_s1 + $0x724] ss:$8 sps:$4 sm:$0xff]  }
  0xcd   : > { %2333 = vmatpush2.bf16.msra.mxu0 %v4161_v19  ;;  %2406 = vmatpush2.bf16.msra.mxu1 %v4164_v14  ;;  %v4215_v19 = vld [vmem:[%s6150_s1 + $0x620] ss:$8 sps:$4 sm:$0xff]  }
  0xce   : > { %2334 = vmatprep.subr.bf16.mxu0 %v4169_v7  ;;  %2407 = vmatprep.subr.bf16.mxu1 %v4172_v17  ;;  %v4218_v14 = vld [vmem:[%s6150_s1 + $0x720] ss:$8 sps:$4 sm:$0xff]   ;;  %v5663_v17 = vrot.slane %v2611_v39, 1 }
  0xcf   : > { %v4266_v39 = vld [vmem:[%s6150_s1 + $0x7a0] ss:$8 sps:$4 sm:$0xff]  }
  0xd1   : > { %2335 = vmatpush2.bf16.msra.mxu0 %v4167_v52  ;;  %2408 = vmatpush2.bf16.msra.mxu1 %v4170_v29  ;;  %v4224_v29 = vld [vmem:[%s6150_s1 + $0x710] ss:$8 sps:$4 sm:$0xff]  }
  0xd2   : > { %2336 = vmatprep.subr.bf16.mxu0 %v4175_v6  ;;  %2409 = vmatprep.subr.bf16.mxu1 %v4178_v47 }
  0xd5   : > { %2337 = vmatpush2.bf16.msra.mxu0 %v4173_v41  ;;  %2410 = vmatpush2.bf16.msra.mxu1 %v4176_v37  ;;  %v4229_v41 = vld [vmem:[%s6150_s1 + $0x604] ss:$8 sps:$4 sm:$0xff]  }
  0xd6   : > { %2338 = vmatprep.subr.bf16.mxu0 %v4181_v63  ;;  %2411 = vmatprep.subr.bf16.mxu1 %v4184_v48  ;;  %v4232_v37 = vld [vmem:[%s6150_s1 + $0x704] ss:$8 sps:$4 sm:$0xff]   ;;  %v4227_v63 = vld [vmem:[%s6150_s1 + $0x600] ss:$8 sps:$4 sm:$0xff]  }
  0xd7   : > { %v4230_v48 = vld [vmem:[%s6150_s1 + $0x700] ss:$8 sps:$4 sm:$0xff]  }
  0xd9   : > { %2339 = vmatpush2.bf16.msra.mxu0 %v4179_v45  ;;  %2412 = vmatpush2.bf16.msra.mxu1 %v4182_v20  ;;  %v4233_v45 = vld [vmem:[%s6150_s1 + $0x6f0] ss:$8 sps:$4 sm:$0xff]  }
  0xda   : > { %3071 = vmatprep.subr.bf16.mxu0 %v4187_v16  ;;  %3144 = vmatprep.subr.bf16.mxu1 %v4190_v36  ;;  %v4236_v20 = vld [vmem:[%s6150_s1 + $0x7f0] ss:$8 sps:$4 sm:$0xff]   ;;  %v4241_v16 = vld [vmem:[%s6150_s1 + $0x6e4] ss:$8 sps:$4 sm:$0xff]  }
  0xdb   : > { %v4244_v36 = vld [vmem:[%s6150_s1 + $0x7e4] ss:$8 sps:$4 sm:$0xff]  }
  0xdc   : > { %2341 = vmatmul.mubr.bf16.vlgmr.msra.gmra.mxu0 %v5295_v30  ;;  %2414 = vmatmul.mubr.bf16.vlgmr.msra.gmra.mxu1 %v5313_v58  ;;  %v2473_v30 = vld [vmem:[#allocation2 + $0x100] sm:$0xfe]  ;;  %v4197_v58 = vld [vmem:[%s6150_s1 + $0x650] ss:$8 sps:$4 sm:$0xff]  }
  0xdd   : > { %2350 = vmatprep.mubr.bf16.mxu0 %v1912_v40  ;;  %2423 = vmatprep.mubr.bf16.mxu1 %v1914_v60  ;;  %v2509_v32 = vpack.c.bf16 %v5243_v8, %v2473_v30  ;;  %v4203_v8 = vld [vmem:[%s6150_s1 + $0x640] ss:$8 sps:$4 sm:$0xff]   ;;  %v4250_v40 = vld [vmem:[%s6150_s1 + $0x7d4] ss:$8 sps:$4 sm:$0xff]   ;;  %v4248_v60 = vld [vmem:[%s6150_s1 + $0x7d0] ss:$8 sps:$4 sm:$0xff]  }
  0xde   : > { %3072 = vmatpush1.bf16.msra.mxu0 %v4185_v54  ;;  %3145 = vmatpush1.bf16.msra.mxu1 %v4188_v4  ;;  %v4239_v54 = vld [vmem:[%s6150_s1 + $0x6e0] ss:$8 sps:$4 sm:$0xff]   ;;  %v2472_v30 = vld [vmem:[#allocation2 + $0xf8] sm:$0xfe] }
  0xdf   : > { %3073 = vmatprep.subr.bf16.mxu0 %v4193_v31  ;;  %3146 = vmatprep.subr.bf16.mxu1 %v4196_v10  ;;  %v2628_v59 = vshrl.u32 %v2509_v32, 16  ;;  %v4242_v4 = vld [vmem:[%s6150_s1 + $0x7e0] ss:$8 sps:$4 sm:$0xff]   ;;  %v4253_v31 = vld [vmem:[%s6150_s1 + $0x6c4] ss:$8 sps:$4 sm:$0xff]  }
  0xe0   : > { %v4256_v10 = vld [vmem:[%s6150_s1 + $0x7c4] ss:$8 sps:$4 sm:$0xff]  }
  0xe2   : > { %3074 = vmatpush1.bf16.msra.mxu0 %v4191_v28  ;;  %3147 = vmatpush1.bf16.msra.mxu1 %v4194_v35  ;;  %v4251_v28 = vld [vmem:[%s6150_s1 + $0x6c0] ss:$8 sps:$4 sm:$0xff]  }
  0xe3   : > { %3075 = vmatprep.subr.bf16.mxu0 %v4199_v2  ;;  %3148 = vmatprep.subr.bf16.mxu1 %v4202_v5  ;;  %v4254_v35 = vld [vmem:[%s6150_s1 + $0x7c0] ss:$8 sps:$4 sm:$0xff]   ;;  %v4259_v2 = vld [vmem:[%s6150_s1 + $0x6b4] ss:$8 sps:$4 sm:$0xff]  }
  0xe4   : > { %2351 = vmatmul.mubr.bf16.gmra.mxu0 %v5324_v62  ;;  %2424 = vmatmul.mubr.bf16.gmra.mxu1 %v5330_v50  ;;  %v2606_v62 = vshll.u32 %v2507_v11, 16  ;;  %v5631_v50 = vpack.c.bf16 %v2485_v24, %v5245_v51  ;;  %v4212_v51 = vld [vmem:[%s6150_s1 + $0x730] ss:$8 sps:$4 sm:$0xff]   ;;  %v2470_v5 = vld [vmem:[#allocation2 + $0x120] sm:$0xfe] }
  0xe5   : > { %2360 = vmatprep.mubr.bf16.mxu0 %v5336_v13  ;;  %2433 = vmatprep.mubr.bf16.mxu1 %v5345_v61  ;;  %v2630_v13 = vshll.u32 %v2509_v32, 16  ;;  %v4214_v61 = vld [vmem:[%s6150_s1 + $0x734] ss:$8 sps:$4 sm:$0xff]   ;;  %v2506_v11 = vpack.c.bf16 %v5261_v9, %v2470_v5  ;;  %v4265_v32 = vld [vmem:[%s6150_s1 + $0x6a4] ss:$8 sps:$4 sm:$0xff]  }
  0xe6   : > { %3076 = vmatpush1.bf16.msra.mxu0 %v4197_v58  ;;  %3149 = vmatpush1.bf16.msra.mxu1 %v4200_v1  ;;  %v2608_v46 = vrot.slane %v2606_v62, 1  ;;  %v2635_v15 = vshll.u32 %v5631_v50, 16  ;;  %v2476_v58 = vld [vmem:[#allocation2 + $0x138] sm:$0xff]  ;;  %v2487_v62 = vld [vmem:[#allocation2 + $0x90] sm:$0xff]  ;;  %v2493_v9 = vld [vmem:[#allocation2 + $0xa0] sm:$0xff] }
  0xe7   : > { %3077 = vmatprep.subr.bf16.mxu0 %v4205_v43  ;;  %3150 = vmatprep.subr.bf16.mxu1 %v4208_v27  ;;  %v2632_v56 = vrot.slane %v2630_v13, 1  ;;  %v4257_v1 = vld [vmem:[%s6150_s1 + $0x6b0] ss:$8 sps:$4 sm:$0xff]   ;;  %v4268_v43 = vld [vmem:[%s6150_s1 + $0x7a4] ss:$8 sps:$4 sm:$0xff]   ;;  %v2508_v24 = vpack.c.bf16 %v2476_v58, %v2472_v30 }
  0xe8   : > { %v2609_v7 = vor.u32 %v2608_v46, %v2604_v18  ;;  %v5665_v52 = vrot.slane %v2635_v15, 1  ;;  %v2482_v27 = vld [vmem:[#allocation2 + $0x128] sm:$0xff]  ;;  %v2491_v13 = vld [vmem:[#allocation2 + $0x118] sm:$0xff] }
  0xe9   : > { %v4263_v18 = vld [vmem:[%s6150_s1 + $0x6a0] ss:$8 sps:$4 sm:$0xff]   ;;  %v2618_v46 = vshll.u32 %v2508_v24, 16 }
  0xea   : > { %3078 = vmatpush1.bf16.msra.mxu0 %v4203_v8  ;;  %3151 = vmatpush1.bf16.msra.mxu1 %v4206_v3  ;;  %v2614_v6 = vsel %vm794_vm1, %v2609_v7, %v5663_v17  ;;  %v2480_v8 = vld [vmem:[#allocation2 + $0x70] sm:$0xff]  ;;  %v2484_v3 = vld [vmem:[#allocation2 + $0x8] sm:$0xff]  ;;  %v2592_v7 = vshrl.u32 %v2506_v11, 16 }
  0xeb   : > { %3079 = vmatprep.subr.bf16.mxu0 %v4211_v33  ;;  %3152 = vmatprep.subr.bf16.mxu1 %v4214_v61  ;;  %v2489_v33 = vld [vmem:[#allocation2 + $0x88] sm:$0xff]  ;;  %v5765_v61 = vpack.c.bf16 %v2482_v27, %v5263_v23  ;;  %v4271_v23 = vld [vmem:[%s6150_s1 + $0x694] ss:$8 sps:$4 sm:$0xff]  }
  0xec   : > { %2361 = vmatmul.mubr.bf16.gmra.mxu0 %v5351_v25  ;;  %2434 = vmatmul.mubr.bf16.gmra.mxu1 %v5363_v22  ;;  %v2633_v25 = vor.u32 %v2632_v56, %v2628_v59  ;;  %v4223_v22 = vld [vmem:[%s6150_s1 + $0x614] ss:$8 sps:$4 sm:$0xff]   ;;  %v5781_v56 = vpack.c.bf16 %v2491_v13, %v2487_v62  ;;  %v5783_v15 = vpack.c.bf16 %v2493_v9, %v2489_v33  ;;  %v2494_v27 = vld [vmem:[#allocation2 + $0x68] sm:$0xff] }
  0xed   : > { %2370 = vmatprep.mubr.bf16.mxu0 %v5369_v49  ;;  %2443 = vmatprep.mubr.bf16.mxu1 %v5375_v21  ;;  %v4226_v49 = vld [vmem:[%s6150_s1 + $0x714] ss:$8 sps:$4 sm:$0xff]   ;;  %v4221_v21 = vld [vmem:[%s6150_s1 + $0x610] ss:$8 sps:$4 sm:$0xff]   ;;  %v2639_v30 = vshrl.u32 %v5765_v61, 16 }
  0xee   : > { %3080 = vmatpush1.bf16.msra.mxu0 %v4209_v57  ;;  %3153 = vmatpush1.bf16.msra.mxu1 %v4212_v51  ;;  %v2638_v47 = vsel %vm794_vm1, %v2633_v25, %v5665_v52  ;;  %v2594_v57 = vshll.u32 %v2506_v11, 16  ;;  %v5773_v51 = vpack.c.bf16 %v2484_v3, %v2480_v8  ;;  %v4274_v59 = vld [vmem:[%s6150_s1 + $0x794] ss:$8 sps:$4 sm:$0xff]   ;;  %v2695_v33 = vshrl.u32 %v5783_v15, 16 }
  0xef   : > { %3081 = vmatprep.subr.bf16.mxu0 %v4217_v42  ;;  %3154 = vmatprep.subr.bf16.mxu1 %v4220_v0  ;;  %v4269_v42 = vld [vmem:[%s6150_s1 + $0x690] ss:$8 sps:$4 sm:$0xff]  }
  0xf0   : > { %v4272_v0 = vld [vmem:[%s6150_s1 + $0x790] ss:$8 sps:$4 sm:$0xff]   ;;  %v2596_v25 = vrot.slane %v2594_v57, 1 }
  0xf1   : > { %v2500_v57 = vld [vmem:[#allocation2 + $0x30] sm:$0xff] }
  0xf2   : > { %3082 = vmatpush1.bf16.msra.mxu0 %v4215_v19  ;;  %3155 = vmatpush1.bf16.msra.mxu1 %v4218_v14  ;;  %v4277_v19 = vld [vmem:[%s6150_s1 + $0x684] ss:$8 sps:$4 sm:$0xff]  }
  0xf3   : > { %3083 = vmatprep.subr.bf16.mxu0 %v4223_v22  ;;  %3156 = vmatprep.subr.bf16.mxu1 %v4226_v49  ;;  %v4280_v14 = vld [vmem:[%s6150_s1 + $0x784] ss:$8 sps:$4 sm:$0xff]   ;;  %v2599_v22 = vshll.u32 %v5765_v61, 16  ;;  %v2496_v61 = vld [vmem:[#allocation2 + $0x50] sm:$0xff] }
  0xf4   : > { %2371 = vmatmul.mubr.bf16.gmra.mxu0 %v5381_v12  ;;  %2444 = vmatmul.mubr.bf16.gmra.mxu1 %v5394_v38  ;;  %v4235_v12 = vld [vmem:[%s6150_s1 + $0x6f4] ss:$8 sps:$4 sm:$0xff]   ;;  %v2486_v49 = vld [vmem:[#allocation2 + $0xa8] sm:$0xff] }
  0xf5   : > { %3103 = vmatprep.mubr.bf16.mxu0 %v2614_v6  ;;  %3176 = vmatprep.mubr.bf16.mxu1 %v2638_v47  ;;  %v4238_v38 = vld [vmem:[%s6150_s1 + $0x7f4] ss:$8 sps:$4 sm:$0xff]   ;;  %v2620_v6 = vrot.slane %v2618_v46, 1  ;;  %v2623_v47 = vshll.u32 %v5773_v51, 16  ;;  %v2503_v46 = vld [vmem:[#allocation2] sm:$0x1] }
  0xf6   : > { %3084 = vmatpush1.bf16.msra.mxu0 %v4221_v21  ;;  %3157 = vmatpush1.bf16.msra.mxu1 %v4224_v29  ;;  %v2490_v21 = vld [vmem:[#allocation2 + $0xc0] sm:$0xff]  ;;  %v2616_v29 = vshrl.u32 %v2508_v24, 16  ;;  %v2498_v24 = vld [vmem:[#allocation2 + $0x58] sm:$0xff] }
  0xf7   : > { %3085 = vmatprep.subr.bf16.mxu0 %v4229_v41  ;;  %3158 = vmatprep.subr.bf16.mxu1 %v4232_v37  ;;  %v2647_v41 = vshrl.u32 %v5622_v34, 16  ;;  %v2488_v37 = vld [vmem:[#allocation2 + $0xe0] sm:$0xff] }
  0xf8   : > { %v4275_v34 = vld [vmem:[%s6150_s1 + $0x680] ss:$8 sps:$4 sm:$0xff]  }
  0xfa   : > { %3086 = vmatpush1.bf16.msra.mxu0 %v4227_v63  ;;  %3159 = vmatpush1.bf16.msra.mxu1 %v4230_v48  ;;  %v2492_v63 = vld [vmem:[#allocation2 + $0xd8] sm:$0xff]  ;;  %v2651_v48 = vshll.u32 %v5781_v56, 16 }
  0xfb   : > { %3087 = vmatprep.subr.bf16.mxu0 %v4235_v12  ;;  %3160 = vmatprep.subr.bf16.mxu1 %v4238_v38  ;;  %v2663_v12 = vshrl.u32 %v5631_v50, 16  ;;  %v2667_v38 = vshll.u32 %v5783_v15, 16  ;;  %v4278_v50 = vld [vmem:[%s6150_s1 + $0x780] ss:$8 sps:$4 sm:$0xff]  }
  0xfd   : > { %v2669_v5 = vrot.slane %v2667_v38, 1 }
  0xfe   : > { %3088 = vmatpush2.bf16.msra.mxu0 %v4233_v45  ;;  %3161 = vmatpush2.bf16.msra.mxu1 %v4236_v20  ;;  %v2495_v45 = vld [vmem:[#allocation2 + $0x130] sm:$0xff]  ;;  %v2499_v20 = vld [vmem:[#allocation2 + $0x78] sm:$0xff] }
  0xff   : > { %3089 = vmatprep.subr.bf16.mxu0 %v4241_v16  ;;  %3162 = vmatprep.subr.bf16.mxu1 %v4244_v36  ;;  %v5803_v16 = vpack.c.bf16 %v2490_v21, %v2486_v49  ;;  %v2497_v36 = vld [vmem:[#allocation2 + $0xe8] sm:$0xff]  ;;  %v2697_v49 = vor.u32 %v2695_v33, %v2669_v5 }
 0x101   : > { %v2643_v58 = vshll.u32 %v5803_v16, 16 }
 0x102   : > { %3090 = vmatpush2.bf16.msra.mxu0 %v4239_v54  ;;  %3163 = vmatpush2.bf16.msra.mxu1 %v4242_v4  ;;  %v2501_v54 = vld [vmem:[#allocation2 + $0x40] sm:$0xff]  ;;  %v2597_v4 = vor.u32 %v2596_v25, %v2592_v7  ;;  %v2520_v7 = vpack.c.bf16 %v2500_v57, %v2496_v61 }
 0x103   : > { %3091 = vmatprep.subr.bf16.mxu0 %v4247_v55  ;;  %3164 = vmatprep.subr.bf16.mxu1 %v4250_v40  ;;  %v2601_v55 = vrot.slane %v2599_v22, 1  ;;  %v5805_v40 = vpack.c.bf16 %v2492_v63, %v2488_v37 }
 0x105   : > { %v2602_v11 = vsel %vm794_vm1, %v2597_v4, %v2601_v55  ;;  %v2687_v38 = vshrl.u32 %v5805_v40, 16  ;;  %v2502_v4 = vld [vmem:[#allocation2 + $0x28] sm:$0x1] }
 0x106   : > { %3092 = vmatpush2.bf16.msra.mxu0 %v4245_v53  ;;  %3165 = vmatpush2.bf16.msra.mxu1 %v4248_v60  ;;  %v2621_v53 = vor.u32 %v2620_v6, %v2616_v29  ;;  %v2625_v60 = vrot.slane %v2623_v47, 1  ;;  %v2523_v29 = vpack.c.bf16 %v2503_v46, %v2503_v46 }
 0x107   : > { %3093 = vmatprep.subr.bf16.mxu0 %v4253_v31  ;;  %3166 = vmatprep.subr.bf16.mxu1 %v4256_v10  ;;  %v2649_v31 = vor.u32 %v2647_v41, %v5663_v17  ;;  %v5814_v10 = vpack.c.bf16 %v2499_v20, %v2495_v45  ;;  %v2659_v17 = vshll.u32 %v5805_v40, 16 }
 0x10a   : > { %3094 = vmatpush2.bf16.msra.mxu0 %v4251_v28  ;;  %3167 = vmatpush2.bf16.msra.mxu1 %v4254_v35  ;;  %v2653_v35 = vrot.slane %v2651_v48, 1  ;;  %v2671_v48 = vshrl.u32 %v5803_v16, 16 }
 0x10b   : > { %3095 = vmatprep.subr.bf16.mxu0 %v4259_v2  ;;  %3168 = vmatprep.subr.bf16.mxu1 %v4262_v44  ;;  %v2665_v2 = vor.u32 %v2663_v12, %v5665_v52  ;;  %v5817_v44 = vpack.c.bf16 %v2501_v54, %v2497_v36  ;;  %v2679_v52 = vshrl.u32 %v5781_v56, 16  ;;  %v2691_v36 = vshll.u32 %v2520_v7, 16 }
 0x10c   : > { %v2654_v62 = vsel %vm794_vm1, %v2649_v31, %v2653_v35  ;;  %v2711_v54 = vshrl.u32 %v5814_v10, 16 }
 0x10d   : > { %v2670_v13 = vsel %vm794_vm1, %v2665_v2, %v2669_v5  ;;  %v2699_v9 = vshll.u32 %v5817_v44, 16  ;;  %v2681_v15 = vor.u32 %v2679_v52, %v2653_v35  ;;  %v2522_v35 = vpack.c.bf16 %v2502_v4, %v2502_v4 }
 0x10e   : > { %3096 = vmatpush2.bf16.msra.mxu0 %v4257_v1  ;;  %3169 = vmatpush2.bf16.msra.mxu1 %v4260_v26  ;;  %v2655_v26 = vshrl.u32 %v5773_v51, 16  ;;  %v2645_v51 = vrot.slane %v2643_v58, 1 }
 0x10f   : > { %3097 = vmatprep.subr.bf16.mxu0 %v4265_v32  ;;  %3170 = vmatprep.subr.bf16.mxu1 %v4268_v43  ;;  %v2626_v32 = vsel %vm794_vm1, %v2621_v53, %v2625_v60  ;;  %v2683_v43 = vshll.u32 %v5814_v10, 16  ;;  %v2701_v21 = vrot.slane %v2699_v9, 1 }
 0x110   : > { %v2657_v56 = vor.u32 %v2655_v26, %v2625_v60  ;;  %v2504_v60 = vld [vmem:[#allocation2 + $0xb8] sm:$0x1]  ;;  %v2673_v16 = vor.u32 %v2671_v48, %v2645_v51 }
 0x111   : > { %v2524_v2 = vpack.c.bf16 %v2504_v60, %v2504_v60 }
 0x112   : > { %3098 = vmatpush2.bf16.msra.mxu0 %v4263_v18  ;;  %3171 = vmatpush2.bf16.msra.mxu1 %v4266_v39  ;;  %v2641_v39 = vor.u32 %v2639_v30, %v2601_v55  ;;  %v2702_v55 = vsel %vm794_vm1, %v2697_v49, %v2701_v21 }
 0x113   : > { %3099 = vmatprep.subr.bf16.mxu0 %v4271_v23  ;;  %3172 = vmatprep.subr.bf16.mxu1 %v4274_v59  ;;  %v2505_v23 = vld [vmem:[#allocation2 + $0x60] sm:$0x1] }
 0x114   : > { %v2525_v6 = vpack.c.bf16 %v2505_v23, %v2505_v23  ;;  %v2646_v41 = vsel %vm794_vm1, %v2641_v39, %v2645_v51 }
 0x116   : > { %3100 = vmatpush2.bf16.msra.mxu0 %v4269_v42  ;;  %3173 = vmatpush2.bf16.msra.mxu1 %v4272_v0  ;;  %v1309_v28 = vpop.f32.mrf.mxu0  ;;  %v2661_v42 = vrot.slane %v2659_v17, 1  ;;  %v2518_v0 = vpack.c.bf16 %v2498_v24, %v2494_v27  ;;  %v2731_v53 = vshll.u32 %v2525_v6, 16  ;;  %v2707_v17 = vshll.u32 %v2522_v35, 16 }
 0x117   : > { %3101 = vmatprep.subr.bf16.mxu0 %v4277_v19  ;;  %3174 = vmatprep.subr.bf16.mxu1 %v4280_v14  ;;  %v1382_v8 = vpop.f32.mrf.mxu1  ;;  %v2685_v14 = vrot.slane %v2683_v43, 1 }
 0x118   : > { %v1311_v1 = vpop.f32.mrf.mxu0  ;;  %v5831_v18 = vadd.f32 %v1382_v8, %v1309_v28  ;;  %v2662_v63 = vsel %vm794_vm1, %v2657_v56, %v2661_v42  ;;  %v2675_v12 = vshll.u32 %v2518_v0, 16  ;;  %v2689_v40 = vor.u32 %v2687_v38, %v2661_v42 }
 0x119   : > { %v1384_v59 = vpop.f32.mrf.mxu1  ;;  %v2686_v20 = vsel %vm794_vm1, %v2681_v15, %v2685_v14  ;;  %v2693_v28 = vrot.slane %v2691_v36, 1  ;;  %v2713_v5 = vor.u32 %v2711_v54, %v2685_v14  ;;  %v2733_v58 = vrot.slane %v2731_v53, 1 }
 0x11a   : > { %3102 = vmatpush2.bf16.msra.mxu0 %v4275_v34  ;;  %3175 = vmatpush2.bf16.msra.mxu1 %v4278_v50  ;;  %v1313_v3 = vpop.f32.mrf.mxu0  ;;  %v5833_v19 = vadd.f32 %v1384_v59, %v1311_v1  ;;  %v2715_v34 = vshll.u32 %v2523_v29, 16  ;;  %v2727_v50 = vshrl.u32 %v5817_v44, 16  ;;  %v2677_v31 = vrot.slane %v2675_v12, 1 }
 0x11b   : > { %v1386_v25 = vpop.f32.mrf.mxu1  ;;  %v2703_v26 = vshrl.u32 %v2518_v0, 16  ;;  %v2694_v44 = vsel %vm794_vm1, %v2689_v40, %v2693_v28  ;;  %v2709_v24 = vrot.slane %v2707_v17, 1 }
 0x11c   : > { %v1315_v22 = vpop.f32.mrf.mxu0  ;;  %v5835_v47 = vadd.f32 %v1386_v25, %v1313_v3  ;;  %v2717_v10 = vrot.slane %v2715_v34, 1  ;;  %v2729_v30 = vor.u32 %v2727_v50, %v2701_v21  ;;  %v2678_v1 = vsel %vm794_vm1, %v2673_v16, %v2677_v31 }
 0x11d   : > { %3104 = vmatmul.mubr.bf16.vlgmr.msra.gmra.mxu0 %v2602_v11  ;;  %3177 = vmatmul.mubr.bf16.vlgmr.msra.gmra.mxu1 %v2626_v32  ;;  %v1388_v37 = vpop.f32.mrf.mxu1  ;;  %v2719_v11 = vshrl.u32 %v2520_v7, 16  ;;  %v2723_v32 = vshll.u32 %v2524_v2, 16  ;;  %v2705_v27 = vor.u32 %v2703_v26, %v2677_v31 }
 0x11e   : > { %3113 = vmatprep.mubr.bf16.mxu0 %v2654_v62  ;;  %3186 = vmatprep.mubr.bf16.mxu1 %v2670_v13  ;;  %v5841_v45 = vadd.f32 %v1388_v37, %v1315_v22  ;;  %v2718_v52 = vsel %vm794_vm1, %v2713_v5, %v2717_v10  ;;  %v2734_v43 = vsel %vm794_vm1, %v2729_v30, %v2733_v58 }
 0x11f   : > { %v2721_v8 = vor.u32 %v2719_v11, %v2693_v28  ;;  %v2725_v3 = vrot.slane %v2723_v32, 1  ;;  %v2710_v57 = vsel %vm794_vm1, %v2705_v27, %v2709_v24 }
 0x121   : > { %v2726_v39 = vsel %vm794_vm1, %v2721_v8, %v2725_v3 }
 0x125   : > { %3114 = vmatmul.mubr.bf16.gmra.mxu0 %v2646_v41  ;;  %3187 = vmatmul.mubr.bf16.gmra.mxu1 %v2662_v63 }
 0x126   : > { %3123 = vmatprep.mubr.bf16.mxu0 %v2686_v20  ;;  %3196 = vmatprep.mubr.bf16.mxu1 %v2702_v55 }
 0x12b   : > { %v1392_v13 = vpop.f32.mrf.mxu1 }
 0x12c   : > { %v1319_v62 = vpop.f32.mrf.mxu0 }
 0x12d   : > { %3124 = vmatmul.mubr.bf16.gmra.mxu0 %v2678_v1  ;;  %3197 = vmatmul.mubr.bf16.gmra.mxu1 %v2694_v44  ;;  %v5851_v33 = vadd.f32 %v1392_v13, %v1319_v62  ;;  %v1394_v61 = vpop.f32.mrf.mxu1 }
 0x12e   : > { %3133 = vmatprep.mubr.bf16.mxu0 %v2718_v52  ;;  %3206 = vmatprep.mubr.bf16.mxu1 %v2734_v43  ;;  %v1321_v9 = vpop.f32.mrf.mxu0 }
 0x12f   : > { %v5855_v51 = vadd.f32 %v1394_v61, %v1321_v9  ;;  %v1396_v23 = vpop.f32.mrf.mxu1 }
 0x130   : > { %v1323_v46 = vpop.f32.mrf.mxu0 }
 0x131   : > { %v5857_v59 = vadd.f32 %v1396_v23, %v1323_v46  ;;  %v1398_v42 = vpop.f32.mrf.mxu1 }
 0x132   : > { %v1325_v56 = vpop.f32.mrf.mxu0 }
 0x133   : > { %v5859_v0 = vadd.f32 %v1398_v42, %v1325_v56 }
 0x135   : > { %3134 = vmatmul.mubr.bf16.gmra.mxu0 %v2710_v57  ;;  %3207 = vmatmul.mubr.bf16.gmra.mxu1 %v2726_v39 }
 0x138   : > { %v1329_v15 = vpop.f32.mrf.mxu0 }
 0x13a   : > { %v1331_v14 = vpop.f32.mrf.mxu0  ;;  %v1402_v7 = vpop.f32.mrf.mxu1 }
 0x13b   : > { %v5861_v22 = vadd.f32 %v1402_v7, %v1329_v15 }
 0x13c   : > { %v1333_v25 = vpop.f32.mrf.mxu0  ;;  %v1404_v49 = vpop.f32.mrf.mxu1 }
 0x13d   : > { %v5863_v21 = vadd.f32 %v1404_v49, %v1331_v14 }
 0x13e   : > { %v1406_v29 = vpop.f32.mrf.mxu1  ;;  %v1335_v6 = vpop.f32.mrf.mxu0 }
 0x13f   : > { %v5865_v41 = vadd.f32 %v1406_v29, %v1333_v25 }
 0x140   : > { %v1408_v37 = vpop.f32.mrf.mxu1 }
 0x141   : > { %v5867_v63 = vadd.f32 %v1408_v37, %v1335_v6 }
 0x148   : > { %v1339_v48 = vpop.f32.mrf.mxu0 }
 0x14a   : > { %v1341_v12 = vpop.f32.mrf.mxu0  ;;  %v1412_v38 = vpop.f32.mrf.mxu1 }
 0x14b   : > { %v5869_v20 = vadd.f32 %v1412_v38, %v1339_v48 }
 0x14c   : > { %v1343_v36 = vpop.f32.mrf.mxu0  ;;  %v1414_v54 = vpop.f32.mrf.mxu1 }
 0x14d   : > { %6190 = vst [vmem:[#allocation10_spill] sm:$0xff] %v5869_v20  ;;  %v5871_v4 = vadd.f32 %v1414_v54, %v1341_v12 }
 0x14e   : > { %v1416_v55 = vpop.f32.mrf.mxu1  ;;  %v1345_v34 = vpop.f32.mrf.mxu0 }
 0x14f   : > { %6191 = vst [vmem:[#allocation6_spill] sm:$0xff] %v5871_v4  ;;  %v5873_v50 = vadd.f32 %v1416_v55, %v1343_v36 }
 0x150   : > { %v1418_v53 = vpop.f32.mrf.mxu1 }
 0x151   : > { %6192 = vst [vmem:[#allocation8_spill] sm:$0xff] %v5873_v50  ;;  %v5875_v60 = vadd.f32 %v1418_v53, %v1345_v34 }
 0x153   : > { %6193 = vst [vmem:[#allocation7_spill] sm:$0xff] %v5875_v60 }
 0x15c   : > { %v1775_v16 = vpop.f32.mrf.mxu0  ;;  %v5877_v31 = vpop.f32.mrf.mxu1 }
 0x15e   : > { %v1777_v40 = vpop.f32.mrf.mxu0  ;;  %v5879_v28 = vpop.f32.mrf.mxu1 }
 0x160   : > { %v1779_v35 = vpop.f32.mrf.mxu0  ;;  %v5881_v2 = vpop.f32.mrf.mxu1 }
 0x162   : > { %v1781_v5 = vpop.f32.mrf.mxu0  ;;  %v5883_v10 = vpop.f32.mrf.mxu1 }
 0x164   : > { %v5885_v30 = vpop.f32.mrf.mxu0  ;;  %v5887_v58 = vpop.f32.mrf.mxu1 }
 0x166   : > { %v5889_v1 = vpop.f32.mrf.mxu0  ;;  %v5891_v26 = vpop.f32.mrf.mxu1 }
 0x168   : > { %v5893_v44 = vpop.f32.mrf.mxu0  ;;  %v5895_v17 = vpop.f32.mrf.mxu1 }
 0x16a   : > { %v5897_v11 = vpop.f32.mrf.mxu0  ;;  %v5899_v32 = vpop.f32.mrf.mxu1 }
 0x16c   : > { %v5901_v52 = vpop.f32.mrf.mxu0  ;;  %v5903_v43 = vpop.f32.mrf.mxu1 }
 0x16e   : > { %v5905_v27 = vpop.f32.mrf.mxu0  ;;  %v5907_v24 = vpop.f32.mrf.mxu1 }
 0x170   : > { %v5909_v8 = vpop.f32.mrf.mxu0  ;;  %v5911_v3 = vpop.f32.mrf.mxu1 }
 0x172   : > { %v5913_v62 = vpop.f32.mrf.mxu0  ;;  %v5915_v13 = vpop.f32.mrf.mxu1 }
 0x173   : > { %6194 = vst [vmem:[#allocation9_spill] sm:$0xff] %v5915_v13 }
 0x174   : > { %v5917_v9 = vpop.f32.mrf.mxu0  ;;  %v5919_v61 = vpop.f32.mrf.mxu1 }
 0x175   : > { %6195 = vst [vmem:[#allocation12_spill] sm:$0xff] %v5917_v9  ;;  %6196 = vst [vmem:[#allocation13_spill] sm:$0xff] %v5919_v61 }
 0x176   : > { %v5921_v57 = vpop.f32.mrf.mxu0  ;;  %v5923_v39 = vpop.f32.mrf.mxu1 }
 0x177   : > { %6197 = vst [vmem:[#allocation14_spill] sm:$0xff] %v5921_v57  ;;  %6198 = vst [vmem:[#allocation15_spill] sm:$0xff] %v5923_v39 }
 0x178   : > { %v5925_v46 = vpop.f32.mrf.mxu0  ;;  %v5927_v23 = vpop.f32.mrf.mxu1 }
 0x179   : > { %6199 = vst [vmem:[#allocation16_spill] sm:$0xff] %v5925_v46  ;;  %6200 = vst [vmem:[#allocation17_spill] sm:$0xff] %v5927_v23 }
 0x17a   : > { %v5929_v56 = vpop.f32.mrf.mxu0  ;;  %v5931_v42 = vpop.f32.mrf.mxu1 }
 0x17b   : > { %6201 = vst [vmem:[#allocation18_spill] sm:$0xff] %v5929_v56  ;;  %6202 = vst [vmem:[#allocation19_spill] sm:$0xff] %v5931_v42 }
 0x19c   : > { %v2342_v15 = vpop.f32.mrf.mxu0  ;;  %v2415_v14 = vpop.f32.mrf.mxu1 }
 0x19e   : > { %v2344_v7 = vpop.f32.mrf.mxu0  ;;  %v2417_v25 = vpop.f32.mrf.mxu1 }
 0x1a0   : > { %v2346_v49 = vpop.f32.mrf.mxu0  ;;  %v2419_v29 = vpop.f32.mrf.mxu1 }
 0x1a2   : > { %v2348_v6 = vpop.f32.mrf.mxu0  ;;  %v2421_v37 = vpop.f32.mrf.mxu1 }
 0x1a4   : > { %v5933_v48 = vpop.f32.mrf.mxu0  ;;  %v5935_v12 = vpop.f32.mrf.mxu1 }
 0x1a6   : > { %v5937_v38 = vpop.f32.mrf.mxu0  ;;  %v5939_v36 = vpop.f32.mrf.mxu1 }
 0x1a8   : > { %v5941_v54 = vpop.f32.mrf.mxu0  ;;  %v5943_v55 = vpop.f32.mrf.mxu1 }
 0x1aa   : > { %v5945_v34 = vpop.f32.mrf.mxu0  ;;  %v5947_v53 = vpop.f32.mrf.mxu1 }
 0x1ac   : > { %v5949_v42 = vpop.f32.mrf.mxu0  ;;  %v5951_v23 = vpop.f32.mrf.mxu1 }
 0x1ad   : > { %6203 = vst [vmem:[#allocation20_spill] sm:$0xff] %v5951_v23  ;;  %v2416_v23 = vadd.f32 %v2415_v14, %v2342_v15 }
 0x1ae   : > { %v5953_v56 = vpop.f32.mrf.mxu0  ;;  %v5955_v60 = vpop.f32.mrf.mxu1 }
 0x1af   : > { %6204 = vst [vmem:[#allocation21_spill] sm:$0xff] %v5953_v56  ;;  %6205 = vst [vmem:[#allocation22_spill] sm:$0xff] %v5955_v60  ;;  %v6215_v60 = vld [vmem:[#allocation11_spill] sm:$0xff] }
 0x1b0   : > { %v5957_v46 = vpop.f32.mrf.mxu0  ;;  %v5959_v50 = vpop.f32.mrf.mxu1 }
 0x1b1   : > { %6206 = vst [vmem:[#allocation23_spill] sm:$0xff] %v5957_v46  ;;  %6207 = vst [vmem:[#allocation24_spill] sm:$0xff] %v5959_v50  ;;  %v1776_v46 = vadd.f32 %v1775_v16, %v5831_v18  ;;  %v1778_v50 = vadd.f32 %v1777_v40, %v5833_v19  ;;  %v2418_v16 = vadd.f32 %v2417_v25, %v2344_v7 }
 0x1b2   : > { %v5961_v39 = vpop.f32.mrf.mxu0  ;;  %v5963_v57 = vpop.f32.mrf.mxu1  ;;  %v1788_v40 = vadd.f32 %v5889_v1, %v5855_v51  ;;  %v1796_v51 = vadd.f32 %v5901_v52, %v5861_v22  ;;  %v1798_v22 = vadd.f32 %v5905_v27, %v5863_v21 }
 0x1b3   : > { %6208 = vst [vmem:[#allocation25_spill] sm:$0xff] %v5961_v39  ;;  %6209 = vst [vmem:[#allocation26_spill] sm:$0xff] %v5963_v57  ;;  %v3237_v39 = vsub.s32 0, %v6215_v60  ;;  %v1780_v57 = vadd.f32 %v1779_v35, %v5835_v47  ;;  %v1849_v18 = vadd.f32 %v5877_v31, %v1776_v46  ;;  %v1851_v19 = vadd.f32 %v5879_v28, %v1778_v50 }
 0x1b4   : > { %v5965_v4 = vpop.f32.mrf.mxu0  ;;  %v5967_v61 = vpop.f32.mrf.mxu1  ;;  %v1786_v47 = vadd.f32 %v5885_v30, %v5851_v33  ;;  %v1792_v35 = vadd.f32 %v5897_v11, %v5859_v0  ;;  %v2420_v28 = vadd.f32 %v2419_v29, %v2346_v49  ;;  %v2422_v30 = vadd.f32 %v2421_v37, %v2348_v6 }
 0x1b5   : > { %6210 = vst [vmem:[#allocation27_spill] sm:$0xff] %v5967_v61  ;;  %v3233_v61 = vld [vmem:[%s6151_s2] sm:$0x3]  ;;  %v1853_v50 = vadd.f32 %v5881_v2, %v1780_v57  ;;  %v2454_v31 = vadd.f32 %v2416_v23, %v1849_v18  ;;  %v2455_v11 = vadd.f32 %v2418_v16, %v1851_v19  ;;  %v1861_v57 = vadd.f32 %v5891_v26, %v1788_v40 }
 0x1b6   : > { %v5969_v9 = vpop.f32.mrf.mxu0  ;;  %v5971_v20 = vpop.f32.mrf.mxu1  ;;  %v6000_v15 = vrot.slane %v3233_v61, %v3237_v39  ;;  %v1869_v7 = vadd.f32 %v5903_v43, %v1796_v51  ;;  %v2426_v26 = vadd.f32 %v5935_v12, %v5933_v48  ;;  %v6025_v37 = vadd.f32 %v5907_v24, %v1798_v22 }
 0x1b7   : > { %6211 = vst [vmem:[#allocation28_spill] sm:$0xff] %v5969_v9  ;;  %6212 = vst [vmem:[#allocation29_spill] sm:$0xff] %v5971_v20  ;;  %v1782_v9 = vadd.f32 %v1781_v5, %v5841_v45  ;;  %v1790_v45 = vadd.f32 %v5893_v44, %v5857_v59  ;;  %v1859_v44 = vadd.f32 %v5887_v58, %v1786_v47 }
 0x1b8   : > { %v5973_v13 = vpop.f32.mrf.mxu0  ;;  %v5975_v56 = vpop.f32.mrf.mxu1  ;;  %v2456_v14 = vadd.f32 %v2420_v28, %v1853_v50  ;;  %v1800_v43 = vadd.f32 %v5909_v8, %v5865_v41  ;;  %v1802_v18 = vadd.f32 %v5913_v62, %v5867_v63  ;;  %v2430_v48 = vadd.f32 %v5943_v55, %v5941_v54  ;;  %v6216_v50 = vld [vmem:[#allocation20_spill] sm:$0xff] }
 0x1b9   : > { %6213 = vst [vmem:[#allocation30_spill] sm:$0xff] %v5973_v13  ;;  %6214 = vst [vmem:[#allocation31_spill] sm:$0xff] %v5975_v56  ;;  %v3241_v56 = vsub.s32 1, %v6215_v60  ;;  %v1855_v33 = vadd.f32 %v5883_v10, %v1782_v9  ;;  %v1863_v23 = vadd.f32 %v5895_v17, %v1790_v45  ;;  %v1865_v10 = vadd.f32 %v5899_v32, %v1792_v35 }
 0x1ba   : > { %v5985_v20 = vpop.f32.mrf.mxu0  ;;  %v5987_v13 = vpop.f32.mrf.mxu1  ;;  %v2428_v17 = vadd.f32 %v5939_v36, %v5937_v38  ;;  %v2458_v40 = vadd.f32 %v2426_v26, %v1859_v44  ;;  %v2432_v24 = vadd.f32 %v5947_v53, %v5945_v34  ;;  %v2436_v34 = vadd.f32 %v6216_v50, %v5949_v42  ;;  %v6218_v44 = vld [vmem:[#allocation10_spill] sm:$0xff]  ;;  %v6223_v26 = vld [vmem:[#allocation24_spill] sm:$0xff] }
 0x1bb   : > { %v6007_v0 = vrot.slane %v3233_v61, %v3241_v56  ;;  %v2457_v25 = vadd.f32 %v2422_v30, %v1855_v33 }
 0x1bc   : > { %v2459_v45 = vadd.f32 %v2428_v17, %v1861_v57 }
 0x1dd   : > { %v3105_v5 = vpop.f32.mrf.mxu0  ;;  %v3178_v60 = vpop.f32.mrf.mxu1 }
 0x1de   : > { %v3179_v46 = vadd.f32 %v3178_v60, %v3105_v5  ;;  %v1873_v5 = vadd.f32 %v5911_v3, %v1800_v43  ;;  %v2460_v60 = vadd.f32 %v2430_v48, %v1863_v23  ;;  %v2461_v3 = vadd.f32 %v2432_v24, %v1865_v10  ;;  %v6224_v43 = vld [vmem:[#allocation13_spill] sm:$0xff]  ;;  %v6225_v48 = vld [vmem:[#allocation6_spill] sm:$0xff] }
 0x1df   : > { %v3107_v59 = vpop.f32.mrf.mxu0  ;;  %v3180_v1 = vpop.f32.mrf.mxu1 }
 0x1e0   : > { %v3217_v39 = vadd.f32 %v3179_v46, %v2454_v31  ;;  %v3181_v2 = vadd.f32 %v3180_v1, %v3107_v59  ;;  %v6217_v59 = vld [vmem:[#allocation9_spill] sm:$0xff] }
 0x1e1   : > { %v3109_v52 = vpop.f32.mrf.mxu0  ;;  %v3182_v9 = vpop.f32.mrf.mxu1  ;;  %v1875_v1 = vadd.f32 %v6217_v59, %v1802_v18 }
 0x1e2   : > { %v3245_v61 = vadd.f32 %v6000_v15, %v3217_v39  ;;  %v3218_v58 = vadd.f32 %v3181_v2, %v2455_v11  ;;  %v3183_v56 = vadd.f32 %v3182_v9, %v3109_v52  ;;  %v6219_v11 = vld [vmem:[#allocation12_spill] sm:$0xff] }
 0x1e3   : > { %v3111_v32 = vpop.f32.mrf.mxu0  ;;  %v3184_v21 = vpop.f32.mrf.mxu1  ;;  %v1806_v39 = vadd.f32 %v6219_v11, %v6218_v44 }
 0x1e4   : > { %v3261_v27 = vmul.f32 0.1, %v3245_v61  ;;  %v3246_v49 = vadd.f32 %v6007_v0, %v3218_v58  ;;  %v3219_v29 = vadd.f32 %v3183_v56, %v2456_v14  ;;  %v3185_v6 = vadd.f32 %v3184_v21, %v3111_v32  ;;  %v6221_v58 = vld [vmem:[#allocation22_spill] sm:$0xff] }
 0x1e5   : > { %v3115_v12 = vpop.f32.mrf.mxu0  ;;  %v3188_v38 = vpop.f32.mrf.mxu1  ;;  %v2462_v14 = vadd.f32 %v2436_v34, %v1869_v7  ;;  %v1879_v18 = vadd.f32 %v6224_v43, %v1806_v39  ;;  %v6226_v7 = vld [vmem:[#allocation14_spill] sm:$0xff] }
 0x1e6   : > { %v3277_v36 = vmax.f32 %v3245_v61, %v3261_v27  ;;  %v3262_v19 = vmul.f32 0.1, %v3246_v49  ;;  %v3247_v47 = vadd.f32 %v6000_v15, %v3219_v29  ;;  %v3220_v16 = vadd.f32 %v3185_v6, %v2457_v25  ;;  %v6220_v61 = vld [vmem:[#allocation21_spill] sm:$0xff]  ;;  %v6222_v25 = vld [vmem:[#allocation23_spill] sm:$0xff] }
 0x1e7   : > { %v3189_v35 = vadd.f32 %v3188_v38, %v3115_v12  ;;  %v3117_v41 = vpop.f32.mrf.mxu0  ;;  %v3190_v8 = vpop.f32.mrf.mxu1  ;;  %v2438_v56 = vadd.f32 %v6221_v58, %v6220_v61  ;;  %v2440_v17 = vadd.f32 %v6223_v26, %v6222_v25  ;;  %v1808_v12 = vadd.f32 %v6226_v7, %v6225_v48  ;;  %v6227_v38 = vld [vmem:[#allocation25_spill] sm:$0xff] }
 0x1e8   : > { %3293 = vst [vmem:[%s6036_s23] sm:$0xff] %v3277_v36  ;;  %v3278_v63 = vmax.f32 %v3246_v49, %v3262_v19  ;;  %v3263_v62 = vmul.f32 0.1, %v3247_v47  ;;  %v3248_v54 = vadd.f32 %v6007_v0, %v3220_v16  ;;  %v3191_v55 = vadd.f32 %v3190_v8, %v3117_v41  ;;  %v6228_v36 = vld [vmem:[#allocation26_spill] sm:$0xff] }
 0x1e9   : > { %v3221_v53 = vadd.f32 %v3189_v35, %v2458_v40  ;;  %v3119_v31 = vpop.f32.mrf.mxu0  ;;  %v3192_v28 = vpop.f32.mrf.mxu1  ;;  %v2442_v19 = vadd.f32 %v6228_v36, %v6227_v38  ;;  %v2463_v8 = vadd.f32 %v2438_v56, %v6025_v37  ;;  %v6232_v37 = vld [vmem:[#allocation29_spill] sm:$0xff] }
 0x1ea   : > { %3294 = vst [vmem:[%s6036_s23 + $0x8] sm:$0xff] %v3278_v63  ;;  %v3279_v46 = vmax.f32 %v3247_v47, %v3263_v62  ;;  %v3264_v33 = vmul.f32 0.1, %v3248_v54  ;;  %v3222_v51 = vadd.f32 %v3191_v55, %v2459_v45  ;;  %v3193_v30 = vadd.f32 %v3192_v28, %v3119_v31  ;;  %v6229_v62 = vld [vmem:[#allocation27_spill] sm:$0xff]  ;;  %v6239_v38 = vld [vmem:[#allocation17_spill] sm:$0xff] }
 0x1eb   : > { %v3249_v2 = vadd.f32 %v6000_v15, %v3221_v53  ;;  %v3121_v57 = vpop.f32.mrf.mxu0  ;;  %v3194_v23 = vpop.f32.mrf.mxu1  ;;  %v2464_v63 = vadd.f32 %v2440_v17, %v1873_v5 }
 0x1ec   : > { %3295 = vst [vmem:[%s6036_s23 + $0x10] sm:$0xff] %v3279_v46  ;;  %v3280_v42 = vmax.f32 %v3248_v54, %v3264_v33  ;;  %v3250_v22 = vadd.f32 %v6007_v0, %v3222_v51  ;;  %v3223_v52 = vadd.f32 %v3193_v30, %v2460_v60  ;;  %v3195_v9 = vadd.f32 %v3194_v23, %v3121_v57  ;;  %v6230_v46 = vld [vmem:[#allocation15_spill] sm:$0xff]  ;;  %v6231_v30 = vld [vmem:[#allocation28_spill] sm:$0xff] }
 0x1ed   : > { %v3265_v32 = vmul.f32 0.1, %v3249_v2  ;;  %v3125_v21 = vpop.f32.mrf.mxu0  ;;  %v3198_v10 = vpop.f32.mrf.mxu1  ;;  %v2446_v54 = vadd.f32 %v6229_v62, %v5965_v4  ;;  %v1881_v33 = vadd.f32 %v6230_v46, %v1808_v12  ;;  %v2465_v51 = vadd.f32 %v2442_v19, %v1875_v1  ;;  %v6233_v57 = vld [vmem:[#allocation8_spill] sm:$0xff]  ;;  %v6240_v19 = vld [vmem:[#allocation19_spill] sm:$0xff] }
 0x1ee   : > { %3296 = vst [vmem:[%s6036_s23 + $0x18] sm:$0xff] %v3280_v42  ;;  %v3266_v27 = vmul.f32 0.1, %v3250_v22  ;;  %v3251_v49 = vadd.f32 %v6000_v15, %v3223_v52  ;;  %v3224_v29 = vadd.f32 %v3195_v9, %v2461_v3  ;;  %v3199_v6 = vadd.f32 %v3198_v10, %v3125_v21  ;;  %v6234_v23 = vld [vmem:[#allocation16_spill] sm:$0xff]  ;;  %v6236_v52 = vld [vmem:[#allocation18_spill] sm:$0xff]  ;;  %v6238_v10 = vld [vmem:[#allocation31_spill] sm:$0xff] }
 0x1ef   : > { %v3281_v47 = vmax.f32 %v3249_v2, %v3265_v32  ;;  %v3127_v16 = vpop.f32.mrf.mxu0  ;;  %v3200_v40 = vpop.f32.mrf.mxu1  ;;  %v2448_v5 = vadd.f32 %v6232_v37, %v6231_v30  ;;  %v1810_v42 = vadd.f32 %v6234_v23, %v6233_v57  ;;  %v2466_v1 = vadd.f32 %v2446_v54, %v1879_v18  ;;  %v6237_v21 = vld [vmem:[#allocation30_spill] sm:$0xff] }
 0x1f0   : > { %v3282_v45 = vmax.f32 %v3250_v22, %v3266_v27  ;;  %v3267_v24 = vmul.f32 0.1, %v3251_v49  ;;  %v3252_v35 = vadd.f32 %v6007_v0, %v3224_v29  ;;  %v3225_v41 = vadd.f32 %v3199_v6, %v2462_v14  ;;  %v6235_v22 = vld [vmem:[#allocation7_spill] sm:$0xff] }
 0x1f1   : > { %3297 = vst [vmem:[%s6036_s23 + $0x20] sm:$0xff] %v3281_v47  ;;  %v3201_v55 = vadd.f32 %v3200_v40, %v3127_v16  ;;  %v3129_v60 = vpop.f32.mrf.mxu0  ;;  %v3202_v50 = vpop.f32.mrf.mxu1  ;;  %v1812_v9 = vadd.f32 %v6236_v52, %v6235_v22  ;;  %v2467_v32 = vadd.f32 %v2448_v5, %v1881_v33  ;;  %v2450_v27 = vadd.f32 %v6238_v10, %v6237_v21 }
 0x1f2   : > { %3298 = vst [vmem:[%s6036_s23 + $0x28] sm:$0xff] %v3282_v45  ;;  %v3283_v34 = vmax.f32 %v3251_v49, %v3267_v24  ;;  %v3268_v53 = vmul.f32 0.1, %v3252_v35  ;;  %v3253_v31 = vadd.f32 %v6000_v15, %v3225_v41  ;;  %v3203_v28 = vadd.f32 %v3202_v50, %v3129_v60 }
 0x1f3   : > { %v3226_v59 = vadd.f32 %v3201_v55, %v2463_v8  ;;  %v3131_v4 = vpop.f32.mrf.mxu0  ;;  %v3204_v44 = vpop.f32.mrf.mxu1  ;;  %v2452_v49 = vadd.f32 %v5987_v13, %v5985_v20  ;;  %v1883_v36 = vadd.f32 %v6239_v38, %v1810_v42  ;;  %v1885_v47 = vadd.f32 %v6240_v19, %v1812_v9 }
 0x1f4   : > { %3299 = vst [vmem:[%s6036_s23 + $0x30] sm:$0xff] %v3283_v34  ;;  %v3284_v11 = vmax.f32 %v3252_v35, %v3268_v53  ;;  %v3269_v39 = vmul.f32 0.1, %v3253_v31  ;;  %v3227_v3 = vadd.f32 %v3203_v28, %v2464_v63  ;;  %v3205_v2 = vadd.f32 %v3204_v44, %v3131_v4 }
 0x1f5   : > { %v3254_v14 = vadd.f32 %v6007_v0, %v3226_v59  ;;  %v3135_v61 = vpop.f32.mrf.mxu0  ;;  %v3208_v58 = vpop.f32.mrf.mxu1  ;;  %v2468_v41 = vadd.f32 %v2450_v27, %v1883_v36  ;;  %v2469_v8 = vadd.f32 %v2452_v49, %v1885_v47 }
 0x1f6   : > { %3300 = vst [vmem:[%s6036_s23 + $0x38] sm:$0xff] %v3284_v11  ;;  %v3285_v56 = vmax.f32 %v3253_v31, %v3269_v39  ;;  %v3255_v25 = vadd.f32 %v6000_v15, %v3227_v3  ;;  %v3228_v26 = vadd.f32 %v3205_v2, %v2465_v51  ;;  %v3209_v17 = vadd.f32 %v3208_v58, %v3135_v61 }
 0x1f7   : > { %v3270_v29 = vmul.f32 0.1, %v3254_v14  ;;  %v3137_v6 = vpop.f32.mrf.mxu0  ;;  %v3210_v43 = vpop.f32.mrf.mxu1 }
 0x1f8   : > { %3301 = vst [vmem:[%s6036_s23 + $0x40] sm:$0xff] %v3285_v56  ;;  %v3271_v18 = vmul.f32 0.1, %v3255_v25  ;;  %v3256_v48 = vadd.f32 %v6007_v0, %v3228_v26  ;;  %v3229_v7 = vadd.f32 %v3209_v17, %v2466_v1  ;;  %v3211_v12 = vadd.f32 %v3210_v43, %v3137_v6 }
 0x1f9   : > { %v3286_v16 = vmax.f32 %v3254_v14, %v3270_v29  ;;  %v3139_v40 = vpop.f32.mrf.mxu0  ;;  %v3212_v45 = vpop.f32.mrf.mxu1 }
 0x1fa   : > { %v3287_v24 = vmax.f32 %v3255_v25, %v3271_v18  ;;  %v3272_v20 = vmul.f32 0.1, %v3256_v48  ;;  %v3257_v13 = vadd.f32 %v6000_v15, %v3229_v7  ;;  %v3230_v35 = vadd.f32 %v3211_v12, %v2467_v32 }
 0x1fb   : > { %3302 = vst [vmem:[%s6036_s23 + $0x48] sm:$0xff] %v3286_v16  ;;  %v3213_v63 = vadd.f32 %v3212_v45, %v3139_v40  ;;  %v3141_v62 = vpop.f32.mrf.mxu0  ;;  %v3214_v54 = vpop.f32.mrf.mxu1 }
 0x1fc   : > { %3303 = vst [vmem:[%s6036_s23 + $0x50] sm:$0xff] %v3287_v24  ;;  %v3288_v55 = vmax.f32 %v3256_v48, %v3272_v20  ;;  %v3273_v60 = vmul.f32 0.1, %v3257_v13  ;;  %v3258_v50 = vadd.f32 %v6007_v0, %v3230_v35  ;;  %v3215_v34 = vadd.f32 %v3214_v54, %v3141_v62 }
 0x1fd   : > { %v3231_v53 = vadd.f32 %v3213_v63, %v2468_v41 }
 0x1fe   : > { %3304 = vst [vmem:[%s6036_s23 + $0x58] sm:$0xff] %v3288_v55  ;;  %v3289_v31 = vmax.f32 %v3257_v13, %v3273_v60  ;;  %v3274_v28 = vmul.f32 0.1, %v3258_v50  ;;  %v3232_v46 = vadd.f32 %v3215_v34, %v2469_v8 }
 0x1ff   : > { %v3259_v33 = vadd.f32 %v6000_v15, %v3231_v53 }
 0x200   : > { %3305 = vst [vmem:[%s6036_s23 + $0x60] sm:$0xff] %v3289_v31  ;;  %v3290_v51 = vmax.f32 %v3258_v50, %v3274_v28  ;;  %v3260_v30 = vadd.f32 %v6007_v0, %v3232_v46 }
 0x201   : > { %v3275_v37 = vmul.f32 0.1, %v3259_v33 }
 0x202   : > { %3306 = vst [vmem:[%s6036_s23 + $0x68] sm:$0xff] %v3290_v51  ;;  %v3276_v5 = vmul.f32 0.1, %v3260_v30 }
 0x203   : > { %v3291_v59 = vmax.f32 %v3259_v33, %v3275_v37 }
 0x204   : > { %v3292_v15 = vmax.f32 %v3260_v30, %v3276_v5 }
 0x205   : > { %3307 = vst [vmem:[%s6036_s23 + $0x70] sm:$0xff] %v3291_v59 }
 0x206   : > { %3308 = vst [vmem:[%s6036_s23 + $0x78] sm:$0xff] %v3292_v15 }
 0x207   : > { %4294 = shalt.err (!%p4291_p3)
}
 0x208   : > { %s4295_s10 = scalar_lea.hbm %s6101_s30, 2048  ;;  %s4299_s13 = scalar_lea.hbm %s6153_s4, 4096 }
 0x209   : > { %p4296_p4 = scmp.ne.s32.totalorder %s6101_s30, %s4295_s10  ;;  %p4300_p9 = scmp.lt.s32.totalorder %s6101_s30, %s6153_s4 }
 0x20a   : > { %p4301_p10 = scmp.lt.s32.totalorder %s4299_s13, %s4295_s10 }
 0x20b   : > { %p4297_p7 = pnand %p4296_p4, %p4412_p5 }
 0x20c   : > { %p4302_p11 = por %p4301_p10, %p4300_p9 }
 0x20d   : > { %p4298_p8 = pneg %p4297_p7 }
 0x20f   : > { %p4303_p12 = pnand %p4302_p11, %p4298_p8 }
 0x211   : > { %4306 = shalt.err (!%p4303_p12)
}
 0x212   : > { %s4347_s22 = smov 256   ;;  %s4348_s23 = smov 16  }
 0x213   : > { %3851 = dma.vmem_to_hbm [thread:$0]  (%p4412_p5), %s6103_s27, 2048, %s6101_s30, %s6109_s19, %s4347_s22, %s4347_s22, %s4348_s23  }
 0x214 PF: > { %p3857_p13 = scmp.ge.s32.totalorder %s4341_s18, 2  ;;  %s3338_s8 = sand.u32 1, %s4329_s15  }
 0x215   : > { %s3339_s28 = scalar_lea.sflag [#allocation4], %s3338_s8 }
 0x216   : > { %p3854_p0 = pnand %p3857_p13, %p4416_p6 }
 0x218   : > { %p3855_p1 = pneg %p3854_p0 }
 0x21a   : > { %4324 = dma.done.wait (%p3855_p1), %s3339_s28, 2048  }
 0x21b   : > { %4326 = vsyncadd (%p3855_p1), %s3339_s28, 4294965248  ;;  %p14_p2 = scmp.ge.s32.totalorder %s4399_s21, 4   ;;  %s6241_s15 = smov %s4333_s16 }
 0x21c   : > { %s6242_s16 = smov %s4337_s17  ;;  %s6243_s17 = smov %s4410_s24 }
 0x21d   : > { %s6244_s18 = smov %s4399_s21  ;;  %16 = sbr.rel (!%p14_p2) target bundleno = 3 (0x3), region = 74 }
 0x222   :  { %3344 = vsyncpa [#allocation4], 1 }
 0x223   :  { %3346 = vsyncpa [#allocation4 + $0x1], 1 }

// kernel: resblock2_forward.2
= control target key start
LH: loop header
LB: loop body
LE: loop exit
PB: predicated region body
PF: predicated region fallthrough
CT: control target
= control target key end

     0   :  { %12 = vsyncpa [#allocation4], 0  ;;  %s14089_s0 = inlined_call_operand.vmem [shape: bf16[2,256,128], index: 0, kind: input, shape index: {}]   ;;  %s14090_s1 = inlined_call_operand.vmem [shape: bf16[2,128,64], index: 1, kind: input, shape index: {}]   ;;  %s14091_s2 = inlined_call_operand.hbm [shape: f32[2,1,64], index: 2, kind: input, shape index: {}]   ;;  %s14092_s3 = inlined_call_operand.vmem [shape: bf16[18,64,128], index: 3, kind: input, shape index: {}]   ;;  %s14093_s4 = inlined_call_operand.hbm [shape: f32[2,1,128], index: 4, kind: input, shape index: {}]   ;;  %s14094_s5 = inlined_call_operand.vmem [shape: bf16[256,1], index: 5, kind: input, shape index: {}]   ;;  %s14095_s6 = inlined_call_operand.vmem [shape: bf16[256,1], index: 6, kind: input, shape index: {}]   ;;  %s14096_s7 = inlined_call_operand.vmem [shape: bf16[2,256,128], index: 7, kind: output, shape index: {}]  }
   0x1   :  { %13 = vsyncpa [#allocation6], 0  ;;  %s10818_s24 = smov 0  }
   0x2 LB: > { %s10824_s25 = sadd.s32 4294967295, %s10769_s24   ;;  %p8545_p0 = scmp.ge.s32.totalorder %s10769_s24, 1  ;;  %s10769_s24 = sphi %s10818_s24, %s19_s24  }
   0x3   : > { %p202_p1 = scmp.lt.s32.totalorder %s10769_s24, 3  ;;  %s10771_s26 = smov [#allocation3]  }
   0x4   : > { %s217_s27 = sshll.u32 %s10771_s26, 4  ;;  %p10546_p3 = scmp.eq.s32.totalorder %s10824_s25, 0  ;;  %s218_s27 = int_to_ptr.vmem [resolvable:$true] %s217_s27 }
   0x5   : > { %p10828_p2 = pnand %p8545_p0, %p202_p1  ;;  %s10772_s29 = smov [#allocation5]  }
   0x6   : > { %s233_s30 = sshll.u32 %s10772_s29, 4  ;;  %s10714_s9 = scalar_lea.vmem %s218_s27, 32  ;;  %s234_s30 = int_to_ptr.vmem [resolvable:$true] %s233_s30 }
   0x7   : > { %p10539_p4 = pneg %p10828_p2  ;;  %p10715_p7 = scmp.ne.s32.totalorder %s218_s27, %s10714_s9 }
   0x8   : > { %p10722_p10 = scmp.lt.s32.totalorder %s218_s27, %s218_s27  ;;  %p10723_p11 = scmp.lt.s32.totalorder %s10714_s9, %s10714_s9 }
   0x9   : > { %p10837_p5 = pnand %p10546_p3, %p10539_p4 }
   0xa   : > { %p10724_p12 = por %p10723_p11, %p10722_p10 }
   0xb   : > { %p10705_p6 = pneg %p10837_p5 }
   0xd   : > { %p10717_p8 = pnand %p10715_p7, %p10705_p6 }
   0xf   : > { %p10718_p9 = pneg %p10717_p8 }
  0x11   : > { %p10725_p13 = pnand %p10724_p12, %p10718_p9 }
  0x13   : > { %10728 = shalt.err (!%p10725_p13)
}
  0x14   : > { %s10773_s10 = smov 16   ;;  %s10774_s11 = smov 1  }
  0x15   : > { %10542 = dma.hbm_to_vmem [thread:$0]  (!%p10837_p5), %s14091_s2, 32, %s218_s27, [#allocation4], %s10773_s10, %s10773_s10, %s10774_s11  }
  0x16   : > { %s10740_s14 = scalar_lea.vmem %s234_s30, 32  ;;  %p10748_p7 = scmp.lt.s32.totalorder %s234_s30, %s234_s30 }
  0x17   : > { %p10741_p0 = scmp.ne.s32.totalorder %s234_s30, %s10740_s14  ;;  %p10749_p8 = scmp.lt.s32.totalorder %s10740_s14, %s10740_s14 }
  0x19   : > { %p10743_p1 = pnand %p10741_p0, %p10705_p6  ;;  %p10750_p10 = por %p10749_p8, %p10748_p7 }
  0x1b   : > { %p10744_p4 = pneg %p10743_p1 }
  0x1d   : > { %p10751_p9 = pnand %p10750_p10, %p10744_p4 }
  0x1f   : > { %10754 = shalt.err (!%p10751_p9)
}
  0x20   : > { %10545 = dma.hbm_to_vmem [thread:$0]  (!%p10837_p5), %s14093_s4, 32, %s234_s30, [#allocation6], %s10773_s10, %s10773_s10, %s10774_s11  }
  0x21   : > { %263 = sbr.rel (%p10828_p2) target bundleno = 1499 (0x5db), region = 48 }
  0x26   : > { %10760 = dma.done.wait (%p10546_p3), [#allocation4], 32  }
  0x27   : > { %10762 = vsyncadd (%p10546_p3), [#allocation4], 4294967264 }
  0x28   : > { %10764 = dma.done.wait (%p10546_p3), [#allocation6], 32  }
  0x29   : > { %10766 = vsyncadd (%p10546_p3), [#allocation6], 4294967264  ;;  %v10775_v0 = vmov 0   ;;  %p299_p5 = scmp.lt.s32.totalorder %s10824_s25, 1  ;;  %v320_v1 = vld [vmem:[%s14094_s5 + $0x8] sm:$0xf] }
  0x2a   : > { %10566 = vset.pattern.permute.xlu1 %v10775_v0  ;;  %10565 = vset.pattern.permute.xlu0 %v10775_v0  ;;  %v318_v2 = vld [vmem:[%s14094_s5] sm:$0xf]  ;;  %v10567_v3 = vld [vmem:[%s14090_s1 + $0x38] sm:$0xff]   ;;  %v321_v4 = vld [vmem:[%s14094_s5 + $0xc] sm:$0xf]  ;;  %vm310_vm0 = vcmask 523264  }
  0x2b   : > { %944 = vperm.xlu1 %10566, %v320_v1   ;;  %920 = vperm.xlu0 %10565, %v318_v2   ;;  %v319_v5 = vld [vmem:[%s14094_s5 + $0x4] sm:$0xf]  ;;  %v10568_v6 = vld [vmem:[%s14090_s1 + $0x30] sm:$0xff]   ;;  %s14535_s25 = smov (!%p299_p5, %s10824_s25), 1  ;;  %v350_v8 = vld [vmem:[%s14095_s6] sm:$0xf] }
  0x2c   : > { %9707 = vmatprep.subr.bf16.mxu0 %v10567_v3  ;;  %v351_v7 = vld [vmem:[%s14095_s6 + $0x4] sm:$0xf]  ;;  %v10569_v9 = vld [vmem:[%s14090_s1 + $0x28] sm:$0xff]   ;;  %s9170_s14 = sshll.u32 %s14535_s25, 7  ;;  %v323_v13 = vld [vmem:[%s14094_s5 + $0x14] sm:$0xf] }
  0x2d   : > { %9708 = vmatpush3.bf16.msra.mxu0 %v10567_v3  ;;  %v353_v10 = vld [vmem:[%s14095_s6 + $0xc] sm:$0xf]  ;;  %v352_v11 = vld [vmem:[%s14095_s6 + $0x8] sm:$0xf]  ;;  %v10570_v12 = vld [vmem:[%s14090_s1 + $0x20] sm:$0xff]   ;;  %s10915_s23 = scalar_lea.vmem %s14089_s0, %s9170_s14  ;;  %vm313_vm1 = vcmask 516096   ;;  %s13975_s16 = scalar_lea.vmem %s14096_s7, %s9170_s14 }
  0x2e   : > { %9709 = vmatprep.subr.bf16.mxu0 %v10568_v6  ;;  %v322_v14 = vld [vmem:[%s14094_s5 + $0x10] sm:$0xf]  ;;  %v10571_v15 = vld [vmem:[%s14090_s1 + $0x18] sm:$0xff]   ;;  %v382_v16 = vld [vmem:[%s10915_s23] sm:$0xff]  }
  0x2f   : > { %956 = vperm.xlu1 %10566, %v321_v4   ;;  %932 = vperm.xlu0 %10565, %v319_v5   ;;  %v325_v17 = vld [vmem:[%s14094_s5 + $0x1c] sm:$0xf]  ;;  %v324_v18 = vld [vmem:[%s14094_s5 + $0x18] sm:$0xf]  ;;  %v10572_v19 = vld [vmem:[%s14090_s1 + $0x10] sm:$0xff]  }
  0x30   : > { %9723 = vmatprep.mubr.bf16.mxu0 %v382_v16  ;;  %v355_v20 = vld [vmem:[%s14095_s6 + $0x14] sm:$0xf]  ;;  %v354_v21 = vld [vmem:[%s14095_s6 + $0x10] sm:$0xf]  ;;  %v10573_v22 = vld [vmem:[%s14090_s1 + $0x8] sm:$0xff]  }
  0x31   : > { %9710 = vmatpush3.bf16.msra.mxu0 %v10568_v6  ;;  %v357_v23 = vld [vmem:[%s14095_s6 + $0x1c] sm:$0xf]  ;;  %v356_v24 = vld [vmem:[%s14095_s6 + $0x18] sm:$0xf]  ;;  %v10574_v25 = vld [vmem:[%s14090_s1] sm:$0xff]  }
  0x32   : > { %9711 = vmatprep.subr.bf16.mxu0 %v10569_v9  ;;  %v384_v26 = vld [vmem:[%s10915_s23 + $0x8] sm:$0xff]   ;;  %v386_v27 = vld [vmem:[%s10915_s23 + $0x10] sm:$0xff]   ;;  %v327_v28 = vld [vmem:[%s14094_s5 + $0x24] sm:$0xf] }
  0x33   : > { %2007 = vperm.xlu1 %10566, %v351_v7   ;;  %1995 = vperm.xlu0 %10565, %v350_v8   ;;  %v326_v29 = vld [vmem:[%s14094_s5 + $0x20] sm:$0xf]  ;;  %v329_v30 = vld [vmem:[%s14094_s5 + $0x2c] sm:$0xf]  ;;  %v328_v31 = vld [vmem:[%s14094_s5 + $0x28] sm:$0xf] }
  0x34   : > { %v388_v32 = vld [vmem:[%s10915_s23 + $0x18] sm:$0xff]   ;;  %v390_v33 = vld [vmem:[%s10915_s23 + $0x20] sm:$0xff]   ;;  %v361_v36 = vld [vmem:[%s14095_s6 + $0x2c] sm:$0xf] }
  0x35   : > { %9712 = vmatpush3.bf16.msra.mxu0 %v10569_v9  ;;  %v359_v34 = vld [vmem:[%s14095_s6 + $0x24] sm:$0xf]  ;;  %v358_v35 = vld [vmem:[%s14095_s6 + $0x20] sm:$0xf]  ;;  %v360_v37 = vld [vmem:[%s14095_s6 + $0x28] sm:$0xf] }
  0x36   : > { %9713 = vmatprep.subr.bf16.mxu0 %v10570_v12  ;;  %v392_v38 = vld [vmem:[%s10915_s23 + $0x28] sm:$0xff]   ;;  %v394_v39 = vld [vmem:[%s10915_s23 + $0x30] sm:$0xff]   ;;  %v333_v42 = vld [vmem:[%s14094_s5 + $0x3c] sm:$0xf] }
  0x37   : > { %2031 = vperm.xlu1 %10566, %v353_v10   ;;  %2019 = vperm.xlu0 %10565, %v352_v11   ;;  %v331_v40 = vld [vmem:[%s14094_s5 + $0x34] sm:$0xf]  ;;  %v330_v41 = vld [vmem:[%s14094_s5 + $0x30] sm:$0xf]  ;;  %v332_v43 = vld [vmem:[%s14094_s5 + $0x38] sm:$0xf] }
  0x38   : > { %v396_v44 = vld [vmem:[%s10915_s23 + $0x38] sm:$0xff]   ;;  %v398_v45 = vld [vmem:[%s10915_s23 + $0x40] sm:$0xff]   ;;  %v363_v46 = vld [vmem:[%s14095_s6 + $0x34] sm:$0xf] }
  0x39   : > { %9714 = vmatpush3.bf16.msra.mxu0 %v10570_v12  ;;  %v362_v47 = vld [vmem:[%s14095_s6 + $0x30] sm:$0xf]  ;;  %v365_v48 = vld [vmem:[%s14095_s6 + $0x3c] sm:$0xf]  ;;  %v364_v49 = vld [vmem:[%s14095_s6 + $0x38] sm:$0xf] }
  0x3a   : > { %9715 = vmatprep.subr.bf16.mxu0 %v10571_v15  ;;  %v400_v50 = vld [vmem:[%s10915_s23 + $0x48] sm:$0xff]   ;;  %v402_v51 = vld [vmem:[%s10915_s23 + $0x50] sm:$0xff]   ;;  %v335_v52 = vld [vmem:[%s14094_s5 + $0x44] sm:$0xf] }
  0x3b   : > { %980 = vperm.xlu1 %10566, %v323_v13   ;;  %968 = vperm.xlu0 %10565, %v322_v14   ;;  %v334_v53 = vld [vmem:[%s14094_s5 + $0x40] sm:$0xf]  ;;  %v337_v54 = vld [vmem:[%s14094_s5 + $0x4c] sm:$0xf]  ;;  %v336_v55 = vld [vmem:[%s14094_s5 + $0x48] sm:$0xf] }
  0x3c   : > { %v404_v56 = vld [vmem:[%s10915_s23 + $0x58] sm:$0xff]   ;;  %v406_v57 = vld [vmem:[%s10915_s23 + $0x60] sm:$0xff]   ;;  %v369_v60 = vld [vmem:[%s14095_s6 + $0x4c] sm:$0xf] }
  0x3d   : > { %9716 = vmatpush3.bf16.msra.mxu0 %v10571_v15  ;;  %v367_v58 = vld [vmem:[%s14095_s6 + $0x44] sm:$0xf]  ;;  %v366_v59 = vld [vmem:[%s14095_s6 + $0x40] sm:$0xf]  ;;  %v368_v61 = vld [vmem:[%s14095_s6 + $0x48] sm:$0xf] }
  0x3e   : > { %9717 = vmatprep.subr.bf16.mxu0 %v10572_v19  ;;  %v408_v62 = vld [vmem:[%s10915_s23 + $0x68] sm:$0xff]   ;;  %v410_v63 = vld [vmem:[%s10915_s23 + $0x70] sm:$0xff]   ;;  %v341_v2 = vld [vmem:[%s14094_s5 + $0x5c] sm:$0xf] }
  0x3f   : > { %1004 = vperm.xlu1 %10566, %v325_v17   ;;  %992 = vperm.xlu0 %10565, %v324_v18   ;;  %v339_v0 = vld [vmem:[%s14094_s5 + $0x54] sm:$0xf]  ;;  %v338_v1 = vld [vmem:[%s14094_s5 + $0x50] sm:$0xf]  ;;  %v340_v3 = vld [vmem:[%s14094_s5 + $0x58] sm:$0xf] }
  0x40   : > { %v412_v4 = vld [vmem:[%s10915_s23 + $0x78] sm:$0xff]   ;;  %v371_v5 = vld [vmem:[%s14095_s6 + $0x54] sm:$0xf]  ;;  %v370_v6 = vld [vmem:[%s14095_s6 + $0x50] sm:$0xf] }
  0x41   : > { %9718 = vmatpush3.bf16.msra.mxu0 %v10572_v19  ;;  %v373_v7 = vld [vmem:[%s14095_s6 + $0x5c] sm:$0xf]  ;;  %v372_v8 = vld [vmem:[%s14095_s6 + $0x58] sm:$0xf]  ;;  %v343_v9 = vld [vmem:[%s14094_s5 + $0x64] sm:$0xf] }
  0x42   : > { %9719 = vmatprep.subr.bf16.mxu0 %v10573_v22  ;;  %v342_v10 = vld [vmem:[%s14094_s5 + $0x60] sm:$0xf]  ;;  %v345_v11 = vld [vmem:[%s14094_s5 + $0x6c] sm:$0xf]  ;;  %v344_v12 = vld [vmem:[%s14094_s5 + $0x68] sm:$0xf] }
  0x43   : > { %2055 = vperm.xlu1 %10566, %v355_v20   ;;  %2043 = vperm.xlu0 %10565, %v354_v21   ;;  %v375_v13 = vld [vmem:[%s14095_s6 + $0x64] sm:$0xf]  ;;  %v374_v14 = vld [vmem:[%s14095_s6 + $0x60] sm:$0xf]  ;;  %v10591_v15 = vld [vmem:[%s14092_s3 + $0x38] sm:$0xff]   ;;  %v10776_v20 = vmov 0.0  }
  0x44   : > { %v377_v16 = vld [vmem:[%s14095_s6 + $0x6c] sm:$0xf]  ;;  %v376_v17 = vld [vmem:[%s14095_s6 + $0x68] sm:$0xf]  ;;  %9755 = vmatprep.subr.bf16.mxu1 %v10591_v15  ;;  %v10592_v18 = vld [vmem:[%s14092_s3 + $0x58] sm:$0xff]   ;;  %315 = vst.msk [vmem:[#allocation2 + $0x111] sm:$0xff] %vm310_vm0, %v10776_v20 }
  0x45   : > { %9720 = vmatpush3.bf16.msra.mxu0 %v10573_v22  ;;  %9756 = vmatpush3.bf16.msra.mxu1 %v10591_v15  ;;  %v10593_v19 = vld [vmem:[%s14092_s3 + $0x30] sm:$0xff]   ;;  %316 = vst.msk [vmem:[#allocation2 + $0x119] sm:$0xff] %vm310_vm0, %v10776_v20  ;;  %311 = vst.msk [vmem:[#allocation2] sm:$0xff] %vm310_vm0, %v10776_v20 }
  0x46   : > { %9721 = vmatprep.subr.bf16.mxu0 %v10574_v25  ;;  %317 = vst.msk [vmem:[#allocation2 + $0x121] sm:$0x1] %vm313_vm1, %v10776_v20  ;;  %314 = vst.msk [vmem:[#allocation2 + $0x10] sm:$0x1] %vm313_vm1, %v10776_v20  ;;  %v347_v21 = vld [vmem:[%s14094_s5 + $0x74] sm:$0xf]  ;;  %9757 = vmatprep.subr.bf16.mxu1 %v10593_v19 }
  0x47   : > { %2079 = vperm.xlu1 %10566, %v357_v23   ;;  %2067 = vperm.xlu0 %10565, %v356_v24   ;;  %312 = vst.msk [vmem:[#allocation2 + $0x8] sm:$0xff] %vm310_vm0, %v10776_v20  ;;  %v346_v22 = vld [vmem:[%s14094_s5 + $0x70] sm:$0xf]  ;;  %v10595_v24 = vld [vmem:[%s14092_s3 + $0x28] sm:$0xff]  }
  0x48   : > { %v10594_v23 = vld [vmem:[%s14092_s3 + $0x50] sm:$0xff]  }
  0x49   : > { %9722 = vmatpush3.bf16.msra.mxu0 %v10574_v25  ;;  %9758 = vmatpush3.bf16.msra.mxu1 %v10593_v19  ;;  %v349_v25 = vld [vmem:[%s14094_s5 + $0x7c] sm:$0xf] }
  0x4a   : > { %9835 = vmatprep.subr.bf16.mxu0 %v10592_v18  ;;  %9759 = vmatprep.subr.bf16.mxu1 %v10595_v24 }
  0x4b   : > { %1028 = vperm.xlu1 %10566, %v327_v28   ;;  %1016 = vperm.xlu0 %10565, %v326_v29   ;;  %v10777_v28 = vmov 839922192  }
  0x4c   : > { %9724 = vmatmul.mubr.bf16.vlgmr.msra.gmra.mxu0 %v384_v26  ;;  %v348_v26 = vld [vmem:[%s14094_s5 + $0x78] sm:$0xf]  ;;  %v924_v29 = vunpack.c.l.s4 %v10777_v28 }
  0x4d   : > { %9727 = vmatprep.mubr.bf16.mxu0 %v386_v27  ;;  %9836 = vmatpush3.bf16.msra.mxu0 %v10592_v18  ;;  %v10596_v27 = vld [vmem:[%s14092_s3 + $0x48] sm:$0xff]  }
  0x4e   : > { %9837 = vmatprep.subr.bf16.mxu0 %v10594_v23  ;;  %9760 = vmatpush3.bf16.msra.mxu1 %v10595_v24 }
  0x4f   : > { %1052 = vperm.xlu1 %10566, %v329_v30   ;;  %1040 = vperm.xlu0 %10565, %v328_v31   ;;  %v926_v30 = vlaneseq  ;;  %v10597_v31 = vld [vmem:[%s14092_s3 + $0x20] sm:$0xff]  }
  0x50   : > { %9761 = vmatprep.subr.bf16.mxu1 %v10597_v31 }
  0x51   : > { %9838 = vmatpush3.bf16.msra.mxu0 %v10594_v23 }
  0x52   : > { %9839 = vmatprep.subr.bf16.mxu0 %v10596_v27  ;;  %9762 = vmatpush3.bf16.msra.mxu1 %v10597_v31 }
  0x53   : > { %2103 = vperm.xlu1 %10566, %v359_v34   ;;  %2091 = vperm.xlu0 %10565, %v358_v35   ;;  %v10598_v34 = vld [vmem:[%s14092_s3 + $0x40] sm:$0xff]  }
  0x54   : > { %9728 = vmatmul.mubr.bf16.gmra.mxu0 %v388_v32  ;;  %v379_v32 = vld [vmem:[%s14095_s6 + $0x74] sm:$0xf]  ;;  %v1422_v35 = vld [vmem:[#allocation2 + $0x1] sm:$0xff] }
  0x55   : > { %9731 = vmatprep.mubr.bf16.mxu0 %v390_v33  ;;  %v378_v33 = vld [vmem:[%s14095_s6 + $0x70] sm:$0xf]  ;;  %9840 = vmatpush3.bf16.msra.mxu0 %v10596_v27 }
  0x56   : > { %9841 = vmatprep.subr.bf16.mxu0 %v10598_v34 }
  0x57   : > { %2127 = vperm.xlu1 %10566, %v361_v36   ;;  %2115 = vperm.xlu0 %10565, %v360_v37   ;;  %v1423_v36 = vld [vmem:[#allocation2 + $0x9] sm:$0xff]  ;;  %v925_v37 = vunpack.c.0.s8 %v924_v29 }
  0x59   : > { %9842 = vmatpush3.bf16.msra.mxu0 %v10598_v34 }
  0x5b   : > { %1076 = vperm.xlu1 %10566, %v331_v40   ;;  %1064 = vperm.xlu0 %10565, %v330_v41   ;;  %v381_v40 = vld [vmem:[%s14095_s6 + $0x7c] sm:$0xf]  ;;  %v380_v41 = vld [vmem:[%s14095_s6 + $0x78] sm:$0xf] }
  0x5c   : > { %9732 = vmatmul.mubr.bf16.gmra.mxu0 %v392_v38  ;;  %v927_v38 = vshrl.u32 %v926_v30, 7 }
  0x5d   : > { %9735 = vmatprep.mubr.bf16.mxu0 %v394_v39  ;;  %v1454_v39 = vpack.c.bf16 %v1423_v36, %v1422_v35 }
  0x5f   : > { %1100 = vperm.xlu1 %10566, %v333_v42   ;;  %1088 = vperm.xlu0 %10565, %v332_v43   ;;  %v11142_v42 = vsub.s32 %v925_v37, %v927_v38 }
  0x60   : > { %9763 = vmatprep.mubr.msk.bf16.mxu1 %vm310_vm0, %v1454_v39 }
  0x63   : > { %2151 = vperm.xlu1 %10566, %v363_v46   ;;  %2139 = vperm.xlu0 %10565, %v362_v47  }
  0x64   : > { %9736 = vmatmul.mubr.bf16.gmra.mxu0 %v396_v44 }
  0x65   : > { %9739 = vmatprep.mubr.bf16.mxu0 %v398_v45 }
  0x67   : > { %2175 = vperm.xlu1 %10566, %v365_v48   ;;  %2163 = vperm.xlu0 %10565, %v364_v49   ;;  %v11149_v49 = vld [vmem:[%s14092_s3 + $0x18] sm:$0xff]  }
  0x68   : > { %9795 = vmatprep.subr.bf16.mxu1 %v11149_v49 }
  0x6b   : > { %1124 = vperm.xlu1 %10566, %v335_v52   ;;  %1112 = vperm.xlu0 %10565, %v334_v53  }
  0x6c   : > { %9740 = vmatmul.mubr.bf16.gmra.mxu0 %v400_v50 }
  0x6d   : > { %9743 = vmatprep.mubr.bf16.mxu0 %v402_v51 }
  0x6f   : > { %1148 = vperm.xlu1 %10566, %v337_v54   ;;  %1136 = vperm.xlu0 %10565, %v336_v55  }
  0x73   : > { %2199 = vperm.xlu1 %10566, %v367_v58   ;;  %2187 = vperm.xlu0 %10565, %v366_v59  }
  0x74   : > { %9744 = vmatmul.mubr.bf16.gmra.mxu0 %v404_v56 }
  0x75   : > { %9747 = vmatprep.mubr.bf16.mxu0 %v406_v57 }
  0x77   : > { %2223 = vperm.xlu1 %10566, %v369_v60   ;;  %2211 = vperm.xlu0 %10565, %v368_v61  }
  0x7b   : > { %1172 = vperm.xlu1 %10566, %v339_v0   ;;  %1160 = vperm.xlu0 %10565, %v338_v1  }
  0x7c   : > { %9748 = vmatmul.mubr.bf16.gmra.mxu0 %v408_v62 }
  0x7d   : > { %9751 = vmatprep.mubr.bf16.mxu0 %v410_v63 }
  0x7f   : > { %1196 = vperm.xlu1 %10566, %v341_v2   ;;  %1184 = vperm.xlu0 %10565, %v340_v3  }
  0x83   : > { %2247 = vperm.xlu1 %10566, %v371_v5   ;;  %2235 = vperm.xlu0 %10565, %v370_v6  }
  0x84   : > { %9752 = vmatmul.mubr.bf16.gmra.mxu0 %v412_v4 }
  0x87   : > { %2271 = vperm.xlu1 %10566, %v373_v7   ;;  %2259 = vperm.xlu0 %10565, %v372_v8  }
  0x8b   : > { %1220 = vperm.xlu1 %10566, %v343_v9   ;;  %1208 = vperm.xlu0 %10565, %v342_v10  }
  0x8f   : > { %1244 = vperm.xlu1 %10566, %v345_v11   ;;  %1232 = vperm.xlu0 %10565, %v344_v12  }
  0x93   : > { %2295 = vperm.xlu1 %10566, %v375_v13   ;;  %2283 = vperm.xlu0 %10565, %v374_v14  }
  0x97   : > { %2319 = vperm.xlu1 %10566, %v377_v16   ;;  %2307 = vperm.xlu0 %10565, %v376_v17  }
  0x9b   : > { %1268 = vperm.xlu1 %10566, %v347_v21   ;;  %1256 = vperm.xlu0 %10565, %v346_v22   ;;  %v11201_v22 = vld [vmem:[%s14092_s3 + $0x98] sm:$0xff]  }
  0x9c   : > { %9915 = vmatprep.subr.bf16.mxu0 %v11201_v22 }
  0x9f   : > { %1292 = vperm.xlu1 %10566, %v349_v25   ;;  %1280 = vperm.xlu0 %10565, %v348_v26  }
  0xa3   : > { %2343 = vperm.xlu1 %10566, %v379_v32   ;;  %2331 = vperm.xlu0 %10565, %v378_v33  }
  0xa6   : > { %v945_v43 = vpop.permute.xlu1 %944  ;;  %v921_v44 = vpop.permute.xlu0 %920 }
  0xa7   : > { %2367 = vperm.xlu1 %10566, %v381_v40   ;;  %2355 = vperm.xlu0 %10565, %v380_v41   ;;  %v953_v45 = vrot.slane %v945_v43, %v11142_v42  ;;  %v929_v46 = vrot.slane %v921_v44, %v11142_v42 }
  0xaa   : > { %v957_v47 = vpop.permute.xlu1 %956  ;;  %v933_v48 = vpop.permute.xlu0 %932 }
  0xab   : > { %v965_v50 = vrot.slane %v957_v47, %v11142_v42  ;;  %v941_v51 = vrot.slane %v933_v48, %v11142_v42 }
  0xad   : > { %v11154_v52 = vcombine.low %v953_v45, %v965_v50  ;;  %v11156_v53 = vcombine.low %v929_v46, %v941_v51 }
  0xae   : > { %v11158_v54 = vpop.permute.xlu1 %2007  ;;  %v11160_v55 = vpop.permute.xlu0 %1995 }
  0xaf   : > { %14214 = vst [vmem:[#allocation9_spill] sm:$0xff] %v11154_v52  ;;  %14215 = vst [vmem:[#allocation10_spill] sm:$0xff] %v11156_v53 }
  0xb2   : > { %v11162_v56 = vpop.permute.xlu1 %2031  ;;  %v11164_v57 = vpop.permute.xlu0 %2019 }
  0xb6   : > { %v981_v58 = vpop.permute.xlu1 %980  ;;  %v969_v59 = vpop.permute.xlu0 %968 }
  0xb7   : > { %v989_v60 = vrot.slane %v981_v58, %v11142_v42  ;;  %v977_v61 = vrot.slane %v969_v59, %v11142_v42 }
  0xb9   : > { %v11168_v62 = vcombine.low %v977_v61, %v989_v60 }
  0xba   : > { %v1005_v63 = vpop.permute.xlu1 %1004  ;;  %v993_v0 = vpop.permute.xlu0 %992 }
  0xbb   : > { %14216 = vst [vmem:[#allocation11_spill] sm:$0xff] %v11168_v62  ;;  %v1013_v1 = vrot.slane %v1005_v63, %v11142_v42  ;;  %v1001_v2 = vrot.slane %v993_v0, %v11142_v42 }
  0xbd   : > { %v11172_v3 = vcombine.low %v1001_v2, %v1013_v1 }
  0xbe   : > { %v11174_v4 = vpop.permute.xlu1 %2055  ;;  %v11176_v5 = vpop.permute.xlu0 %2043 }
  0xbf   : > { %14217 = vst [vmem:[#allocation12_spill] sm:$0xff] %v11172_v3 }
  0xc2   : > { %v11178_v6 = vpop.permute.xlu1 %2079  ;;  %v11180_v7 = vpop.permute.xlu0 %2067 }
  0xc6   : > { %v1029_v8 = vpop.permute.xlu1 %1028  ;;  %v1017_v9 = vpop.permute.xlu0 %1016 }
  0xc7   : > { %v1037_v10 = vrot.slane %v1029_v8, %v11142_v42  ;;  %v1025_v11 = vrot.slane %v1017_v9, %v11142_v42 }
  0xc9   : > { %v11184_v12 = vcombine.low %v1025_v11, %v1037_v10 }
  0xca   : > { %v1053_v13 = vpop.permute.xlu1 %1052  ;;  %v1041_v14 = vpop.permute.xlu0 %1040 }
  0xcb   : > { %14218 = vst [vmem:[#allocation13_spill] sm:$0xff] %v11184_v12  ;;  %v1061_v15 = vrot.slane %v1053_v13, %v11142_v42  ;;  %v1049_v16 = vrot.slane %v1041_v14, %v11142_v42 }
  0xcd   : > { %v11188_v17 = vcombine.low %v1049_v16, %v1061_v15 }
  0xce   : > { %v11190_v18 = vpop.permute.xlu1 %2103  ;;  %v11192_v19 = vpop.permute.xlu0 %2091 }
  0xcf   : > { %14219 = vst [vmem:[#allocation14_spill] sm:$0xff] %v11188_v17 }
  0xd2   : > { %v11194_v20 = vpop.permute.xlu1 %2127  ;;  %v11196_v21 = vpop.permute.xlu0 %2115 }
  0xd6   : > { %v1077_v23 = vpop.permute.xlu1 %1076  ;;  %v1065_v24 = vpop.permute.xlu0 %1064 }
  0xd7   : > { %v1085_v25 = vrot.slane %v1077_v23, %v11142_v42  ;;  %v1073_v26 = vrot.slane %v1065_v24, %v11142_v42 }
  0xd9   : > { %v11206_v27 = vcombine.low %v1073_v26, %v1085_v25 }
  0xda   : > { %v1101_v28 = vpop.permute.xlu1 %1100  ;;  %v1089_v29 = vpop.permute.xlu0 %1088 }
  0xdb   : > { %14220 = vst [vmem:[#allocation15_spill] sm:$0xff] %v11206_v27  ;;  %v1109_v30 = vrot.slane %v1101_v28, %v11142_v42  ;;  %v1097_v31 = vrot.slane %v1089_v29, %v11142_v42 }
  0xdd   : > { %v11210_v32 = vcombine.low %v1097_v31, %v1109_v30 }
  0xde   : > { %v11212_v33 = vpop.permute.xlu1 %2151  ;;  %v11214_v34 = vpop.permute.xlu0 %2139 }
  0xdf   : > { %14221 = vst [vmem:[#allocation16_spill] sm:$0xff] %v11210_v32 }
  0xe2   : > { %v11216_v35 = vpop.permute.xlu1 %2175  ;;  %v11218_v36 = vpop.permute.xlu0 %2163 }
  0xe6   : > { %v1125_v37 = vpop.permute.xlu1 %1124  ;;  %v1113_v38 = vpop.permute.xlu0 %1112 }
  0xe7   : > { %v1133_v39 = vrot.slane %v1125_v37, %v11142_v42  ;;  %v1121_v40 = vrot.slane %v1113_v38, %v11142_v42  ;;  %v11258_v37 = vld [vmem:[#allocation3] ss:$0 sm:$0xff] }
  0xe9   : > { %v11222_v41 = vcombine.low %v1121_v40, %v1133_v39 }
  0xea   : > { %v1149_v43 = vpop.permute.xlu1 %1148  ;;  %v1137_v44 = vpop.permute.xlu0 %1136 }
  0xeb   : > { %14222 = vst [vmem:[#allocation17_spill] sm:$0xff] %v11222_v41  ;;  %v1157_v45 = vrot.slane %v1149_v43, %v11142_v42  ;;  %v1145_v46 = vrot.slane %v1137_v44, %v11142_v42 }
  0xed   : > { %v11226_v47 = vcombine.low %v1145_v46, %v1157_v45 }
  0xee   : > { %v11228_v48 = vpop.permute.xlu1 %2199  ;;  %v11230_v50 = vpop.permute.xlu0 %2187 }
  0xef   : > { %14223 = vst [vmem:[#allocation18_spill] sm:$0xff] %v11226_v47 }
  0xf2   : > { %v11232_v51 = vpop.permute.xlu1 %2223  ;;  %v11234_v58 = vpop.permute.xlu0 %2211 }
  0xf6   : > { %v1173_v59 = vpop.permute.xlu1 %1172  ;;  %v1161_v60 = vpop.permute.xlu0 %1160 }
  0xf7   : > { %v1181_v61 = vrot.slane %v1173_v59, %v11142_v42  ;;  %v1169_v63 = vrot.slane %v1161_v60, %v11142_v42 }
  0xf9   : > { %v11238_v0 = vcombine.low %v1169_v63, %v1181_v61 }
  0xfa   : > { %v1197_v1 = vpop.permute.xlu1 %1196  ;;  %v1185_v2 = vpop.permute.xlu0 %1184 }
  0xfb   : > { %14224 = vst [vmem:[#allocation19_spill] sm:$0xff] %v11238_v0  ;;  %v1205_v8 = vrot.slane %v1197_v1, %v11142_v42  ;;  %v1193_v9 = vrot.slane %v1185_v2, %v11142_v42 }
  0xfd   : > { %v11242_v10 = vcombine.low %v1193_v9, %v1205_v8 }
  0xfe   : > { %v11244_v11 = vpop.permute.xlu1 %2247  ;;  %v11246_v13 = vpop.permute.xlu0 %2235 }
  0xff   : > { %14225 = vst [vmem:[#allocation20_spill] sm:$0xff] %v11242_v10 }
 0x102   : > { %v11248_v14 = vpop.permute.xlu1 %2271  ;;  %v11250_v15 = vpop.permute.xlu0 %2259 }
 0x106   : > { %v1221_v16 = vpop.permute.xlu1 %1220  ;;  %v1209_v23 = vpop.permute.xlu0 %1208 }
 0x107   : > { %v1229_v24 = vrot.slane %v1221_v16, %v11142_v42  ;;  %v1217_v25 = vrot.slane %v1209_v23, %v11142_v42 }
 0x109   : > { %v11254_v26 = vcombine.low %v1217_v25, %v1229_v24 }
 0x10a   : > { %v1245_v28 = vpop.permute.xlu1 %1244  ;;  %v1233_v29 = vpop.permute.xlu0 %1232 }
 0x10b   : > { %14226 = vst [vmem:[#allocation21_spill] sm:$0xff] %v11254_v26  ;;  %v1253_v30 = vrot.slane %v1245_v28, %v11142_v42  ;;  %v1241_v31 = vrot.slane %v1233_v29, %v11142_v42 }
 0x10c   : > { %v9725_v39 = vpop.f32.mrf.mxu0 }
 0x10d   : > { %v11260_v38 = vcombine.low %v1241_v31, %v1253_v30  ;;  %v656_v40 = vadd.f32 %v9725_v39, %v11258_v37 }
 0x10e   : > { %v11263_v43 = vpop.permute.xlu1 %2295  ;;  %v11265_v44 = vpop.permute.xlu0 %2283 }
 0x10f   : > { %14227 = vst [vmem:[#allocation22_spill] sm:$0xff] %v11260_v38  ;;  %v647_v45 = vpop.f32.mrf.mxu0  ;;  %v776_v46 = vmul.f32 0.1, %v656_v40 }
 0x110   : > { %v648_v59 = vadd.f32 %v11258_v37, %v647_v45 }
 0x111   : > { %v9726_v60 = vpop.f32.mrf.mxu0  ;;  %v808_v61 = vmax.f32 %v656_v40, %v776_v46  ;;  %v2016_v40 = vrot.slane %v11158_v54, %v11142_v42 }
 0x112   : > { %v774_v63 = vmul.f32 0.1, %v648_v59  ;;  %v659_v1 = vadd.f32 %v9726_v60, %v11258_v37  ;;  %v11269_v2 = vpop.permute.xlu1 %2319  ;;  %v11271_v8 = vpop.permute.xlu0 %2307  ;;  %v2004_v60 = vrot.slane %v11160_v55, %v11142_v42 }
 0x113   : > { %v650_v9 = vpop.f32.mrf.mxu0  ;;  %840 = vst.msk [vmem:[#allocation2 + $0x21] sm:$0xff] %vm310_vm0, %v808_v61 }
 0x114   : > { %v806_v16 = vmax.f32 %v648_v59, %v774_v63  ;;  %v777_v23 = vmul.f32 0.1, %v659_v1  ;;  %v651_v24 = vadd.f32 %v11258_v37, %v650_v9 }
 0x115   : > { %v9729_v25 = vpop.f32.mrf.mxu0 }
 0x116   : > { %838 = vst.msk [vmem:[#allocation2 + $0x11] sm:$0xff] %vm310_vm0, %v806_v16  ;;  %v809_v28 = vmax.f32 %v659_v1, %v777_v23  ;;  %v775_v29 = vmul.f32 0.1, %v651_v24  ;;  %v672_v30 = vadd.f32 %v9729_v25, %v11258_v37  ;;  %v1269_v31 = vpop.permute.xlu1 %1268  ;;  %v1257_v39 = vpop.permute.xlu0 %1256 }
 0x117   : > { %v1277_v45 = vrot.slane %v1269_v31, %v11142_v42  ;;  %v1265_v46 = vrot.slane %v1257_v39, %v11142_v42  ;;  %v663_v59 = vpop.f32.mrf.mxu0 }
 0x118   : > { %841 = vst.msk [vmem:[#allocation2 + $0x29] sm:$0xff] %vm310_vm0, %v809_v28  ;;  %v807_v61 = vmax.f32 %v651_v24, %v775_v29  ;;  %v780_v63 = vmul.f32 0.1, %v672_v30  ;;  %v664_v1 = vadd.f32 %v11258_v37, %v663_v59  ;;  %v1945_v24 = vld [vmem:[#allocation2 + $0x2] sm:$0xff]  ;;  %v11291_v29 = vcombine.low %v2004_v60, %v2016_v40 }
 0x119   : > { %v11285_v9 = vcombine.low %v1265_v46, %v1277_v45  ;;  %v9730_v16 = vpop.f32.mrf.mxu0  ;;  %v2040_v40 = vrot.slane %v11162_v56, %v11142_v42  ;;  %v2028_v60 = vrot.slane %v11164_v57, %v11142_v42  ;;  %v2052_v56 = vrot.slane %v11176_v5, %v11142_v42 }
 0x11a   : > { %839 = vst.msk [vmem:[#allocation2 + $0x19] sm:$0xff] %vm310_vm0, %v807_v61  ;;  %v812_v54 = vmax.f32 %v672_v30, %v780_v63  ;;  %v778_v23 = vmul.f32 0.1, %v664_v1  ;;  %v675_v25 = vadd.f32 %v9730_v16, %v11258_v37  ;;  %v1293_v31 = vpop.permute.xlu1 %1292  ;;  %v1281_v39 = vpop.permute.xlu0 %1280  ;;  %14229 = vst [vmem:[#allocation24_spill] sm:$0xff] %v11291_v29 }
 0x11b   : > { %14228 = vst [vmem:[#allocation23_spill] sm:$0xff] %v11285_v9  ;;  %v1301_v38 = vrot.slane %v1293_v31, %v11142_v42  ;;  %v1289_v55 = vrot.slane %v1281_v39, %v11142_v42  ;;  %v666_v28 = vpop.f32.mrf.mxu0  ;;  %v11318_v5 = vcombine.low %v2028_v60, %v2040_v40 }
 0x11c   : > { %844 = vst.msk [vmem:[#allocation2 + $0x41] sm:$0xff] %vm310_vm0, %v812_v54  ;;  %v810_v45 = vmax.f32 %v664_v1, %v778_v23  ;;  %v781_v46 = vmul.f32 0.1, %v675_v25  ;;  %v667_v59 = vadd.f32 %v11258_v37, %v666_v28 }
 0x11d   : > { %v11295_v30 = vcombine.low %v1289_v55, %v1301_v38  ;;  %v9733_v61 = vpop.f32.mrf.mxu0  ;;  %v1946_v63 = vld [vmem:[#allocation2 + $0xa] sm:$0xff]  ;;  %14231 = vst [vmem:[#allocation26_spill] sm:$0xff] %v11318_v5 }
 0x11e   : > { %842 = vst.msk [vmem:[#allocation2 + $0x31] sm:$0xff] %vm310_vm0, %v810_v45  ;;  %v813_v16 = vmax.f32 %v675_v25, %v781_v46  ;;  %v779_v31 = vmul.f32 0.1, %v667_v59  ;;  %v688_v39 = vadd.f32 %v9733_v61, %v11258_v37  ;;  %v1977_v9 = vpack.c.bf16 %v1946_v63, %v1945_v24  ;;  %v1424_v25 = vld [vmem:[#allocation2 + $0x11] sm:$0xff] }
 0x11f   : > { %14230 = vst [vmem:[#allocation25_spill] sm:$0xff] %v11295_v30  ;;  %v679_v1 = vpop.f32.mrf.mxu0  ;;  %v1427_v28 = vld [vmem:[#allocation2 + $0x29] sm:$0xff]  ;;  %v2064_v24 = vrot.slane %v11174_v4, %v11142_v42 }
 0x120   : > { %845 = vst.msk [vmem:[#allocation2 + $0x49] sm:$0xff] %vm310_vm0, %v813_v16  ;;  %v811_v38 = vmax.f32 %v667_v59, %v779_v31  ;;  %v784_v54 = vmul.f32 0.1, %v688_v39  ;;  %v680_v23 = vadd.f32 %v11258_v37, %v679_v1  ;;  %v2473_v55 = vmul.bf16 %v11291_v29, %v1977_v9  ;;  %v1426_v31 = vld [vmem:[#allocation2 + $0x21] sm:$0xff]  ;;  %v10600_v4 = vld [vmem:[%s14092_s3 + $0x10] sm:$0xff]  }
 0x121   : > { %v9734_v45 = vpop.f32.mrf.mxu0  ;;  %v1425_v46 = vld [vmem:[#allocation2 + $0x19] sm:$0xff]  ;;  %v11320_v29 = vpack.c.bf16 %v1427_v28, %v1426_v31  ;;  %v1949_v60 = vld [vmem:[#allocation2 + $0x22] sm:$0xff] }
 0x122   : > { %v1947_v57 = vld [vmem:[#allocation2 + $0x12] sm:$0xff]  ;;  %v1948_v61 = vld [vmem:[#allocation2 + $0x1a] sm:$0xff]  ;;  %843 = vst.msk [vmem:[#allocation2 + $0x39] sm:$0xff] %vm310_vm0, %v811_v38  ;;  %v816_v59 = vmax.f32 %v688_v39, %v784_v54  ;;  %v782_v63 = vmul.f32 0.1, %v680_v23  ;;  %v691_v16 = vadd.f32 %v9734_v45, %v11258_v37  ;;  %9843 = vmatprep.mubr.msk.bf16.mxu0 %vm310_vm0, %v2473_v55  ;;  %v11313_v9 = vpack.c.bf16 %v1425_v46, %v1424_v25 }
 0x123   : > { %v682_v1 = vpop.f32.mrf.mxu0  ;;  %v1978_v30 = vpack.c.bf16 %v1948_v61, %v1947_v57  ;;  %v11326_v55 = vcombine.low %v2052_v56, %v2064_v24  ;;  %v2076_v57 = vrot.slane %v11180_v7, %v11142_v42  ;;  %v2100_v7 = vrot.slane %v11192_v19, %v11142_v42  ;;  %v10602_v19 = vld [vmem:[%s14092_s3] sm:$0xff]  }
 0x124   : > { %848 = vst.msk [vmem:[#allocation2 + $0x61] sm:$0xff] %vm310_vm0, %v816_v59  ;;  %v814_v39 = vmax.f32 %v680_v23, %v782_v63  ;;  %v785_v38 = vmul.f32 0.1, %v691_v16  ;;  %v683_v54 = vadd.f32 %v11258_v37, %v682_v1  ;;  %9764 = vmatmul.mubr.msk.bf16.vlgmr.msra.gmra.mxu1 %vm310_vm0, %v11313_v9  ;;  %v10604_v23 = vld [vmem:[%s14092_s3 + $0x90] sm:$0xff]  }
 0x125   : > { %14232 = vst [vmem:[#allocation27_spill] sm:$0xff] %v11326_v55  ;;  %9796 = vmatpush3.bf16.msra.mxu1 %v11149_v49  ;;  %v9737_v25 = vpop.f32.mrf.mxu0  ;;  %9767 = vmatprep.mubr.msk.bf16.mxu1 %vm310_vm0, %v11320_v29  ;;  %v2474_v40 = vmul.bf16 %v11318_v5, %v1978_v30  ;;  %v1950_v28 = vld [vmem:[#allocation2 + $0x2a] sm:$0xff]  ;;  %v2088_v30 = vrot.slane %v11178_v6, %v11142_v42 }
 0x126   : > { %846 = vst.msk [vmem:[#allocation2 + $0x51] sm:$0xff] %vm310_vm0, %v814_v39  ;;  %v817_v45 = vmax.f32 %v691_v16, %v785_v38  ;;  %v783_v46 = vmul.f32 0.1, %v683_v54  ;;  %v704_v24 = vadd.f32 %v9737_v25, %v11258_v37  ;;  %v1979_v56 = vpack.c.bf16 %v1950_v28, %v1949_v60  ;;  %9797 = vmatprep.subr.bf16.mxu1 %v10600_v4  ;;  %v10601_v49 = vld [vmem:[%s14092_s3 + $0x8] sm:$0xff]   ;;  %v1428_v1 = vld [vmem:[#allocation2 + $0x31] sm:$0xff] }
 0x127   : > { %9844 = vmatmul.mubr.msk.bf16.vlgmr.msra.gmra.mxu0 %vm310_vm0, %v2474_v40  ;;  %v695_v61 = vpop.f32.mrf.mxu0  ;;  %v1431_v39 = vld [vmem:[#allocation2 + $0x49] sm:$0xff]  ;;  %v2112_v6 = vrot.slane %v11190_v18, %v11142_v42  ;;  %v1430_v18 = vld [vmem:[#allocation2 + $0x41] sm:$0xff] }
 0x128   : > { %849 = vst.msk [vmem:[#allocation2 + $0x69] sm:$0xff] %vm310_vm0, %v817_v45  ;;  %v815_v59 = vmax.f32 %v683_v54, %v783_v46  ;;  %v788_v63 = vmul.f32 0.1, %v704_v24  ;;  %v696_v16 = vadd.f32 %v11258_v37, %v695_v61  ;;  %v2475_v31 = vmul.bf16 %v11326_v55, %v1979_v56  ;;  %9916 = vmatpush3.bf16.msra.mxu0 %v11201_v22 }
 0x129   : > { %v9738_v38 = vpop.f32.mrf.mxu0  ;;  %v1429_v25 = vld [vmem:[#allocation2 + $0x39] sm:$0xff]  ;;  %9798 = vmatpush3.bf16.msra.mxu1 %v10600_v4  ;;  %9917 = vmatprep.subr.bf16.mxu0 %v10604_v23  ;;  %v10605_v4 = vld [vmem:[%s14092_s3 + $0x88] sm:$0xff]   ;;  %v11364_v46 = vcombine.low %v2076_v57, %v2088_v30  ;;  %v11366_v56 = vpack.c.bf16 %v1431_v39, %v1430_v18 }
 0x12a   : > { %v1951_v40 = vld [vmem:[#allocation2 + $0x32] sm:$0xff]  ;;  %v1952_v60 = vld [vmem:[#allocation2 + $0x3a] sm:$0xff]  ;;  %847 = vst.msk [vmem:[#allocation2 + $0x59] sm:$0xff] %vm310_vm0, %v815_v59  ;;  %v820_v54 = vmax.f32 %v704_v24, %v788_v63  ;;  %v786_v28 = vmul.f32 0.1, %v696_v16  ;;  %v707_v45 = vadd.f32 %v9738_v38, %v11258_v37  ;;  %9847 = vmatprep.mubr.msk.bf16.mxu0 %vm310_vm0, %v2475_v31  ;;  %v11356_v22 = vpack.c.bf16 %v1429_v25, %v1428_v1  ;;  %v1953_v57 = vld [vmem:[#allocation2 + $0x42] sm:$0xff] }
 0x12b   : > { %9799 = vmatprep.subr.bf16.mxu1 %v10601_v49  ;;  %14233 = vst [vmem:[#allocation28_spill] sm:$0xff] %v11364_v46  ;;  %v698_v24 = vpop.f32.mrf.mxu0  ;;  %v1980_v61 = vpack.c.bf16 %v1952_v60, %v1951_v40  ;;  %v11372_v1 = vcombine.low %v2100_v7, %v2112_v6  ;;  %v11385_v7 = vld [vmem:[%s14092_s3 + $0x78] sm:$0xff]   ;;  %v2124_v60 = vrot.slane %v11196_v21, %v11142_v42 }
 0x12c   : > { %852 = vst.msk [vmem:[#allocation2 + $0x81] sm:$0xff] %vm310_vm0, %v820_v54  ;;  %v818_v59 = vmax.f32 %v696_v16, %v786_v28  ;;  %v789_v63 = vmul.f32 0.1, %v707_v45  ;;  %v699_v31 = vadd.f32 %v11258_v37, %v698_v24  ;;  %9768 = vmatmul.mubr.msk.bf16.gmra.mxu1 %vm310_vm0, %v11356_v22  ;;  %9918 = vmatpush3.bf16.msra.mxu0 %v10604_v23  ;;  %v10606_v16 = vld [vmem:[%s14092_s3 + $0x80] sm:$0xff]  }
 0x12d   : > { %14234 = vst [vmem:[#allocation29_spill] sm:$0xff] %v11372_v1  ;;  %v9741_v38 = vpop.f32.mrf.mxu0  ;;  %9771 = vmatprep.mubr.msk.bf16.mxu1 %vm310_vm0, %v11366_v56  ;;  %v2476_v30 = vmul.bf16 %v11364_v46, %v1980_v61  ;;  %v1954_v39 = vld [vmem:[#allocation2 + $0x4a] sm:$0xff]  ;;  %9800 = vmatpush3.bf16.msra.mxu1 %v10601_v49  ;;  %v2136_v49 = vrot.slane %v11194_v20, %v11142_v42  ;;  %v11398_v20 = vld [vmem:[%s14092_s3 + $0xd8] sm:$0xff]  }
 0x12e   : > { %850 = vst.msk [vmem:[#allocation2 + $0x71] sm:$0xff] %vm310_vm0, %v818_v59  ;;  %v821_v25 = vmax.f32 %v707_v45, %v789_v63  ;;  %v787_v40 = vmul.f32 0.1, %v699_v31  ;;  %v720_v23 = vadd.f32 %v9741_v38, %v11258_v37  ;;  %v1981_v6 = vpack.c.bf16 %v1954_v39, %v1953_v57  ;;  %9801 = vmatprep.subr.bf16.mxu1 %v10602_v19  ;;  %v1432_v61 = vld [vmem:[#allocation2 + $0x51] sm:$0xff] }
 0x12f   : > { %9919 = vmatprep.subr.bf16.mxu0 %v10605_v4  ;;  %9848 = vmatmul.mubr.msk.bf16.gmra.mxu0 %vm310_vm0, %v2476_v30  ;;  %v711_v54 = vpop.f32.mrf.mxu0  ;;  %v1435_v59 = vld [vmem:[#allocation2 + $0x69] sm:$0xff]  ;;  %v2160_v21 = vrot.slane %v11212_v33, %v11142_v42  ;;  %v2148_v63 = vrot.slane %v11214_v34, %v11142_v42  ;;  %v1434_v33 = vld [vmem:[#allocation2 + $0x61] sm:$0xff]  ;;  %v11410_v34 = vcombine.low %v2124_v60, %v2136_v49 }
 0x130   : > { %853 = vst.msk [vmem:[#allocation2 + $0x89] sm:$0xff] %vm310_vm0, %v821_v25  ;;  %v819_v28 = vmax.f32 %v699_v31, %v787_v40  ;;  %v792_v45 = vmul.f32 0.1, %v720_v23  ;;  %v712_v18 = vadd.f32 %v11258_v37, %v711_v54  ;;  %v2477_v24 = vmul.bf16 %v11372_v1, %v1981_v6  ;;  %9920 = vmatpush3.bf16.msra.mxu0 %v10605_v4  ;;  %v1957_v60 = vld [vmem:[#allocation2 + $0x62] sm:$0xff] }
 0x131   : > { %v9742_v31 = vpop.f32.mrf.mxu0  ;;  %v1433_v38 = vld [vmem:[#allocation2 + $0x59] sm:$0xff]  ;;  %9802 = vmatpush3.bf16.msra.mxu1 %v10602_v19  ;;  %9921 = vmatprep.subr.bf16.mxu0 %v10606_v16  ;;  %14235 = vst [vmem:[#allocation30_spill] sm:$0xff] %v11410_v34  ;;  %v11412_v54 = vpack.c.bf16 %v1435_v59, %v1434_v33 }
 0x132   : > { %v1955_v30 = vld [vmem:[#allocation2 + $0x52] sm:$0xff]  ;;  %v1956_v57 = vld [vmem:[#allocation2 + $0x5a] sm:$0xff]  ;;  %851 = vst.msk [vmem:[#allocation2 + $0x79] sm:$0xff] %vm310_vm0, %v819_v28  ;;  %v824_v4 = vmax.f32 %v720_v23, %v792_v45  ;;  %v790_v39 = vmul.f32 0.1, %v712_v18  ;;  %v723_v25 = vadd.f32 %v9742_v31, %v11258_v37  ;;  %9851 = vmatprep.mubr.msk.bf16.mxu0 %vm310_vm0, %v2477_v24  ;;  %v11407_v40 = vpack.c.bf16 %v1433_v38, %v1432_v61 }
 0x133   : > { %9875 = vmatprep.subr.bf16.mxu1 %v11385_v7  ;;  %v714_v6 = vpop.f32.mrf.mxu0  ;;  %v1982_v19 = vpack.c.bf16 %v1956_v57, %v1955_v30  ;;  %v11418_v24 = vcombine.low %v2148_v63, %v2160_v21  ;;  %v2172_v21 = vrot.slane %v11218_v36, %v11142_v42 }
 0x134   : > { %856 = vst.msk [vmem:[#allocation2 + $0xa1] sm:$0xff] %vm310_vm0, %v824_v4  ;;  %v822_v28 = vmax.f32 %v712_v18, %v790_v39  ;;  %v793_v23 = vmul.f32 0.1, %v723_v25  ;;  %v715_v45 = vadd.f32 %v11258_v37, %v714_v6  ;;  %9772 = vmatmul.mubr.msk.bf16.gmra.mxu1 %vm310_vm0, %v11407_v40  ;;  %9922 = vmatpush3.bf16.msra.mxu0 %v10606_v16 }
 0x135   : > { %14236 = vst [vmem:[#allocation31_spill] sm:$0xff] %v11418_v24  ;;  %v9745_v61 = vpop.f32.mrf.mxu0  ;;  %9775 = vmatprep.mubr.msk.bf16.mxu1 %vm310_vm0, %v11412_v54  ;;  %v2478_v49 = vmul.bf16 %v11410_v34, %v1982_v19  ;;  %v1958_v59 = vld [vmem:[#allocation2 + $0x6a] sm:$0xff]  ;;  %9995 = vmatprep.subr.bf16.mxu0 %v11398_v20  ;;  %v2184_v16 = vrot.slane %v11216_v35, %v11142_v42 }
 0x136   : > { %854 = vst.msk [vmem:[#allocation2 + $0x91] sm:$0xff] %vm310_vm0, %v822_v28  ;;  %v825_v18 = vmax.f32 %v723_v25, %v793_v23  ;;  %v791_v31 = vmul.f32 0.1, %v715_v45  ;;  %v736_v38 = vadd.f32 %v9745_v61, %v11258_v37  ;;  %v1983_v30 = vpack.c.bf16 %v1958_v59, %v1957_v60  ;;  %v1436_v33 = vld [vmem:[#allocation2 + $0x71] sm:$0xff] }
 0x137   : > { %9852 = vmatmul.mubr.msk.bf16.gmra.mxu0 %vm310_vm0, %v2478_v49  ;;  %v727_v63 = vpop.f32.mrf.mxu0  ;;  %v1439_v6 = vld [vmem:[#allocation2 + $0x89] sm:$0xff]  ;;  %v2208_v19 = vrot.slane %v11228_v48, %v11142_v42  ;;  %v2196_v35 = vrot.slane %v11230_v50, %v11142_v42 }
 0x138   : > { %857 = vst.msk [vmem:[#allocation2 + $0xa9] sm:$0xff] %vm310_vm0, %v825_v18  ;;  %v823_v57 = vmax.f32 %v715_v45, %v791_v31  ;;  %v796_v4 = vmul.f32 0.1, %v736_v38  ;;  %v728_v39 = vadd.f32 %v11258_v37, %v727_v63  ;;  %v2479_v25 = vmul.bf16 %v11418_v24, %v1983_v30  ;;  %v1438_v18 = vld [vmem:[#allocation2 + $0x81] sm:$0xff] }
 0x139   : > { %v9746_v36 = vpop.f32.mrf.mxu0  ;;  %v1437_v28 = vld [vmem:[#allocation2 + $0x79] sm:$0xff]  ;;  %v11443_v31 = vcombine.low %v2172_v21, %v2184_v16  ;;  %v11445_v30 = vpack.c.bf16 %v1439_v6, %v1438_v18  ;;  %v1961_v21 = vld [vmem:[#allocation2 + $0x82] sm:$0xff]  ;;  %v2256_v18 = vrot.slane %v11244_v11, %v11142_v42 }
 0x13a   : > { %v1959_v23 = vld [vmem:[#allocation2 + $0x72] sm:$0xff]  ;;  %v1960_v61 = vld [vmem:[#allocation2 + $0x7a] sm:$0xff]  ;;  %855 = vst.msk [vmem:[#allocation2 + $0x99] sm:$0xff] %vm310_vm0, %v823_v57  ;;  %v828_v45 = vmax.f32 %v736_v38, %v796_v4  ;;  %v794_v49 = vmul.f32 0.1, %v728_v39  ;;  %v739_v60 = vadd.f32 %v9746_v36, %v11258_v37  ;;  %9855 = vmatprep.mubr.msk.bf16.mxu0 %vm310_vm0, %v2479_v25  ;;  %v11441_v59 = vpack.c.bf16 %v1437_v28, %v1436_v33 }
 0x13b   : > { %14237 = vst [vmem:[#allocation32_spill] sm:$0xff] %v11443_v31  ;;  %v730_v48 = vpop.f32.mrf.mxu0  ;;  %v1984_v50 = vpack.c.bf16 %v1960_v61, %v1959_v23  ;;  %v11451_v57 = vcombine.low %v2196_v35, %v2208_v19  ;;  %v2232_v28 = vrot.slane %v11232_v51, %v11142_v42  ;;  %v2220_v19 = vrot.slane %v11234_v58, %v11142_v42 }
 0x13c   : > { %860 = vst.msk [vmem:[#allocation2 + $0xc1] sm:$0xff] %vm310_vm0, %v828_v45  ;;  %v826_v63 = vmax.f32 %v728_v39, %v794_v49  ;;  %v797_v24 = vmul.f32 0.1, %v739_v60  ;;  %v731_v38 = vadd.f32 %v11258_v37, %v730_v48  ;;  %9776 = vmatmul.mubr.msk.bf16.gmra.mxu1 %vm310_vm0, %v11441_v59  ;;  %v2244_v51 = vrot.slane %v11246_v13, %v11142_v42 }
 0x13d   : > { %14238 = vst [vmem:[#allocation33_spill] sm:$0xff] %v11451_v57  ;;  %v9749_v4 = vpop.f32.mrf.mxu0  ;;  %9779 = vmatprep.mubr.msk.bf16.mxu1 %vm310_vm0, %v11445_v30  ;;  %v2480_v16 = vmul.bf16 %v11443_v31, %v1984_v50  ;;  %v1962_v25 = vld [vmem:[#allocation2 + $0x8a] sm:$0xff] }
 0x13e   : > { %858 = vst.msk [vmem:[#allocation2 + $0xb1] sm:$0xff] %vm310_vm0, %v826_v63  ;;  %v829_v33 = vmax.f32 %v739_v60, %v797_v24  ;;  %v795_v39 = vmul.f32 0.1, %v731_v38  ;;  %v752_v6 = vadd.f32 %v9749_v4, %v11258_v37  ;;  %v1985_v36 = vpack.c.bf16 %v1962_v25, %v1961_v21  ;;  %v1440_v49 = vld [vmem:[#allocation2 + $0x91] sm:$0xff]  ;;  %v1442_v25 = vld [vmem:[#allocation2 + $0xa1] sm:$0xff] }
 0x13f   : > { %9856 = vmatmul.mubr.msk.bf16.gmra.mxu0 %vm310_vm0, %v2480_v16  ;;  %v743_v35 = vpop.f32.mrf.mxu0  ;;  %v1443_v60 = vld [vmem:[#allocation2 + $0xa9] sm:$0xff] }
 0x140   : > { %861 = vst.msk [vmem:[#allocation2 + $0xc9] sm:$0xff] %vm310_vm0, %v829_v33  ;;  %v827_v23 = vmax.f32 %v731_v38, %v795_v39  ;;  %v800_v61 = vmul.f32 0.1, %v752_v6  ;;  %v744_v45 = vadd.f32 %v11258_v37, %v743_v35  ;;  %v2481_v24 = vmul.bf16 %v11451_v57, %v1985_v36 }
 0x141   : > { %v9750_v58 = vpop.f32.mrf.mxu0  ;;  %v1441_v48 = vld [vmem:[#allocation2 + $0x99] sm:$0xff]  ;;  %v11475_v33 = vcombine.low %v2220_v19, %v2232_v28  ;;  %v11477_v39 = vpack.c.bf16 %v1443_v60, %v1442_v25  ;;  %v1965_v19 = vld [vmem:[#allocation2 + $0xa2] sm:$0xff] }
 0x142   : > { %v1963_v50 = vld [vmem:[#allocation2 + $0x92] sm:$0xff]  ;;  %v1964_v63 = vld [vmem:[#allocation2 + $0x9a] sm:$0xff]  ;;  %859 = vst.msk [vmem:[#allocation2 + $0xb9] sm:$0xff] %vm310_vm0, %v827_v23  ;;  %v832_v38 = vmax.f32 %v752_v6, %v800_v61  ;;  %v798_v4 = vmul.f32 0.1, %v744_v45  ;;  %v755_v16 = vadd.f32 %v9750_v58, %v11258_v37  ;;  %9859 = vmatprep.mubr.msk.bf16.mxu0 %vm310_vm0, %v2481_v24  ;;  %v11473_v21 = vpack.c.bf16 %v1441_v48, %v1440_v49 }
 0x143   : > { %14239 = vst [vmem:[#allocation34_spill] sm:$0xff] %v11475_v33  ;;  %v746_v11 = vpop.f32.mrf.mxu0  ;;  %v1986_v13 = vpack.c.bf16 %v1964_v63, %v1963_v50  ;;  %v11483_v23 = vcombine.low %v2244_v51, %v2256_v18  ;;  %v2280_v48 = vrot.slane %v11248_v14, %v11142_v42  ;;  %v2268_v18 = vrot.slane %v11250_v15, %v11142_v42 }
 0x144   : > { %864 = vst.msk [vmem:[#allocation2 + $0xe1] sm:$0xff] %vm310_vm0, %v832_v38  ;;  %v830_v36 = vmax.f32 %v744_v45, %v798_v4  ;;  %v801_v35 = vmul.f32 0.1, %v755_v16  ;;  %v747_v6 = vadd.f32 %v11258_v37, %v746_v11  ;;  %9780 = vmatmul.mubr.msk.bf16.gmra.mxu1 %vm310_vm0, %v11473_v21  ;;  %v2304_v11 = vrot.slane %v11263_v43, %v11142_v42 }
 0x145   : > { %14240 = vst [vmem:[#allocation35_spill] sm:$0xff] %v11483_v23  ;;  %v9753_v61 = vpop.f32.mrf.mxu0  ;;  %9783 = vmatprep.mubr.msk.bf16.mxu1 %vm310_vm0, %v11477_v39  ;;  %v2482_v28 = vmul.bf16 %v11475_v33, %v1986_v13  ;;  %v1966_v24 = vld [vmem:[#allocation2 + $0xaa] sm:$0xff]  ;;  %v2292_v14 = vrot.slane %v11265_v44, %v11142_v42 }
 0x146   : > { %862 = vst.msk [vmem:[#allocation2 + $0xd1] sm:$0xff] %vm310_vm0, %v830_v36  ;;  %v833_v49 = vmax.f32 %v755_v16, %v801_v35  ;;  %v799_v45 = vmul.f32 0.1, %v747_v6  ;;  %v768_v60 = vadd.f32 %v9753_v61, %v11258_v37  ;;  %v1987_v58 = vpack.c.bf16 %v1966_v24, %v1965_v19  ;;  %v1444_v16 = vld [vmem:[#allocation2 + $0xb1] sm:$0xff]  ;;  %v1446_v24 = vld [vmem:[#allocation2 + $0xc1] sm:$0xff] }
 0x147   : > { %9860 = vmatmul.mubr.msk.bf16.gmra.mxu0 %vm310_vm0, %v2482_v28  ;;  %v759_v51 = vpop.f32.mrf.mxu0  ;;  %v1447_v25 = vld [vmem:[#allocation2 + $0xc9] sm:$0xff] }
 0x148   : > { %865 = vst.msk [vmem:[#allocation2 + $0xe9] sm:$0xff] %vm310_vm0, %v833_v49  ;;  %v831_v50 = vmax.f32 %v747_v6, %v799_v45  ;;  %v804_v63 = vmul.f32 0.1, %v768_v60  ;;  %v760_v38 = vadd.f32 %v11258_v37, %v759_v51  ;;  %v2483_v4 = vmul.bf16 %v11483_v23, %v1987_v58 }
 0x149   : > { %v9754_v15 = vpop.f32.mrf.mxu0  ;;  %v1445_v13 = vld [vmem:[#allocation2 + $0xb9] sm:$0xff]  ;;  %v11507_v49 = vcombine.low %v2268_v18, %v2280_v48  ;;  %v11509_v45 = vpack.c.bf16 %v1447_v25, %v1446_v24  ;;  %v2316_v48 = vrot.slane %v11271_v8, %v11142_v42  ;;  %v2344_v18 = vpop.permute.xlu1 %2343  ;;  %v11522_v25 = vcombine.low %v2292_v14, %v2304_v11 }
 0x14a   : > { %v1967_v36 = vld [vmem:[#allocation2 + $0xb2] sm:$0xff]  ;;  %v1968_v35 = vld [vmem:[#allocation2 + $0xba] sm:$0xff]  ;;  %863 = vst.msk [vmem:[#allocation2 + $0xd9] sm:$0xff] %vm310_vm0, %v831_v50  ;;  %v836_v6 = vmax.f32 %v768_v60, %v804_v63  ;;  %v802_v61 = vmul.f32 0.1, %v760_v38  ;;  %v771_v28 = vadd.f32 %v9754_v15, %v11258_v37  ;;  %9863 = vmatprep.mubr.msk.bf16.mxu0 %vm310_vm0, %v2483_v4  ;;  %v11505_v19 = vpack.c.bf16 %v1445_v13, %v1444_v16  ;;  %v2332_v63 = vpop.permute.xlu0 %2331 }
 0x14b   : > { %14241 = vst [vmem:[#allocation36_spill] sm:$0xff] %v11507_v49  ;;  %v762_v43 = vpop.f32.mrf.mxu0  ;;  %v1988_v44 = vpack.c.bf16 %v1968_v35, %v1967_v36  ;;  %v2328_v50 = vrot.slane %v11269_v2, %v11142_v42  ;;  %14242 = vst [vmem:[#allocation37_spill] sm:$0xff] %v11522_v25  ;;  %v2352_v14 = vrot.slane %v2344_v18, %v11142_v42  ;;  %v871_v18 = vld [vmem:[#allocation2 + $0x8] sm:$0xff] }
 0x14c   : > { %868 = vst.msk [vmem:[#allocation2 + $0x101] sm:$0xff] %vm310_vm0, %v836_v6  ;;  %v834_v58 = vmax.f32 %v760_v38, %v802_v61  ;;  %v805_v51 = vmul.f32 0.1, %v771_v28  ;;  %v763_v60 = vadd.f32 %v11258_v37, %v762_v43  ;;  %9784 = vmatmul.mubr.msk.bf16.gmra.mxu1 %vm310_vm0, %v11505_v19  ;;  %v1969_v38 = vld [vmem:[#allocation2 + $0xc2] sm:$0xff] }
 0x14d   : > { %9787 = vmatprep.mubr.msk.bf16.mxu1 %vm310_vm0, %v11509_v45  ;;  %v2484_v4 = vmul.bf16 %v11507_v49, %v1988_v44  ;;  %v1970_v16 = vld [vmem:[#allocation2 + $0xca] sm:$0xff]  ;;  %v11528_v6 = vcombine.low %v2316_v48, %v2328_v50  ;;  %v1450_v44 = vld [vmem:[#allocation2 + $0xe1] sm:$0xff] }
 0x14e   : > { %866 = vst.msk [vmem:[#allocation2 + $0xf1] sm:$0xff] %vm310_vm0, %v834_v58  ;;  %v837_v37 = vmax.f32 %v771_v28, %v805_v51  ;;  %v803_v15 = vmul.f32 0.1, %v763_v60  ;;  %v1989_v13 = vpack.c.bf16 %v1970_v16, %v1969_v38  ;;  %v1448_v36 = vld [vmem:[#allocation2 + $0xd1] sm:$0xff]  ;;  %v2340_v28 = vrot.slane %v2332_v63, %v11142_v42  ;;  %v2368_v51 = vpop.permute.xlu1 %2367  ;;  %v870_v48 = vld [vmem:[#allocation2] sm:$0xff] }
 0x14f   : > { %9864 = vmatmul.mubr.msk.bf16.gmra.mxu0 %vm310_vm0, %v2484_v4  ;;  %v1451_v35 = vld [vmem:[#allocation2 + $0xe9] sm:$0xff]  ;;  %14243 = vst [vmem:[#allocation38_spill] sm:$0xff] %v11528_v6 }
 0x150   : > { %869 = vst.msk [vmem:[#allocation2 + $0x109] sm:$0xff] %vm310_vm0, %v837_v37  ;;  %v835_v2 = vmax.f32 %v763_v60, %v803_v15  ;;  %v2485_v8 = vmul.bf16 %v11522_v25, %v1989_v13  ;;  %v2356_v60 = vpop.permute.xlu0 %2355  ;;  %v11536_v4 = vpack.c.bf16 %v1451_v35, %v1450_v44  ;;  %v1973_v63 = vld [vmem:[#allocation2 + $0xe2] sm:$0xff]  ;;  %v11543_v16 = vcombine.low %v2340_v28, %v2352_v14 }
 0x151   : > { %v1449_v61 = vld [vmem:[#allocation2 + $0xd9] sm:$0xff]  ;;  %v2376_v37 = vrot.slane %v2368_v51, %v11142_v42  ;;  %v2364_v15 = vrot.slane %v2356_v60, %v11142_v42  ;;  %v872_v60 = vld [vmem:[#allocation2 + $0x10] sm:$0xff] }
 0x152   : > { %v1971_v24 = vld [vmem:[#allocation2 + $0xd2] sm:$0xff]  ;;  %v1972_v11 = vld [vmem:[#allocation2 + $0xda] sm:$0xff]  ;;  %867 = vst.msk [vmem:[#allocation2 + $0xf9] sm:$0xff] %vm310_vm0, %v835_v2  ;;  %9867 = vmatprep.mubr.msk.bf16.mxu0 %vm310_vm0, %v2485_v8  ;;  %v11534_v43 = vpack.c.bf16 %v1449_v61, %v1448_v36  ;;  %14244 = vst [vmem:[#allocation39_spill] sm:$0xff] %v11543_v16  ;;  %v902_v2 = vpack.c.bf16 %v871_v18, %v870_v48 }
 0x153   : > { %v1990_v58 = vpack.c.bf16 %v1972_v11, %v1971_v24  ;;  %v11549_v11 = vcombine.low %v2364_v15, %v2376_v37  ;;  %v873_v42 = vld [vmem:[#allocation2 + $0x18] sm:$0xff]  ;;  %v874_v51 = vld [vmem:[#allocation2 + $0x20] sm:$0xff]  ;;  %v875_v48 = vld [vmem:[#allocation2 + $0x28] sm:$0xff] }
 0x154   : > { %9788 = vmatmul.mubr.msk.bf16.gmra.mxu1 %vm310_vm0, %v11534_v43  ;;  %v1398_v44 = vmul.bf16 %v11156_v53, %v902_v2  ;;  %v11562_v18 = vpack.c.bf16 %v875_v48, %v874_v51  ;;  %v877_v15 = vld [vmem:[#allocation2 + $0x38] sm:$0xff]  ;;  %v876_v2 = vld [vmem:[#allocation2 + $0x30] sm:$0xff]  ;;  %v883_v51 = vld [vmem:[#allocation2 + $0x68] sm:$0xff] }
 0x155   : > { %v2486_v50 = vmul.bf16 %v11528_v6, %v1990_v58  ;;  %9791 = vmatprep.mubr.msk.bf16.mxu1 %vm310_vm0, %v11536_v4  ;;  %v1974_v38 = vld [vmem:[#allocation2 + $0xea] sm:$0xff]  ;;  %14245 = vst [vmem:[#allocation40_spill] sm:$0xff] %v11549_v11 }
 0x156   : > { %v1991_v13 = vpack.c.bf16 %v1974_v38, %v1973_v63  ;;  %v1452_v36 = vld [vmem:[#allocation2 + $0xf1] sm:$0xff]  ;;  %v1400_v37 = vmul.bf16 %v11168_v62, %v11562_v18 }
 0x157   : > { %9868 = vmatmul.mubr.msk.bf16.gmra.mxu0 %vm310_vm0, %v2486_v50  ;;  %v11559_v50 = vpack.c.bf16 %v873_v42, %v872_v60  ;;  %v10608_v38 = vld [vmem:[%s14092_s3 + $0x70] sm:$0xff]   ;;  %v10614_v42 = vld [vmem:[%s14092_s3 + $0xc0] sm:$0xff]   ;;  %v11611_v60 = vld [vmem:[%s14092_s3 + $0xb8] sm:$0xff]  }
 0x158   : > { %v2487_v8 = vmul.bf16 %v11543_v16, %v1991_v13  ;;  %v878_v13 = vld [vmem:[#allocation2 + $0x40] sm:$0xff] }
 0x159   : > { %v1453_v35 = vld [vmem:[#allocation2 + $0xf9] sm:$0xff]  ;;  %v1399_v63 = vmul.bf16 %v11154_v52, %v11559_v50 }
 0x15a   : > { %v1975_v61 = vld [vmem:[#allocation2 + $0xf2] sm:$0xff]  ;;  %v1976_v24 = vld [vmem:[#allocation2 + $0xfa] sm:$0xff]  ;;  %9871 = vmatprep.mubr.msk.bf16.mxu0 %vm310_vm0, %v2487_v8  ;;  %v11552_v14 = vpack.c.bf16 %v1453_v35, %v1452_v36  ;;  %v11579_v8 = vpack.c.bf16 %v877_v15, %v876_v2  ;;  %v879_v36 = vld [vmem:[#allocation2 + $0x48] sm:$0xff] }
 0x15b   : > { %v1992_v28 = vpack.c.bf16 %v1976_v24, %v1975_v61  ;;  %v10609_v35 = vld [vmem:[%s14092_s3 + $0x68] sm:$0xff]   ;;  %v11586_v61 = vpack.c.bf16 %v879_v36, %v878_v13  ;;  %v10610_v24 = vld [vmem:[%s14092_s3 + $0x60] sm:$0xff]   ;;  %v884_v15 = vld [vmem:[#allocation2 + $0x70] sm:$0xff] }
 0x15c   : > { %9792 = vmatmul.mubr.msk.bf16.gmra.mxu1 %vm310_vm0, %v11552_v14  ;;  %v887_v2 = vld [vmem:[#allocation2 + $0x88] sm:$0xff] }
 0x15d   : > { %v2488_v58 = vmul.bf16 %v11549_v11, %v1992_v28  ;;  %9803 = vmatprep.mubr.msk.bf16.mxu1 %vm310_vm0, %v1398_v44  ;;  %v1402_v28 = vmul.bf16 %v11184_v12, %v11586_v61  ;;  %v880_v44 = vld [vmem:[#allocation2 + $0x50] sm:$0xff] }
 0x15f   : > { %9872 = vmatmul.mubr.msk.bf16.gmra.mxu0 %vm310_vm0, %v2488_v58 }
 0x160   : > { %9923 = vmatprep.mubr.msk.bf16.mxu0 %vm310_vm0, %v11313_v9  ;;  %v10612_v9 = vld [vmem:[%s14092_s3 + $0xd0] sm:$0xff]  }
 0x164   : > { %9804 = vmatmul.mubr.msk.bf16.vlgmr.msra.gmra.mxu1 %vm310_vm0, %v1399_v63  ;;  %v11622_v63 = vld [vmem:[%s14092_s3 + $0x118] sm:$0xff]  }
 0x165   : > { %9876 = vmatpush3.bf16.msra.mxu1 %v11385_v7  ;;  %9807 = vmatprep.mubr.msk.bf16.mxu1 %vm310_vm0, %v1400_v37  ;;  %v1401_v7 = vmul.bf16 %v11172_v3, %v11579_v8  ;;  %v885_v37 = vld [vmem:[#allocation2 + $0x78] sm:$0xff] }
 0x166   : > { %9877 = vmatprep.subr.bf16.mxu1 %v10608_v38  ;;  %v11632_v13 = vpack.c.bf16 %v885_v37, %v884_v15  ;;  %v898_v15 = vld [vmem:[#allocation2 + $0xe0] sm:$0xff] }
 0x167   : > { %9924 = vmatmul.mubr.msk.bf16.vlgmr.msra.gmra.mxu0 %vm310_vm0, %v11320_v29  ;;  %v10613_v29 = vld [vmem:[%s14092_s3 + $0xc8] sm:$0xff]  }
 0x168   : > { %9927 = vmatprep.mubr.msk.bf16.mxu0 %vm310_vm0, %v11356_v22  ;;  %9996 = vmatpush3.bf16.msra.mxu0 %v11398_v20  ;;  %v881_v22 = vld [vmem:[#allocation2 + $0x58] sm:$0xff]  ;;  %v882_v20 = vld [vmem:[#allocation2 + $0x60] sm:$0xff]  ;;  %v1405_v36 = vmul.bf16 %v11210_v32, %v11632_v13 }
 0x169   : > { %9878 = vmatpush3.bf16.msra.mxu1 %v10608_v38  ;;  %9997 = vmatprep.subr.bf16.mxu0 %v10612_v9  ;;  %v11606_v58 = vpack.c.bf16 %v881_v22, %v880_v44  ;;  %v11615_v48 = vpack.c.bf16 %v883_v51, %v882_v20  ;;  %v893_v44 = vld [vmem:[#allocation2 + $0xb8] sm:$0xff]  ;;  %v892_v51 = vld [vmem:[#allocation2 + $0xb0] sm:$0xff] }
 0x16a   : > { %9879 = vmatprep.subr.bf16.mxu1 %v10609_v35 }
 0x16b   : > { %v1403_v38 = vmul.bf16 %v11188_v17, %v11606_v58 }
 0x16c   : > { %9808 = vmatmul.mubr.msk.bf16.gmra.mxu1 %vm310_vm0, %v1401_v7  ;;  %9998 = vmatpush3.bf16.msra.mxu0 %v10612_v9  ;;  %v889_v7 = vld [vmem:[#allocation2 + $0x98] sm:$0xff] }
 0x16d   : > { %9811 = vmatprep.mubr.msk.bf16.mxu1 %vm310_vm0, %v1402_v28  ;;  %9880 = vmatpush3.bf16.msra.mxu1 %v10609_v35 }
 0x16e   : > { %9881 = vmatprep.subr.bf16.mxu1 %v10610_v24  ;;  %9999 = vmatprep.subr.bf16.mxu0 %v10613_v29 }
 0x16f   : > { %9928 = vmatmul.mubr.msk.bf16.gmra.mxu0 %vm310_vm0, %v11366_v56  ;;  %v1404_v56 = vmul.bf16 %v11206_v27, %v11615_v48 }
 0x170   : > { %9931 = vmatprep.mubr.msk.bf16.mxu0 %vm310_vm0, %v11407_v40  ;;  %10000 = vmatpush3.bf16.msra.mxu0 %v10613_v29  ;;  %v886_v40 = vld [vmem:[#allocation2 + $0x80] sm:$0xff]  ;;  %v888_v29 = vld [vmem:[#allocation2 + $0x90] sm:$0xff] }
 0x171   : > { %9882 = vmatpush3.bf16.msra.mxu1 %v10610_v24  ;;  %10001 = vmatprep.subr.bf16.mxu0 %v10614_v42  ;;  %v11636_v9 = vpack.c.bf16 %v887_v2, %v886_v40  ;;  %v890_v24 = vld [vmem:[#allocation2 + $0xa0] sm:$0xff]  ;;  %v11646_v28 = vpack.c.bf16 %v889_v7, %v888_v29  ;;  %v897_v40 = vld [vmem:[#allocation2 + $0xd8] sm:$0xff]  ;;  %v896_v2 = vld [vmem:[#allocation2 + $0xd0] sm:$0xff] }
 0x172   : > { %9955 = vmatprep.subr.bf16.mxu1 %v11611_v60 }
 0x173   : > { %v1406_v35 = vmul.bf16 %v11222_v41, %v11636_v9  ;;  %v1407_v22 = vmul.bf16 %v11226_v47, %v11646_v28 }
 0x174   : > { %9812 = vmatmul.mubr.msk.bf16.gmra.mxu1 %vm310_vm0, %v1403_v38  ;;  %10002 = vmatpush3.bf16.msra.mxu0 %v10614_v42  ;;  %v894_v42 = vld [vmem:[#allocation2 + $0xc0] sm:$0xff]  ;;  %v11660_v38 = vpack.c.bf16 %v893_v44, %v892_v51  ;;  %v3132_v44 = vld [vmem:[#allocation2 + $0x109] sm:$0xff] }
 0x175   : > { %9815 = vmatprep.mubr.msk.bf16.mxu1 %vm310_vm0, %v1404_v56  ;;  %10075 = vmatprep.subr.bf16.mxu0 %v11622_v63  ;;  %v3131_v51 = vld [vmem:[#allocation2 + $0x101] sm:$0xff] }
 0x176   : > { %v1409_v56 = vmul.bf16 %v11242_v10, %v11660_v38 }
 0x177   : > { %9932 = vmatmul.mubr.msk.bf16.gmra.mxu0 %vm310_vm0, %v11412_v54  ;;  %v891_v54 = vld [vmem:[#allocation2 + $0xa8] sm:$0xff] }
 0x178   : > { %9935 = vmatprep.mubr.msk.bf16.mxu0 %vm310_vm0, %v11441_v59  ;;  %v11650_v59 = vpack.c.bf16 %v891_v54, %v890_v24  ;;  %v14247_v24 = vld [vmem:[#allocation23_spill] sm:$0xff] }
 0x179   : > { %v901_v54 = vld [vmem:[#allocation2 + $0xf8] sm:$0xff] }
 0x17a   : > { %v1408_v20 = vmul.bf16 %v11238_v0, %v11650_v59 }
 0x17c   : > { %9816 = vmatmul.mubr.msk.bf16.gmra.mxu1 %vm310_vm0, %v1405_v36  ;;  %v11674_v36 = vpack.c.bf16 %v897_v40, %v896_v2  ;;  %v3811_v40 = vmul.bf16 %v11168_v62, %v11586_v61  ;;  %v10621_v2 = vld [vmem:[%s14092_s3 + $0x108] sm:$0xff]  }
 0x17d   : > { %9819 = vmatprep.mubr.msk.bf16.mxu1 %vm310_vm0, %v1406_v35  ;;  %v14246_v35 = vld [vmem:[#allocation22_spill] sm:$0xff] }
 0x17e   : > { %v1411_v7 = vmul.bf16 %v14246_v35, %v11674_v36 }
 0x17f   : > { %9936 = vmatmul.mubr.msk.bf16.gmra.mxu0 %vm310_vm0, %v11445_v30  ;;  %v895_v30 = vld [vmem:[#allocation2 + $0xc8] sm:$0xff] }
 0x180   : > { %9939 = vmatprep.mubr.msk.bf16.mxu0 %vm310_vm0, %v11473_v21  ;;  %v11664_v21 = vpack.c.bf16 %v895_v30, %v894_v42  ;;  %v2811_v42 = vmul.bf16 %v11156_v53, %v11559_v50  ;;  %v3148_v30 = vpack.c.bf16 %v3132_v44, %v3131_v51  ;;  %v2813_v50 = vmul.bf16 %v11168_v62, %v11579_v8 }
 0x181   : > { %v2819_v44 = vmul.bf16 %v11222_v41, %v11646_v28  ;;  %v2821_v51 = vmul.bf16 %v11238_v0, %v11660_v38 }
 0x182   : > { %v1410_v37 = vmul.bf16 %v11254_v26, %v11664_v21 }
 0x184   : > { %9820 = vmatmul.mubr.msk.bf16.gmra.mxu1 %vm310_vm0, %v1407_v22  ;;  %v900_v22 = vld [vmem:[#allocation2 + $0xf0] sm:$0xff] }
 0x185   : > { %9823 = vmatprep.mubr.msk.bf16.mxu1 %vm310_vm0, %v1408_v20  ;;  %v11688_v20 = vpack.c.bf16 %v901_v54, %v900_v22  ;;  %v2817_v54 = vmul.bf16 %v11206_v27, %v11632_v13  ;;  %v3814_v22 = vmul.bf16 %v11188_v17, %v11632_v13  ;;  %v3816_v13 = vmul.bf16 %v11210_v32, %v11646_v28 }
 0x186   : > { %v3818_v28 = vmul.bf16 %v11226_v47, %v11660_v38  ;;  %v3820_v38 = vmul.bf16 %v11242_v10, %v11674_v36 }
 0x187   : > { %9940 = vmatmul.mubr.msk.bf16.gmra.mxu0 %vm310_vm0, %v11477_v39  ;;  %v899_v39 = vld [vmem:[#allocation2 + $0xe8] sm:$0xff] }
 0x188   : > { %9943 = vmatprep.mubr.msk.bf16.mxu0 %vm310_vm0, %v11505_v19  ;;  %v11678_v19 = vpack.c.bf16 %v899_v39, %v898_v15  ;;  %v10617_v15 = vld [vmem:[%s14092_s3 + $0xa8] sm:$0xff]   ;;  %v2815_v39 = vmul.bf16 %v11184_v12, %v11606_v58 }
 0x18a   : > { %v1412_v29 = vmul.bf16 %v14247_v24, %v11678_v19 }
 0x18c   : > { %9824 = vmatmul.mubr.msk.bf16.gmra.mxu1 %vm310_vm0, %v1409_v56  ;;  %v3809_v56 = vmul.bf16 %v11156_v53, %v11562_v18 }
 0x18d   : > { %9827 = vmatprep.mubr.msk.bf16.mxu1 %vm310_vm0, %v1410_v37  ;;  %v3810_v37 = vmul.bf16 %v11154_v52, %v11579_v8  ;;  %v2814_v8 = vmul.bf16 %v11172_v3, %v11586_v61  ;;  %v3812_v61 = vmul.bf16 %v11172_v3, %v11606_v58  ;;  %v2816_v58 = vmul.bf16 %v11188_v17, %v11615_v48  ;;  %v4450_v17 = vld [vmem:[#allocation2 + $0x10a] sm:$0xff] }
 0x18f   : > { %9944 = vmatmul.mubr.msk.bf16.gmra.mxu0 %vm310_vm0, %v11509_v45  ;;  %v14248_v45 = vld [vmem:[#allocation25_spill] sm:$0xff] }
 0x190   : > { %9947 = vmatprep.mubr.msk.bf16.mxu0 %vm310_vm0, %v11534_v43  ;;  %v1413_v43 = vmul.bf16 %v14248_v45, %v11688_v20 }
 0x194   : > { %9828 = vmatmul.mubr.msk.bf16.gmra.mxu1 %vm310_vm0, %v1411_v7  ;;  %v3813_v7 = vmul.bf16 %v11184_v12, %v11615_v48  ;;  %v2818_v48 = vmul.bf16 %v11210_v32, %v11636_v9 }
 0x195   : > { %9831 = vmatprep.mubr.msk.bf16.mxu1 %vm310_vm0, %v1412_v29  ;;  %v11749_v29 = vld [vmem:[%s14092_s3 + $0xf8] sm:$0xff]  }
 0x197   : > { %9948 = vmatmul.mubr.msk.bf16.gmra.mxu0 %vm310_vm0, %v11536_v4  ;;  %v2812_v4 = vmul.bf16 %v11154_v52, %v11562_v18  ;;  %v10620_v18 = vld [vmem:[%s14092_s3 + $0x110] sm:$0xff]  }
 0x198   : > { %9951 = vmatprep.mubr.msk.bf16.mxu0 %vm310_vm0, %v11552_v14  ;;  %v10616_v14 = vld [vmem:[%s14092_s3 + $0xb0] sm:$0xff]  }
 0x19c   : > { %9832 = vmatmul.mubr.msk.bf16.gmra.mxu1 %vm310_vm0, %v1413_v43  ;;  %v3815_v43 = vmul.bf16 %v11206_v27, %v11636_v9  ;;  %v2820_v9 = vmul.bf16 %v11226_v47, %v11650_v59  ;;  %v4449_v27 = vld [vmem:[#allocation2 + $0x102] sm:$0xff] }
 0x19d   : > { %9883 = vmatprep.mubr.msk.bf16.mxu1 %vm310_vm0, %v2811_v42  ;;  %v3817_v42 = vmul.bf16 %v11222_v41, %v11650_v59  ;;  %v2822_v59 = vmul.bf16 %v11242_v10, %v11664_v21 }
 0x19f   : > { %9952 = vmatmul.mubr.msk.bf16.gmra.mxu0 %vm310_vm0, %v3148_v30  ;;  %v3819_v30 = vmul.bf16 %v11238_v0, %v11664_v21  ;;  %v2824_v21 = vmul.bf16 %v14246_v35, %v11678_v19  ;;  %v4445_v0 = vld [vmem:[#allocation2 + $0xe2] sm:$0xff] }
 0x1a0   : > { %10003 = vmatprep.mubr.msk.bf16.mxu0 %vm310_vm0, %v3809_v56  ;;  %v2823_v56 = vmul.bf16 %v11254_v26, %v11674_v36  ;;  %v3424_v36 = vld [vmem:[#allocation2 + $0x1a] sm:$0xff] }
 0x1a4   : > { %9884 = vmatmul.mubr.msk.bf16.vlgmr.msra.gmra.mxu1 %vm310_vm0, %v2812_v4  ;;  %v3821_v4 = vmul.bf16 %v11254_v26, %v11678_v19  ;;  %v4446_v26 = vld [vmem:[#allocation2 + $0xea] sm:$0xff] }
 0x1a5   : > { %9956 = vmatpush3.bf16.msra.mxu1 %v11611_v60  ;;  %9887 = vmatprep.mubr.msk.bf16.mxu1 %vm310_vm0, %v2813_v50  ;;  %v10618_v60 = vld [vmem:[%s14092_s3 + $0xa0] sm:$0xff]   ;;  %v3790_v50 = vld [vmem:[#allocation2 + $0x108] sm:$0xff] }
 0x1a6   : > { %9957 = vmatprep.subr.bf16.mxu1 %v10616_v14 }
 0x1a7   : > { %10004 = vmatmul.mubr.msk.bf16.vlgmr.msra.gmra.mxu0 %vm310_vm0, %v3810_v37 }
 0x1a8   : > { %10007 = vmatprep.mubr.msk.bf16.mxu0 %vm310_vm0, %v3811_v40  ;;  %10076 = vmatpush3.bf16.msra.mxu0 %v11622_v63  ;;  %v10622_v63 = vld [vmem:[%s14092_s3 + $0x100] sm:$0xff]   ;;  %v3423_v40 = vld [vmem:[#allocation2 + $0x12] sm:$0xff] }
 0x1a9   : > { %9958 = vmatpush3.bf16.msra.mxu1 %v10616_v14  ;;  %10077 = vmatprep.subr.bf16.mxu0 %v10620_v18  ;;  %v3789_v14 = vld [vmem:[#allocation2 + $0x100] sm:$0xff]  ;;  %v3455_v19 = vpack.c.bf16 %v3424_v36, %v3423_v40  ;;  %v4430_v36 = vld [vmem:[#allocation2 + $0x6a] sm:$0xff] }
 0x1aa   : > { %9959 = vmatprep.subr.bf16.mxu1 %v10617_v15  ;;  %v3807_v37 = vpack.c.bf16 %v3790_v50, %v3789_v14 }
 0x1ac   : > { %9888 = vmatmul.mubr.msk.bf16.gmra.mxu1 %vm310_vm0, %v2814_v8  ;;  %10078 = vmatpush3.bf16.msra.mxu0 %v10620_v18  ;;  %v2825_v18 = vmul.bf16 %v14247_v24, %v11688_v20  ;;  %v3823_v8 = vmul.bf16 %v14247_v24, %v3807_v37 }
 0x1ad   : > { %9891 = vmatprep.mubr.msk.bf16.mxu1 %vm310_vm0, %v2815_v39  ;;  %9960 = vmatpush3.bf16.msra.mxu1 %v10617_v15  ;;  %v3822_v15 = vmul.bf16 %v14246_v35, %v11688_v20  ;;  %v4422_v39 = vld [vmem:[#allocation2 + $0x2a] sm:$0xff]  ;;  %v3427_v20 = vld [vmem:[#allocation2 + $0x32] sm:$0xff] }
 0x1ae   : > { %9961 = vmatprep.subr.bf16.mxu1 %v10618_v60  ;;  %10079 = vmatprep.subr.bf16.mxu0 %v10621_v2 }
 0x1af   : > { %10008 = vmatmul.mubr.msk.bf16.gmra.mxu0 %vm310_vm0, %v3812_v61 }
 0x1b0   : > { %10011 = vmatprep.mubr.msk.bf16.mxu0 %vm310_vm0, %v3813_v7  ;;  %10080 = vmatpush3.bf16.msra.mxu0 %v10621_v2  ;;  %v3792_v2 = vld [vmem:[#allocation2 + $0x118] sm:$0xff]  ;;  %v2826_v7 = vmul.bf16 %v14248_v45, %v3807_v37  ;;  %v10625_v37 = vld [vmem:[%s14092_s3 + $0xe8] sm:$0xff]  }
 0x1b1   : > { %9962 = vmatpush3.bf16.msra.mxu1 %v10618_v60  ;;  %10081 = vmatprep.subr.bf16.mxu0 %v10622_v63  ;;  %v3791_v60 = vld [vmem:[#allocation2 + $0x110] sm:$0xff] }
 0x1b2   : > { %10035 = vmatprep.subr.bf16.mxu1 %v11749_v29  ;;  %v3808_v61 = vpack.c.bf16 %v3792_v2, %v3791_v60 }
 0x1b4   : > { %9892 = vmatmul.mubr.msk.bf16.gmra.mxu1 %vm310_vm0, %v2816_v58  ;;  %10082 = vmatpush3.bf16.msra.mxu0 %v10622_v63  ;;  %v4421_v63 = vld [vmem:[#allocation2 + $0x22] sm:$0xff] }
 0x1b5   : > { %9895 = vmatprep.mubr.msk.bf16.mxu1 %vm310_vm0, %v2817_v54  ;;  %v4453_v58 = vpack.c.bf16 %v4422_v39, %v4421_v63  ;;  %v14249_v54 = vld [vmem:[#allocation24_spill] sm:$0xff] }
 0x1b6   : > { %v10626_v39 = vld [vmem:[%s14092_s3 + $0xe0] sm:$0xff]  }
 0x1b7   : > { %10012 = vmatmul.mubr.msk.bf16.gmra.mxu0 %vm310_vm0, %v3814_v22  ;;  %v3471_v22 = vmul.bf16 %v14249_v54, %v3455_v19 }
 0x1b8   : > { %10015 = vmatprep.mubr.msk.bf16.mxu0 %vm310_vm0, %v3815_v43  ;;  %v3428_v43 = vld [vmem:[#allocation2 + $0x3a] sm:$0xff] }
 0x1bc   : > { %9896 = vmatmul.mubr.msk.bf16.gmra.mxu1 %vm310_vm0, %v2818_v48  ;;  %v3824_v48 = vmul.bf16 %v14248_v45, %v3808_v61  ;;  %v4441_v45 = vld [vmem:[#allocation2 + $0xc2] sm:$0xff] }
 0x1bd   : > { %9899 = vmatprep.mubr.msk.bf16.mxu1 %vm310_vm0, %v2819_v44  ;;  %v4469_v44 = vmul.bf16 %v14249_v54, %v4453_v58 }
 0x1bf   : > { %10016 = vmatmul.mubr.msk.bf16.gmra.mxu0 %vm310_vm0, %v3816_v13  ;;  %v3457_v13 = vpack.c.bf16 %v3428_v43, %v3427_v20 }
 0x1c0   : > { %10019 = vmatprep.mubr.msk.bf16.mxu0 %vm310_vm0, %v3817_v42  ;;  %v4426_v42 = vld [vmem:[#allocation2 + $0x4a] sm:$0xff] }
 0x1c1   : > { %v4470_v14 = vmul.bf16 %v11318_v5, %v3457_v13 }
 0x1c4   : > { %9900 = vmatmul.mubr.msk.bf16.gmra.mxu1 %vm310_vm0, %v2820_v9  ;;  %v4425_v9 = vld [vmem:[#allocation2 + $0x42] sm:$0xff] }
 0x1c5   : > { %9903 = vmatprep.mubr.msk.bf16.mxu1 %vm310_vm0, %v2821_v51  ;;  %v3472_v51 = vmul.bf16 %v11318_v5, %v4453_v58  ;;  %v3435_v58 = vld [vmem:[#allocation2 + $0x72] sm:$0xff] }
 0x1c7   : > { %10020 = vmatmul.mubr.msk.bf16.gmra.mxu0 %vm310_vm0, %v3818_v28  ;;  %v4455_v28 = vpack.c.bf16 %v4426_v42, %v4425_v9  ;;  %v4434_v9 = vld [vmem:[#allocation2 + $0x8a] sm:$0xff] }
 0x1c8   : > { %10023 = vmatprep.mubr.msk.bf16.mxu0 %vm310_vm0, %v3819_v30  ;;  %v10624_v30 = vld [vmem:[%s14092_s3 + $0xf0] sm:$0xff]  }
 0x1c9   : > { %v3474_v2 = vmul.bf16 %v11364_v46, %v4455_v28 }
 0x1cc   : > { %9904 = vmatmul.mubr.msk.bf16.gmra.mxu1 %vm310_vm0, %v2822_v59  ;;  %v3473_v59 = vmul.bf16 %v11326_v55, %v3457_v13 }
 0x1cd   : > { %9907 = vmatprep.mubr.msk.bf16.mxu1 %vm310_vm0, %v2823_v56 }
 0x1cf   : > { %10024 = vmatmul.mubr.msk.bf16.gmra.mxu0 %vm310_vm0, %v3820_v38  ;;  %v3431_v38 = vld [vmem:[#allocation2 + $0x52] sm:$0xff] }
 0x1d0   : > { %10027 = vmatprep.mubr.msk.bf16.mxu0 %vm310_vm0, %v3821_v4  ;;  %v3432_v4 = vld [vmem:[#allocation2 + $0x5a] sm:$0xff] }
 0x1d1   : > { %v3459_v40 = vpack.c.bf16 %v3432_v4, %v3431_v38 }
 0x1d3   : > { %v3475_v63 = vmul.bf16 %v11372_v1, %v3459_v40  ;;  %v4472_v43 = vmul.bf16 %v11364_v46, %v3459_v40 }
 0x1d4   : > { %9908 = vmatmul.mubr.msk.bf16.gmra.mxu1 %vm310_vm0, %v2824_v21  ;;  %v4471_v21 = vmul.bf16 %v11326_v55, %v4455_v28  ;;  %v4442_v55 = vld [vmem:[#allocation2 + $0xca] sm:$0xff] }
 0x1d5   : > { %9911 = vmatprep.mubr.msk.bf16.mxu1 %vm310_vm0, %v2825_v18 }
 0x1d7   : > { %10028 = vmatmul.mubr.msk.bf16.gmra.mxu0 %vm310_vm0, %v3822_v15 }
 0x1d8   : > { %10031 = vmatprep.mubr.msk.bf16.mxu0 %vm310_vm0, %v3823_v8  ;;  %v4429_v8 = vld [vmem:[#allocation2 + $0x62] sm:$0xff] }
 0x1d9   : > { %v4457_v19 = vpack.c.bf16 %v4430_v36, %v4429_v8  ;;  %v3439_v36 = vld [vmem:[#allocation2 + $0x92] sm:$0xff]  ;;  %v3440_v8 = vld [vmem:[#allocation2 + $0x9a] sm:$0xff] }
 0x1db   : > { %v3476_v38 = vmul.bf16 %v11410_v34, %v4457_v19 }
 0x1dc   : > { %9912 = vmatmul.mubr.msk.bf16.gmra.mxu1 %vm310_vm0, %v2826_v7 }
 0x1dd   : > { %9963 = vmatprep.mubr.msk.bf16.mxu1 %vm310_vm0, %v3471_v22  ;;  %v3436_v22 = vld [vmem:[#allocation2 + $0x7a] sm:$0xff] }
 0x1de   : > { %v3461_v42 = vpack.c.bf16 %v3436_v22, %v3435_v58  ;;  %v3463_v22 = vpack.c.bf16 %v3440_v8, %v3439_v36  ;;  %v3443_v36 = vld [vmem:[#allocation2 + $0xb2] sm:$0xff]  ;;  %v3444_v8 = vld [vmem:[#allocation2 + $0xba] sm:$0xff] }
 0x1df   : > { %10032 = vmatmul.mubr.msk.bf16.gmra.mxu0 %vm310_vm0, %v3824_v48 }
 0x1e0   : > { %10083 = vmatprep.mubr.msk.bf16.mxu0 %vm310_vm0, %v4469_v44  ;;  %v4473_v44 = vmul.bf16 %v11372_v1, %v4457_v19 }
 0x1e4   : > { %v11826_v56 = vpop.f32.mrf.mxu1  ;;  %9964 = vmatmul.mubr.msk.bf16.vlgmr.msra.gmra.mxu1 %vm310_vm0, %v3472_v51 }
 0x1e5   : > { %10036 = vmatpush3.bf16.msra.mxu1 %v11749_v29  ;;  %9967 = vmatprep.mubr.msk.bf16.mxu1 %vm310_vm0, %v3473_v59 }
 0x1e6   : > { %v11832_v50 = vpop.f32.mrf.mxu1  ;;  %10037 = vmatprep.subr.bf16.mxu1 %v10624_v30 }
 0x1e7   : > { %v11838_v18 = vpop.f32.mrf.mxu0  ;;  %10084 = vmatmul.mubr.msk.bf16.vlgmr.msra.gmra.mxu0 %vm310_vm0, %v4470_v14 }
 0x1e8   : > { %10087 = vmatprep.mubr.msk.bf16.mxu0 %vm310_vm0, %v4471_v21  ;;  %v11842_v29 = vpop.f32.mrf.mxu1  ;;  %v14250_v21 = vld [vmem:[#allocation31_spill] sm:$0xff] }
 0x1e9   : > { %v11844_v15 = vpop.f32.mrf.mxu0  ;;  %10038 = vmatpush3.bf16.msra.mxu1 %v10624_v30  ;;  %v4433_v30 = vld [vmem:[#allocation2 + $0x82] sm:$0xff] }
 0x1ea   : > { %v11846_v60 = vpop.f32.mrf.mxu1  ;;  %10039 = vmatprep.subr.bf16.mxu1 %v10625_v37  ;;  %v4459_v4 = vpack.c.bf16 %v4434_v9, %v4433_v30  ;;  %v4437_v30 = vld [vmem:[#allocation2 + $0xa2] sm:$0xff] }
 0x1eb   : > { %v11852_v61 = vpop.f32.mrf.mxu0 }
 0x1ec   : > { %v11855_v7 = vpop.f32.mrf.mxu1  ;;  %9968 = vmatmul.mubr.msk.bf16.gmra.mxu1 %vm310_vm0, %v3474_v2  ;;  %v4475_v19 = vmul.bf16 %v14250_v21, %v4459_v4 }
 0x1ed   : > { %v11858_v20 = vpop.f32.mrf.mxu0  ;;  %9971 = vmatprep.mubr.msk.bf16.mxu1 %vm310_vm0, %v3475_v63  ;;  %10040 = vmatpush3.bf16.msra.mxu1 %v10625_v37  ;;  %v3477_v37 = vmul.bf16 %v14250_v21, %v3461_v42  ;;  %v3479_v21 = vmul.bf16 %v11451_v57, %v3463_v22 }
 0x1ee   : > { %v11862_v48 = vpop.f32.mrf.mxu1  ;;  %10041 = vmatprep.subr.bf16.mxu1 %v10626_v39 }
 0x1ef   : > { %v11865_v13 = vpop.f32.mrf.mxu0  ;;  %10088 = vmatmul.mubr.msk.bf16.gmra.mxu0 %vm310_vm0, %v4472_v43  ;;  %v4438_v43 = vld [vmem:[#allocation2 + $0xaa] sm:$0xff] }
 0x1f0   : > { %10091 = vmatprep.mubr.msk.bf16.mxu0 %vm310_vm0, %v4473_v44  ;;  %v11869_v51 = vpop.f32.mrf.mxu1 }
 0x1f1   : > { %v11871_v28 = vpop.f32.mrf.mxu0  ;;  %10042 = vmatpush3.bf16.msra.mxu1 %v10626_v39  ;;  %v4474_v39 = vmul.bf16 %v11410_v34, %v3461_v42  ;;  %v3478_v42 = vmul.bf16 %v11443_v31, %v4459_v4 }
 0x1f2   : > { %v11873_v59 = vpop.f32.mrf.mxu1 }
 0x1f3   : > { %v11876_v14 = vpop.f32.mrf.mxu0 }
 0x1f4   : > { %v11879_v40 = vpop.f32.mrf.mxu1  ;;  %9972 = vmatmul.mubr.msk.bf16.gmra.mxu1 %vm310_vm0, %v3476_v38 }
 0x1f5   : > { %v11882_v2 = vpop.f32.mrf.mxu0  ;;  %9975 = vmatprep.mubr.msk.bf16.mxu1 %vm310_vm0, %v3477_v37  ;;  %v4461_v37 = vpack.c.bf16 %v4438_v43, %v4437_v30  ;;  %v3465_v30 = vpack.c.bf16 %v3444_v8, %v3443_v36  ;;  %v3447_v36 = vld [vmem:[#allocation2 + $0xd2] sm:$0xff]  ;;  %v3448_v8 = vld [vmem:[#allocation2 + $0xda] sm:$0xff] }
 0x1f6   : > { %v11886_v63 = vpop.f32.mrf.mxu1 }
 0x1f7   : > { %v11889_v58 = vpop.f32.mrf.mxu0  ;;  %10092 = vmatmul.mubr.msk.bf16.gmra.mxu0 %vm310_vm0, %v4474_v39  ;;  %v4477_v4 = vmul.bf16 %v11451_v57, %v4461_v37  ;;  %v3481_v57 = vmul.bf16 %v11483_v23, %v3465_v30 }
 0x1f8   : > { %10095 = vmatprep.mubr.msk.bf16.mxu0 %vm310_vm0, %v4475_v19  ;;  %v11893_v44 = vpop.f32.mrf.mxu1  ;;  %v4476_v19 = vmul.bf16 %v11443_v31, %v3463_v22  ;;  %v3480_v22 = vmul.bf16 %v11475_v33, %v4461_v37  ;;  %v4463_v31 = vpack.c.bf16 %v4442_v55, %v4441_v45  ;;  %v3467_v37 = vpack.c.bf16 %v3448_v8, %v3447_v36  ;;  %v3451_v36 = vld [vmem:[#allocation2 + $0xf2] sm:$0xff]  ;;  %v3452_v8 = vld [vmem:[#allocation2 + $0xfa] sm:$0xff] }
 0x1f9   : > { %v11895_v9 = vpop.f32.mrf.mxu0 }
 0x1fa   : > { %v11897_v38 = vpop.f32.mrf.mxu1  ;;  %v4479_v55 = vmul.bf16 %v11483_v23, %v4463_v31  ;;  %v3483_v23 = vmul.bf16 %v11522_v25, %v3467_v37 }
 0x1fb   : > { %v11900_v34 = vpop.f32.mrf.mxu0 }
 0x1fc   : > { %v11903_v1 = vpop.f32.mrf.mxu1  ;;  %9976 = vmatmul.mubr.msk.bf16.gmra.mxu1 %vm310_vm0, %v3478_v42 }
 0x1fd   : > { %v11906_v39 = vpop.f32.mrf.mxu0  ;;  %9979 = vmatprep.mubr.msk.bf16.mxu1 %vm310_vm0, %v3479_v21 }
 0x1fe   : > { %v11910_v46 = vpop.f32.mrf.mxu1 }
 0x1ff   : > { %v11913_v43 = vpop.f32.mrf.mxu0  ;;  %10096 = vmatmul.mubr.msk.bf16.gmra.mxu0 %vm310_vm0, %v4476_v19 }
 0x200   : > { %10099 = vmatprep.mubr.msk.bf16.mxu0 %vm310_vm0, %v4477_v4  ;;  %v11917_v42 = vpop.f32.mrf.mxu1  ;;  %v4478_v4 = vmul.bf16 %v11475_v33, %v3465_v30  ;;  %v3482_v30 = vmul.bf16 %v11507_v49, %v4463_v31  ;;  %v4465_v33 = vpack.c.bf16 %v4446_v26, %v4445_v0  ;;  %v3469_v31 = vpack.c.bf16 %v3452_v8, %v3451_v36 }
 0x201   : > { %v11919_v5 = vpop.f32.mrf.mxu0 }
 0x202   : > { %v11921_v21 = vpop.f32.mrf.mxu1  ;;  %v4481_v0 = vmul.bf16 %v11522_v25, %v4465_v33  ;;  %v3485_v25 = vmul.bf16 %v11543_v16, %v3469_v31  ;;  %v4482_v8 = vmul.bf16 %v11528_v6, %v3469_v31 }
 0x203   : > { %v11924_v54 = vpop.f32.mrf.mxu0 }
 0x204   : > { %v11927_v24 = vpop.f32.mrf.mxu1  ;;  %9980 = vmatmul.mubr.msk.bf16.gmra.mxu1 %vm310_vm0, %v3480_v22 }
 0x205   : > { %v11930_v19 = vpop.f32.mrf.mxu0  ;;  %9983 = vmatprep.mubr.msk.bf16.mxu1 %vm310_vm0, %v3481_v57 }
 0x206   : > { %v11934_v35 = vpop.f32.mrf.mxu1 }
 0x207   : > { %v11937_v45 = vpop.f32.mrf.mxu0  ;;  %10100 = vmatmul.mubr.msk.bf16.gmra.mxu0 %vm310_vm0, %v4478_v4 }
 0x208   : > { %10103 = vmatprep.mubr.msk.bf16.mxu0 %vm310_vm0, %v4479_v55  ;;  %v11941_v22 = vpop.f32.mrf.mxu1  ;;  %v4480_v55 = vmul.bf16 %v11507_v49, %v3467_v37  ;;  %v3484_v37 = vmul.bf16 %v11528_v6, %v4465_v33  ;;  %v4467_v49 = vpack.c.bf16 %v4450_v17, %v4449_v27  ;;  %v4451_v33 = vld [vmem:[#allocation2 + $0x112] sm:$0xff]  ;;  %v4452_v17 = vld [vmem:[#allocation2 + $0x11a] sm:$0xff] }
 0x209   : > { %v11943_v10 = vpop.f32.mrf.mxu0  ;;  %v4099_v6 = vld [vmem:[#allocation2 + $0x21] sm:$0xff] }
 0x20a   : > { %v11945_v57 = vpop.f32.mrf.mxu1  ;;  %v3486_v31 = vmul.bf16 %v11549_v11, %v4467_v49 }
 0x20b   : > { %14251 = vst [vmem:[#allocation41_spill] sm:$0xff] %v11945_v57  ;;  %v11948_v47 = vpop.f32.mrf.mxu0 }
 0x20c   : > { %v11951_v41 = vpop.f32.mrf.mxu1  ;;  %9984 = vmatmul.mubr.msk.bf16.gmra.mxu1 %vm310_vm0, %v3482_v30 }
 0x20d   : > { %v11954_v4 = vpop.f32.mrf.mxu0  ;;  %9987 = vmatprep.mubr.msk.bf16.mxu1 %vm310_vm0, %v3483_v23 }
 0x20e   : > { %14252 = vst [vmem:[#allocation42_spill] sm:$0xff] %v11954_v4  ;;  %v11958_v32 = vpop.f32.mrf.mxu1 }
 0x20f   : > { %v11961_v26 = vpop.f32.mrf.mxu0  ;;  %10104 = vmatmul.mubr.msk.bf16.gmra.mxu0 %vm310_vm0, %v4480_v55 }
 0x210   : > { %10107 = vmatprep.mubr.msk.bf16.mxu0 %vm310_vm0, %v4481_v0  ;;  %v11965_v30 = vpop.f32.mrf.mxu1  ;;  %v4483_v0 = vmul.bf16 %v11543_v16, %v4467_v49  ;;  %v4102_v49 = vld [vmem:[#allocation2 + $0x39] sm:$0xff] }
 0x211   : > { %v11967_v12 = vpop.f32.mrf.mxu0 }
 0x212   : > { %v11969_v23 = vpop.f32.mrf.mxu1 }
 0x213   : > { %14253 = vst [vmem:[#allocation43_spill] sm:$0xff] %v11969_v23  ;;  %v11972_v3 = vpop.f32.mrf.mxu0 }
 0x214   : > { %v11975_v62 = vpop.f32.mrf.mxu1  ;;  %9988 = vmatmul.mubr.msk.bf16.gmra.mxu1 %vm310_vm0, %v3484_v37  ;;  %v4100_v37 = vld [vmem:[#allocation2 + $0x29] sm:$0xff] }
 0x215   : > { %v11978_v36 = vpop.f32.mrf.mxu0  ;;  %9991 = vmatprep.mubr.msk.bf16.mxu1 %vm310_vm0, %v3485_v25  ;;  %v4468_v25 = vpack.c.bf16 %v4452_v17, %v4451_v33  ;;  %v4131_v4 = vpack.c.bf16 %v4100_v37, %v4099_v6  ;;  %v4104_v6 = vld [vmem:[#allocation2 + $0x49] sm:$0xff] }
 0x216   : > { %14254 = vst [vmem:[#allocation44_spill] sm:$0xff] %v11978_v36  ;;  %v11982_v55 = vpop.f32.mrf.mxu1 }
 0x217   : > { %v11985_v27 = vpop.f32.mrf.mxu0  ;;  %10108 = vmatmul.mubr.msk.bf16.gmra.mxu0 %vm310_vm0, %v4482_v8 }
 0x218   : > { %10111 = vmatprep.mubr.msk.bf16.mxu0 %vm310_vm0, %v4483_v0  ;;  %v11989_v52 = vpop.f32.mrf.mxu1  ;;  %v4484_v0 = vmul.bf16 %v11549_v11, %v4468_v25 }
 0x219   : > { %v11991_v53 = vpop.f32.mrf.mxu0 }
 0x21a   : > { %v11993_v36 = vpop.f32.mrf.mxu1 }
 0x21b   : > { %14255 = vst [vmem:[#allocation45_spill] sm:$0xff] %v11993_v36  ;;  %v11996_v16 = vpop.f32.mrf.mxu0  ;;  %v4101_v36 = vld [vmem:[#allocation2 + $0x31] sm:$0xff] }
 0x21c   : > { %v11998_v23 = vpop.f32.mrf.mxu1  ;;  %9992 = vmatmul.mubr.msk.bf16.gmra.mxu1 %vm310_vm0, %v3486_v31 }
 0x21d   : > { %14256 = vst [vmem:[#allocation46_spill] sm:$0xff] %v11998_v23  ;;  %v12001_v8 = vpop.f32.mrf.mxu0  ;;  %10043 = vmatprep.mubr.msk.bf16.mxu1 %vm310_vm0, %v4131_v4  ;;  %v4103_v23 = vld [vmem:[#allocation2 + $0x41] sm:$0xff] }
 0x21e   : > { %14257 = vst [vmem:[#allocation47_spill] sm:$0xff] %v12001_v8  ;;  %v12005_v57 = vpop.f32.mrf.mxu1  ;;  %v4132_v8 = vpack.c.bf16 %v4102_v49, %v4101_v36  ;;  %v4133_v25 = vpack.c.bf16 %v4104_v6, %v4103_v23  ;;  %v4108_v23 = vld [vmem:[#allocation2 + $0x69] sm:$0xff] }
 0x21f   : > { %14258 = vst [vmem:[#allocation48_spill] sm:$0xff] %v12005_v57  ;;  %v12007_v33 = vpop.f32.mrf.mxu0  ;;  %10112 = vmatmul.mubr.msk.bf16.gmra.mxu0 %vm310_vm0, %v4484_v0 }
 0x220   : > { %14259 = vst [vmem:[#allocation49_spill] sm:$0xff] %v12007_v33  ;;  %v12010_v17 = vpop.f32.mrf.mxu1 }
 0x221   : > { %14260 = vst [vmem:[#allocation50_spill] sm:$0xff] %v12010_v17  ;;  %v12012_v37 = vpop.f32.mrf.mxu0 }
 0x222   : > { %14261 = vst [vmem:[#allocation51_spill] sm:$0xff] %v12012_v37  ;;  %v12014_v31 = vpop.f32.mrf.mxu1 }
 0x223   : > { %14262 = vst [vmem:[#allocation52_spill] sm:$0xff] %v12014_v31  ;;  %v12016_v4 = vpop.f32.mrf.mxu0  ;;  %v4106_v31 = vld [vmem:[#allocation2 + $0x59] sm:$0xff] }
 0x224   : > { %14263 = vst [vmem:[#allocation53_spill] sm:$0xff] %v12016_v4  ;;  %v9805_v11 = vpop.f32.mrf.mxu1  ;;  %10044 = vmatmul.mubr.msk.bf16.vlgmr.msra.gmra.mxu1 %vm310_vm0, %v4132_v8  ;;  %v4107_v4 = vld [vmem:[#allocation2 + $0x61] sm:$0xff] }
 0x225   : > { %v1827_v33 = vadd.f32 %v9805_v11, %v11826_v56  ;;  %v12020_v0 = vpop.f32.mrf.mxu0  ;;  %10047 = vmatprep.mubr.msk.bf16.mxu1 %vm310_vm0, %v4133_v25  ;;  %v4105_v11 = vld [vmem:[#allocation2 + $0x51] sm:$0xff] }
 0x226   : > { %14264 = vst [vmem:[#allocation54_spill] sm:$0xff] %v12020_v0  ;;  %v1818_v17 = vpop.f32.mrf.mxu1  ;;  %v4134_v0 = vpack.c.bf16 %v4106_v31, %v4105_v11  ;;  %v4109_v11 = vld [vmem:[#allocation2 + $0x71] sm:$0xff] }
 0x227   : > { %v1819_v37 = vadd.f32 %v1818_v17, %v11832_v50  ;;  %v12024_v57 = vpop.f32.mrf.mxu0  ;;  %v12027_v36 = vadd.f32 %v11838_v18, %v1827_v33 }
 0x228   : > { %14265 = vst [vmem:[#allocation55_spill] sm:$0xff] %v12024_v57  ;;  %v9806_v49 = vpop.f32.mrf.mxu1  ;;  %v4135_v57 = vpack.c.bf16 %v4108_v23, %v4107_v4  ;;  %v4110_v4 = vld [vmem:[#allocation2 + $0x79] sm:$0xff] }
 0x229   : > { %v1830_v6 = vadd.f32 %v9806_v49, %v11842_v29  ;;  %v12030_v8 = vpop.f32.mrf.mxu0  ;;  %v12033_v56 = vadd.f32 %v11844_v15, %v1819_v37 }
 0x22a   : > { %v1821_v25 = vpop.f32.mrf.mxu1 }
 0x22b   : > { %v1822_v50 = vadd.f32 %v1821_v25, %v11846_v60  ;;  %v12036_v17 = vpop.f32.mrf.mxu0  ;;  %v12039_v18 = vadd.f32 %v11852_v61, %v1830_v6  ;;  %v4136_v25 = vpack.c.bf16 %v4110_v4, %v4109_v11  ;;  %v4116_v11 = vld [vmem:[#allocation2 + $0xa9] sm:$0xff] }
 0x22c   : > { %v9809_v33 = vpop.f32.mrf.mxu1  ;;  %10048 = vmatmul.mubr.msk.bf16.gmra.mxu1 %vm310_vm0, %v4134_v0  ;;  %v4112_v0 = vld [vmem:[#allocation2 + $0x89] sm:$0xff] }
 0x22d   : > { %v1843_v29 = vadd.f32 %v9809_v33, %v11855_v7  ;;  %v12043_v49 = vpop.f32.mrf.mxu0  ;;  %10051 = vmatprep.mubr.msk.bf16.mxu1 %vm310_vm0, %v4135_v57  ;;  %v12047_v15 = vadd.f32 %v11858_v20, %v1822_v50  ;;  %v4111_v50 = vld [vmem:[#allocation2 + $0x81] sm:$0xff] }
 0x22e   : > { %v1834_v37 = vpop.f32.mrf.mxu1 }
 0x22f   : > { %v1835_v60 = vadd.f32 %v1834_v37, %v11862_v48  ;;  %v12050_v31 = vpop.f32.mrf.mxu0  ;;  %v12053_v61 = vadd.f32 %v11865_v13, %v1843_v29  ;;  %v4137_v37 = vpack.c.bf16 %v4112_v0, %v4111_v50  ;;  %v4114_v0 = vld [vmem:[#allocation2 + $0x99] sm:$0xff] }
 0x230   : > { %v9810_v23 = vpop.f32.mrf.mxu1 }
 0x231   : > { %v1846_v7 = vadd.f32 %v9810_v23, %v11869_v51  ;;  %v12056_v6 = vpop.f32.mrf.mxu0  ;;  %v12059_v57 = vadd.f32 %v11871_v28, %v1835_v60 }
 0x232   : > { %v1837_v20 = vpop.f32.mrf.mxu1 }
 0x233   : > { %v1838_v48 = vadd.f32 %v1837_v20, %v11873_v59  ;;  %v12062_v33 = vpop.f32.mrf.mxu0  ;;  %v12065_v13 = vadd.f32 %v11876_v14, %v1846_v7 }
 0x234   : > { %v9813_v29 = vpop.f32.mrf.mxu1  ;;  %10052 = vmatmul.mubr.msk.bf16.gmra.mxu1 %vm310_vm0, %v4136_v25  ;;  %v4113_v25 = vld [vmem:[#allocation2 + $0x91] sm:$0xff] }
 0x235   : > { %v1859_v51 = vadd.f32 %v9813_v29, %v11879_v40  ;;  %v12069_v23 = vpop.f32.mrf.mxu0  ;;  %10055 = vmatprep.mubr.msk.bf16.mxu1 %vm310_vm0, %v4137_v37  ;;  %v12073_v28 = vadd.f32 %v11882_v2, %v1838_v48  ;;  %v10627_v2 = vld [vmem:[%s14090_s1 + $0x78] sm:$0xff]   ;;  %v4138_v48 = vpack.c.bf16 %v4114_v0, %v4113_v25  ;;  %v4115_v37 = vld [vmem:[#allocation2 + $0xa1] sm:$0xff] }
 0x236   : > { %14266 = vst [vmem:[#allocation56_spill] sm:$0xff] %v12069_v23  ;;  %v1850_v60 = vpop.f32.mrf.mxu1  ;;  %10115 = vmatprep.subr.bf16.mxu1 %v10627_v2 }
 0x237   : > { %v1851_v59 = vadd.f32 %v1850_v60, %v11886_v63  ;;  %v12076_v4 = vpop.f32.mrf.mxu0  ;;  %v12079_v14 = vadd.f32 %v11889_v58, %v1859_v51  ;;  %v4139_v51 = vpack.c.bf16 %v4116_v11, %v4115_v37  ;;  %10116 = vmatpush3.bf16.msra.mxu1 %v10627_v2  ;;  %v4117_v37 = vld [vmem:[#allocation2 + $0xb1] sm:$0xff] }
 0x238   : > { %v9814_v7 = vpop.f32.mrf.mxu1 }
 0x239   : > { %v1862_v40 = vadd.f32 %v9814_v7, %v11893_v44  ;;  %v12082_v20 = vpop.f32.mrf.mxu0  ;;  %v12085_v50 = vadd.f32 %v11895_v9, %v1851_v59 }
 0x23a   : > { %v1853_v63 = vpop.f32.mrf.mxu1 }
 0x23b   : > { %v1854_v58 = vadd.f32 %v1853_v63, %v11897_v38  ;;  %v12091_v29 = vpop.f32.mrf.mxu0  ;;  %v12094_v44 = vadd.f32 %v11900_v34, %v1862_v40  ;;  %v4118_v34 = vld [vmem:[#allocation2 + $0xb9] sm:$0xff]  ;;  %v4120_v63 = vld [vmem:[#allocation2 + $0xc9] sm:$0xff] }
 0x23c   : > { %v9817_v60 = vpop.f32.mrf.mxu1  ;;  %10056 = vmatmul.mubr.msk.bf16.gmra.mxu1 %vm310_vm0, %v4138_v48 }
 0x23d   : > { %v1875_v9 = vadd.f32 %v9817_v60, %v11903_v1  ;;  %v12098_v59 = vpop.f32.mrf.mxu0  ;;  %10059 = vmatprep.mubr.msk.bf16.mxu1 %vm310_vm0, %v4139_v51  ;;  %v12102_v0 = vadd.f32 %v11906_v39, %v1854_v58  ;;  %v4140_v58 = vpack.c.bf16 %v4118_v34, %v4117_v37  ;;  %v4119_v51 = vld [vmem:[#allocation2 + $0xc1] sm:$0xff] }
 0x23e   : > { %14267 = vst [vmem:[#allocation57_spill] sm:$0xff] %v12098_v59  ;;  %v1866_v38 = vpop.f32.mrf.mxu1 }
 0x23f   : > { %14268 = vst [vmem:[#allocation58_spill] sm:$0xff] %v12102_v0  ;;  %v1867_v7 = vadd.f32 %v1866_v38, %v11910_v46  ;;  %v12105_v11 = vpop.f32.mrf.mxu0  ;;  %v12108_v40 = vadd.f32 %v11913_v43, %v1875_v9  ;;  %v10628_v46 = vld [vmem:[%s14090_s1 + $0x70] sm:$0xff]   ;;  %v4141_v9 = vpack.c.bf16 %v4120_v63, %v4119_v51 }
 0x240   : > { %v9818_v25 = vpop.f32.mrf.mxu1  ;;  %10117 = vmatprep.subr.bf16.mxu1 %v10628_v46  ;;  %v4121_v51 = vld [vmem:[#allocation2 + $0xd1] sm:$0xff] }
 0x241   : > { %v1878_v1 = vadd.f32 %v9818_v25, %v11917_v42  ;;  %v12111_v48 = vpop.f32.mrf.mxu0  ;;  %v12114_v39 = vadd.f32 %v11919_v5, %v1867_v7  ;;  %10118 = vmatpush3.bf16.msra.mxu1 %v10628_v46 }
 0x242   : > { %v1869_v2 = vpop.f32.mrf.mxu1 }
 0x243   : > { %v1870_v43 = vadd.f32 %v1869_v2, %v11921_v21  ;;  %v12120_v60 = vpop.f32.mrf.mxu0  ;;  %v12123_v42 = vadd.f32 %v11924_v54, %v1878_v1  ;;  %v4122_v54 = vld [vmem:[#allocation2 + $0xd9] sm:$0xff]  ;;  %v4124_v2 = vld [vmem:[#allocation2 + $0xe9] sm:$0xff] }
 0x244   : > { %v9821_v38 = vpop.f32.mrf.mxu1  ;;  %10060 = vmatmul.mubr.msk.bf16.gmra.mxu1 %vm310_vm0, %v4140_v58 }
 0x245   : > { %v1891_v5 = vadd.f32 %v9821_v38, %v11927_v24  ;;  %v12127_v7 = vpop.f32.mrf.mxu0  ;;  %10063 = vmatprep.mubr.msk.bf16.mxu1 %vm310_vm0, %v4141_v9  ;;  %v12131_v34 = vadd.f32 %v11930_v19, %v1870_v43  ;;  %v4142_v43 = vpack.c.bf16 %v4122_v54, %v4121_v51  ;;  %v4123_v9 = vld [vmem:[#allocation2 + $0xe1] sm:$0xff]  ;;  %v4128_v51 = vld [vmem:[#allocation2 + $0x109] sm:$0xff] }
 0x246   : > { %14269 = vst [vmem:[#allocation59_spill] sm:$0xff] %v12127_v7  ;;  %v1882_v21 = vpop.f32.mrf.mxu1  ;;  %v4143_v38 = vpack.c.bf16 %v4124_v2, %v4123_v9  ;;  %v4126_v2 = vld [vmem:[#allocation2 + $0xf9] sm:$0xff] }
 0x247   : > { %14270 = vst [vmem:[#allocation60_spill] sm:$0xff] %v12131_v34  ;;  %v1883_v25 = vadd.f32 %v1882_v21, %v11934_v35  ;;  %v12134_v63 = vpop.f32.mrf.mxu0  ;;  %v12137_v1 = vadd.f32 %v11937_v45, %v1891_v5  ;;  %v10629_v35 = vld [vmem:[%s14090_s1 + $0x68] sm:$0xff]   ;;  %v4130_v7 = vld [vmem:[#allocation2 + $0x119] sm:$0xff] }
 0x248   : > { %v9822_v37 = vpop.f32.mrf.mxu1  ;;  %10119 = vmatprep.subr.bf16.mxu1 %v10629_v35  ;;  %v14281_v34 = vld [vmem:[#allocation51_spill] sm:$0xff] }
 0x249   : > { %v1894_v24 = vadd.f32 %v9822_v37, %v11941_v22  ;;  %v12140_v58 = vpop.f32.mrf.mxu0  ;;  %v12143_v19 = vadd.f32 %v11943_v10, %v1883_v25  ;;  %10120 = vmatpush3.bf16.msra.mxu1 %v10629_v35 }
 0x24a   : > { %v12148_v46 = vpop.f32.mrf.mxu1 }
 0x24b   : > { %14271 = vst [vmem:[#allocation61_spill] sm:$0xff] %v12148_v46  ;;  %v12150_v45 = vpop.f32.mrf.mxu0  ;;  %v12153_v5 = vadd.f32 %v11948_v47, %v1894_v24 }
 0x24c   : > { %v9825_v22 = vpop.f32.mrf.mxu1  ;;  %10064 = vmatmul.mubr.msk.bf16.gmra.mxu1 %vm310_vm0, %v4142_v43 }
 0x24d   : > { %v1907_v10 = vadd.f32 %v9825_v22, %v11951_v41  ;;  %v12157_v21 = vpop.f32.mrf.mxu0  ;;  %10067 = vmatprep.mubr.msk.bf16.mxu1 %vm310_vm0, %v4143_v38  ;;  %v4125_v41 = vld [vmem:[#allocation2 + $0xf1] sm:$0xff] }
 0x24e   : > { %14272 = vst [vmem:[#allocation62_spill] sm:$0xff] %v12157_v21  ;;  %v1898_v25 = vpop.f32.mrf.mxu1  ;;  %v4144_v38 = vpack.c.bf16 %v4126_v2, %v4125_v41 }
 0x24f   : > { %v1899_v54 = vadd.f32 %v1898_v25, %v11958_v32  ;;  %v12161_v37 = vpop.f32.mrf.mxu0  ;;  %v12164_v47 = vadd.f32 %v11961_v26, %v1907_v10  ;;  %v10630_v32 = vld [vmem:[%s14090_s1 + $0x60] sm:$0xff]  }
 0x250   : > { %v9826_v24 = vpop.f32.mrf.mxu1  ;;  %v4127_v25 = vld [vmem:[#allocation2 + $0x101] sm:$0xff]  ;;  %10121 = vmatprep.subr.bf16.mxu1 %v10630_v32 }
 0x251   : > { %v1910_v43 = vadd.f32 %v9826_v24, %v11965_v30  ;;  %v12167_v9 = vpop.f32.mrf.mxu0  ;;  %v12170_v22 = vadd.f32 %v11967_v12, %v1899_v54  ;;  %v4145_v10 = vpack.c.bf16 %v4128_v51, %v4127_v25  ;;  %v4129_v24 = vld [vmem:[#allocation2 + $0x111] sm:$0xff]  ;;  %10122 = vmatpush3.bf16.msra.mxu1 %v10630_v32 }
 0x252   : > { %v12175_v35 = vpop.f32.mrf.mxu1  ;;  %v4146_v25 = vpack.c.bf16 %v4130_v7, %v4129_v24  ;;  %v10631_v32 = vld [vmem:[%s14090_s1 + $0x58] sm:$0xff]  }
 0x253   : > { %14273 = vst [vmem:[#allocation63_spill] sm:$0xff] %v12175_v35  ;;  %v12177_v26 = vpop.f32.mrf.mxu0  ;;  %v12180_v21 = vadd.f32 %v11972_v3, %v1910_v43  ;;  %10123 = vmatprep.subr.bf16.mxu1 %v10631_v32 }
 0x254   : > { %v9829_v30 = vpop.f32.mrf.mxu1  ;;  %10068 = vmatmul.mubr.msk.bf16.gmra.mxu1 %vm310_vm0, %v4144_v38 }
 0x255   : > { %v1923_v12 = vadd.f32 %v9829_v30, %v11975_v62  ;;  %v12184_v54 = vpop.f32.mrf.mxu0  ;;  %10071 = vmatprep.mubr.msk.bf16.mxu1 %vm310_vm0, %v4145_v10  ;;  %10124 = vmatpush3.bf16.msra.mxu1 %v10631_v32  ;;  %v10632_v32 = vld [vmem:[%s14090_s1 + $0x50] sm:$0xff]  }
 0x256   : > { %14274 = vst [vmem:[#allocation64_spill] sm:$0xff] %v12184_v54  ;;  %v1914_v2 = vpop.f32.mrf.mxu1  ;;  %v14279_v54 = vld [vmem:[#allocation49_spill] sm:$0xff]  ;;  %10125 = vmatprep.subr.bf16.mxu1 %v10632_v32 }
 0x257   : > { %v1915_v41 = vadd.f32 %v1914_v2, %v11982_v55  ;;  %v12188_v51 = vpop.f32.mrf.mxu0  ;;  %v12191_v3 = vadd.f32 %v11985_v27, %v1923_v12  ;;  %v14278_v2 = vld [vmem:[#allocation48_spill] sm:$0xff] }
 0x258   : > { %v9830_v43 = vpop.f32.mrf.mxu1 }
 0x259   : > { %v1926_v38 = vadd.f32 %v9830_v43, %v11989_v52  ;;  %v12194_v62 = vpop.f32.mrf.mxu0  ;;  %v12197_v30 = vadd.f32 %v11991_v53, %v1915_v41  ;;  %v14276_v52 = vld [vmem:[#allocation46_spill] sm:$0xff]  ;;  %10126 = vmatpush3.bf16.msra.mxu1 %v10632_v32 }
 0x25a   : > { %v12202_v10 = vpop.f32.mrf.mxu1 }
 0x25b   : > { %14275 = vst [vmem:[#allocation65_spill] sm:$0xff] %v12202_v10  ;;  %v12204_v55 = vpop.f32.mrf.mxu0  ;;  %v12207_v27 = vadd.f32 %v11996_v16, %v1926_v38  ;;  %v14280_v16 = vld [vmem:[#allocation50_spill] sm:$0xff] }
 0x25c   : > { %v9833_v7 = vpop.f32.mrf.mxu1  ;;  %10072 = vmatmul.mubr.msk.bf16.gmra.mxu1 %vm310_vm0, %v4146_v25 }
 0x25d   : > { %v1939_v12 = vadd.f32 %v9833_v7, %v14276_v52  ;;  %v12211_v24 = vpop.f32.mrf.mxu0 }
 0x25e   : > { %14277 = vst [vmem:[#allocation46_spill] sm:$0xff] %v12211_v24  ;;  %v1930_v53 = vpop.f32.mrf.mxu1  ;;  %v14285_v24 = vld [vmem:[#allocation55_spill] sm:$0xff] }
 0x25f   : > { %v1931_v41 = vadd.f32 %v1930_v53, %v14278_v2  ;;  %v12214_v43 = vpop.f32.mrf.mxu0  ;;  %v12217_v10 = vadd.f32 %v14279_v54, %v1939_v12  ;;  %v14283_v53 = vld [vmem:[#allocation53_spill] sm:$0xff] }
 0x260   : > { %v9834_v59 = vpop.f32.mrf.mxu1 }
 0x261   : > { %v1942_v38 = vadd.f32 %v9834_v59, %v14280_v16  ;;  %v12220_v35 = vpop.f32.mrf.mxu0  ;;  %v12223_v25 = vadd.f32 %v14281_v34, %v1931_v41 }
 0x262   : > { %v12228_v7 = vpop.f32.mrf.mxu1 }
 0x263   : > { %14282 = vst [vmem:[#allocation48_spill] sm:$0xff] %v12228_v7  ;;  %v12230_v52 = vpop.f32.mrf.mxu0  ;;  %v12233_v2 = vadd.f32 %v14283_v53, %v1942_v38 }
 0x264   : > { %v9885_v54 = vpop.f32.mrf.mxu1 }
 0x265   : > { %v3071_v59 = vadd.f32 %v9885_v54, %v12027_v36  ;;  %v12236_v12 = vpop.f32.mrf.mxu0 }
 0x266   : > { %14284 = vst [vmem:[#allocation49_spill] sm:$0xff] %v12236_v12  ;;  %v2942_v34 = vpop.f32.mrf.mxu1 }
 0x267   : > { %v3069_v41 = vadd.f32 %v2942_v34, %v12033_v56  ;;  %v12239_v16 = vpop.f32.mrf.mxu0  ;;  %v12242_v0 = vadd.f32 %v14285_v24, %v3071_v59 }
 0x268   : > { %v9886_v7 = vpop.f32.mrf.mxu1 }
 0x269   : > { %v3072_v46 = vadd.f32 %v9886_v7, %v12039_v18  ;;  %v12245_v38 = vpop.f32.mrf.mxu0  ;;  %v12248_v53 = vadd.f32 %v12030_v8, %v3069_v41 }
 0x26a   : > { %v12250_v32 = vpop.f32.mrf.mxu1 }
 0x26b   : > { %v12252_v36 = vpop.f32.mrf.mxu0  ;;  %v12255_v54 = vadd.f32 %v12036_v17, %v3072_v46 }
 0x26c   : > { %v9889_v56 = vpop.f32.mrf.mxu1 }
 0x26d   : > { %v3075_v34 = vadd.f32 %v9889_v56, %v12053_v61  ;;  %v12258_v24 = vpop.f32.mrf.mxu0 }
 0x26e   : > { %14286 = vst [vmem:[#allocation50_spill] sm:$0xff] %v12258_v24  ;;  %v2958_v59 = vpop.f32.mrf.mxu1 }
 0x26f   : > { %v3073_v18 = vadd.f32 %v2958_v59, %v12059_v57  ;;  %v12261_v7 = vpop.f32.mrf.mxu0  ;;  %v12264_v8 = vadd.f32 %v12050_v31, %v3075_v34 }
 0x270   : > { %v9890_v41 = vpop.f32.mrf.mxu1 }
 0x271   : > { %v3076_v12 = vadd.f32 %v9890_v41, %v12065_v13  ;;  %v12267_v23 = vpop.f32.mrf.mxu0  ;;  %v12270_v17 = vadd.f32 %v12056_v6, %v3073_v18  ;;  %v10633_v13 = vld [vmem:[%s14090_s1 + $0x48] sm:$0xff]  }
 0x272   : > { %v12272_v46 = vpop.f32.mrf.mxu1  ;;  %10127 = vmatprep.subr.bf16.mxu1 %v10633_v13 }
 0x273   : > { %14287 = vst [vmem:[#allocation51_spill] sm:$0xff] %v12272_v46  ;;  %v12274_v61 = vpop.f32.mrf.mxu0  ;;  %v12277_v56 = vadd.f32 %v12062_v33, %v3076_v12  ;;  %10128 = vmatpush3.bf16.msra.mxu1 %v10633_v13 }
 0x274   : > { %v9893_v57 = vpop.f32.mrf.mxu1 }
 0x275   : > { %v3079_v59 = vadd.f32 %v9893_v57, %v12079_v14  ;;  %v12280_v31 = vpop.f32.mrf.mxu0 }
 0x276   : > { %14288 = vst [vmem:[#allocation53_spill] sm:$0xff] %v12280_v31  ;;  %v2974_v34 = vpop.f32.mrf.mxu1 }
 0x277   : > { %v3077_v6 = vadd.f32 %v2974_v34, %v12085_v50  ;;  %v12286_v18 = vpop.f32.mrf.mxu0  ;;  %v12289_v41 = vadd.f32 %v12076_v4, %v3079_v59  ;;  %v10634_v4 = vld [vmem:[%s14090_s1 + $0x40] sm:$0xff]  }
 0x278   : > { %v9894_v33 = vpop.f32.mrf.mxu1  ;;  %10129 = vmatprep.subr.bf16.mxu1 %v10634_v4 }
 0x279   : > { %v3080_v12 = vadd.f32 %v9894_v33, %v12094_v44  ;;  %v12292_v14 = vpop.f32.mrf.mxu0  ;;  %v12295_v57 = vadd.f32 %v12082_v20, %v3077_v6  ;;  %10130 = vmatpush3.bf16.msra.mxu1 %v10634_v4 }
 0x27a   : > { %v12297_v31 = vpop.f32.mrf.mxu1 }
 0x27b   : > { %14289 = vst [vmem:[#allocation55_spill] sm:$0xff] %v12297_v31  ;;  %v12299_v24 = vpop.f32.mrf.mxu0  ;;  %v12302_v50 = vadd.f32 %v12091_v29, %v3080_v12 }
 0x27c   : > { %v9897_v59 = vpop.f32.mrf.mxu1 }
 0x27d   : > { %v3083_v13 = vadd.f32 %v9897_v59, %v12108_v40  ;;  %v12308_v44 = vpop.f32.mrf.mxu0 }
 0x27e   : > { %14290 = vst [vmem:[#allocation66_spill] sm:$0xff] %v12308_v44  ;;  %v2990_v34 = vpop.f32.mrf.mxu1 }
 0x27f   : > { %v3081_v20 = vadd.f32 %v2990_v34, %v12114_v39  ;;  %v12311_v6 = vpop.f32.mrf.mxu0  ;;  %v12314_v33 = vadd.f32 %v12105_v11, %v3083_v13 }
 0x280   : > { %v9898_v29 = vpop.f32.mrf.mxu1 }
 0x281   : > { %v3084_v12 = vadd.f32 %v9898_v29, %v12123_v42  ;;  %v12317_v31 = vpop.f32.mrf.mxu0  ;;  %v12320_v46 = vadd.f32 %v12111_v48, %v3081_v20 }
 0x282   : > { %v12322_v40 = vpop.f32.mrf.mxu1 }
 0x283   : > { %14291 = vst [vmem:[#allocation67_spill] sm:$0xff] %v12322_v40  ;;  %v12324_v59 = vpop.f32.mrf.mxu0  ;;  %v12327_v4 = vadd.f32 %v12120_v60, %v3084_v12 }
 0x284   : > { %v9901_v39 = vpop.f32.mrf.mxu1 }
 0x285   : > { %v3087_v34 = vadd.f32 %v9901_v39, %v12137_v1  ;;  %v12330_v11 = vpop.f32.mrf.mxu0 }
 0x286   : > { %14292 = vst [vmem:[#allocation68_spill] sm:$0xff] %v12330_v11  ;;  %v3006_v13 = vpop.f32.mrf.mxu1 }
 0x287   : > { %v3085_v42 = vadd.f32 %v3006_v13, %v12143_v19  ;;  %v12333_v29 = vpop.f32.mrf.mxu0  ;;  %v12336_v48 = vadd.f32 %v12134_v63, %v3087_v34 }
 0x288   : > { %v9902_v20 = vpop.f32.mrf.mxu1 }
 0x289   : > { %v3088_v44 = vadd.f32 %v9902_v20, %v12153_v5  ;;  %v12339_v40 = vpop.f32.mrf.mxu0  ;;  %v12342_v60 = vadd.f32 %v12140_v58, %v3085_v42 }
 0x28a   : > { %v12344_v12 = vpop.f32.mrf.mxu1 }
 0x28b   : > { %14293 = vst [vmem:[#allocation69_spill] sm:$0xff] %v12344_v12  ;;  %v12346_v1 = vpop.f32.mrf.mxu0  ;;  %v12349_v39 = vadd.f32 %v12150_v45, %v3088_v44 }
 0x28c   : > { %v9905_v19 = vpop.f32.mrf.mxu1 }
 0x28d   : > { %v3091_v13 = vadd.f32 %v9905_v19, %v12164_v47  ;;  %v12352_v63 = vpop.f32.mrf.mxu0 }
 0x28e   : > { %14294 = vst [vmem:[#allocation70_spill] sm:$0xff] %v12352_v63  ;;  %v3022_v34 = vpop.f32.mrf.mxu1 }
 0x28f   : > { %v3089_v5 = vadd.f32 %v3022_v34, %v12170_v22  ;;  %v12355_v20 = vpop.f32.mrf.mxu0  ;;  %v12358_v58 = vadd.f32 %v12161_v37, %v3091_v13 }
 0x290   : > { %v9906_v42 = vpop.f32.mrf.mxu1 }
 0x291   : > { %v3092_v11 = vadd.f32 %v9906_v42, %v12180_v21  ;;  %v12361_v12 = vpop.f32.mrf.mxu0  ;;  %v12364_v45 = vadd.f32 %v12167_v9, %v3089_v5 }
 0x292   : > { %v12366_v44 = vpop.f32.mrf.mxu1 }
 0x293   : > { %14295 = vst [vmem:[#allocation71_spill] sm:$0xff] %v12366_v44  ;;  %v12368_v47 = vpop.f32.mrf.mxu0  ;;  %v12371_v19 = vadd.f32 %v12177_v26, %v3092_v11 }
 0x294   : > { %v9909_v22 = vpop.f32.mrf.mxu1 }
 0x295   : > { %v3095_v34 = vadd.f32 %v9909_v22, %v12191_v3  ;;  %v12374_v37 = vpop.f32.mrf.mxu0 }
 0x296   : > { %14296 = vst [vmem:[#allocation72_spill] sm:$0xff] %v12374_v37  ;;  %v3038_v13 = vpop.f32.mrf.mxu1 }
 0x297   : > { %v3093_v21 = vadd.f32 %v3038_v13, %v12197_v30  ;;  %v12377_v42 = vpop.f32.mrf.mxu0  ;;  %v12380_v9 = vadd.f32 %v12188_v51, %v3095_v34 }
 0x298   : > { %v9910_v5 = vpop.f32.mrf.mxu1 }
 0x299   : > { %v3096_v63 = vadd.f32 %v9910_v5, %v12207_v27  ;;  %v12383_v44 = vpop.f32.mrf.mxu0  ;;  %v12386_v26 = vadd.f32 %v12194_v62, %v3093_v21 }
 0x29a   : > { %v12388_v11 = vpop.f32.mrf.mxu1 }
 0x29b   : > { %14297 = vst [vmem:[#allocation73_spill] sm:$0xff] %v12388_v11  ;;  %v12390_v3 = vpop.f32.mrf.mxu0  ;;  %v12393_v22 = vadd.f32 %v12204_v55, %v3096_v63 }
 0x29c   : > { %v9913_v30 = vpop.f32.mrf.mxu1 }
 0x29d   : > { %v3099_v13 = vadd.f32 %v9913_v30, %v12217_v10  ;;  %v12396_v51 = vpop.f32.mrf.mxu0 }
 0x29e   : > { %14298 = vst [vmem:[#allocation74_spill] sm:$0xff] %v12396_v51  ;;  %v3054_v34 = vpop.f32.mrf.mxu1 }
 0x29f   : > { %v3097_v27 = vadd.f32 %v3054_v34, %v12223_v25  ;;  %v12399_v5 = vpop.f32.mrf.mxu0  ;;  %v12402_v62 = vadd.f32 %v12214_v43, %v3099_v13 }
 0x2a0   : > { %v9914_v21 = vpop.f32.mrf.mxu1 }
 0x2a1   : > { %v3100_v37 = vadd.f32 %v9914_v21, %v12233_v2  ;;  %v12405_v11 = vpop.f32.mrf.mxu0  ;;  %v12408_v55 = vadd.f32 %v12220_v35, %v3097_v27 }
 0x2a2   : > { %v12410_v63 = vpop.f32.mrf.mxu1 }
 0x2a3   : > { %14299 = vst [vmem:[#allocation75_spill] sm:$0xff] %v12410_v63  ;;  %v12412_v10 = vpop.f32.mrf.mxu0  ;;  %v12415_v30 = vadd.f32 %v12230_v52, %v3100_v37 }
 0x2a4   : > { %v9965_v25 = vpop.f32.mrf.mxu1 }
 0x2a5   : > { %v3731_v34 = vadd.f32 %v9965_v25, %v12242_v0  ;;  %v12418_v43 = vpop.f32.mrf.mxu0 }
 0x2a6   : > { %14300 = vst [vmem:[#allocation76_spill] sm:$0xff] %v12418_v43  ;;  %v3602_v13 = vpop.f32.mrf.mxu1 }
 0x2a7   : > { %v3729_v2 = vadd.f32 %v3602_v13, %v12248_v53  ;;  %v12422_v21 = vadd.f32 %v12239_v16, %v3731_v34  ;;  %v12424_v35 = vpop.f32.mrf.mxu0 }
 0x2a8   : > { %v9966_v27 = vpop.f32.mrf.mxu1 }
 0x2a9   : > { %v3732_v51 = vadd.f32 %v9966_v27, %v12255_v54  ;;  %v12428_v63 = vadd.f32 %v12245_v38, %v3729_v2  ;;  %v12435_v37 = vpop.f32.mrf.mxu0 }
 0x2aa   : > { %v12430_v52 = vpop.f32.mrf.mxu1 }
 0x2ab   : > { %v12433_v0 = vadd.f32 %v12252_v36, %v3732_v51  ;;  %v12442_v54 = vpop.f32.mrf.mxu0 }
 0x2ac   : > { %v9969_v25 = vpop.f32.mrf.mxu1 }
 0x2ad   : > { %v3735_v53 = vadd.f32 %v9969_v25, %v12264_v8  ;;  %v12453_v8 = vpop.f32.mrf.mxu0 }
 0x2ae   : > { %v3618_v16 = vpop.f32.mrf.mxu1 }
 0x2af   : > { %v3733_v34 = vadd.f32 %v3618_v16, %v12270_v17  ;;  %v12440_v13 = vadd.f32 %v12261_v7, %v3735_v53  ;;  %v10635_v7 = vld [vmem:[%s14092_s3 + $0x158] sm:$0xff]   ;;  %v10636_v17 = vld [vmem:[%s14092_s3 + $0x150] sm:$0xff]   ;;  %v12466_v16 = vpop.f32.mrf.mxu0 }
 0x2b0   : > { %v9970_v38 = vpop.f32.mrf.mxu1  ;;  %10163 = vmatprep.subr.bf16.mxu0 %v10635_v7 }
 0x2b1   : > { %v3736_v2 = vadd.f32 %v9970_v38, %v12277_v56  ;;  %v12446_v27 = vadd.f32 %v12267_v23, %v3733_v34  ;;  %10164 = vmatpush3.bf16.msra.mxu0 %v10635_v7  ;;  %v10637_v38 = vld [vmem:[%s14092_s3 + $0x148] sm:$0xff]  }
 0x2b2   : > { %v12448_v36 = vpop.f32.mrf.mxu1  ;;  %10165 = vmatprep.subr.bf16.mxu0 %v10636_v17 }
 0x2b3   : > { %v12451_v51 = vadd.f32 %v12274_v61, %v3736_v2 }
 0x2b4   : > { %v9973_v25 = vpop.f32.mrf.mxu1 }
 0x2b5   : > { %v3739_v56 = vadd.f32 %v9973_v25, %v12289_v41  ;;  %10166 = vmatpush3.bf16.msra.mxu0 %v10636_v17 }
 0x2b6   : > { %v3634_v23 = vpop.f32.mrf.mxu1  ;;  %10167 = vmatprep.subr.bf16.mxu0 %v10637_v38 }
 0x2b7   : > { %v3737_v53 = vadd.f32 %v3634_v23, %v12295_v57  ;;  %v12464_v61 = vadd.f32 %v12286_v18, %v3739_v56  ;;  %v12480_v18 = vpop.f32.mrf.mxu0 }
 0x2b8   : > { %v9974_v34 = vpop.f32.mrf.mxu1 }
 0x2b9   : > { %v3740_v2 = vadd.f32 %v9974_v34, %v12302_v50  ;;  %v12473_v41 = vadd.f32 %v12292_v14, %v3737_v53  ;;  %10168 = vmatpush3.bf16.msra.mxu0 %v10637_v38  ;;  %v12487_v14 = vpop.f32.mrf.mxu0 }
 0x2ba   : > { %v12475_v25 = vpop.f32.mrf.mxu1 }
 0x2bb   : > { %v12478_v57 = vadd.f32 %v12299_v24, %v3740_v2 }
 0x2bc   : > { %v9977_v7 = vpop.f32.mrf.mxu1 }
 0x2bd   : > { %v3743_v56 = vadd.f32 %v9977_v7, %v12314_v33  ;;  %v12498_v33 = vpop.f32.mrf.mxu0 }
 0x2be   : > { %v3650_v23 = vpop.f32.mrf.mxu1 }
 0x2bf   : > { %v3741_v43 = vadd.f32 %v3650_v23, %v12320_v46  ;;  %v12485_v50 = vadd.f32 %v12311_v6, %v3743_v56 }
 0x2c0   : > { %v9978_v53 = vpop.f32.mrf.mxu1 }
 0x2c1   : > { %v3744_v24 = vadd.f32 %v9978_v53, %v12327_v4  ;;  %v12491_v17 = vadd.f32 %v12317_v31, %v3741_v43  ;;  %v12505_v4 = vpop.f32.mrf.mxu0 }
 0x2c2   : > { %v12493_v34 = vpop.f32.mrf.mxu1 }
 0x2c3   : > { %v12496_v2 = vadd.f32 %v12324_v59, %v3744_v24 }
 0x2c4   : > { %v9981_v46 = vpop.f32.mrf.mxu1 }
 0x2c5   : > { %v3747_v6 = vadd.f32 %v9981_v46, %v12336_v48  ;;  %v12516_v48 = vpop.f32.mrf.mxu0 }
 0x2c6   : > { %v3666_v7 = vpop.f32.mrf.mxu1 }
 0x2c7   : > { %v3745_v38 = vadd.f32 %v3666_v7, %v12342_v60  ;;  %v12503_v56 = vadd.f32 %v12333_v29, %v3747_v6 }
 0x2c8   : > { %v9982_v31 = vpop.f32.mrf.mxu1 }
 0x2c9   : > { %v3748_v43 = vadd.f32 %v9982_v31, %v12349_v39  ;;  %v12509_v23 = vadd.f32 %v12339_v40, %v3745_v38  ;;  %v12523_v39 = vpop.f32.mrf.mxu0 }
 0x2ca   : > { %v12511_v59 = vpop.f32.mrf.mxu1 }
 0x2cb   : > { %v12514_v53 = vadd.f32 %v12346_v1, %v3748_v43 }
 0x2cc   : > { %v9985_v24 = vpop.f32.mrf.mxu1 }
 0x2cd   : > { %v3751_v60 = vadd.f32 %v9985_v24, %v12358_v58  ;;  %v12534_v58 = vpop.f32.mrf.mxu0 }
 0x2ce   : > { %v3682_v29 = vpop.f32.mrf.mxu1 }
 0x2cf   : > { %v3749_v46 = vadd.f32 %v3682_v29, %v12364_v45  ;;  %v12521_v6 = vadd.f32 %v12355_v20, %v3751_v60 }
 0x2d0   : > { %v9986_v40 = vpop.f32.mrf.mxu1 }
 0x2d1   : > { %14301 = vst [vmem:[#allocation77_spill] sm:$0xff] %v12521_v6  ;;  %v3752_v7 = vadd.f32 %v9986_v40, %v12371_v19  ;;  %v12527_v38 = vadd.f32 %v12361_v12, %v3749_v46  ;;  %v12541_v19 = vpop.f32.mrf.mxu0 }
 0x2d2   : > { %v12529_v1 = vpop.f32.mrf.mxu1 }
 0x2d3   : > { %14302 = vst [vmem:[#allocation78_spill] sm:$0xff] %v12527_v38  ;;  %14303 = vst [vmem:[#allocation79_spill] sm:$0xff] %v12529_v1  ;;  %v12532_v31 = vadd.f32 %v12368_v47, %v3752_v7 }
 0x2d4   : > { %v9989_v43 = vpop.f32.mrf.mxu1 }
 0x2d5   : > { %14304 = vst [vmem:[#allocation80_spill] sm:$0xff] %v12532_v31  ;;  %v3755_v45 = vadd.f32 %v9989_v43, %v12380_v9  ;;  %v12552_v9 = vpop.f32.mrf.mxu0  ;;  %v3070_v43 = vadd.f32 %v12250_v32, %v12047_v15  ;;  %v12574_v32 = vld [vmem:[%s10915_s23] sm:$0xff]  }
 0x2d6   : > { %v3698_v20 = vpop.f32.mrf.mxu1 }
 0x2d7   : > { %v3753_v24 = vadd.f32 %v3698_v20, %v12386_v26  ;;  %v12539_v60 = vadd.f32 %v12377_v42, %v3755_v45  ;;  %v12561_v45 = vpop.f32.mrf.mxu0 }
 0x2d8   : > { %v9990_v12 = vpop.f32.mrf.mxu1 }
 0x2d9   : > { %14305 = vst [vmem:[#allocation81_spill] sm:$0xff] %v12539_v60  ;;  %v3756_v29 = vadd.f32 %v9990_v12, %v12393_v22  ;;  %v12545_v46 = vadd.f32 %v12383_v44, %v3753_v24 }
 0x2da   : > { %v12547_v47 = vpop.f32.mrf.mxu1 }
 0x2db   : > { %14306 = vst [vmem:[#allocation82_spill] sm:$0xff] %v12545_v46  ;;  %14307 = vst [vmem:[#allocation83_spill] sm:$0xff] %v12547_v47  ;;  %v12550_v40 = vadd.f32 %v12390_v3, %v3756_v29  ;;  %v12579_v29 = vld [vmem:[%s10915_s23 + $0x8] sm:$0xff]  }
 0x2dc   : > { %v9993_v26 = vpop.f32.mrf.mxu1  ;;  %v14316_v46 = vld [vmem:[#allocation56_spill] sm:$0xff] }
 0x2dd   : > { %14308 = vst [vmem:[#allocation84_spill] sm:$0xff] %v12550_v40  ;;  %v3759_v42 = vadd.f32 %v9993_v26, %v12402_v62  ;;  %v3392_v62 = vadd.f32 %v12043_v49, %v3070_v43  ;;  %v12586_v49 = vld [vmem:[%s10915_s23 + $0x10] sm:$0xff]   ;;  %v12630_v40 = vld [vmem:[%s10915_s23 + $0x40] sm:$0xff]  }
 0x2de   : > { %v3714_v7 = vpop.f32.mrf.mxu1 }
 0x2df   : > { %v3757_v22 = vadd.f32 %v3714_v7, %v12408_v55  ;;  %v12559_v44 = vadd.f32 %v12399_v5, %v3759_v42  ;;  %v3730_v7 = vadd.f32 %v12430_v52, %v3392_v62  ;;  %v14313_v42 = vld [vmem:[#allocation51_spill] sm:$0xff] }
 0x2e0   : > { %v9994_v3 = vpop.f32.mrf.mxu1  ;;  %v3074_v5 = vadd.f32 %v14313_v42, %v12073_v28  ;;  %v12614_v42 = vld [vmem:[%s10915_s23 + $0x30] sm:$0xff]   ;;  %14315 = vst [vmem:[#allocation51_spill] sm:$0xff] %v12630_v40 }
 0x2e1   : > { %14309 = vst [vmem:[#allocation85_spill] sm:$0xff] %v12559_v44  ;;  %v3760_v20 = vadd.f32 %v9994_v3, %v12415_v30  ;;  %v12565_v24 = vadd.f32 %v12405_v11, %v3757_v22  ;;  %v416_v11 = vunpack.c.l.bf16 %v12579_v29  ;;  %v12582_v30 = vpop.f32.mrf.mxu0  ;;  %v12593_v3 = vld [vmem:[%s10915_s23 + $0x18] sm:$0xff]   ;;  %v12609_v22 = vld [vmem:[%s10915_s23 + $0x28] sm:$0xff]  }
 0x2e2   : > { %v12567_v12 = vpop.f32.mrf.mxu1  ;;  %v3396_v60 = vadd.f32 %v14316_v46, %v3074_v5  ;;  %v14321_v40 = vld [vmem:[#allocation58_spill] sm:$0xff] }
 0x2e3   : > { %14310 = vst [vmem:[#allocation86_spill] sm:$0xff] %v12565_v24  ;;  %14311 = vst [vmem:[#allocation87_spill] sm:$0xff] %v12567_v12  ;;  %v12571_v15 = vadd.f32 %v12412_v10, %v3760_v20  ;;  %v12602_v10 = vld [vmem:[%s10915_s23 + $0x20] sm:$0xff]   ;;  %v12618_v44 = vpop.f32.mrf.mxu0  ;;  %v12625_v12 = vld [vmem:[%s10915_s23 + $0x38] sm:$0xff]  }
 0x2e4   : > { %v10045_v26 = vpop.f32.mrf.mxu1  ;;  %v3734_v52 = vadd.f32 %v12448_v36, %v3396_v60  ;;  %v14322_v20 = vld [vmem:[#allocation55_spill] sm:$0xff] }
 0x2e5   : > { %14312 = vst [vmem:[#allocation88_spill] sm:$0xff] %v12571_v15  ;;  %v4391_v43 = vadd.f32 %v10045_v26, %v12422_v21  ;;  %v12599_v15 = vld [vmem:[#allocation5] ss:$0 sm:$0xff]  ;;  %v12643_v28 = vpop.f32.mrf.mxu0 }
 0x2e6   : > { %v4262_v24 = vpop.f32.mrf.mxu1 }
 0x2e7   : > { %v4729_v62 = vadd.f32 %v12424_v35, %v4391_v43  ;;  %v4389_v26 = vadd.f32 %v4262_v24, %v12428_v63  ;;  %v14314_v43 = vld [vmem:[#allocation50_spill] sm:$0xff]  ;;  %v12661_v6 = vpop.f32.mrf.mxu0 }
 0x2e8   : > { %v10046_v21 = vpop.f32.mrf.mxu1  ;;  %v4068_v55 = vadd.f32 %v14314_v43, %v3730_v7 }
 0x2e9   : > { %v4768_v35 = vadd.f32 %v12599_v15, %v4729_v62  ;;  %v4727_v63 = vadd.f32 %v12435_v37, %v4389_v26  ;;  %v4392_v24 = vadd.f32 %v10046_v21, %v12433_v0  ;;  %v12638_v26 = vld [vmem:[%s10915_s23 + $0x48] sm:$0xff]  }
 0x2ea   : > { %v4265_v62 = vpop.f32.mrf.mxu1  ;;  %14317 = vst [vmem:[#allocation50_spill] sm:$0xff] %v12638_v26  ;;  %v14320_v21 = vld [vmem:[#allocation61_spill] sm:$0xff]  ;;  %v3078_v26 = vadd.f32 %v14322_v20, %v14321_v40 }
 0x2eb   : > { %v4800_v31 = vmul.f32 0.1, %v4768_v35  ;;  %v4766_v37 = vadd.f32 %v12599_v15, %v4727_v63  ;;  %v4730_v0 = vadd.f32 %v12442_v54, %v4392_v24  ;;  %v4390_v7 = vadd.f32 %v4265_v62, %v4068_v55  ;;  %v12648_v55 = vld [vmem:[%s10915_s23 + $0x50] sm:$0xff]  }
 0x2ec   : > { %v10049_v46 = vpop.f32.mrf.mxu1  ;;  %14318 = vst [vmem:[#allocation56_spill] sm:$0xff] %v12648_v55  ;;  %v14319_v62 = vld [vmem:[#allocation41_spill] sm:$0xff] }
 0x2ed   : > { %v4832_v5 = vmax.f32 %v4768_v35, %v4800_v31  ;;  %v4798_v47 = vmul.f32 0.1, %v4766_v37  ;;  %v4769_v63 = vadd.f32 %v12599_v15, %v4730_v0  ;;  %v4728_v54 = vadd.f32 %v12453_v8, %v4390_v7  ;;  %v14324_v8 = vld [vmem:[#allocation60_spill] sm:$0xff]  ;;  %v14325_v7 = vld [vmem:[#allocation67_spill] sm:$0xff]  ;;  %v14326_v40 = vld [vmem:[#allocation53_spill] sm:$0xff] }
 0x2ee   : > { %v1886_v43 = vadd.f32 %v14320_v21, %v14319_v62  ;;  %v4395_v36 = vadd.f32 %v10049_v46, %v12440_v13  ;;  %v4278_v60 = vpop.f32.mrf.mxu1  ;;  %v3082_v1 = vadd.f32 %v14325_v7, %v14324_v8  ;;  %v4072_v20 = vadd.f32 %v14326_v40, %v3734_v52  ;;  %v14331_v7 = vld [vmem:[#allocation42_spill] sm:$0xff]  ;;  %v14335_v40 = vld [vmem:[#allocation59_spill] sm:$0xff] }
 0x2ef   : > { %v12656_v38 = vadd.f32 %v4832_v5, %v416_v11  ;;  %v4830_v31 = vmax.f32 %v4766_v37, %v4798_v47  ;;  %v4801_v35 = vmul.f32 0.1, %v4769_v63  ;;  %v4767_v0 = vadd.f32 %v12599_v15, %v4728_v54  ;;  %v14329_v5 = vld [vmem:[#allocation43_spill] sm:$0xff] }
 0x2f0   : > { %v4733_v24 = vadd.f32 %v12466_v16, %v4395_v36  ;;  %v4393_v21 = vadd.f32 %v4278_v60, %v12446_v27  ;;  %v10050_v62 = vpop.f32.mrf.mxu1  ;;  %v14327_v47 = vunpack.c.l.bf16 %v12574_v32  ;;  %v14330_v54 = vld [vmem:[#allocation63_spill] sm:$0xff]  ;;  %v2748_v55 = vadd.f32 %v14331_v7, %v1886_v43 }
 0x2f1   : > { %14323 = vst [vmem:[#allocation41_spill] sm:$0xff] %v12656_v38  ;;  %v4833_v13 = vmax.f32 %v4769_v63, %v4801_v35  ;;  %v4799_v46 = vmul.f32 0.1, %v4767_v0  ;;  %v4396_v11 = vadd.f32 %v10050_v62, %v12451_v51  ;;  %v1902_v8 = vadd.f32 %v14330_v54, %v14329_v5  ;;  %v12683_v5 = vpop.f32.mrf.mxu0 }
 0x2f2   : > { %v12669_v37 = vadd.f32 %v4830_v31, %v14327_v47  ;;  %v4772_v16 = vadd.f32 %v12599_v15, %v4733_v24  ;;  %v4731_v27 = vadd.f32 %v12480_v18, %v4393_v21  ;;  %v4281_v36 = vpop.f32.mrf.mxu1  ;;  %v14332_v52 = vunpack.c.h.bf16 %v12579_v29  ;;  %v14334_v31 = vld [vmem:[#allocation57_spill] sm:$0xff] }
 0x2f3   : > { %v4831_v60 = vmax.f32 %v4767_v0, %v4799_v46  ;;  %v4734_v51 = vadd.f32 %v12487_v14, %v4396_v11  ;;  %v4394_v35 = vadd.f32 %v4281_v36, %v4072_v20  ;;  %v3400_v62 = vadd.f32 %v14334_v31, %v3078_v26  ;;  %v14336_v18 = vld [vmem:[#allocation69_spill] sm:$0xff] }
 0x2f4   : > { %14328 = vst [vmem:[#allocation61_spill] sm:$0xff] %v12669_v37  ;;  %v12678_v63 = vadd.f32 %v4833_v13, %v14332_v52  ;;  %v3404_v47 = vadd.f32 %v14335_v40, %v3082_v1  ;;  %v4804_v43 = vmul.f32 0.1, %v4772_v16  ;;  %v4770_v24 = vadd.f32 %v12599_v15, %v4731_v27  ;;  %v10053_v54 = vpop.f32.mrf.mxu1  ;;  %v12698_v52 = vpop.f32.mrf.mxu0  ;;  %v14341_v40 = vld [vmem:[#allocation66_spill] sm:$0xff] }
 0x2f5   : > { %v3086_v21 = vadd.f32 %v14336_v18, %v2748_v55  ;;  %v4773_v29 = vadd.f32 %v12599_v15, %v4734_v51  ;;  %v4732_v13 = vadd.f32 %v12498_v33, %v4394_v35  ;;  %v4399_v0 = vadd.f32 %v10053_v54, %v12464_v61 }
 0x2f6   : > { %14333 = vst [vmem:[#allocation58_spill] sm:$0xff] %v12678_v63  ;;  %v3738_v14 = vadd.f32 %v12475_v25, %v3400_v62  ;;  %v4836_v20 = vmax.f32 %v4772_v16, %v4804_v43  ;;  %v4802_v26 = vmul.f32 0.1, %v4770_v24  ;;  %v4294_v46 = vpop.f32.mrf.mxu1  ;;  %v14337_v1 = vunpack.c.h.bf16 %v12574_v32 }
 0x2f7   : > { %v4805_v7 = vmul.f32 0.1, %v4773_v29  ;;  %v4771_v27 = vadd.f32 %v12599_v15, %v4732_v13  ;;  %v4737_v55 = vadd.f32 %v12505_v4, %v4399_v0  ;;  %v4397_v36 = vadd.f32 %v4294_v46, %v12473_v41 }
 0x2f8   : > { %v12693_v11 = vadd.f32 %v4831_v60, %v14337_v1  ;;  %v4895_v61 = vpack.c.bf16 %v12678_v63, %v12656_v38  ;;  %v14339_v25 = vunpack.c.l.bf16 %v12593_v3  ;;  %v4834_v16 = vmax.f32 %v4770_v24, %v4802_v26  ;;  %v10054_v32 = vpop.f32.mrf.mxu1  ;;  %v14348_v26 = vld [vmem:[#allocation44_spill] sm:$0xff]  ;;  %v10652_v63 = vld [vmem:[%s14092_s3 + $0x1b0] sm:$0xff]  }
 0x2f9   : > { %v4837_v51 = vmax.f32 %v4773_v29, %v4805_v7  ;;  %v4803_v35 = vmul.f32 0.1, %v4771_v27  ;;  %v4776_v4 = vadd.f32 %v12599_v15, %v4737_v55  ;;  %v4735_v41 = vadd.f32 %v12516_v48, %v4397_v36 }
 0x2fa   : > { %14338 = vst [vmem:[#allocation55_spill] sm:$0xff] %v12693_v11  ;;  %v12704_v33 = vadd.f32 %v4836_v20, %v14339_v25  ;;  %v4894_v60 = vpack.c.bf16 %v12693_v11, %v12669_v37  ;;  %v3742_v31 = vadd.f32 %v12493_v34, %v3404_v47  ;;  %v4400_v62 = vadd.f32 %v10054_v32, %v12478_v57  ;;  %v4297_v54 = vpop.f32.mrf.mxu1  ;;  %v14346_v34 = vld [vmem:[#allocation45_spill] sm:$0xff] }
 0x2fb   : > { %v4076_v43 = vadd.f32 %v14341_v40, %v3738_v14  ;;  %v14342_v24 = vunpack.c.l.bf16 %v12586_v49  ;;  %v14344_v13 = vunpack.c.h.bf16 %v12593_v3  ;;  %v4835_v0 = vmax.f32 %v4771_v27, %v4803_v35  ;;  %v14347_v47 = vld [vmem:[#allocation65_spill] sm:$0xff]  ;;  %v12725_v14 = vpop.f32.mrf.mxu0  ;;  %v14352_v35 = vld [vmem:[#allocation68_spill] sm:$0xff] }
 0x2fc   : > { %14340 = vst [vmem:[#allocation60_spill] sm:$0xff] %v12704_v33  ;;  %10131 = vmatprep.mubr.bf16.mxu1 %v4894_v60  ;;  %v4808_v20 = vmul.f32 0.1, %v4776_v4  ;;  %v4774_v48 = vadd.f32 %v12599_v15, %v4735_v41  ;;  %v1918_v57 = vadd.f32 %v14347_v47, %v14346_v34  ;;  %v2752_v46 = vadd.f32 %v14348_v26, %v1902_v8  ;;  %v10057_v55 = vpop.f32.mrf.mxu1 }
 0x2fd   : > { %v12715_v18 = vadd.f32 %v4834_v16, %v14342_v24  ;;  %v12719_v29 = vadd.f32 %v4837_v51, %v14344_v13  ;;  %10132 = vmatmul.mubr.bf16.vlgmr.msra.gmra.mxu1 %v4895_v61  ;;  %v4738_v1 = vadd.f32 %v12523_v39, %v4400_v62  ;;  %v4398_v7 = vadd.f32 %v4297_v54, %v4076_v43  ;;  %v14351_v61 = vld [vmem:[#allocation62_spill] sm:$0xff]  ;;  %v12743_v40 = vpop.f32.mrf.mxu0 }
 0x2fe   : > { %v4840_v36 = vmax.f32 %v4776_v4, %v4808_v20  ;;  %v4806_v3 = vmul.f32 0.1, %v4774_v48  ;;  %v4403_v25 = vadd.f32 %v10057_v55, %v12485_v50  ;;  %v14349_v27 = vunpack.c.h.bf16 %v12586_v49  ;;  %v4310_v51 = vpop.f32.mrf.mxu1  ;;  %v14357_v20 = vld [vmem:[#allocation47_spill] sm:$0xff] }
 0x2ff   : > { %14343 = vst [vmem:[#allocation67_spill] sm:$0xff] %v12715_v18  ;;  %14345 = vst [vmem:[#allocation53_spill] sm:$0xff] %v12719_v29  ;;  %v3408_v32 = vadd.f32 %v14351_v61, %v3086_v21  ;;  %v4777_v60 = vadd.f32 %v12599_v15, %v4738_v1  ;;  %v4736_v8 = vadd.f32 %v12534_v58, %v4398_v7  ;;  %v14353_v39 = vunpack.c.l.bf16 %v12609_v22 }
 0x300   : > { %v12731_v16 = vadd.f32 %v4835_v0, %v14349_v27  ;;  %v4080_v41 = vadd.f32 %v14352_v35, %v3742_v31  ;;  %v4838_v4 = vmax.f32 %v4774_v48, %v4806_v3  ;;  %v4741_v50 = vadd.f32 %v12541_v19, %v4403_v25  ;;  %v10058_v54 = vpop.f32.mrf.mxu1  ;;  %v14359_v3 = vld [vmem:[#allocation48_spill] sm:$0xff]  ;;  %v14360_v27 = vld [vmem:[#allocation71_spill] sm:$0xff] }
 0x301   : > { %v12739_v62 = vadd.f32 %v4840_v36, %v14353_v39  ;;  %v4401_v49 = vadd.f32 %v4310_v51, %v12491_v17  ;;  %v4809_v43 = vmul.f32 0.1, %v4777_v60  ;;  %v4775_v21 = vadd.f32 %v12599_v15, %v4736_v8  ;;  %v12764_v8 = vpop.f32.mrf.mxu0 }
 0x302   : > { %14350 = vst [vmem:[#allocation43_spill] sm:$0xff] %v12731_v16  ;;  %v4896_v58 = vpack.c.bf16 %v12731_v16, %v12715_v18  ;;  %v4897_v31 = vpack.c.bf16 %v12719_v29, %v12704_v33  ;;  %v4780_v24 = vadd.f32 %v12599_v15, %v4741_v50  ;;  %v4404_v19 = vadd.f32 %v10058_v54, %v12496_v2  ;;  %v4313_v1 = vpop.f32.mrf.mxu1  ;;  %v14358_v2 = vld [vmem:[#allocation52_spill] sm:$0xff] }
 0x303   : > { %14354 = vst [vmem:[#allocation63_spill] sm:$0xff] %v12739_v62  ;;  %v4739_v13 = vadd.f32 %v12552_v9, %v4401_v49  ;;  %v14355_v17 = vunpack.c.l.bf16 %v12602_v10  ;;  %v2756_v48 = vadd.f32 %v14357_v20, %v1918_v57  ;;  %v3746_v34 = vadd.f32 %v12511_v59, %v3408_v32 }
 0x304   : > { %v4841_v47 = vmax.f32 %v4777_v60, %v4809_v43  ;;  %v4807_v26 = vmul.f32 0.1, %v4775_v21  ;;  %10135 = vmatprep.mubr.bf16.mxu1 %v4896_v58  ;;  %v4812_v7 = vmul.f32 0.1, %v4780_v24  ;;  %v4742_v36 = vadd.f32 %v12561_v45, %v4404_v19  ;;  %v10061_v60 = vpop.f32.mrf.mxu1 }
 0x305   : > { %v12755_v0 = vadd.f32 %v4838_v4, %v14355_v17  ;;  %v4778_v55 = vadd.f32 %v12599_v15, %v4739_v13  ;;  %v4402_v9 = vadd.f32 %v4313_v1, %v4080_v41  ;;  %10136 = vmatmul.mubr.bf16.gmra.mxu1 %v4897_v31  ;;  %v1934_v25 = vadd.f32 %v14359_v3, %v14358_v2  ;;  %v14363_v41 = vld [vmem:[#allocation73_spill] sm:$0xff]  ;;  %v12784_v13 = vpop.f32.mrf.mxu0 }
 0x306   : > { %v3090_v61 = vadd.f32 %v14360_v27, %v2752_v46  ;;  %v14361_v59 = vunpack.c.h.bf16 %v12609_v22  ;;  %v4839_v32 = vmax.f32 %v4775_v21, %v4807_v26  ;;  %v4844_v51 = vmax.f32 %v4780_v24, %v4812_v7  ;;  %v4326_v49 = vpop.f32.mrf.mxu1  ;;  %v14366_v22 = vld [vmem:[#allocation70_spill] sm:$0xff] }
 0x307   : > { %14356 = vst [vmem:[#allocation42_spill] sm:$0xff] %v12755_v0  ;;  %v4810_v35 = vmul.f32 0.1, %v4778_v55  ;;  %v4781_v39 = vadd.f32 %v12599_v15, %v4742_v36  ;;  %v4740_v45 = vadd.f32 %v12582_v30, %v4402_v9  ;;  %v3094_v4 = vadd.f32 %v14363_v41, %v2756_v48  ;;  %v12798_v7 = vld [vmem:[%s10915_s23 + $0x58] sm:$0xff]  }
 0x308   : > { %v12768_v57 = vadd.f32 %v4841_v47, %v14361_v59  ;;  %v4407_v50 = vadd.f32 %v10061_v60, %v12503_v56  ;;  %v14364_v46 = vunpack.c.h.bf16 %v12602_v10  ;;  %v4084_v54 = vadd.f32 %v14366_v22, %v3746_v34  ;;  %v10062_v10 = vpop.f32.mrf.mxu1  ;;  %v14374_v60 = vld [vmem:[#allocation64_spill] sm:$0xff] }
 0x309   : > { %v14367_v21 = vunpack.c.l.bf16 %v12625_v12  ;;  %v4842_v31 = vmax.f32 %v4778_v55, %v4810_v35  ;;  %v4813_v24 = vmul.f32 0.1, %v4781_v39  ;;  %v4779_v30 = vadd.f32 %v12599_v15, %v4740_v45  ;;  %v12810_v35 = vpop.f32.mrf.mxu0 }
 0x30a   : > { %14362 = vst [vmem:[#allocation57_spill] sm:$0xff] %v12768_v57  ;;  %v12776_v43 = vadd.f32 %v4839_v32, %v14364_v46  ;;  %v4745_v56 = vadd.f32 %v12618_v44, %v4407_v50  ;;  %v4405_v19 = vadd.f32 %v4326_v49, %v12509_v23  ;;  %v4899_v20 = vpack.c.bf16 %v12768_v57, %v12739_v62  ;;  %v14371_v23 = vld [vmem:[#allocation54_spill] sm:$0xff]  ;;  %v4329_v2 = vpop.f32.mrf.mxu1  ;;  %v14376_v49 = vld [vmem:[#allocation77_spill] sm:$0xff] }
 0x30b   : > { %v12781_v58 = vadd.f32 %v4844_v51, %v14367_v21  ;;  %v4845_v48 = vmax.f32 %v4781_v39, %v4813_v24  ;;  %v4811_v34 = vmul.f32 0.1, %v4779_v30  ;;  %v4408_v47 = vadd.f32 %v10062_v10, %v12514_v53  ;;  %v14380_v21 = vld [vmem:[#allocation79_spill] sm:$0xff] }
 0x30c   : > { %14365 = vst [vmem:[#allocation59_spill] sm:$0xff] %v12776_v43  ;;  %v4898_v17 = vpack.c.bf16 %v12776_v43, %v12755_v0  ;;  %v14369_v26 = vunpack.c.l.bf16 %v12614_v42  ;;  %v436_v44 = vunpack.c.l.bf16 %v12798_v7  ;;  %v2760_v55 = vadd.f32 %v14371_v23, %v1934_v25  ;;  %v14375_v25 = vld [vmem:[#allocation46_spill] sm:$0xff]  ;;  %v10065_v41 = vpop.f32.mrf.mxu1 }
 0x30d   : > { %14368 = vst [vmem:[#allocation69_spill] sm:$0xff] %v12781_v58  ;;  %v4784_v36 = vadd.f32 %v12599_v15, %v4745_v56  ;;  %v4743_v9 = vadd.f32 %v12643_v28, %v4405_v19  ;;  %v14372_v3 = vunpack.c.h.bf16 %v12625_v12  ;;  %v4843_v53 = vmax.f32 %v4779_v30, %v4811_v34 }
 0x30e   : > { %v12795_v1 = vadd.f32 %v4842_v31, %v14369_v26  ;;  %10139 = vmatprep.mubr.bf16.mxu1 %v4898_v17  ;;  %v4746_v59 = vadd.f32 %v12661_v6, %v4408_v47  ;;  %v4406_v32 = vadd.f32 %v4329_v2, %v4084_v54  ;;  %v3412_v51 = vadd.f32 %v14374_v60, %v3090_v61  ;;  %v14379_v54 = vld [vmem:[#allocation75_spill] sm:$0xff]  ;;  %v4342_v30 = vpop.f32.mrf.mxu1  ;;  %v14381_v17 = vld [vmem:[#allocation78_spill] sm:$0xff]  ;;  %v14387_v60 = vld [vmem:[#allocation72_spill] sm:$0xff] }
 0x30f   : > { %v12806_v27 = vadd.f32 %v4845_v48, %v14372_v3  ;;  %10140 = vmatmul.mubr.bf16.gmra.mxu1 %v4899_v20  ;;  %v3416_v39 = vadd.f32 %v14375_v25, %v3094_v4  ;;  %v4816_v45 = vmul.f32 0.1, %v4784_v36  ;;  %v4782_v28 = vadd.f32 %v12599_v15, %v4743_v9  ;;  %v10110_v20 = vpop.f32.mrf.mxu0  ;;  %v14382_v48 = vld [vmem:[#allocation50_spill] sm:$0xff]  ;;  %v14385_v3 = vld [vmem:[#allocation83_spill] sm:$0xff] }
 0x310   : > { %14370 = vst [vmem:[#allocation66_spill] sm:$0xff] %v12795_v1  ;;  %v4785_v50 = vadd.f32 %v12599_v15, %v4746_v59  ;;  %v4744_v12 = vadd.f32 %v12683_v5, %v4406_v32  ;;  %v4411_v46 = vadd.f32 %v10065_v41, %v14376_v49  ;;  %v14377_v6 = vunpack.c.h.bf16 %v12614_v42  ;;  %v10066_v26 = vpop.f32.mrf.mxu1  ;;  %v14386_v59 = vld [vmem:[#allocation80_spill] sm:$0xff] }
 0x311   : > { %14373 = vst [vmem:[#allocation45_spill] sm:$0xff] %v12806_v27  ;;  %v3098_v61 = vadd.f32 %v14379_v54, %v2760_v55  ;;  %v3750_v31 = vadd.f32 %v14380_v21, %v3412_v51  ;;  %v4848_v24 = vmax.f32 %v4784_v36, %v4816_v45  ;;  %v4814_v4 = vmul.f32 0.1, %v4782_v28  ;;  %v14388_v45 = vld [vmem:[#allocation51_spill] sm:$0xff]  ;;  %v4699_v21 = vpop.f32.mrf.mxu0 }
 0x312   : > { %v12819_v22 = vadd.f32 %v4843_v53, %v14377_v6  ;;  %v4817_v56 = vmul.f32 0.1, %v4785_v50  ;;  %v4783_v19 = vadd.f32 %v12599_v15, %v4744_v12  ;;  %v4749_v10 = vadd.f32 %v12698_v52, %v4411_v46  ;;  %v4345_v25 = vpop.f32.mrf.mxu1 }
 0x313   : > { %v4409_v5 = vadd.f32 %v4342_v30, %v14381_v17  ;;  %v14383_v34 = vunpack.c.l.bf16 %v14382_v48  ;;  %v4846_v47 = vmax.f32 %v4782_v28, %v4814_v4  ;;  %v4901_v55 = vpack.c.bf16 %v12806_v27, %v12781_v58 }
 0x314   : > { %14378 = vst [vmem:[#allocation65_spill] sm:$0xff] %v12819_v22  ;;  %v4900_v23 = vpack.c.bf16 %v12819_v22, %v12795_v1  ;;  %v4849_v36 = vmax.f32 %v4785_v50, %v4817_v56  ;;  %v4815_v9 = vmul.f32 0.1, %v4783_v19  ;;  %v4788_v2 = vadd.f32 %v12599_v15, %v4749_v10  ;;  %v10069_v4 = vpop.f32.mrf.mxu1  ;;  %v14394_v10 = vld [vmem:[#allocation81_spill] sm:$0xff] }
 0x315   : > { %v12828_v42 = vadd.f32 %v4848_v24, %v14383_v34  ;;  %v4747_v52 = vadd.f32 %v12725_v14, %v4409_v5  ;;  %v3754_v53 = vadd.f32 %v14385_v3, %v3416_v39  ;;  %v4412_v32 = vadd.f32 %v10066_v26, %v14386_v59  ;;  %v14393_v39 = vld [vmem:[#allocation56_spill] sm:$0xff]  ;;  %v10113_v59 = vpop.f32.mrf.mxu0 }
 0x316   : > { %10143 = vmatprep.mubr.bf16.mxu1 %v4900_v23  ;;  %v4088_v51 = vadd.f32 %v14387_v60, %v3750_v31  ;;  %v14389_v28 = vunpack.c.l.bf16 %v14388_v45  ;;  %v14391_v12 = vunpack.c.h.bf16 %v14382_v48  ;;  %v4847_v49 = vmax.f32 %v4783_v19, %v4815_v9  ;;  %v14397_v48 = vld [vmem:[#allocation49_spill] sm:$0xff]  ;;  %v4358_v23 = vpop.f32.mrf.mxu1 }
 0x317   : > { %14384 = vst [vmem:[#allocation44_spill] sm:$0xff] %v12828_v42  ;;  %v4820_v46 = vmul.f32 0.1, %v4788_v2  ;;  %v4786_v14 = vadd.f32 %v12599_v15, %v4747_v52  ;;  %10144 = vmatmul.mubr.bf16.gmra.mxu1 %v4901_v55  ;;  %v435_v6 = vunpack.c.h.bf16 %v14393_v39  ;;  %v437_v54 = vunpack.c.h.bf16 %v12798_v7  ;;  %v14398_v55 = vld [vmem:[#allocation74_spill] sm:$0xff] }
 0x318   : > { %v12841_v41 = vadd.f32 %v4846_v47, %v14389_v28  ;;  %v12845_v50 = vadd.f32 %v4849_v36, %v14391_v12  ;;  %v4750_v31 = vadd.f32 %v12743_v40, %v4412_v32  ;;  %v4410_v24 = vadd.f32 %v4345_v25, %v4088_v51  ;;  %v14400_v52 = vld [vmem:[#allocation82_spill] sm:$0xff]  ;;  %v10070_v60 = vpop.f32.mrf.mxu1  ;;  %v14401_v51 = vld [vmem:[#allocation84_spill] sm:$0xff] }
 0x319   : > { %v4852_v30 = vmax.f32 %v4788_v2, %v4820_v46  ;;  %v4818_v56 = vmul.f32 0.1, %v4786_v14  ;;  %v4415_v17 = vadd.f32 %v10069_v4, %v14394_v10  ;;  %v14395_v5 = vunpack.c.h.bf16 %v14388_v45  ;;  %v10699_v28 = vld [vmem:[%s10915_s23 + $0x68] sm:$0xff]  }
 0x31a   : > { %14390 = vst [vmem:[#allocation62_spill] sm:$0xff] %v12841_v41  ;;  %14392 = vst [vmem:[#allocation68_spill] sm:$0xff] %v12845_v50  ;;  %v3420_v34 = vadd.f32 %v14397_v48, %v3098_v61  ;;  %v4789_v47 = vadd.f32 %v12599_v15, %v4750_v31  ;;  %v4748_v26 = vadd.f32 %v12764_v8, %v4410_v24  ;;  %v14402_v25 = vunpack.c.l.bf16 %v14393_v39  ;;  %v4361_v24 = vpop.f32.mrf.mxu1  ;;  %v4712_v39 = vpop.f32.mrf.mxu0 }
 0x31b   : > { %v12854_v19 = vadd.f32 %v4847_v49, %v14395_v5  ;;  %v4092_v40 = vadd.f32 %v14398_v55, %v3754_v53  ;;  %v12862_v36 = vadd.f32 %v4852_v30, %v436_v44  ;;  %v4850_v9 = vmax.f32 %v4786_v14, %v4818_v56  ;;  %v14404_v49 = vld [vmem:[#allocation87_spill] sm:$0xff] }
 0x31c   : > { %v4753_v2 = vadd.f32 %v12784_v13, %v4415_v17  ;;  %v4413_v3 = vadd.f32 %v4358_v23, %v14400_v52  ;;  %v4821_v32 = vmul.f32 0.1, %v4789_v47  ;;  %v4787_v61 = vadd.f32 %v12599_v15, %v4748_v26  ;;  %v10073_v23 = vpop.f32.mrf.mxu1  ;;  %v14406_v52 = vld [vmem:[#allocation85_spill] sm:$0xff] }
 0x31d   : > { %14396 = vst [vmem:[#allocation47_spill] sm:$0xff] %v12854_v19  ;;  %14399 = vst [vmem:[#allocation52_spill] sm:$0xff] %v12862_v36  ;;  %v4902_v8 = vpack.c.bf16 %v12854_v19, %v12841_v41  ;;  %v4903_v53 = vpack.c.bf16 %v12845_v50, %v12828_v42  ;;  %v4416_v13 = vadd.f32 %v10070_v60, %v14401_v51  ;;  %v440_v12 = vunpack.c.l.bf16 %v10699_v28  ;;  %v14410_v51 = vld [vmem:[#allocation86_spill] sm:$0xff] }
 0x31e   : > { %v4792_v7 = vadd.f32 %v12599_v15, %v4753_v2  ;;  %v4751_v44 = vadd.f32 %v12810_v35, %v4413_v3  ;;  %v12876_v45 = vadd.f32 %v4850_v9, %v14402_v25  ;;  %v3758_v46 = vadd.f32 %v14404_v49, %v3420_v34  ;;  %v10700_v35 = vld [vmem:[%s10915_s23 + $0x60] sm:$0xff]  }
 0x31f   : > { %v4853_v14 = vmax.f32 %v4789_v47, %v4821_v32  ;;  %v4819_v31 = vmul.f32 0.1, %v4787_v61  ;;  %10147 = vmatprep.mubr.bf16.mxu1 %v4902_v8  ;;  %v4754_v56 = vadd.f32 %v10110_v20, %v4416_v13  ;;  %v4414_v10 = vadd.f32 %v4361_v24, %v4092_v40  ;;  %v4374_v32 = vpop.f32.mrf.mxu1  ;;  %v14408_v40 = vld [vmem:[#allocation76_spill] sm:$0xff] }
 0x320   : > { %14403 = vst [vmem:[#allocation48_spill] sm:$0xff] %v12876_v45  ;;  %v4824_v4 = vmul.f32 0.1, %v4792_v7  ;;  %v4790_v30 = vadd.f32 %v12599_v15, %v4751_v44  ;;  %10148 = vmatmul.mubr.bf16.gmra.mxu1 %v4903_v53  ;;  %v438_v17 = vunpack.c.l.bf16 %v10700_v35  ;;  %v439_v5 = vunpack.c.h.bf16 %v10700_v35  ;;  %v10114_v44 = vpop.f32.mrf.mxu0  ;;  %v10701_v35 = vld [vmem:[%s10915_s23 + $0x78] sm:$0xff]  }
 0x321   : > { %v12882_v48 = vadd.f32 %v4853_v14, %v437_v54  ;;  %v4851_v26 = vmax.f32 %v4787_v61, %v4819_v31  ;;  %v4793_v47 = vadd.f32 %v12599_v15, %v4754_v56  ;;  %v4752_v9 = vadd.f32 %v4699_v21, %v4414_v10  ;;  %v10074_v25 = vpop.f32.mrf.mxu1 }
 0x322   : > { %v4856_v55 = vmax.f32 %v4792_v7, %v4824_v4  ;;  %v4822_v34 = vmul.f32 0.1, %v4790_v30  ;;  %v441_v2 = vunpack.c.h.bf16 %v10699_v28  ;;  %v4419_v3 = vadd.f32 %v10073_v23, %v14406_v52  ;;  %v4715_v23 = vpop.f32.mrf.mxu0 }
 0x323   : > { %14405 = vst [vmem:[#allocation71_spill] sm:$0xff] %v12882_v48  ;;  %v12886_v20 = vadd.f32 %v4851_v26, %v435_v6  ;;  %v4096_v60 = vadd.f32 %v14408_v40, %v3758_v46  ;;  %v4825_v54 = vmul.f32 0.1, %v4793_v47  ;;  %v4791_v61 = vadd.f32 %v12599_v15, %v4752_v9 }
 0x324   : > { %v12889_v8 = vadd.f32 %v4856_v55, %v440_v12  ;;  %v4854_v53 = vmax.f32 %v4790_v30, %v4822_v34  ;;  %v4757_v7 = vadd.f32 %v10113_v59, %v4419_v3  ;;  %v4417_v13 = vadd.f32 %v4374_v32, %v14410_v51  ;;  %v14411_v12 = vld [vmem:[#allocation88_spill] sm:$0xff]  ;;  %v4377_v59 = vpop.f32.mrf.mxu1 }
 0x325   : > { %14407 = vst [vmem:[#allocation73_spill] sm:$0xff] %v12886_v20  ;;  %v4904_v21 = vpack.c.bf16 %v12886_v20, %v12876_v45  ;;  %v4905_v6 = vpack.c.bf16 %v12882_v48, %v12862_v36  ;;  %v4857_v28 = vmax.f32 %v4793_v47, %v4825_v54  ;;  %v4823_v49 = vmul.f32 0.1, %v4791_v61 }
 0x326   : > { %14409 = vst [vmem:[#allocation70_spill] sm:$0xff] %v12889_v8  ;;  %v4420_v46 = vadd.f32 %v10074_v25, %v14411_v12  ;;  %v12898_v14 = vadd.f32 %v4854_v53, %v438_v17  ;;  %v4796_v31 = vadd.f32 %v12599_v15, %v4757_v7  ;;  %v4755_v24 = vadd.f32 %v4712_v39, %v4417_v13  ;;  %v10702_v39 = vld [vmem:[%s10915_s23 + $0x70] sm:$0xff]  }
 0x327   : > { %10151 = vmatprep.mubr.bf16.mxu1 %v4904_v21  ;;  %v12901_v4 = vadd.f32 %v4857_v28, %v441_v2  ;;  %v4855_v30 = vmax.f32 %v4791_v61, %v4823_v49  ;;  %v4418_v10 = vadd.f32 %v4377_v59, %v4096_v60  ;;  %v444_v26 = vunpack.c.l.bf16 %v10701_v35  ;;  %v10638_v59 = vld [vmem:[%s14092_s3 + $0x140] sm:$0xff]  }
 0x328   : > { %14412 = vst [vmem:[#allocation54_spill] sm:$0xff] %v12898_v14  ;;  %v4758_v56 = vadd.f32 %v10114_v44, %v4420_v46  ;;  %10152 = vmatmul.mubr.bf16.gmra.mxu1 %v4905_v6  ;;  %v4828_v55 = vmul.f32 0.1, %v4796_v31  ;;  %v4794_v34 = vadd.f32 %v12599_v15, %v4755_v24  ;;  %v442_v52 = vunpack.c.l.bf16 %v10702_v39  ;;  %v5241_v6 = vld [vmem:[#allocation2 + $0x8] sm:$0xff]  ;;  %10169 = vmatprep.subr.bf16.mxu0 %v10638_v59 }
 0x329   : > { %14413 = vst [vmem:[#allocation64_spill] sm:$0xff] %v12901_v4  ;;  %v4756_v47 = vadd.f32 %v4715_v23, %v4418_v10  ;;  %v12906_v9 = vadd.f32 %v4855_v30, %v439_v5  ;;  %v445_v32 = vunpack.c.h.bf16 %v10701_v35  ;;  %v443_v44 = vunpack.c.h.bf16 %v10702_v39  ;;  %v10639_v30 = vld [vmem:[%s14092_s3 + $0x138] sm:$0xff]   ;;  %10170 = vmatpush3.bf16.msra.mxu0 %v10638_v59  ;;  %v10641_v10 = vld [vmem:[%s14092_s3 + $0x128] sm:$0xff]   ;;  %v10642_v35 = vld [vmem:[%s14092_s3 + $0x120] sm:$0xff]  }
 0x32a   : > { %v4797_v17 = vadd.f32 %v12599_v15, %v4758_v56  ;;  %v4860_v3 = vmax.f32 %v4796_v31, %v4828_v55  ;;  %v4826_v2 = vmul.f32 0.1, %v4794_v34  ;;  %v4907_v5 = vpack.c.bf16 %v12901_v4, %v12889_v8  ;;  %v14419_v31 = vld [vmem:[#allocation10_spill] sm:$0xff]  ;;  %10203 = vmatprep.subr.bf16.mxu1 %v10639_v30  ;;  %v5314_v23 = vld [vmem:[#allocation2 + $0x9] sm:$0xff] }
 0x32b   : > { %14414 = vst [vmem:[#allocation46_spill] sm:$0xff] %v12906_v9  ;;  %v4795_v60 = vadd.f32 %v12599_v15, %v4756_v47  ;;  %v4906_v53 = vpack.c.bf16 %v12906_v9, %v12898_v14  ;;  %v5240_v15 = vld [vmem:[#allocation2] sm:$0xff]  ;;  %10204 = vmatpush3.bf16.msra.mxu1 %v10639_v30  ;;  %v10640_v56 = vld [vmem:[%s14092_s3 + $0x130] sm:$0xff]   ;;  %v12946_v55 = vld [vmem:[%s14092_s3 + $0x178] sm:$0xff]  }
 0x32c   : > { %v4829_v40 = vmul.f32 0.1, %v4797_v17  ;;  %v12912_v54 = vadd.f32 %v4860_v3, %v444_v26  ;;  %v4858_v61 = vmax.f32 %v4794_v34, %v4826_v2  ;;  %v5272_v49 = vpack.c.bf16 %v5241_v6, %v5240_v15  ;;  %10205 = vmatprep.subr.bf16.mxu1 %v10640_v56  ;;  %v5313_v26 = vld [vmem:[#allocation2 + $0x1] sm:$0xff]  ;;  %10243 = vmatprep.subr.bf16.mxu0 %v12946_v55  ;;  %v12956_v47 = vld [vmem:[#allocation3 + $0x1] ss:$0 sm:$0xff] }
 0x32d   : > { %v4827_v51 = vmul.f32 0.1, %v4795_v60  ;;  %10155 = vmatprep.mubr.bf16.mxu1 %v4906_v53  ;;  %v5345_v34 = vpack.c.bf16 %v5314_v23, %v5313_v26 }
 0x32e   : > { %14415 = vst [vmem:[#allocation77_spill] sm:$0xff] %v12912_v54  ;;  %v4861_v7 = vmax.f32 %v4797_v17, %v4829_v40  ;;  %v12916_v13 = vadd.f32 %v4858_v61, %v442_v52  ;;  %v5288_v24 = vmul.bf16 %v14419_v31, %v5272_v49  ;;  %v12953_v17 = vld [vmem:[%s14092_s3 + $0x198] sm:$0xff]  }
 0x32f   : > { %v4859_v21 = vmax.f32 %v4795_v60, %v4827_v51  ;;  %10206 = vmatpush3.bf16.msra.mxu1 %v10640_v56  ;;  %10171 = vmatprep.mubr.msk.bf16.mxu0 %vm310_vm0, %v5345_v34 }
 0x330   : > { %14416 = vst [vmem:[#allocation75_spill] sm:$0xff] %v12916_v13  ;;  %v12918_v25 = vadd.f32 %v4861_v7, %v445_v32  ;;  %10156 = vmatmul.mubr.bf16.gmra.mxu1 %v4907_v5  ;;  %10207 = vmatprep.subr.bf16.mxu1 %v10641_v10 }
 0x331   : > { %v12920_v28 = vadd.f32 %v4859_v21, %v443_v44 }
 0x332   : > { %14417 = vst [vmem:[#allocation79_spill] sm:$0xff] %v12918_v25  ;;  %v4909_v46 = vpack.c.bf16 %v12918_v25, %v12912_v54 }
 0x333   : > { %14418 = vst [vmem:[#allocation78_spill] sm:$0xff] %v12920_v28  ;;  %v4908_v12 = vpack.c.bf16 %v12920_v28, %v12916_v13  ;;  %10208 = vmatpush3.bf16.msra.mxu1 %v10641_v10  ;;  %v5836_v28 = vld [vmem:[#allocation2 + $0x2] sm:$0xff] }
 0x334   : > { %10209 = vmatprep.subr.bf16.mxu1 %v10642_v35 }
 0x335   : > { %10159 = vmatprep.mubr.bf16.mxu1 %v4908_v12 }
 0x337   : > { %10210 = vmatpush3.bf16.msra.mxu1 %v10642_v35 }
 0x338   : > { %10160 = vmatmul.mubr.bf16.gmra.mxu1 %v4909_v46  ;;  %10283 = vmatprep.subr.bf16.mxu1 %v12953_v17 }
 0x339   : > { %10211 = vmatprep.mubr.msk.bf16.mxu1 %vm310_vm0, %v5288_v24 }
 0x3bd   : > { %v10133_v39 = vpop.f32.mrf.mxu1 }
 0x3be   : > { %v5026_v52 = vadd.f32 %v10133_v39, %v12956_v47 }
 0x3bf   : > { %v5017_v3 = vpop.f32.mrf.mxu1 }
 0x3c0   : > { %v5146_v2 = vmul.f32 0.1, %v5026_v52  ;;  %v5018_v32 = vadd.f32 %v12956_v47, %v5017_v3 }
 0x3c1   : > { %v10134_v40 = vpop.f32.mrf.mxu1 }
 0x3c2   : > { %v5178_v60 = vmax.f32 %v5026_v52, %v5146_v2  ;;  %v5144_v53 = vmul.f32 0.1, %v5018_v32  ;;  %v5029_v61 = vadd.f32 %v10134_v40, %v12956_v47 }
 0x3c3   : > { %v5020_v44 = vpop.f32.mrf.mxu1 }
 0x3c4   : > { %5210 = vst.msk [vmem:[#allocation2 + $0x21] sm:$0xff] %vm310_vm0, %v5178_v60  ;;  %v5176_v7 = vmax.f32 %v5018_v32, %v5144_v53  ;;  %v5147_v51 = vmul.f32 0.1, %v5029_v61  ;;  %v5021_v5 = vadd.f32 %v12956_v47, %v5020_v44 }
 0x3c5   : > { %v10137_v21 = vpop.f32.mrf.mxu1 }
 0x3c6   : > { %5208 = vst.msk [vmem:[#allocation2 + $0x11] sm:$0xff] %vm310_vm0, %v5176_v7  ;;  %v5179_v15 = vmax.f32 %v5029_v61, %v5147_v51  ;;  %v5145_v6 = vmul.f32 0.1, %v5021_v5  ;;  %v5042_v49 = vadd.f32 %v10137_v21, %v12956_v47  ;;  %v10644_v51 = vld [vmem:[%s14092_s3 + $0x170] sm:$0xff]  }
 0x3c7   : > { %v5033_v12 = vpop.f32.mrf.mxu1 }
 0x3c8   : > { %5211 = vst.msk [vmem:[#allocation2 + $0x29] sm:$0xff] %vm310_vm0, %v5179_v15  ;;  %v5177_v46 = vmax.f32 %v5021_v5, %v5145_v6  ;;  %v5150_v24 = vmul.f32 0.1, %v5042_v49  ;;  %v5034_v59 = vadd.f32 %v12956_v47, %v5033_v12 }
 0x3c9   : > { %v10138_v30 = vpop.f32.mrf.mxu1 }
 0x3ca   : > { %5209 = vst.msk [vmem:[#allocation2 + $0x19] sm:$0xff] %vm310_vm0, %v5177_v46  ;;  %v5182_v56 = vmax.f32 %v5042_v49, %v5150_v24  ;;  %v5148_v10 = vmul.f32 0.1, %v5034_v59  ;;  %v5045_v35 = vadd.f32 %v10138_v30, %v12956_v47 }
 0x3cb   : > { %v5036_v26 = vpop.f32.mrf.mxu1 }
 0x3cc   : > { %5214 = vst.msk [vmem:[#allocation2 + $0x41] sm:$0xff] %vm310_vm0, %v5182_v56  ;;  %v5180_v23 = vmax.f32 %v5034_v59, %v5148_v10  ;;  %v5151_v34 = vmul.f32 0.1, %v5045_v35  ;;  %v5037_v39 = vadd.f32 %v12956_v47, %v5036_v26  ;;  %v5317_v59 = vld [vmem:[#allocation2 + $0x21] sm:$0xff] }
 0x3cd   : > { %v5315_v44 = vld [vmem:[#allocation2 + $0x11] sm:$0xff] }
 0x3ce   : > { %5212 = vst.msk [vmem:[#allocation2 + $0x31] sm:$0xff] %vm310_vm0, %v5180_v23  ;;  %v5183_v3 = vmax.f32 %v5045_v35, %v5151_v34  ;;  %v5149_v2 = vmul.f32 0.1, %v5037_v39  ;;  %v5242_v30 = vld [vmem:[#allocation2 + $0x10] sm:$0xff] }
 0x3cf   : > { %v10141_v52 = vpop.f32.mrf.mxu1  ;;  %v5318_v7 = vld [vmem:[#allocation2 + $0x29] sm:$0xff] }
 0x3d0   : > { %v5058_v32 = vadd.f32 %v10141_v52, %v12956_v47  ;;  %5215 = vst.msk [vmem:[#allocation2 + $0x49] sm:$0xff] %vm310_vm0, %v5183_v3  ;;  %v5181_v60 = vmax.f32 %v5037_v39, %v5149_v2  ;;  %v5245_v56 = vld [vmem:[#allocation2 + $0x28] sm:$0xff]  ;;  %v12982_v35 = vpack.c.bf16 %v5318_v7, %v5317_v59 }
 0x3d1   : > { %v5049_v40 = vpop.f32.mrf.mxu1  ;;  %v5316_v21 = vld [vmem:[#allocation2 + $0x19] sm:$0xff]  ;;  %v14420_v2 = vld [vmem:[#allocation9_spill] sm:$0xff] }
 0x3d2   : > { %v5154_v53 = vmul.f32 0.1, %v5058_v32  ;;  %v5050_v61 = vadd.f32 %v12956_v47, %v5049_v40  ;;  %v5243_v15 = vld [vmem:[#allocation2 + $0x18] sm:$0xff]  ;;  %v5244_v6 = vld [vmem:[#allocation2 + $0x20] sm:$0xff]  ;;  %5213 = vst.msk [vmem:[#allocation2 + $0x39] sm:$0xff] %vm310_vm0, %v5181_v60  ;;  %v12980_v24 = vpack.c.bf16 %v5316_v21, %v5315_v44  ;;  %v10645_v7 = vld [vmem:[%s14092_s3 + $0x168] sm:$0xff]  }
 0x3d3   : > { %v10142_v5 = vpop.f32.mrf.mxu1  ;;  %v12984_v26 = vpack.c.bf16 %v5243_v15, %v5242_v30  ;;  %v12986_v23 = vpack.c.bf16 %v5245_v56, %v5244_v6  ;;  %v14421_v40 = vld [vmem:[#allocation11_spill] sm:$0xff]  ;;  %v10649_v59 = vld [vmem:[%s14092_s3 + $0x188] sm:$0xff]   ;;  %v5838_v25 = vld [vmem:[#allocation2 + $0x12] sm:$0xff] }
 0x3d4   : > { %v5186_v49 = vmax.f32 %v5058_v32, %v5154_v53  ;;  %v5152_v12 = vmul.f32 0.1, %v5050_v61  ;;  %v5061_v46 = vadd.f32 %v10142_v5, %v12956_v47  ;;  %10172 = vmatmul.mubr.msk.bf16.vlgmr.msra.gmra.mxu0 %vm310_vm0, %v12980_v24  ;;  %v10648_v53 = vld [vmem:[%s14092_s3 + $0x190] sm:$0xff]   ;;  %v5839_v11 = vld [vmem:[#allocation2 + $0x1a] sm:$0xff] }
 0x3d5   : > { %v5052_v10 = vpop.f32.mrf.mxu1  ;;  %10244 = vmatpush3.bf16.msra.mxu0 %v12946_v55  ;;  %10175 = vmatprep.mubr.msk.bf16.mxu0 %vm310_vm0, %v12982_v35  ;;  %v5289_v32 = vmul.bf16 %v14420_v2, %v12984_v26  ;;  %v5290_v60 = vmul.bf16 %v14421_v40, %v12986_v23 }
 0x3d6   : > { %5218 = vst.msk [vmem:[#allocation2 + $0x61] sm:$0xff] %vm310_vm0, %v5186_v49  ;;  %v5184_v34 = vmax.f32 %v5050_v61, %v5152_v12  ;;  %v5155_v39 = vmul.f32 0.1, %v5061_v46  ;;  %v5053_v52 = vadd.f32 %v12956_v47, %v5052_v10  ;;  %10245 = vmatprep.subr.bf16.mxu0 %v10644_v51  ;;  %v5319_v49 = vld [vmem:[#allocation2 + $0x31] sm:$0xff] }
 0x3d7   : > { %v10145_v3 = vpop.f32.mrf.mxu1  ;;  %10212 = vmatmul.mubr.msk.bf16.vlgmr.msra.gmra.mxu1 %vm310_vm0, %v5289_v32  ;;  %v5322_v12 = vld [vmem:[#allocation2 + $0x49] sm:$0xff] }
 0x3d8   : > { %5216 = vst.msk [vmem:[#allocation2 + $0x51] sm:$0xff] %vm310_vm0, %v5184_v34  ;;  %v5187_v61 = vmax.f32 %v5061_v46, %v5155_v39  ;;  %v5153_v44 = vmul.f32 0.1, %v5053_v52  ;;  %v5074_v55 = vadd.f32 %v10145_v3, %v12956_v47  ;;  %10215 = vmatprep.mubr.msk.bf16.mxu1 %vm310_vm0, %v5290_v60  ;;  %v10646_v46 = vld [vmem:[%s14092_s3 + $0x160] sm:$0xff]   ;;  %10284 = vmatpush3.bf16.msra.mxu1 %v12953_v17  ;;  %v5246_v17 = vld [vmem:[#allocation2 + $0x30] sm:$0xff] }
 0x3d9   : > { %v5065_v5 = vpop.f32.mrf.mxu1  ;;  %v5320_v56 = vld [vmem:[#allocation2 + $0x39] sm:$0xff]  ;;  %10246 = vmatpush3.bf16.msra.mxu0 %v10644_v51  ;;  %10285 = vmatprep.subr.bf16.mxu1 %v10648_v53  ;;  %v5321_v60 = vld [vmem:[#allocation2 + $0x41] sm:$0xff] }
 0x3da   : > { %5219 = vst.msk [vmem:[#allocation2 + $0x69] sm:$0xff] %vm310_vm0, %v5187_v61  ;;  %v5185_v21 = vmax.f32 %v5053_v52, %v5153_v44  ;;  %v5158_v15 = vmul.f32 0.1, %v5074_v55  ;;  %v5066_v6 = vadd.f32 %v12956_v47, %v5065_v5  ;;  %v5247_v10 = vld [vmem:[#allocation2 + $0x38] sm:$0xff]  ;;  %v5248_v34 = vld [vmem:[#allocation2 + $0x40] sm:$0xff]  ;;  %v13020_v32 = vpack.c.bf16 %v5320_v56, %v5319_v49  ;;  %v5249_v61 = vld [vmem:[#allocation2 + $0x48] sm:$0xff]  ;;  %10247 = vmatprep.subr.bf16.mxu0 %v10645_v7 }
 0x3db   : > { %v10146_v30 = vpop.f32.mrf.mxu1  ;;  %v13022_v5 = vpack.c.bf16 %v5322_v12, %v5321_v60  ;;  %v13024_v9 = vpack.c.bf16 %v5247_v10, %v5246_v17  ;;  %v13026_v14 = vpack.c.bf16 %v5249_v61, %v5248_v34  ;;  %v14422_v49 = vld [vmem:[#allocation12_spill] sm:$0xff] }
 0x3dc   : > { %5217 = vst.msk [vmem:[#allocation2 + $0x59] sm:$0xff] %vm310_vm0, %v5185_v21  ;;  %v5190_v39 = vmax.f32 %v5074_v55, %v5158_v15  ;;  %v5156_v52 = vmul.f32 0.1, %v5066_v6  ;;  %v5077_v3 = vadd.f32 %v10146_v30, %v12956_v47  ;;  %10176 = vmatmul.mubr.msk.bf16.gmra.mxu0 %vm310_vm0, %v13020_v32  ;;  %10286 = vmatpush3.bf16.msra.mxu1 %v10648_v53  ;;  %v14423_v30 = vld [vmem:[#allocation13_spill] sm:$0xff]  ;;  %v5844_v37 = vld [vmem:[#allocation2 + $0x42] sm:$0xff] }
 0x3dd   : > { %v5068_v44 = vpop.f32.mrf.mxu1  ;;  %10179 = vmatprep.mubr.msk.bf16.mxu0 %vm310_vm0, %v13022_v5  ;;  %v5291_v12 = vmul.bf16 %v14422_v49, %v13024_v9  ;;  %v5292_v56 = vmul.bf16 %v14423_v30, %v13026_v14  ;;  %10248 = vmatpush3.bf16.msra.mxu0 %v10645_v7 }
 0x3de   : > { %5222 = vst.msk [vmem:[#allocation2 + $0x81] sm:$0xff] %vm310_vm0, %v5190_v39  ;;  %v5188_v51 = vmax.f32 %v5066_v6, %v5156_v52  ;;  %v5159_v55 = vmul.f32 0.1, %v5077_v3  ;;  %v5069_v21 = vadd.f32 %v12956_v47, %v5068_v44  ;;  %v10650_v6 = vld [vmem:[%s14092_s3 + $0x180] sm:$0xff]   ;;  %10249 = vmatprep.subr.bf16.mxu0 %v10646_v46  ;;  %10287 = vmatprep.subr.bf16.mxu1 %v10649_v59  ;;  %v13046_v39 = vld [vmem:[%s14092_s3 + $0x1b8] sm:$0xff]  }
 0x3df   : > { %10216 = vmatmul.mubr.msk.bf16.gmra.mxu1 %vm310_vm0, %v5291_v12  ;;  %v13055_v44 = vld [vmem:[%s14092_s3 + $0x1d8] sm:$0xff]  }
 0x3e0   : > { %v10149_v15 = vpop.f32.mrf.mxu1  ;;  %5220 = vst.msk [vmem:[#allocation2 + $0x71] sm:$0xff] %vm310_vm0, %v5188_v51  ;;  %v5191_v10 = vmax.f32 %v5077_v3, %v5159_v55  ;;  %v5157_v34 = vmul.f32 0.1, %v5069_v21  ;;  %10219 = vmatprep.mubr.msk.bf16.mxu1 %vm310_vm0, %v5292_v56  ;;  %v5323_v3 = vld [vmem:[#allocation2 + $0x51] sm:$0xff]  ;;  %10288 = vmatpush3.bf16.msra.mxu1 %v10649_v59  ;;  %v5325_v59 = vld [vmem:[#allocation2 + $0x61] sm:$0xff] }
 0x3e1   : > { %v5090_v53 = vadd.f32 %v10149_v15, %v12956_v47  ;;  %v5326_v61 = vld [vmem:[#allocation2 + $0x69] sm:$0xff]  ;;  %10250 = vmatpush3.bf16.msra.mxu0 %v10646_v46  ;;  %10289 = vmatprep.subr.bf16.mxu1 %v10650_v6 }
 0x3e2   : > { %v5081_v7 = vpop.f32.mrf.mxu1  ;;  %5223 = vst.msk [vmem:[#allocation2 + $0x89] sm:$0xff] %vm310_vm0, %v5191_v10  ;;  %v5189_v52 = vmax.f32 %v5069_v21, %v5157_v34  ;;  %v5253_v4 = vld [vmem:[#allocation2 + $0x68] sm:$0xff]  ;;  %10323 = vmatprep.subr.bf16.mxu0 %v13046_v39  ;;  %v13062_v20 = vpack.c.bf16 %v5326_v61, %v5325_v59  ;;  %v14424_v61 = vld [vmem:[#allocation14_spill] sm:$0xff] }
 0x3e3   : > { %v5162_v60 = vmul.f32 0.1, %v5090_v53  ;;  %v5082_v17 = vadd.f32 %v12956_v47, %v5081_v7  ;;  %v5324_v55 = vld [vmem:[#allocation2 + $0x59] sm:$0xff]  ;;  %v5250_v7 = vld [vmem:[#allocation2 + $0x50] sm:$0xff] }
 0x3e4   : > { %v10150_v51 = vpop.f32.mrf.mxu1  ;;  %v5251_v15 = vld [vmem:[#allocation2 + $0x58] sm:$0xff]  ;;  %v5252_v12 = vld [vmem:[#allocation2 + $0x60] sm:$0xff]  ;;  %5221 = vst.msk [vmem:[#allocation2 + $0x79] sm:$0xff] %vm310_vm0, %v5189_v52  ;;  %v13059_v34 = vpack.c.bf16 %v5324_v55, %v5323_v3  ;;  %10290 = vmatpush3.bf16.msra.mxu1 %v10650_v6 }
 0x3e5   : > { %v5194_v21 = vmax.f32 %v5090_v53, %v5162_v60  ;;  %v5160_v10 = vmul.f32 0.1, %v5082_v17  ;;  %v5093_v56 = vadd.f32 %v10150_v51, %v12956_v47  ;;  %v13064_v45 = vpack.c.bf16 %v5251_v15, %v5250_v7  ;;  %10363 = vmatprep.subr.bf16.mxu1 %v13055_v44 }
 0x3e6   : > { %v5084_v8 = vpop.f32.mrf.mxu1  ;;  %v13066_v46 = vpack.c.bf16 %v5253_v4, %v5252_v12  ;;  %10180 = vmatmul.mubr.msk.bf16.gmra.mxu0 %vm310_vm0, %v13059_v34  ;;  %v14425_v4 = vld [vmem:[#allocation15_spill] sm:$0xff] }
 0x3e7   : > { %5226 = vst.msk [vmem:[#allocation2 + $0xa1] sm:$0xff] %vm310_vm0, %v5194_v21  ;;  %v5192_v53 = vmax.f32 %v5082_v17, %v5160_v10  ;;  %v5163_v52 = vmul.f32 0.1, %v5093_v56  ;;  %v5085_v60 = vadd.f32 %v12956_v47, %v5084_v8  ;;  %10183 = vmatprep.mubr.msk.bf16.mxu0 %vm310_vm0, %v13062_v20  ;;  %v5293_v51 = vmul.bf16 %v14424_v61, %v13064_v45  ;;  %v5327_v59 = vld [vmem:[#allocation2 + $0x71] sm:$0xff] }
 0x3e8   : > { %v10153_v3 = vpop.f32.mrf.mxu1  ;;  %v5294_v55 = vmul.bf16 %v14425_v4, %v13066_v46  ;;  %v6226_v38 = vmul.bf16 %v14423_v30, %v13064_v45  ;;  %v13258_v45 = vld [vmem:[%s14092_s3 + $0x218] sm:$0xff]  }
 0x3e9   : > { %5224 = vst.msk [vmem:[#allocation2 + $0x91] sm:$0xff] %vm310_vm0, %v5192_v53  ;;  %v5195_v17 = vmax.f32 %v5093_v56, %v5163_v52  ;;  %v5161_v15 = vmul.f32 0.1, %v5085_v60  ;;  %v5106_v8 = vadd.f32 %v10153_v3, %v12956_v47  ;;  %10220 = vmatmul.mubr.msk.bf16.gmra.mxu1 %vm310_vm0, %v5293_v51  ;;  %v5330_v7 = vld [vmem:[#allocation2 + $0x89] sm:$0xff] }
 0x3ea   : > { %v5097_v6 = vpop.f32.mrf.mxu1  ;;  %10223 = vmatprep.mubr.msk.bf16.mxu1 %vm310_vm0, %v5294_v55 }
 0x3eb   : > { %5227 = vst.msk [vmem:[#allocation2 + $0xa9] sm:$0xff] %vm310_vm0, %v5195_v17  ;;  %v5193_v12 = vmax.f32 %v5085_v60, %v5161_v15  ;;  %v5166_v21 = vmul.f32 0.1, %v5106_v8  ;;  %v5098_v10 = vadd.f32 %v12956_v47, %v5097_v6  ;;  %v5328_v56 = vld [vmem:[#allocation2 + $0x79] sm:$0xff]  ;;  %v5329_v60 = vld [vmem:[#allocation2 + $0x81] sm:$0xff]  ;;  %v5254_v17 = vld [vmem:[#allocation2 + $0x70] sm:$0xff] }
 0x3ec   : > { %v10154_v53 = vpop.f32.mrf.mxu1  ;;  %v5255_v52 = vld [vmem:[#allocation2 + $0x78] sm:$0xff]  ;;  %v5256_v48 = vld [vmem:[#allocation2 + $0x80] sm:$0xff]  ;;  %v13087_v19 = vpack.c.bf16 %v5328_v56, %v5327_v59  ;;  %v5257_v15 = vld [vmem:[#allocation2 + $0x88] sm:$0xff]  ;;  %v13089_v41 = vpack.c.bf16 %v5330_v7, %v5329_v60 }
 0x3ed   : > { %5225 = vst.msk [vmem:[#allocation2 + $0x99] sm:$0xff] %vm310_vm0, %v5193_v12  ;;  %v5198_v3 = vmax.f32 %v5106_v8, %v5166_v21  ;;  %v5164_v36 = vmul.f32 0.1, %v5098_v10  ;;  %v5109_v51 = vadd.f32 %v10154_v53, %v12956_v47  ;;  %v13091_v55 = vpack.c.bf16 %v5255_v52, %v5254_v17  ;;  %v14426_v59 = vld [vmem:[#allocation16_spill] sm:$0xff]  ;;  %v14427_v53 = vld [vmem:[#allocation17_spill] sm:$0xff] }
 0x3ee   : > { %v5100_v6 = vpop.f32.mrf.mxu1  ;;  %v13093_v50 = vpack.c.bf16 %v5257_v15, %v5256_v48  ;;  %10184 = vmatmul.mubr.msk.bf16.gmra.mxu0 %vm310_vm0, %v13087_v19 }
 0x3ef   : > { %5230 = vst.msk [vmem:[#allocation2 + $0xc1] sm:$0xff] %vm310_vm0, %v5198_v3  ;;  %v5196_v42 = vmax.f32 %v5098_v10, %v5164_v36  ;;  %v5167_v12 = vmul.f32 0.1, %v5109_v51  ;;  %v5101_v8 = vadd.f32 %v12956_v47, %v5100_v6  ;;  %10187 = vmatprep.mubr.msk.bf16.mxu0 %vm310_vm0, %v13089_v41  ;;  %v5295_v7 = vmul.bf16 %v14426_v59, %v13091_v55 }
 0x3f0   : > { %v10157_v21 = vpop.f32.mrf.mxu1  ;;  %v5296_v48 = vmul.bf16 %v14427_v53, %v13093_v50  ;;  %v5331_v15 = vld [vmem:[#allocation2 + $0x91] sm:$0xff] }
 0x3f1   : > { %5228 = vst.msk [vmem:[#allocation2 + $0xb1] sm:$0xff] %vm310_vm0, %v5196_v42  ;;  %v5199_v56 = vmax.f32 %v5109_v51, %v5167_v12  ;;  %v5165_v36 = vmul.f32 0.1, %v5101_v8  ;;  %v5122_v10 = vadd.f32 %v10157_v21, %v12956_v47  ;;  %10224 = vmatmul.mubr.msk.bf16.gmra.mxu1 %vm310_vm0, %v5295_v7 }
 0x3f2   : > { %v5113_v52 = vpop.f32.mrf.mxu1  ;;  %10227 = vmatprep.mubr.msk.bf16.mxu1 %vm310_vm0, %v5296_v48  ;;  %v5334_v6 = vld [vmem:[#allocation2 + $0xa9] sm:$0xff] }
 0x3f3   : > { %5231 = vst.msk [vmem:[#allocation2 + $0xc9] sm:$0xff] %vm310_vm0, %v5199_v56  ;;  %v5197_v3 = vmax.f32 %v5101_v8, %v5165_v36  ;;  %v5170_v60 = vmul.f32 0.1, %v5122_v10  ;;  %v5114_v17 = vadd.f32 %v12956_v47, %v5113_v52  ;;  %v5333_v8 = vld [vmem:[#allocation2 + $0xa1] sm:$0xff]  ;;  %v5258_v56 = vld [vmem:[#allocation2 + $0x90] sm:$0xff] }
 0x3f4   : > { %v10158_v22 = vpop.f32.mrf.mxu1  ;;  %v5332_v1 = vld [vmem:[#allocation2 + $0x99] sm:$0xff]  ;;  %v5261_v36 = vld [vmem:[#allocation2 + $0xa8] sm:$0xff]  ;;  %v13115_v58 = vpack.c.bf16 %v5334_v6, %v5333_v8 }
 0x3f5   : > { %v5259_v42 = vld [vmem:[#allocation2 + $0x98] sm:$0xff]  ;;  %v5260_v51 = vld [vmem:[#allocation2 + $0xa0] sm:$0xff]  ;;  %5229 = vst.msk [vmem:[#allocation2 + $0xb9] sm:$0xff] %vm310_vm0, %v5197_v3  ;;  %v5202_v12 = vmax.f32 %v5122_v10, %v5170_v60  ;;  %v5168_v21 = vmul.f32 0.1, %v5114_v17  ;;  %v5125_v7 = vadd.f32 %v10158_v22, %v12956_v47  ;;  %v13113_v27 = vpack.c.bf16 %v5332_v1, %v5331_v15 }
 0x3f6   : > { %v5116_v52 = vpop.f32.mrf.mxu1  ;;  %v13117_v48 = vpack.c.bf16 %v5259_v42, %v5258_v56  ;;  %v13119_v43 = vpack.c.bf16 %v5261_v36, %v5260_v51  ;;  %v14428_v22 = vld [vmem:[#allocation18_spill] sm:$0xff]  ;;  %v14429_v15 = vld [vmem:[#allocation19_spill] sm:$0xff] }
 0x3f7   : > { %5234 = vst.msk [vmem:[#allocation2 + $0xe1] sm:$0xff] %vm310_vm0, %v5202_v12  ;;  %v5200_v0 = vmax.f32 %v5114_v17, %v5168_v21  ;;  %v5171_v3 = vmul.f32 0.1, %v5125_v7  ;;  %v5117_v10 = vadd.f32 %v12956_v47, %v5116_v52  ;;  %10188 = vmatmul.mubr.msk.bf16.gmra.mxu0 %vm310_vm0, %v13113_v27 }
 0x3f8   : > { %v10161_v1 = vpop.f32.mrf.mxu1  ;;  %10191 = vmatprep.mubr.msk.bf16.mxu0 %vm310_vm0, %v13115_v58  ;;  %v5297_v60 = vmul.bf16 %v14428_v22, %v13117_v48  ;;  %v5298_v6 = vmul.bf16 %v14429_v15, %v13119_v43  ;;  %v5335_v36 = vld [vmem:[#allocation2 + $0xb1] sm:$0xff] }
 0x3f9   : > { %5232 = vst.msk [vmem:[#allocation2 + $0xd1] sm:$0xff] %vm310_vm0, %v5200_v0  ;;  %v5203_v42 = vmax.f32 %v5125_v7, %v5171_v3  ;;  %v5169_v17 = vmul.f32 0.1, %v5117_v10  ;;  %v5138_v51 = vadd.f32 %v10161_v1, %v12956_v47 }
 0x3fa   : > { %10228 = vmatmul.mubr.msk.bf16.gmra.mxu1 %vm310_vm0, %v5297_v60  ;;  %v5129_v12 = vpop.f32.mrf.mxu1  ;;  %v5338_v52 = vld [vmem:[#allocation2 + $0xc9] sm:$0xff] }
 0x3fb   : > { %5235 = vst.msk [vmem:[#allocation2 + $0xe9] sm:$0xff] %vm310_vm0, %v5203_v42  ;;  %v5201_v21 = vmax.f32 %v5117_v10, %v5169_v17  ;;  %v5174_v8 = vmul.f32 0.1, %v5138_v51  ;;  %v5130_v56 = vadd.f32 %v12956_v47, %v5129_v12  ;;  %10231 = vmatprep.mubr.msk.bf16.mxu1 %vm310_vm0, %v5298_v6  ;;  %v5337_v10 = vld [vmem:[#allocation2 + $0xc1] sm:$0xff]  ;;  %v5262_v42 = vld [vmem:[#allocation2 + $0xb0] sm:$0xff] }
 0x3fc   : > { %v10162_v57 = vpop.f32.mrf.mxu1  ;;  %v5336_v62 = vld [vmem:[#allocation2 + $0xb9] sm:$0xff]  ;;  %v5265_v17 = vld [vmem:[#allocation2 + $0xc8] sm:$0xff]  ;;  %v13141_v18 = vpack.c.bf16 %v5338_v52, %v5337_v10 }
 0x3fd   : > { %v5263_v0 = vld [vmem:[#allocation2 + $0xb8] sm:$0xff]  ;;  %v5264_v7 = vld [vmem:[#allocation2 + $0xc0] sm:$0xff]  ;;  %5233 = vst.msk [vmem:[#allocation2 + $0xd9] sm:$0xff] %vm310_vm0, %v5201_v21  ;;  %v5206_v3 = vmax.f32 %v5138_v51, %v5174_v8  ;;  %v5172_v1 = vmul.f32 0.1, %v5130_v56  ;;  %v5141_v60 = vadd.f32 %v10162_v57, %v12956_v47  ;;  %v13139_v16 = vpack.c.bf16 %v5336_v62, %v5335_v36  ;;  %v14431_v8 = vld [vmem:[#allocation21_spill] sm:$0xff] }
 0x3fe   : > { %v5132_v12 = vpop.f32.mrf.mxu1  ;;  %v13143_v6 = vpack.c.bf16 %v5263_v0, %v5262_v42  ;;  %v13145_v29 = vpack.c.bf16 %v5265_v17, %v5264_v7  ;;  %v14430_v62 = vld [vmem:[#allocation20_spill] sm:$0xff] }
 0x3ff   : > { %5238 = vst.msk [vmem:[#allocation2 + $0x101] sm:$0xff] %vm310_vm0, %v5206_v3  ;;  %v5204_v33 = vmax.f32 %v5130_v56, %v5172_v1  ;;  %v5175_v21 = vmul.f32 0.1, %v5141_v60  ;;  %v5133_v51 = vadd.f32 %v12956_v47, %v5132_v12  ;;  %10192 = vmatmul.mubr.msk.bf16.gmra.mxu0 %vm310_vm0, %v13139_v16 }
 0x400   : > { %10195 = vmatprep.mubr.msk.bf16.mxu0 %vm310_vm0, %v13141_v18  ;;  %v5299_v57 = vmul.bf16 %v14430_v62, %v13143_v6  ;;  %v5300_v36 = vmul.bf16 %v14431_v8, %v13145_v29  ;;  %v5339_v56 = vld [vmem:[#allocation2 + $0xd1] sm:$0xff] }
 0x401   : > { %5236 = vst.msk [vmem:[#allocation2 + $0xf1] sm:$0xff] %vm310_vm0, %v5204_v33  ;;  %v5207_v52 = vmax.f32 %v5141_v60, %v5175_v21  ;;  %v5173_v0 = vmul.f32 0.1, %v5133_v51  ;;  %v5266_v3 = vld [vmem:[#allocation2 + $0xd0] sm:$0xff]  ;;  %v5341_v33 = vld [vmem:[#allocation2 + $0xe1] sm:$0xff] }
 0x402   : > { %10232 = vmatmul.mubr.msk.bf16.gmra.mxu1 %vm310_vm0, %v5299_v57  ;;  %v5342_v7 = vld [vmem:[#allocation2 + $0xe9] sm:$0xff] }
 0x403   : > { %5239 = vst.msk [vmem:[#allocation2 + $0x109] sm:$0xff] %vm310_vm0, %v5207_v52  ;;  %v5205_v47 = vmax.f32 %v5133_v51, %v5173_v0  ;;  %10235 = vmatprep.mubr.msk.bf16.mxu1 %vm310_vm0, %v5300_v36  ;;  %v5269_v1 = vld [vmem:[#allocation2 + $0xe8] sm:$0xff]  ;;  %v13168_v57 = vpack.c.bf16 %v5342_v7, %v5341_v33  ;;  %v14432_v51 = vld [vmem:[#allocation22_spill] sm:$0xff]  ;;  %v14433_v52 = vld [vmem:[#allocation23_spill] sm:$0xff] }
 0x404   : > { %v5340_v10 = vld [vmem:[#allocation2 + $0xd9] sm:$0xff]  ;;  %v14434_v33 = vld [vmem:[#allocation24_spill] sm:$0xff] }
 0x405   : > { %v5267_v42 = vld [vmem:[#allocation2 + $0xd8] sm:$0xff]  ;;  %v5268_v17 = vld [vmem:[#allocation2 + $0xe0] sm:$0xff]  ;;  %5237 = vst.msk [vmem:[#allocation2 + $0xf9] sm:$0xff] %vm310_vm0, %v5205_v47  ;;  %v13162_v12 = vpack.c.bf16 %v5340_v10, %v5339_v56  ;;  %v5837_v47 = vld [vmem:[#allocation2 + $0xa] sm:$0xff] }
 0x406   : > { %v13164_v60 = vpack.c.bf16 %v5267_v42, %v5266_v3  ;;  %v13166_v21 = vpack.c.bf16 %v5269_v1, %v5268_v17  ;;  %v5868_v56 = vpack.c.bf16 %v5837_v47, %v5836_v28  ;;  %v5841_v47 = vld [vmem:[#allocation2 + $0x2a] sm:$0xff] }
 0x407   : > { %10196 = vmatmul.mubr.msk.bf16.gmra.mxu0 %vm310_vm0, %v13162_v12 }
 0x408   : > { %v5301_v36 = vmul.bf16 %v14432_v51, %v13164_v60  ;;  %v5302_v0 = vmul.bf16 %v14433_v52, %v13166_v21  ;;  %10199 = vmatprep.mubr.msk.bf16.mxu0 %vm310_vm0, %v13168_v57  ;;  %v5343_v7 = vld [vmem:[#allocation2 + $0xf1] sm:$0xff]  ;;  %v5884_v13 = vmul.bf16 %v14434_v33, %v5868_v56 }
 0x409   : > { %v5270_v1 = vld [vmem:[#allocation2 + $0xf0] sm:$0xff] }
 0x40a   : > { %10236 = vmatmul.mubr.msk.bf16.gmra.mxu1 %vm310_vm0, %v5301_v36  ;;  %v14435_v36 = vld [vmem:[#allocation25_spill] sm:$0xff] }
 0x40b   : > { %10239 = vmatprep.mubr.msk.bf16.mxu1 %vm310_vm0, %v5302_v0  ;;  %v6222_v0 = vmul.bf16 %v14419_v31, %v12984_v26  ;;  %v5842_v26 = vld [vmem:[#allocation2 + $0x32] sm:$0xff] }
 0x40c   : > { %v5344_v3 = vld [vmem:[#allocation2 + $0xf9] sm:$0xff] }
 0x40d   : > { %v5271_v10 = vld [vmem:[#allocation2 + $0xf8] sm:$0xff]  ;;  %v13180_v42 = vpack.c.bf16 %v5344_v3, %v5343_v7  ;;  %v13192_v7 = vpack.c.bf16 %v5839_v11, %v5838_v25  ;;  %v5840_v3 = vld [vmem:[#allocation2 + $0x22] sm:$0xff]  ;;  %v5845_v25 = vld [vmem:[#allocation2 + $0x4a] sm:$0xff] }
 0x40e   : > { %v13182_v17 = vpack.c.bf16 %v5271_v10, %v5270_v1  ;;  %v13195_v56 = vpack.c.bf16 %v5841_v47, %v5840_v3  ;;  %v14436_v1 = vld [vmem:[#allocation26_spill] sm:$0xff] }
 0x40f   : > { %10200 = vmatmul.mubr.msk.bf16.gmra.mxu0 %vm310_vm0, %v13180_v42  ;;  %v5885_v10 = vmul.bf16 %v14436_v1, %v13192_v7  ;;  %v5843_v11 = vld [vmem:[#allocation2 + $0x3a] sm:$0xff]  ;;  %v10656_v47 = vld [vmem:[%s14092_s3 + $0x1d0] sm:$0xff]  }
 0x410   : > { %v5303_v28 = vmul.bf16 %v14435_v36, %v13182_v17  ;;  %10251 = vmatprep.mubr.msk.bf16.mxu0 %vm310_vm0, %v5884_v13  ;;  %v14437_v13 = vld [vmem:[#allocation27_spill] sm:$0xff]  ;;  %v13215_v3 = vpack.c.bf16 %v5843_v11, %v5842_v26  ;;  %v10657_v26 = vld [vmem:[%s14092_s3 + $0x1c8] sm:$0xff]   ;;  %v5858_v31 = vld [vmem:[#allocation2 + $0xb2] sm:$0xff] }
 0x411   : > { %v5886_v54 = vmul.bf16 %v14437_v13, %v13195_v56 }
 0x412   : > { %10240 = vmatmul.mubr.msk.bf16.gmra.mxu1 %vm310_vm0, %v5303_v28  ;;  %v6223_v28 = vmul.bf16 %v14420_v2, %v12986_v23  ;;  %v5848_v2 = vld [vmem:[#allocation2 + $0x62] sm:$0xff] }
 0x413   : > { %10291 = vmatprep.mubr.msk.bf16.mxu1 %vm310_vm0, %v6222_v0  ;;  %v6224_v0 = vmul.bf16 %v14421_v40, %v13024_v9  ;;  %v14438_v9 = vld [vmem:[#allocation28_spill] sm:$0xff] }
 0x414   : > { %v5887_v23 = vmul.bf16 %v14438_v9, %v13215_v3 }
 0x417   : > { %10252 = vmatmul.mubr.msk.bf16.vlgmr.msra.gmra.mxu0 %vm310_vm0, %v5885_v10  ;;  %v10654_v10 = vld [vmem:[%s14092_s3 + $0x1a0] sm:$0xff]  }
 0x418   : > { %10324 = vmatpush3.bf16.msra.mxu0 %v13046_v39  ;;  %10255 = vmatprep.mubr.msk.bf16.mxu0 %vm310_vm0, %v5886_v54  ;;  %v10653_v39 = vld [vmem:[%s14092_s3 + $0x1a8] sm:$0xff]   ;;  %v13221_v54 = vpack.c.bf16 %v5845_v25, %v5844_v37  ;;  %v5846_v25 = vld [vmem:[#allocation2 + $0x52] sm:$0xff] }
 0x419   : > { %10325 = vmatprep.subr.bf16.mxu0 %v10652_v63  ;;  %v14439_v37 = vld [vmem:[#allocation29_spill] sm:$0xff] }
 0x41a   : > { %10292 = vmatmul.mubr.msk.bf16.vlgmr.msra.gmra.mxu1 %vm310_vm0, %v6223_v28  ;;  %v5888_v11 = vmul.bf16 %v14439_v37, %v13221_v54  ;;  %v5847_v28 = vld [vmem:[#allocation2 + $0x5a] sm:$0xff] }
 0x41b   : > { %10295 = vmatprep.mubr.msk.bf16.mxu1 %vm310_vm0, %v6224_v0  ;;  %10364 = vmatpush3.bf16.msra.mxu1 %v13055_v44  ;;  %v6225_v44 = vmul.bf16 %v14422_v49, %v13026_v14  ;;  %v10658_v0 = vld [vmem:[%s14092_s3 + $0x1c0] sm:$0xff]   ;;  %v13244_v40 = vpack.c.bf16 %v5847_v28, %v5846_v25 }
 0x41c   : > { %10326 = vmatpush3.bf16.msra.mxu0 %v10652_v63  ;;  %10365 = vmatprep.subr.bf16.mxu1 %v10656_v47  ;;  %v5849_v63 = vld [vmem:[#allocation2 + $0x6a] sm:$0xff]  ;;  %v5851_v28 = vld [vmem:[#allocation2 + $0x7a] sm:$0xff] }
 0x41d   : > { %10327 = vmatprep.subr.bf16.mxu0 %v10653_v39  ;;  %v13252_v14 = vpack.c.bf16 %v5849_v63, %v5848_v2  ;;  %v5850_v2 = vld [vmem:[#allocation2 + $0x72] sm:$0xff]  ;;  %v5855_v49 = vld [vmem:[#allocation2 + $0x9a] sm:$0xff] }
 0x41e   : > { %v13272_v63 = vpack.c.bf16 %v5851_v28, %v5850_v2  ;;  %v6229_v2 = vmul.bf16 %v14426_v59, %v13093_v50  ;;  %v6230_v28 = vmul.bf16 %v14427_v53, %v13117_v48  ;;  %v5859_v50 = vld [vmem:[#allocation2 + $0xba] sm:$0xff]  ;;  %v5861_v48 = vld [vmem:[#allocation2 + $0xca] sm:$0xff]  ;;  %v5862_v59 = vld [vmem:[#allocation2 + $0xd2] sm:$0xff] }
 0x41f   : > { %10256 = vmatmul.mubr.msk.bf16.gmra.mxu0 %vm310_vm0, %v5887_v23  ;;  %10366 = vmatpush3.bf16.msra.mxu1 %v10656_v47  ;;  %v13249_v47 = vld [vmem:[%s14092_s3 + $0x1f8] sm:$0xff]  }
 0x420   : > { %10259 = vmatprep.mubr.msk.bf16.mxu0 %vm310_vm0, %v5888_v11  ;;  %10328 = vmatpush3.bf16.msra.mxu0 %v10653_v39  ;;  %v14440_v39 = vld [vmem:[#allocation30_spill] sm:$0xff]  ;;  %v14441_v11 = vld [vmem:[#allocation31_spill] sm:$0xff] }
 0x421   : > { %10329 = vmatprep.subr.bf16.mxu0 %v10654_v10  ;;  %10367 = vmatprep.subr.bf16.mxu1 %v10657_v26  ;;  %v5889_v23 = vmul.bf16 %v14440_v39, %v13244_v40  ;;  %v5890_v25 = vmul.bf16 %v14441_v11, %v13252_v14 }
 0x422   : > { %10296 = vmatmul.mubr.msk.bf16.gmra.mxu1 %vm310_vm0, %v6225_v44  ;;  %v5852_v44 = vld [vmem:[#allocation2 + $0x82] sm:$0xff] }
 0x423   : > { %10299 = vmatprep.mubr.msk.bf16.mxu1 %vm310_vm0, %v6226_v38  ;;  %10368 = vmatpush3.bf16.msra.mxu1 %v10657_v26  ;;  %v5853_v38 = vld [vmem:[#allocation2 + $0x8a] sm:$0xff]  ;;  %v6228_v26 = vmul.bf16 %v14425_v4, %v13091_v55 }
 0x424   : > { %10330 = vmatpush3.bf16.msra.mxu0 %v10654_v10  ;;  %10369 = vmatprep.subr.bf16.mxu1 %v10658_v0  ;;  %v6227_v10 = vmul.bf16 %v14424_v61, %v13066_v46  ;;  %v13275_v30 = vpack.c.bf16 %v5853_v38, %v5852_v44  ;;  %v5854_v61 = vld [vmem:[#allocation2 + $0x92] sm:$0xff]  ;;  %v5857_v55 = vld [vmem:[#allocation2 + $0xaa] sm:$0xff] }
 0x425   : > { %10403 = vmatprep.subr.bf16.mxu0 %v13249_v47  ;;  %v13288_v38 = vpack.c.bf16 %v5855_v49, %v5854_v61  ;;  %v14444_v44 = vld [vmem:[#allocation34_spill] sm:$0xff]  ;;  %v6231_v49 = vmul.bf16 %v14428_v22, %v13119_v43  ;;  %v6232_v61 = vmul.bf16 %v14429_v15, %v13143_v6  ;;  %v5865_v6 = vld [vmem:[#allocation2 + $0xea] sm:$0xff] }
 0x426   : > { %v5863_v43 = vld [vmem:[#allocation2 + $0xda] sm:$0xff]  ;;  %v5866_v22 = vld [vmem:[#allocation2 + $0xf2] sm:$0xff] }
 0x427   : > { %10260 = vmatmul.mubr.msk.bf16.gmra.mxu0 %vm310_vm0, %v5889_v23  ;;  %10370 = vmatpush3.bf16.msra.mxu1 %v10658_v0  ;;  %v14442_v0 = vld [vmem:[#allocation32_spill] sm:$0xff] }
 0x428   : > { %10263 = vmatprep.mubr.msk.bf16.mxu0 %vm310_vm0, %v5890_v25  ;;  %10443 = vmatprep.subr.bf16.mxu1 %v13258_v45  ;;  %v5891_v23 = vmul.bf16 %v14442_v0, %v13272_v63  ;;  %v14443_v25 = vld [vmem:[#allocation33_spill] sm:$0xff] }
 0x429   : > { %v5892_v46 = vmul.bf16 %v14443_v25, %v13275_v30 }
 0x42a   : > { %10300 = vmatmul.mubr.msk.bf16.gmra.mxu1 %vm310_vm0, %v6227_v10  ;;  %v5856_v10 = vld [vmem:[#allocation2 + $0xa2] sm:$0xff] }
 0x42b   : > { %10303 = vmatprep.mubr.msk.bf16.mxu1 %vm310_vm0, %v6228_v26  ;;  %v13291_v26 = vpack.c.bf16 %v5857_v55, %v5856_v10  ;;  %v13304_v55 = vpack.c.bf16 %v5859_v50, %v5858_v31  ;;  %v14446_v10 = vld [vmem:[#allocation36_spill] sm:$0xff]  ;;  %v6233_v31 = vmul.bf16 %v14430_v62, %v13145_v29  ;;  %v6234_v50 = vmul.bf16 %v14431_v8, %v13164_v60  ;;  %v5867_v29 = vld [vmem:[#allocation2 + $0xfa] sm:$0xff] }
 0x42c   : > { %v6236_v60 = vmul.bf16 %v14433_v52, %v13182_v17  ;;  %v10664_v17 = vld [vmem:[%s14092_s3 + $0x210] sm:$0xff]  }
 0x42f   : > { %10264 = vmatmul.mubr.msk.bf16.gmra.mxu0 %vm310_vm0, %v5891_v23  ;;  %v5893_v23 = vmul.bf16 %v14444_v44, %v13288_v38 }
 0x430   : > { %10267 = vmatprep.mubr.msk.bf16.mxu0 %vm310_vm0, %v5892_v46  ;;  %v14445_v46 = vld [vmem:[#allocation35_spill] sm:$0xff] }
 0x431   : > { %v5894_v4 = vmul.bf16 %v14445_v46, %v13291_v26 }
 0x432   : > { %10304 = vmatmul.mubr.msk.bf16.gmra.mxu1 %vm310_vm0, %v6229_v2  ;;  %v5860_v2 = vld [vmem:[#allocation2 + $0xc2] sm:$0xff] }
 0x433   : > { %10307 = vmatprep.mubr.msk.bf16.mxu1 %vm310_vm0, %v6230_v28  ;;  %v13307_v28 = vpack.c.bf16 %v5861_v48, %v5860_v2  ;;  %v13320_v48 = vpack.c.bf16 %v5863_v43, %v5862_v59  ;;  %v14448_v2 = vld [vmem:[#allocation38_spill] sm:$0xff]  ;;  %v6235_v59 = vmul.bf16 %v14432_v51, %v13166_v21  ;;  %v13336_v43 = vpack.c.bf16 %v5867_v29, %v5866_v22 }
 0x434   : > { %v10660_v21 = vld [vmem:[%s14092_s3 + $0x1f0] sm:$0xff]   ;;  %v7175_v29 = vld [vmem:[#allocation2 + $0x38] sm:$0xff] }
 0x437   : > { %10268 = vmatmul.mubr.msk.bf16.gmra.mxu0 %vm310_vm0, %v5893_v23  ;;  %v5895_v23 = vmul.bf16 %v14446_v10, %v13304_v55 }
 0x438   : > { %10271 = vmatprep.mubr.msk.bf16.mxu0 %vm310_vm0, %v5894_v4  ;;  %v14447_v4 = vld [vmem:[#allocation37_spill] sm:$0xff] }
 0x439   : > { %v5896_v53 = vmul.bf16 %v14447_v4, %v13307_v28 }
 0x43a   : > { %10308 = vmatmul.mubr.msk.bf16.gmra.mxu1 %vm310_vm0, %v6231_v49  ;;  %v5864_v49 = vld [vmem:[#allocation2 + $0xe2] sm:$0xff] }
 0x43b   : > { %10311 = vmatprep.mubr.msk.bf16.mxu1 %vm310_vm0, %v6232_v61  ;;  %v13323_v61 = vpack.c.bf16 %v5865_v6, %v5864_v49  ;;  %v6204_v6 = vld [vmem:[#allocation2 + $0x100] sm:$0xff] }
 0x43c   : > { %v14450_v49 = vld [vmem:[#allocation40_spill] sm:$0xff] }
 0x43f   : > { %10272 = vmatmul.mubr.msk.bf16.gmra.mxu0 %vm310_vm0, %v5895_v23  ;;  %v5897_v23 = vmul.bf16 %v14448_v2, %v13320_v48 }
 0x440   : > { %10275 = vmatprep.mubr.msk.bf16.mxu0 %vm310_vm0, %v5896_v53  ;;  %v14449_v53 = vld [vmem:[#allocation39_spill] sm:$0xff] }
 0x441   : > { %v5898_v15 = vmul.bf16 %v14449_v53, %v13323_v61 }
 0x442   : > { %10312 = vmatmul.mubr.msk.bf16.gmra.mxu1 %vm310_vm0, %v6233_v31  ;;  %v6205_v31 = vld [vmem:[#allocation2 + $0x108] sm:$0xff] }
 0x443   : > { %10315 = vmatprep.mubr.msk.bf16.mxu1 %vm310_vm0, %v6234_v50  ;;  %v13340_v50 = vpack.c.bf16 %v6205_v31, %v6204_v6  ;;  %v7174_v6 = vld [vmem:[#allocation2 + $0x30] sm:$0xff] }
 0x445   : > { %v6237_v22 = vmul.bf16 %v14435_v36, %v13340_v50 }
 0x447   : > { %10276 = vmatmul.mubr.msk.bf16.gmra.mxu0 %vm310_vm0, %v5897_v23  ;;  %v5899_v23 = vmul.bf16 %v14450_v49, %v13336_v43 }
 0x448   : > { %10279 = vmatprep.mubr.msk.bf16.mxu0 %vm310_vm0, %v5898_v15  ;;  %v6882_v15 = vmul.bf16 %v14434_v33, %v13192_v7  ;;  %v6884_v7 = vmul.bf16 %v14437_v13, %v13215_v3  ;;  %v6885_v3 = vmul.bf16 %v14438_v9, %v13221_v54  ;;  %v7173_v54 = vld [vmem:[#allocation2 + $0x28] sm:$0xff] }
 0x44a   : > { %10316 = vmatmul.mubr.msk.bf16.gmra.mxu1 %vm310_vm0, %v6235_v59  ;;  %v7176_v59 = vld [vmem:[#allocation2 + $0x40] sm:$0xff] }
 0x44b   : > { %10319 = vmatprep.mubr.msk.bf16.mxu1 %vm310_vm0, %v6236_v60 }
 0x44f   : > { %10280 = vmatmul.mubr.msk.bf16.gmra.mxu0 %vm310_vm0, %v5899_v23  ;;  %v7205_v23 = vpack.c.bf16 %v7175_v29, %v7174_v6  ;;  %v7183_v6 = vld [vmem:[#allocation2 + $0x78] sm:$0xff] }
 0x450   : > { %10331 = vmatprep.mubr.msk.bf16.mxu0 %vm310_vm0, %v12980_v24  ;;  %v6883_v24 = vmul.bf16 %v14436_v1, %v13195_v56  ;;  %v10665_v56 = vld [vmem:[%s14092_s3 + $0x208] sm:$0xff]  }
 0x452   : > { %10320 = vmatmul.mubr.msk.bf16.gmra.mxu1 %vm310_vm0, %v6237_v22  ;;  %v7177_v22 = vld [vmem:[#allocation2 + $0x48] sm:$0xff] }
 0x453   : > { %10371 = vmatprep.mubr.msk.bf16.mxu1 %vm310_vm0, %v6882_v15  ;;  %v7206_v15 = vpack.c.bf16 %v7177_v22, %v7176_v59  ;;  %v14455_v59 = vld [vmem:[#allocation13_spill] sm:$0xff]  ;;  %v7184_v22 = vld [vmem:[#allocation2 + $0x80] sm:$0xff] }
 0x457   : > { %10332 = vmatmul.mubr.msk.bf16.vlgmr.msra.gmra.mxu0 %vm310_vm0, %v12982_v35  ;;  %v10661_v35 = vld [vmem:[%s14092_s3 + $0x1e8] sm:$0xff]  }
 0x458   : > { %10404 = vmatpush3.bf16.msra.mxu0 %v13249_v47  ;;  %10335 = vmatprep.mubr.msk.bf16.mxu0 %vm310_vm0, %v13020_v32  ;;  %v10662_v32 = vld [vmem:[%s14092_s3 + $0x1e0] sm:$0xff]  }
 0x459   : > { %10405 = vmatprep.subr.bf16.mxu0 %v10660_v21  ;;  %v10666_v47 = vld [vmem:[%s14092_s3 + $0x200] sm:$0xff]  }
 0x45a   : > { %10372 = vmatmul.mubr.msk.bf16.vlgmr.msra.gmra.mxu1 %vm310_vm0, %v6883_v24 }
 0x45b   : > { %10375 = vmatprep.mubr.msk.bf16.mxu1 %vm310_vm0, %v6884_v7  ;;  %10444 = vmatpush3.bf16.msra.mxu1 %v13258_v45  ;;  %v6886_v45 = vmul.bf16 %v14439_v37, %v13244_v40  ;;  %v6887_v40 = vmul.bf16 %v14440_v39, %v13252_v14  ;;  %v6864_v14 = vld [vmem:[#allocation2 + $0x102] sm:$0xff]  ;;  %v10668_v7 = vld [vmem:[%s14092_s3 + $0x230] sm:$0xff]  }
 0x45c   : > { %10406 = vmatpush3.bf16.msra.mxu0 %v10660_v21  ;;  %10445 = vmatprep.subr.bf16.mxu1 %v10664_v17  ;;  %v14452_v21 = vld [vmem:[#allocation9_spill] sm:$0xff] }
 0x45d   : > { %10407 = vmatprep.subr.bf16.mxu0 %v10661_v35  ;;  %v7221_v24 = vmul.bf16 %v14452_v21, %v7205_v23  ;;  %v7516_v23 = vld [vmem:[#allocation2 + $0x51] sm:$0xff] }
 0x45f   : > { %10336 = vmatmul.mubr.msk.bf16.gmra.mxu0 %vm310_vm0, %v13022_v5  ;;  %10446 = vmatpush3.bf16.msra.mxu1 %v10664_v17  ;;  %v13394_v5 = vld [vmem:[%s14092_s3 + $0x238] sm:$0xff]  }
 0x460   : > { %10339 = vmatprep.mubr.msk.bf16.mxu0 %vm310_vm0, %v13059_v34  ;;  %10408 = vmatpush3.bf16.msra.mxu0 %v10661_v35  ;;  %v6888_v34 = vmul.bf16 %v14441_v11, %v13272_v63  ;;  %v6865_v63 = vld [vmem:[#allocation2 + $0x10a] sm:$0xff]  ;;  %v7513_v17 = vld [vmem:[#allocation2 + $0x39] sm:$0xff] }
 0x461   : > { %10409 = vmatprep.subr.bf16.mxu0 %v10662_v32  ;;  %10447 = vmatprep.subr.bf16.mxu1 %v10665_v56  ;;  %v14453_v35 = vld [vmem:[#allocation11_spill] sm:$0xff] }
 0x462   : > { %10376 = vmatmul.mubr.msk.bf16.gmra.mxu1 %vm310_vm0, %v6885_v3  ;;  %v7179_v3 = vld [vmem:[#allocation2 + $0x58] sm:$0xff] }
 0x463   : > { %10379 = vmatprep.mubr.msk.bf16.mxu1 %vm310_vm0, %v6886_v45  ;;  %10448 = vmatpush3.bf16.msra.mxu1 %v10665_v56  ;;  %v7515_v56 = vld [vmem:[#allocation2 + $0x49] sm:$0xff]  ;;  %v7512_v45 = vld [vmem:[#allocation2 + $0x31] sm:$0xff] }
 0x464   : > { %10410 = vmatpush3.bf16.msra.mxu0 %v10662_v32  ;;  %10449 = vmatprep.subr.bf16.mxu1 %v10666_v47  ;;  %v7222_v32 = vmul.bf16 %v14453_v35, %v7206_v15 }
 0x465   : > { %10483 = vmatprep.subr.bf16.mxu0 %v13394_v5 }
 0x467   : > { %10340 = vmatmul.mubr.msk.bf16.gmra.mxu0 %vm310_vm0, %v13062_v20  ;;  %10450 = vmatpush3.bf16.msra.mxu1 %v10666_v47  ;;  %v6890_v20 = vmul.bf16 %v14443_v25, %v13288_v38  ;;  %v6543_v38 = vld [vmem:[#allocation2 + $0x109] sm:$0xff] }
 0x468   : > { %10343 = vmatprep.mubr.msk.bf16.mxu0 %vm310_vm0, %v13087_v19  ;;  %10523 = vmatprep.subr.bf16.mxu1 %v13394_v5  ;;  %v6889_v19 = vmul.bf16 %v14442_v0, %v13275_v30  ;;  %v7172_v30 = vld [vmem:[#allocation2 + $0x20] sm:$0xff] }
 0x46a   : > { %10380 = vmatmul.mubr.msk.bf16.gmra.mxu1 %vm310_vm0, %v6887_v40  ;;  %v7180_v40 = vld [vmem:[#allocation2 + $0x60] sm:$0xff] }
 0x46b   : > { %10383 = vmatprep.mubr.msk.bf16.mxu1 %vm310_vm0, %v6888_v34  ;;  %v7543_v34 = vpack.c.bf16 %v7513_v17, %v7512_v45  ;;  %v7182_v17 = vld [vmem:[#allocation2 + $0x70] sm:$0xff] }
 0x46f   : > { %10344 = vmatmul.mubr.msk.bf16.gmra.mxu0 %vm310_vm0, %v13089_v41  ;;  %v6891_v41 = vmul.bf16 %v14444_v44, %v13291_v26  ;;  %v7204_v26 = vpack.c.bf16 %v7173_v54, %v7172_v30  ;;  %v10669_v30 = vld [vmem:[%s14092_s3 + $0x228] sm:$0xff]  }
 0x470   : > { %10347 = vmatprep.mubr.msk.bf16.mxu0 %vm310_vm0, %v13113_v27  ;;  %v6892_v27 = vmul.bf16 %v14445_v46, %v13304_v55  ;;  %v13450_v55 = vpack.c.bf16 %v6865_v63, %v6864_v14 }
 0x472   : > { %10384 = vmatmul.mubr.msk.bf16.gmra.mxu1 %vm310_vm0, %v6889_v19  ;;  %v6897_v60 = vmul.bf16 %v14450_v49, %v13450_v55  ;;  %v7514_v19 = vld [vmem:[#allocation2 + $0x41] sm:$0xff] }
 0x473   : > { %10387 = vmatprep.mubr.msk.bf16.mxu1 %vm310_vm0, %v6890_v20  ;;  %v7178_v20 = vld [vmem:[#allocation2 + $0x50] sm:$0xff] }
 0x477   : > { %10348 = vmatmul.mubr.msk.bf16.gmra.mxu0 %vm310_vm0, %v13115_v58  ;;  %v6893_v58 = vmul.bf16 %v14446_v10, %v13307_v28 }
 0x478   : > { %10351 = vmatprep.mubr.msk.bf16.mxu0 %vm310_vm0, %v13139_v16  ;;  %v6894_v16 = vmul.bf16 %v14447_v4, %v13320_v48 }
 0x47a   : > { %10388 = vmatmul.mubr.msk.bf16.gmra.mxu1 %vm310_vm0, %v6891_v41 }
 0x47b   : > { %10391 = vmatprep.mubr.msk.bf16.mxu1 %vm310_vm0, %v6892_v27  ;;  %v7544_v27 = vpack.c.bf16 %v7515_v56, %v7514_v19 }
 0x47f   : > { %10352 = vmatmul.mubr.msk.bf16.gmra.mxu0 %vm310_vm0, %v13141_v18  ;;  %v6895_v18 = vmul.bf16 %v14448_v2, %v13323_v61  ;;  %v7511_v61 = vld [vmem:[#allocation2 + $0x29] sm:$0xff] }
 0x480   : > { %10355 = vmatprep.mubr.msk.bf16.mxu0 %vm310_vm0, %v13162_v12  ;;  %v6896_v12 = vmul.bf16 %v14449_v53, %v13336_v43  ;;  %v7510_v43 = vld [vmem:[#allocation2 + $0x21] sm:$0xff] }
 0x481   : > { %v7542_v31 = vpack.c.bf16 %v7511_v61, %v7510_v43  ;;  %v10670_v61 = vld [vmem:[%s14092_s3 + $0x220] sm:$0xff]   ;;  %v7519_v43 = vld [vmem:[#allocation2 + $0x69] sm:$0xff] }
 0x482   : > { %10392 = vmatmul.mubr.msk.bf16.gmra.mxu1 %vm310_vm0, %v6893_v58  ;;  %v7207_v58 = vpack.c.bf16 %v7179_v3, %v7178_v20  ;;  %v7209_v3 = vpack.c.bf16 %v7183_v6, %v7182_v17 }
 0x483   : > { %10395 = vmatprep.mubr.msk.bf16.mxu1 %vm310_vm0, %v6894_v16  ;;  %v7181_v16 = vld [vmem:[#allocation2 + $0x68] sm:$0xff] }
 0x487   : > { %10356 = vmatmul.mubr.msk.bf16.gmra.mxu0 %vm310_vm0, %v13168_v57  ;;  %v6542_v57 = vld [vmem:[#allocation2 + $0x101] sm:$0xff] }
 0x488   : > { %10359 = vmatprep.mubr.msk.bf16.mxu0 %vm310_vm0, %v13180_v42  ;;  %v13452_v28 = vpack.c.bf16 %v6543_v38, %v6542_v57  ;;  %v14451_v42 = vld [vmem:[#allocation10_spill] sm:$0xff]  ;;  %v14454_v57 = vld [vmem:[#allocation12_spill] sm:$0xff] }
 0x489   : > { %v7220_v48 = vmul.bf16 %v14451_v42, %v7204_v26  ;;  %v7223_v42 = vmul.bf16 %v14454_v57, %v7207_v58 }
 0x48a   : > { %10396 = vmatmul.mubr.msk.bf16.gmra.mxu1 %vm310_vm0, %v6895_v18 }
 0x48b   : > { %10399 = vmatprep.mubr.msk.bf16.mxu1 %vm310_vm0, %v6896_v12  ;;  %v7208_v12 = vpack.c.bf16 %v7181_v16, %v7180_v40  ;;  %v7521_v16 = vld [vmem:[#allocation2 + $0x79] sm:$0xff] }
 0x48f   : > { %10360 = vmatmul.mubr.msk.bf16.gmra.mxu0 %vm310_vm0, %v13452_v28 }
 0x490   : > { %10411 = vmatprep.mubr.msk.bf16.mxu0 %vm310_vm0, %v7220_v48  ;;  %v7517_v48 = vld [vmem:[#allocation2 + $0x59] sm:$0xff] }
 0x491   : > { %v7545_v21 = vpack.c.bf16 %v7517_v48, %v7516_v23  ;;  %v7188_v48 = vld [vmem:[#allocation2 + $0xa0] sm:$0xff] }
 0x492   : > { %10400 = vmatmul.mubr.msk.bf16.gmra.mxu1 %vm310_vm0, %v6897_v60  ;;  %v7224_v60 = vmul.bf16 %v14455_v59, %v7208_v12  ;;  %v14457_v12 = vld [vmem:[#allocation15_spill] sm:$0xff] }
 0x493   : > { %10451 = vmatprep.mubr.msk.bf16.mxu1 %vm310_vm0, %v7542_v31 }
 0x494   : > { %v10173_v47 = vpop.f32.mrf.mxu0 }
 0x496   : > { %v5476_v41 = vpop.f32.mrf.mxu0 }
 0x497   : > { %10412 = vmatmul.mubr.msk.bf16.vlgmr.msra.gmra.mxu0 %vm310_vm0, %v7221_v24  ;;  %v10213_v18 = vpop.f32.mrf.mxu1  ;;  %v7518_v24 = vld [vmem:[#allocation2 + $0x61] sm:$0xff] }
 0x498   : > { %10484 = vmatpush3.bf16.msra.mxu0 %v13394_v5  ;;  %10415 = vmatprep.mubr.msk.bf16.mxu0 %vm310_vm0, %v7222_v32  ;;  %v13474_v54 = vadd.f32 %v10213_v18, %v10173_v47  ;;  %v10174_v14 = vpop.f32.mrf.mxu0  ;;  %v7546_v56 = vpack.c.bf16 %v7519_v43, %v7518_v24  ;;  %v7185_v47 = vld [vmem:[#allocation2 + $0x88] sm:$0xff]  ;;  %v7186_v43 = vld [vmem:[#allocation2 + $0x90] sm:$0xff] }
 0x499   : > { %10485 = vmatprep.subr.bf16.mxu0 %v10668_v7  ;;  %v5709_v63 = vpop.f32.mrf.mxu1  ;;  %v7210_v40 = vpack.c.bf16 %v7185_v47, %v7184_v22  ;;  %v14458_v47 = vld [vmem:[#allocation16_spill] sm:$0xff] }
 0x49a   : > { %10452 = vmatmul.mubr.msk.bf16.vlgmr.msra.gmra.mxu1 %vm310_vm0, %v7543_v34  ;;  %v13478_v38 = vadd.f32 %v5709_v63, %v5476_v41  ;;  %v5479_v26 = vpop.f32.mrf.mxu0  ;;  %v7523_v63 = vld [vmem:[#allocation2 + $0x89] sm:$0xff] }
 0x49b   : > { %10455 = vmatprep.mubr.msk.bf16.mxu1 %vm310_vm0, %v7544_v27  ;;  %10527 = vmatpush3.bf16.msra.mxu1 %v13394_v5  ;;  %v10214_v29 = vpop.f32.mrf.mxu1  ;;  %v14456_v27 = vld [vmem:[#allocation14_spill] sm:$0xff] }
 0x49c   : > { %10486 = vmatpush3.bf16.msra.mxu0 %v10668_v7  ;;  %10524 = vmatprep.subr.bf16.mxu1 %v10668_v7  ;;  %v13485_v5 = vadd.f32 %v10214_v29, %v10174_v14  ;;  %v10177_v31 = vpop.f32.mrf.mxu0  ;;  %v7225_v58 = vmul.bf16 %v14456_v27, %v7209_v3  ;;  %v7226_v14 = vmul.bf16 %v14457_v12, %v7210_v40  ;;  %v7525_v40 = vld [vmem:[#allocation2 + $0x99] sm:$0xff]  ;;  %v7527_v27 = vld [vmem:[#allocation2 + $0xa9] sm:$0xff]  ;;  %v7524_v12 = vld [vmem:[#allocation2 + $0x91] sm:$0xff] }
 0x49d   : > { %10487 = vmatprep.subr.bf16.mxu0 %v10669_v30  ;;  %v5712_v15 = vpop.f32.mrf.mxu1 }
 0x49e   : > { %v13489_v35 = vadd.f32 %v5712_v15, %v5479_v26  ;;  %v5492_v32 = vpop.f32.mrf.mxu0  ;;  %v7187_v26 = vld [vmem:[#allocation2 + $0x98] sm:$0xff]  ;;  %v7189_v15 = vld [vmem:[#allocation2 + $0xa8] sm:$0xff] }
 0x49f   : > { %10416 = vmatmul.mubr.msk.bf16.gmra.mxu0 %vm310_vm0, %v7223_v42  ;;  %10528 = vmatpush3.bf16.msra.mxu1 %v10668_v7  ;;  %v10217_v45 = vpop.f32.mrf.mxu1  ;;  %v7211_v22 = vpack.c.bf16 %v7187_v26, %v7186_v43  ;;  %v7212_v24 = vpack.c.bf16 %v7189_v15, %v7188_v48  ;;  %v7549_v26 = vpack.c.bf16 %v7525_v40, %v7524_v12  ;;  %v7193_v43 = vld [vmem:[#allocation2 + $0xc8] sm:$0xff]  ;;  %v14461_v40 = vld [vmem:[#allocation19_spill] sm:$0xff] }
 0x4a0   : > { %10419 = vmatprep.mubr.msk.bf16.mxu0 %vm310_vm0, %v7224_v60  ;;  %10488 = vmatpush3.bf16.msra.mxu0 %v10669_v30  ;;  %v13492_v7 = vadd.f32 %v10217_v45, %v10177_v31  ;;  %v10178_v34 = vpop.f32.mrf.mxu0  ;;  %v7522_v60 = vld [vmem:[#allocation2 + $0x81] sm:$0xff] }
 0x4a1   : > { %10489 = vmatprep.subr.bf16.mxu0 %v10670_v61  ;;  %10525 = vmatprep.subr.bf16.mxu1 %v10669_v30  ;;  %v5725_v19 = vpop.f32.mrf.mxu1  ;;  %v7548_v23 = vpack.c.bf16 %v7523_v63, %v7522_v60  ;;  %v7227_v45 = vmul.bf16 %v14458_v47, %v7211_v22  ;;  %v7529_v47 = vld [vmem:[#allocation2 + $0xb9] sm:$0xff] }
 0x4a2   : > { %10456 = vmatmul.mubr.msk.bf16.gmra.mxu1 %vm310_vm0, %v7545_v21  ;;  %v13495_v20 = vadd.f32 %v5725_v19, %v5492_v32  ;;  %v5495_v41 = vpop.f32.mrf.mxu0  ;;  %v14459_v19 = vld [vmem:[#allocation17_spill] sm:$0xff]  ;;  %v7196_v12 = vld [vmem:[#allocation2 + $0xe0] sm:$0xff] }
 0x4a3   : > { %10459 = vmatprep.mubr.msk.bf16.mxu1 %vm310_vm0, %v7546_v56  ;;  %10529 = vmatpush3.bf16.msra.mxu1 %v10669_v30  ;;  %v10218_v18 = vpop.f32.mrf.mxu1  ;;  %v7520_v30 = vld [vmem:[#allocation2 + $0x71] sm:$0xff] }
 0x4a4   : > { %10490 = vmatpush3.bf16.msra.mxu0 %v10670_v61  ;;  %10526 = vmatprep.subr.bf16.mxu1 %v10670_v61  ;;  %v13499_v57 = vadd.f32 %v10218_v18, %v10178_v34  ;;  %v7547_v59 = vpack.c.bf16 %v7521_v16, %v7520_v30  ;;  %v7190_v30 = vld [vmem:[#allocation2 + $0xb0] sm:$0xff] }
 0x4a5   : > { %v5728_v29 = vpop.f32.mrf.mxu1 }
 0x4a6   : > { %v10181_v42 = vpop.f32.mrf.mxu0  ;;  %v13503_v6 = vadd.f32 %v5728_v29, %v5495_v41  ;;  %v7228_v41 = vmul.bf16 %v14459_v19, %v7212_v24  ;;  %v7531_v19 = vld [vmem:[#allocation2 + $0xc9] sm:$0xff] }
 0x4a7   : > { %10420 = vmatmul.mubr.msk.bf16.gmra.mxu0 %vm310_vm0, %v7225_v58  ;;  %10530 = vmatpush3.bf16.msra.mxu1 %v10670_v61  ;;  %v7191_v58 = vld [vmem:[#allocation2 + $0xb8] sm:$0xff] }
 0x4a8   : > { %10423 = vmatprep.mubr.msk.bf16.mxu0 %vm310_vm0, %v7226_v14  ;;  %v5508_v31 = vpop.f32.mrf.mxu0  ;;  %v7192_v14 = vld [vmem:[#allocation2 + $0xc0] sm:$0xff]  ;;  %v7213_v60 = vpack.c.bf16 %v7191_v58, %v7190_v30 }
 0x4a9   : > { %v10221_v21 = vpop.f32.mrf.mxu1 }
 0x4aa   : > { %10460 = vmatmul.mubr.msk.bf16.gmra.mxu1 %vm310_vm0, %v7547_v59  ;;  %v13506_v17 = vadd.f32 %v10221_v21, %v10181_v42  ;;  %v10182_v61 = vpop.f32.mrf.mxu0  ;;  %v7526_v42 = vld [vmem:[#allocation2 + $0xa1] sm:$0xff] }
 0x4ab   : > { %10463 = vmatprep.mubr.msk.bf16.mxu1 %vm310_vm0, %v7548_v23  ;;  %v5741_v32 = vpop.f32.mrf.mxu1  ;;  %v7550_v59 = vpack.c.bf16 %v7527_v27, %v7526_v42  ;;  %v7214_v23 = vpack.c.bf16 %v7193_v43, %v7192_v14  ;;  %v7194_v42 = vld [vmem:[#allocation2 + $0xd0] sm:$0xff]  ;;  %v7197_v43 = vld [vmem:[#allocation2 + $0xe8] sm:$0xff] }
 0x4ac   : > { %v13509_v56 = vadd.f32 %v5741_v32, %v5508_v31  ;;  %v5511_v3 = vpop.f32.mrf.mxu0  ;;  %v14460_v32 = vld [vmem:[#allocation18_spill] sm:$0xff] }
 0x4ad   : > { %v10222_v34 = vpop.f32.mrf.mxu1 }
 0x4ae   : > { %v13513_v16 = vadd.f32 %v10222_v34, %v10182_v61  ;;  %v10185_v18 = vpop.f32.mrf.mxu0  ;;  %v7230_v34 = vmul.bf16 %v14461_v40, %v7214_v23  ;;  %v7216_v23 = vpack.c.bf16 %v7197_v43, %v7196_v12 }
 0x4af   : > { %10424 = vmatmul.mubr.msk.bf16.gmra.mxu0 %vm310_vm0, %v7227_v45  ;;  %v5744_v63 = vpop.f32.mrf.mxu1 }
 0x4b0   : > { %10427 = vmatprep.mubr.msk.bf16.mxu0 %vm310_vm0, %v7228_v41  ;;  %v13517_v48 = vadd.f32 %v5744_v63, %v5511_v3  ;;  %v5524_v29 = vpop.f32.mrf.mxu0  ;;  %v7229_v3 = vmul.bf16 %v14460_v32, %v7213_v60  ;;  %v7195_v41 = vld [vmem:[#allocation2 + $0xd8] sm:$0xff] }
 0x4b1   : > { %v10225_v31 = vpop.f32.mrf.mxu1  ;;  %v7215_v60 = vpack.c.bf16 %v7195_v41, %v7194_v42  ;;  %v7199_v41 = vld [vmem:[#allocation2 + $0xf8] sm:$0xff]  ;;  %v7198_v42 = vld [vmem:[#allocation2 + $0xf0] sm:$0xff] }
 0x4b2   : > { %10464 = vmatmul.mubr.msk.bf16.gmra.mxu1 %vm310_vm0, %v7549_v26  ;;  %v13520_v22 = vadd.f32 %v10225_v31, %v10185_v18  ;;  %v10186_v15 = vpop.f32.mrf.mxu0  ;;  %v7528_v18 = vld [vmem:[#allocation2 + $0xb1] sm:$0xff]  ;;  %v7530_v26 = vld [vmem:[#allocation2 + $0xc1] sm:$0xff] }
 0x4b3   : > { %10467 = vmatprep.mubr.msk.bf16.mxu1 %vm310_vm0, %v7550_v59  ;;  %v5757_v21 = vpop.f32.mrf.mxu1  ;;  %v7551_v63 = vpack.c.bf16 %v7529_v47, %v7528_v18  ;;  %v7552_v59 = vpack.c.bf16 %v7531_v19, %v7530_v26  ;;  %v7535_v19 = vld [vmem:[#allocation2 + $0xe9] sm:$0xff]  ;;  %v7534_v26 = vld [vmem:[#allocation2 + $0xe1] sm:$0xff] }
 0x4b4   : > { %v13523_v24 = vadd.f32 %v5757_v21, %v5524_v29  ;;  %v5527_v61 = vpop.f32.mrf.mxu0 }
 0x4b5   : > { %v10226_v45 = vpop.f32.mrf.mxu1 }
 0x4b6   : > { %v13527_v27 = vadd.f32 %v10226_v45, %v10186_v15  ;;  %v7533_v45 = vld [vmem:[#allocation2 + $0xd9] sm:$0xff] }
 0x4b7   : > { %v10189_v58 = vpop.f32.mrf.mxu0  ;;  %10428 = vmatmul.mubr.msk.bf16.gmra.mxu0 %vm310_vm0, %v7229_v3  ;;  %v5760_v14 = vpop.f32.mrf.mxu1 }
 0x4b8   : > { %10431 = vmatprep.mubr.msk.bf16.mxu0 %vm310_vm0, %v7230_v34  ;;  %v13531_v30 = vadd.f32 %v5760_v14, %v5527_v61  ;;  %v7231_v61 = vmul.bf16 %v14430_v62, %v7215_v60  ;;  %v7232_v34 = vmul.bf16 %v14431_v8, %v7216_v23  ;;  %v7217_v60 = vpack.c.bf16 %v7199_v41, %v7198_v42 }
 0x4b9   : > { %v5540_v29 = vpop.f32.mrf.mxu0 }
 0x4ba   : > { %v10229_v31 = vpop.f32.mrf.mxu1  ;;  %10468 = vmatmul.mubr.msk.bf16.gmra.mxu1 %vm310_vm0, %v7551_v63 }
 0x4bb   : > { %v13534_v15 = vadd.f32 %v10229_v31, %v10189_v58  ;;  %10471 = vmatprep.mubr.msk.bf16.mxu1 %vm310_vm0, %v7552_v59  ;;  %v10190_v21 = vpop.f32.mrf.mxu0  ;;  %v7532_v58 = vld [vmem:[#allocation2 + $0xd1] sm:$0xff]  ;;  %v7554_v59 = vpack.c.bf16 %v7535_v19, %v7534_v26 }
 0x4bc   : > { %v5773_v32 = vpop.f32.mrf.mxu1  ;;  %v7553_v63 = vpack.c.bf16 %v7533_v45, %v7532_v58  ;;  %v7537_v45 = vld [vmem:[#allocation2 + $0xf9] sm:$0xff]  ;;  %v7536_v58 = vld [vmem:[#allocation2 + $0xf1] sm:$0xff] }
 0x4bd   : > { %v13537_v3 = vadd.f32 %v5773_v32, %v5540_v29  ;;  %v5543_v47 = vpop.f32.mrf.mxu0  ;;  %v7203_v19 = vld [vmem:[#allocation2 + $0x118] sm:$0xff]  ;;  %v7555_v26 = vpack.c.bf16 %v7537_v45, %v7536_v58 }
 0x4be   : > { %v10230_v40 = vpop.f32.mrf.mxu1  ;;  %v7834_v58 = vld [vmem:[#allocation2 + $0x32] sm:$0xff] }
 0x4bf   : > { %v13541_v18 = vadd.f32 %v10230_v40, %v10190_v21  ;;  %v10193_v12 = vpop.f32.mrf.mxu0  ;;  %10432 = vmatmul.mubr.msk.bf16.gmra.mxu0 %vm310_vm0, %v7231_v61  ;;  %v7233_v61 = vmul.bf16 %v14432_v51, %v7217_v60  ;;  %v7234_v40 = vmul.bf16 %v14433_v52, %v13340_v50 }
 0x4c0   : > { %v5776_v14 = vpop.f32.mrf.mxu1  ;;  %10435 = vmatprep.mubr.msk.bf16.mxu0 %vm310_vm0, %v7232_v34  ;;  %v7202_v34 = vld [vmem:[#allocation2 + $0x110] sm:$0xff] }
 0x4c1   : > { %v13545_v29 = vadd.f32 %v5776_v14, %v5543_v47  ;;  %v5556_v62 = vpop.f32.mrf.mxu0  ;;  %v7833_v14 = vld [vmem:[#allocation2 + $0x2a] sm:$0xff] }
 0x4c2   : > { %v10233_v8 = vpop.f32.mrf.mxu1  ;;  %10472 = vmatmul.mubr.msk.bf16.gmra.mxu1 %vm310_vm0, %v7553_v63 }
 0x4c3   : > { %v13548_v43 = vadd.f32 %v10233_v8, %v10193_v12  ;;  %10475 = vmatprep.mubr.msk.bf16.mxu1 %vm310_vm0, %v7554_v59  ;;  %v10194_v31 = vpop.f32.mrf.mxu0  ;;  %v7832_v59 = vld [vmem:[#allocation2 + $0x22] sm:$0xff] }
 0x4c4   : > { %v5789_v23 = vpop.f32.mrf.mxu1  ;;  %v7864_v52 = vpack.c.bf16 %v7833_v14, %v7832_v59  ;;  %v7835_v14 = vld [vmem:[#allocation2 + $0x3a] sm:$0xff] }
 0x4c5   : > { %v13551_v21 = vadd.f32 %v5789_v23, %v5556_v62  ;;  %v5559_v32 = vpop.f32.mrf.mxu0  ;;  %v7219_v62 = vpack.c.bf16 %v7203_v19, %v7202_v34  ;;  %v7541_v23 = vld [vmem:[#allocation2 + $0x119] sm:$0xff] }
 0x4c6   : > { %v10234_v47 = vpop.f32.mrf.mxu1  ;;  %v7880_v34 = vmul.bf16 %v14434_v33, %v7864_v52  ;;  %v7863_v59 = vld [vmem:[#allocation2 + $0x11a] sm:$0xff]  ;;  %v7894_v33 = vmul.bf16 %v14449_v53, %v13450_v55  ;;  %v7836_v52 = vld [vmem:[#allocation2 + $0x42] sm:$0xff]  ;;  %v7838_v55 = vld [vmem:[#allocation2 + $0x52] sm:$0xff] }
 0x4c7   : > { %v13556_v41 = vadd.f32 %v10234_v47, %v10194_v31  ;;  %v10197_v12 = vpop.f32.mrf.mxu0  ;;  %10436 = vmatmul.mubr.msk.bf16.gmra.mxu0 %vm310_vm0, %v7233_v61  ;;  %v7540_v31 = vld [vmem:[#allocation2 + $0x111] sm:$0xff]  ;;  %v7235_v45 = vmul.bf16 %v14435_v36, %v7219_v62  ;;  %v7865_v62 = vpack.c.bf16 %v7835_v14, %v7834_v58  ;;  %v7839_v58 = vld [vmem:[#allocation2 + $0x5a] sm:$0xff] }
 0x4c8   : > { %v5792_v63 = vpop.f32.mrf.mxu1  ;;  %10439 = vmatprep.mubr.msk.bf16.mxu0 %vm310_vm0, %v7234_v40  ;;  %v7557_v19 = vpack.c.bf16 %v7541_v23, %v7540_v31 }
 0x4c9   : > { %v13560_v42 = vadd.f32 %v5792_v63, %v5559_v32  ;;  %v5572_v51 = vpop.f32.mrf.mxu0 }
 0x4ca   : > { %v10237_v60 = vpop.f32.mrf.mxu1  ;;  %10476 = vmatmul.mubr.msk.bf16.gmra.mxu1 %vm310_vm0, %v7555_v26 }
 0x4cb   : > { %v13563_v50 = vadd.f32 %v10237_v60, %v10197_v12  ;;  %10479 = vmatprep.mubr.msk.bf16.mxu1 %vm310_vm0, %v13452_v28  ;;  %v10198_v8 = vpop.f32.mrf.mxu0  ;;  %v7837_v28 = vld [vmem:[#allocation2 + $0x4a] sm:$0xff] }
 0x4cc   : > { %v5805_v61 = vpop.f32.mrf.mxu1 }
 0x4cd   : > { %v13567_v47 = vadd.f32 %v5805_v61, %v5572_v51  ;;  %v5575_v32 = vpop.f32.mrf.mxu0  ;;  %v7862_v51 = vld [vmem:[#allocation2 + $0x112] sm:$0xff] }
 0x4ce   : > { %v10238_v40 = vpop.f32.mrf.mxu1 }
 0x4cf   : > { %v13571_v12 = vadd.f32 %v10238_v40, %v10198_v8  ;;  %v10201_v63 = vpop.f32.mrf.mxu0  ;;  %10440 = vmatmul.mubr.msk.bf16.gmra.mxu0 %vm310_vm0, %v7235_v45  ;;  %v7866_v8 = vpack.c.bf16 %v7837_v28, %v7836_v52  ;;  %v7879_v45 = vpack.c.bf16 %v7863_v59, %v7862_v51 }
 0x4d0   : > { %v5808_v26 = vpop.f32.mrf.mxu1  ;;  %10491 = vmatprep.mubr.msk.bf16.mxu0 %vm310_vm0, %v7880_v34 }
 0x4d1   : > { %v13575_v60 = vadd.f32 %v5808_v26, %v5575_v32  ;;  %v5588_v36 = vpop.f32.mrf.mxu0  ;;  %v7881_v26 = vmul.bf16 %v14436_v1, %v7865_v62  ;;  %v7882_v53 = vmul.bf16 %v14437_v13, %v7866_v8  ;;  %v7895_v28 = vmul.bf16 %v14450_v49, %v7879_v45  ;;  %v7840_v13 = vld [vmem:[#allocation2 + $0x62] sm:$0xff] }
 0x4d2   : > { %v10241_v31 = vpop.f32.mrf.mxu1  ;;  %10480 = vmatmul.mubr.msk.bf16.gmra.mxu1 %vm310_vm0, %v7557_v19 }
 0x4d3   : > { %14462 = vst [vmem:[#allocation50_spill] sm:$0xff] %v13575_v60  ;;  %v13580_v23 = vadd.f32 %v10241_v31, %v10201_v63  ;;  %10519 = vmatprep.mubr.msk.bf16.mxu1 %vm310_vm0, %v7894_v33  ;;  %v10202_v61 = vpop.f32.mrf.mxu0  ;;  %v7841_v63 = vld [vmem:[#allocation2 + $0x6a] sm:$0xff]  ;;  %v7867_v33 = vpack.c.bf16 %v7839_v58, %v7838_v55  ;;  %v7843_v55 = vld [vmem:[#allocation2 + $0x7a] sm:$0xff] }
 0x4d4   : > { %v5821_v40 = vpop.f32.mrf.mxu1  ;;  %v7868_v52 = vpack.c.bf16 %v7841_v63, %v7840_v13  ;;  %v7845_v63 = vld [vmem:[#allocation2 + $0x8a] sm:$0xff] }
 0x4d5   : > { %v13583_v34 = vadd.f32 %v5821_v40, %v5588_v36  ;;  %v5591_v32 = vpop.f32.mrf.mxu0  ;;  %v7883_v40 = vmul.bf16 %v14438_v9, %v7867_v33 }
 0x4d6   : > { %v10242_v60 = vpop.f32.mrf.mxu1 }
 0x4d7   : > { %v13587_v14 = vadd.f32 %v10242_v60, %v10202_v61  ;;  %v10253_v19 = vpop.f32.mrf.mxu0  ;;  %10492 = vmatmul.mubr.msk.bf16.vlgmr.msra.gmra.mxu0 %vm310_vm0, %v7881_v26 }
 0x4d8   : > { %v5824_v51 = vpop.f32.mrf.mxu1  ;;  %v6144_v59 = vadd.f32 %v10253_v19, %v13474_v54  ;;  %10495 = vmatprep.mubr.msk.bf16.mxu0 %vm310_vm0, %v7882_v53  ;;  %v7842_v53 = vld [vmem:[#allocation2 + $0x72] sm:$0xff] }
 0x4d9   : > { %v13593_v36 = vadd.f32 %v5824_v51, %v5591_v32  ;;  %v6015_v1 = vpop.f32.mrf.mxu0 }
 0x4da   : > { %v6142_v62 = vadd.f32 %v6015_v1, %v13478_v38  ;;  %v10293_v60 = vpop.f32.mrf.mxu1  ;;  %10520 = vmatmul.mubr.msk.bf16.vlgmr.msra.gmra.mxu1 %vm310_vm0, %v7895_v28  ;;  %v7884_v38 = vmul.bf16 %v14439_v37, %v7868_v52 }
 0x4db   : > { %v13597_v31 = vadd.f32 %v10293_v60, %v6144_v59  ;;  %v10254_v8 = vpop.f32.mrf.mxu0  ;;  %v7844_v59 = vld [vmem:[#allocation2 + $0x82] sm:$0xff] }
 0x4dc   : > { %v6145_v49 = vadd.f32 %v10254_v8, %v13485_v5  ;;  %v6353_v61 = vpop.f32.mrf.mxu1  ;;  %v7870_v33 = vpack.c.bf16 %v7845_v63, %v7844_v59  ;;  %v7848_v63 = vld [vmem:[#allocation2 + $0xa2] sm:$0xff] }
 0x4dd   : > { %v13600_v54 = vadd.f32 %v6353_v61, %v6142_v62  ;;  %v6018_v45 = vpop.f32.mrf.mxu0 }
 0x4de   : > { %v6143_v32 = vadd.f32 %v6018_v45, %v13489_v35  ;;  %v10294_v26 = vpop.f32.mrf.mxu1  ;;  %v7869_v35 = vpack.c.bf16 %v7843_v55, %v7842_v53  ;;  %v7849_v53 = vld [vmem:[#allocation2 + $0xaa] sm:$0xff] }
 0x4df   : > { %v13605_v58 = vadd.f32 %v10294_v26, %v6145_v49  ;;  %v10257_v19 = vpop.f32.mrf.mxu0  ;;  %10496 = vmatmul.mubr.msk.bf16.gmra.mxu0 %vm310_vm0, %v7883_v40  ;;  %v7886_v40 = vmul.bf16 %v14441_v11, %v7870_v33 }
 0x4e0   : > { %v6148_v5 = vadd.f32 %v10257_v19, %v13492_v7  ;;  %v6356_v28 = vpop.f32.mrf.mxu1  ;;  %10499 = vmatprep.mubr.msk.bf16.mxu0 %vm310_vm0, %v7884_v38  ;;  %v7885_v49 = vmul.bf16 %v14440_v39, %v7869_v35 }
 0x4e1   : > { %v13610_v51 = vadd.f32 %v6356_v28, %v6143_v32  ;;  %v6031_v9 = vpop.f32.mrf.mxu0  ;;  %v7846_v32 = vld [vmem:[#allocation2 + $0x92] sm:$0xff]  ;;  %v7872_v28 = vpack.c.bf16 %v7849_v53, %v7848_v63 }
 0x4e2   : > { %v6146_v37 = vadd.f32 %v6031_v9, %v13495_v20  ;;  %v10297_v1 = vpop.f32.mrf.mxu1  ;;  %v7847_v20 = vld [vmem:[#allocation2 + $0x9a] sm:$0xff] }
 0x4e3   : > { %v13613_v13 = vadd.f32 %v10297_v1, %v6148_v5  ;;  %v10258_v62 = vpop.f32.mrf.mxu0 }
 0x4e4   : > { %v6149_v60 = vadd.f32 %v10258_v62, %v13499_v57  ;;  %v6369_v52 = vpop.f32.mrf.mxu1 }
 0x4e5   : > { %v13616_v8 = vadd.f32 %v6369_v52, %v6146_v37  ;;  %v6034_v7 = vpop.f32.mrf.mxu0  ;;  %v7888_v52 = vmul.bf16 %v14443_v25, %v7872_v28 }
 0x4e6   : > { %v6147_v61 = vadd.f32 %v6034_v7, %v13503_v6  ;;  %v10298_v45 = vpop.f32.mrf.mxu1  ;;  %v7871_v6 = vpack.c.bf16 %v7847_v20, %v7846_v32  ;;  %v7850_v7 = vld [vmem:[#allocation2 + $0xb2] sm:$0xff]  ;;  %v7852_v20 = vld [vmem:[#allocation2 + $0xc2] sm:$0xff] }
 0x4e7   : > { %v13621_v26 = vadd.f32 %v10298_v45, %v6149_v60  ;;  %v10261_v38 = vpop.f32.mrf.mxu0  ;;  %10500 = vmatmul.mubr.msk.bf16.gmra.mxu0 %vm310_vm0, %v7885_v49  ;;  %v7853_v45 = vld [vmem:[#allocation2 + $0xca] sm:$0xff] }
 0x4e8   : > { %v6152_v57 = vadd.f32 %v10261_v38, %v13506_v17  ;;  %v6372_v55 = vpop.f32.mrf.mxu1  ;;  %10503 = vmatprep.mubr.msk.bf16.mxu0 %vm310_vm0, %v7886_v40  ;;  %v7887_v33 = vmul.bf16 %v14442_v0, %v7871_v6  ;;  %v7874_v53 = vpack.c.bf16 %v7853_v45, %v7852_v20 }
 0x4e9   : > { %v13626_v19 = vadd.f32 %v6372_v55, %v6147_v61  ;;  %v6047_v39 = vpop.f32.mrf.mxu0 }
 0x4ea   : > { %v6150_v11 = vadd.f32 %v6047_v39, %v13509_v56  ;;  %v10301_v5 = vpop.f32.mrf.mxu1  ;;  %v7851_v56 = vld [vmem:[#allocation2 + $0xba] sm:$0xff] }
 0x4eb   : > { %v13629_v9 = vadd.f32 %v10301_v5, %v6152_v57  ;;  %v10262_v35 = vpop.f32.mrf.mxu0 }
 0x4ec   : > { %v6153_v59 = vadd.f32 %v10262_v35, %v13513_v16  ;;  %v6385_v37 = vpop.f32.mrf.mxu1  ;;  %v7890_v35 = vmul.bf16 %v14445_v46, %v7874_v53  ;;  %v7858_v53 = vld [vmem:[#allocation2 + $0xf2] sm:$0xff] }
 0x4ed   : > { %v13632_v1 = vadd.f32 %v6385_v37, %v6150_v11  ;;  %v6050_v17 = vpop.f32.mrf.mxu0 }
 0x4ee   : > { %v6151_v62 = vadd.f32 %v6050_v17, %v13517_v48  ;;  %v10302_v60 = vpop.f32.mrf.mxu1  ;;  %v7873_v48 = vpack.c.bf16 %v7851_v56, %v7850_v7 }
 0x4ef   : > { %v13637_v49 = vadd.f32 %v10302_v60, %v6153_v59  ;;  %v10265_v61 = vpop.f32.mrf.mxu0  ;;  %10504 = vmatmul.mubr.msk.bf16.gmra.mxu0 %vm310_vm0, %v7887_v33  ;;  %v7854_v59 = vld [vmem:[#allocation2 + $0xd2] sm:$0xff]  ;;  %v7857_v33 = vld [vmem:[#allocation2 + $0xea] sm:$0xff] }
 0x4f0   : > { %v6156_v16 = vadd.f32 %v10265_v61, %v13520_v22  ;;  %v6388_v40 = vpop.f32.mrf.mxu1  ;;  %10507 = vmatprep.mubr.msk.bf16.mxu0 %vm310_vm0, %v7888_v52  ;;  %v7889_v11 = vmul.bf16 %v14444_v44, %v7873_v48  ;;  %v7856_v52 = vld [vmem:[#allocation2 + $0xe2] sm:$0xff] }
 0x4f1   : > { %v13642_v32 = vadd.f32 %v6388_v40, %v6151_v62  ;;  %v6063_v0 = vpop.f32.mrf.mxu0  ;;  %v7876_v56 = vpack.c.bf16 %v7857_v33, %v7856_v52 }
 0x4f2   : > { %v6154_v25 = vadd.f32 %v6063_v0, %v13523_v24  ;;  %v10305_v38 = vpop.f32.mrf.mxu1  ;;  %v7855_v24 = vld [vmem:[#allocation2 + $0xda] sm:$0xff] }
 0x4f3   : > { %v13645_v57 = vadd.f32 %v10305_v38, %v6156_v16  ;;  %v10266_v55 = vpop.f32.mrf.mxu0  ;;  %v7892_v38 = vmul.bf16 %v14447_v4, %v7876_v56 }
 0x4f4   : > { %v6157_v39 = vadd.f32 %v10266_v55, %v13527_v27  ;;  %v6401_v6 = vpop.f32.mrf.mxu1 }
 0x4f5   : > { %v13648_v63 = vadd.f32 %v6401_v6, %v6154_v25  ;;  %v6066_v22 = vpop.f32.mrf.mxu0 }
 0x4f6   : > { %v6155_v5 = vadd.f32 %v6066_v22, %v13531_v30  ;;  %v10306_v28 = vpop.f32.mrf.mxu1  ;;  %v7875_v30 = vpack.c.bf16 %v7855_v24, %v7854_v59 }
 0x4f7   : > { %v13653_v37 = vadd.f32 %v10306_v28, %v6157_v39  ;;  %v10269_v17 = vpop.f32.mrf.mxu0  ;;  %10508 = vmatmul.mubr.msk.bf16.gmra.mxu0 %vm310_vm0, %v7889_v11 }
 0x4f8   : > { %v6160_v27 = vadd.f32 %v10269_v17, %v13534_v15  ;;  %v6404_v62 = vpop.f32.mrf.mxu1  ;;  %10511 = vmatprep.mubr.msk.bf16.mxu0 %vm310_vm0, %v7890_v35  ;;  %v7891_v48 = vmul.bf16 %v14446_v10, %v7875_v30 }
 0x4f9   : > { %v13658_v60 = vadd.f32 %v6404_v62, %v6155_v5  ;;  %v6079_v44 = vpop.f32.mrf.mxu0 }
 0x4fa   : > { %v6158_v46 = vadd.f32 %v6079_v44, %v13537_v3  ;;  %v10309_v7 = vpop.f32.mrf.mxu1  ;;  %v7859_v3 = vld [vmem:[#allocation2 + $0xfa] sm:$0xff] }
 0x4fb   : > { %v13661_v61 = vadd.f32 %v10309_v7, %v6160_v27  ;;  %v10270_v45 = vpop.f32.mrf.mxu0  ;;  %v7877_v11 = vpack.c.bf16 %v7859_v3, %v7858_v53 }
 0x4fc   : > { %v6161_v16 = vadd.f32 %v10270_v45, %v13541_v18  ;;  %v6417_v40 = vpop.f32.mrf.mxu1 }
 0x4fd   : > { %v13664_v0 = vadd.f32 %v6417_v40, %v6158_v46  ;;  %v6082_v15 = vpop.f32.mrf.mxu0 }
 0x4fe   : > { %v6159_v20 = vadd.f32 %v6082_v15, %v13545_v29  ;;  %v10310_v25 = vpop.f32.mrf.mxu1  ;;  %v14463_v15 = vld [vmem:[#allocation50_spill] sm:$0xff] }
 0x4ff   : > { %v13669_v55 = vadd.f32 %v10310_v25, %v6161_v16  ;;  %v10273_v39 = vpop.f32.mrf.mxu0  ;;  %10512 = vmatmul.mubr.msk.bf16.gmra.mxu0 %vm310_vm0, %v7891_v48 }
 0x500   : > { %v6164_v18 = vadd.f32 %v10273_v39, %v13548_v43  ;;  %v6420_v6 = vpop.f32.mrf.mxu1  ;;  %10515 = vmatprep.mubr.msk.bf16.mxu0 %vm310_vm0, %v7892_v38  ;;  %v7893_v43 = vmul.bf16 %v14448_v2, %v7877_v11 }
 0x501   : > { %v13674_v22 = vadd.f32 %v6420_v6, %v6159_v20  ;;  %v6095_v10 = vpop.f32.mrf.mxu0 }
 0x502   : > { %v6162_v29 = vadd.f32 %v6095_v10, %v13551_v21  ;;  %v10313_v5 = vpop.f32.mrf.mxu1 }
 0x503   : > { %v13677_v4 = vadd.f32 %v10313_v5, %v6164_v18  ;;  %v10274_v28 = vpop.f32.mrf.mxu0 }
 0x504   : > { %v6165_v35 = vadd.f32 %v10274_v28, %v13556_v41  ;;  %v6433_v59 = vpop.f32.mrf.mxu1 }
 0x505   : > { %v13680_v24 = vadd.f32 %v6433_v59, %v6162_v29  ;;  %v6098_v17 = vpop.f32.mrf.mxu0 }
 0x506   : > { %v6163_v33 = vadd.f32 %v6098_v17, %v13560_v42  ;;  %v10314_v27 = vpop.f32.mrf.mxu1 }
 0x507   : > { %v13684_v62 = vadd.f32 %v10314_v27, %v6165_v35  ;;  %v10277_v44 = vpop.f32.mrf.mxu0  ;;  %10516 = vmatmul.mubr.msk.bf16.gmra.mxu0 %vm310_vm0, %v7893_v43 }
 0x508   : > { %v6168_v21 = vadd.f32 %v10277_v44, %v13563_v50  ;;  %v6436_v30 = vpop.f32.mrf.mxu1 }
 0x509   : > { %v13688_v52 = vadd.f32 %v6436_v30, %v6163_v33  ;;  %v6111_v41 = vpop.f32.mrf.mxu0 }
 0x50a   : > { %v6166_v46 = vadd.f32 %v6111_v41, %v13567_v47  ;;  %v10317_v7 = vpop.f32.mrf.mxu1 }
 0x50b   : > { %v13691_v56 = vadd.f32 %v10317_v7, %v6168_v21  ;;  %v10278_v2 = vpop.f32.mrf.mxu0 }
 0x50c   : > { %v6169_v42 = vadd.f32 %v10278_v2, %v13571_v12  ;;  %v6449_v45 = vpop.f32.mrf.mxu1 }
 0x50d   : > { %v13694_v16 = vadd.f32 %v6449_v45, %v6166_v46  ;;  %v6114_v40 = vpop.f32.mrf.mxu0 }
 0x50e   : > { %v6167_v48 = vadd.f32 %v6114_v40, %v14463_v15  ;;  %v10318_v20 = vpop.f32.mrf.mxu1 }
 0x50f   : > { %v13697_v50 = vadd.f32 %v10318_v20, %v6169_v42  ;;  %v10281_v25 = vpop.f32.mrf.mxu0 }
 0x510   : > { %v6172_v38 = vadd.f32 %v10281_v25, %v13580_v23  ;;  %v6452_v53 = vpop.f32.mrf.mxu1 }
 0x511   : > { %v13700_v47 = vadd.f32 %v6452_v53, %v6167_v48  ;;  %v6127_v3 = vpop.f32.mrf.mxu0 }
 0x512   : > { %v6170_v39 = vadd.f32 %v6127_v3, %v13583_v34  ;;  %v10321_v18 = vpop.f32.mrf.mxu1 }
 0x513   : > { %v13703_v12 = vadd.f32 %v10321_v18, %v6172_v38  ;;  %v10282_v6 = vpop.f32.mrf.mxu0 }
 0x514   : > { %v6173_v10 = vadd.f32 %v10282_v6, %v13587_v14  ;;  %v6465_v11 = vpop.f32.mrf.mxu1 }
 0x515   : > { %v13706_v29 = vadd.f32 %v6465_v11, %v6170_v39  ;;  %v6130_v5 = vpop.f32.mrf.mxu0 }
 0x516   : > { %v6171_v28 = vadd.f32 %v6130_v5, %v13593_v36  ;;  %v10322_v35 = vpop.f32.mrf.mxu1 }
 0x517   : > { %v13709_v23 = vadd.f32 %v10322_v35, %v6173_v10  ;;  %v10333_v59 = vpop.f32.mrf.mxu0 }
 0x518   : > { %v6468_v17 = vpop.f32.mrf.mxu1  ;;  %v6804_v43 = vadd.f32 %v10333_v59, %v13597_v31 }
 0x519   : > { %v13712_v34 = vadd.f32 %v6468_v17, %v6171_v28  ;;  %v6675_v33 = vpop.f32.mrf.mxu0 }
 0x51a   : > { %v6802_v27 = vadd.f32 %v6675_v33, %v13600_v54  ;;  %v10373_v44 = vpop.f32.mrf.mxu1 }
 0x51b   : > { %v13715_v14 = vadd.f32 %v10373_v44, %v6804_v43  ;;  %v10334_v21 = vpop.f32.mrf.mxu0 }
 0x51c   : > { %v6805_v30 = vadd.f32 %v10334_v21, %v13605_v58  ;;  %v7013_v41 = vpop.f32.mrf.mxu1 }
 0x51d   : > { %v13718_v36 = vadd.f32 %v7013_v41, %v6802_v27  ;;  %v6678_v46 = vpop.f32.mrf.mxu0 }
 0x51e   : > { %v6803_v7 = vadd.f32 %v6678_v46, %v13610_v51  ;;  %v10374_v2 = vpop.f32.mrf.mxu1 }
 0x51f   : > { %v13721_v42 = vadd.f32 %v10374_v2, %v6805_v30  ;;  %v10337_v31 = vpop.f32.mrf.mxu0 }
 0x520   : > { %v6808_v45 = vadd.f32 %v10337_v31, %v13613_v13  ;;  %v7016_v40 = vpop.f32.mrf.mxu1 }
 0x521   : > { %v13724_v54 = vadd.f32 %v7016_v40, %v6803_v7  ;;  %v6691_v15 = vpop.f32.mrf.mxu0 }
 0x522   : > { %v6806_v48 = vadd.f32 %v6691_v15, %v13616_v8  ;;  %v10377_v20 = vpop.f32.mrf.mxu1 }
 0x523   : > { %v13727_v58 = vadd.f32 %v10377_v20, %v6808_v45  ;;  %v10338_v25 = vpop.f32.mrf.mxu0 }
 0x524   : > { %v6809_v38 = vadd.f32 %v10338_v25, %v13621_v26  ;;  %v7029_v53 = vpop.f32.mrf.mxu1 }
 0x525   : > { %v13730_v51 = vadd.f32 %v7029_v53, %v6806_v48  ;;  %v6694_v3 = vpop.f32.mrf.mxu0 }
 0x526   : > { %v6807_v39 = vadd.f32 %v6694_v3, %v13626_v19  ;;  %v10378_v18 = vpop.f32.mrf.mxu1 }
 0x527   : > { %v13733_v13 = vadd.f32 %v10378_v18, %v6809_v38  ;;  %v10341_v6 = vpop.f32.mrf.mxu0 }
 0x528   : > { %v6812_v10 = vadd.f32 %v10341_v6, %v13629_v9  ;;  %v7032_v11 = vpop.f32.mrf.mxu1 }
 0x529   : > { %v13736_v8 = vadd.f32 %v7032_v11, %v6807_v39  ;;  %v6707_v5 = vpop.f32.mrf.mxu0 }
 0x52a   : > { %v6810_v28 = vadd.f32 %v6707_v5, %v13632_v1  ;;  %v10381_v35 = vpop.f32.mrf.mxu1 }
 0x52b   : > { %v13739_v26 = vadd.f32 %v10381_v35, %v6812_v10  ;;  %v10342_v59 = vpop.f32.mrf.mxu0 }
 0x52c   : > { %v6813_v17 = vadd.f32 %v10342_v59, %v13637_v49  ;;  %v7045_v43 = vpop.f32.mrf.mxu1 }
 0x52d   : > { %v13742_v19 = vadd.f32 %v7045_v43, %v6810_v28  ;;  %v6710_v33 = vpop.f32.mrf.mxu0 }
 0x52e   : > { %v6811_v27 = vadd.f32 %v6710_v33, %v13642_v32  ;;  %v10382_v44 = vpop.f32.mrf.mxu1 }
 0x52f   : > { %v13745_v9 = vadd.f32 %v10382_v44, %v6813_v17  ;;  %v10345_v21 = vpop.f32.mrf.mxu0 }
 0x530   : > { %v6816_v30 = vadd.f32 %v10345_v21, %v13645_v57  ;;  %v7048_v41 = vpop.f32.mrf.mxu1 }
 0x531   : > { %v13748_v1 = vadd.f32 %v7048_v41, %v6811_v27  ;;  %v6723_v46 = vpop.f32.mrf.mxu0 }
 0x532   : > { %v6814_v7 = vadd.f32 %v6723_v46, %v13648_v63  ;;  %v10385_v2 = vpop.f32.mrf.mxu1 }
 0x533   : > { %v13751_v49 = vadd.f32 %v10385_v2, %v6816_v30  ;;  %v10346_v31 = vpop.f32.mrf.mxu0 }
 0x534   : > { %v6817_v45 = vadd.f32 %v10346_v31, %v13653_v37  ;;  %v7061_v40 = vpop.f32.mrf.mxu1 }
 0x535   : > { %v13754_v32 = vadd.f32 %v7061_v40, %v6814_v7  ;;  %v6726_v15 = vpop.f32.mrf.mxu0 }
 0x536   : > { %v6815_v48 = vadd.f32 %v6726_v15, %v13658_v60  ;;  %v10386_v20 = vpop.f32.mrf.mxu1 }
 0x537   : > { %v13757_v57 = vadd.f32 %v10386_v20, %v6817_v45  ;;  %v10349_v25 = vpop.f32.mrf.mxu0 }
 0x538   : > { %v6820_v38 = vadd.f32 %v10349_v25, %v13661_v61  ;;  %v7064_v53 = vpop.f32.mrf.mxu1 }
 0x539   : > { %v13760_v63 = vadd.f32 %v7064_v53, %v6815_v48  ;;  %v6739_v3 = vpop.f32.mrf.mxu0 }
 0x53a   : > { %v6818_v39 = vadd.f32 %v6739_v3, %v13664_v0  ;;  %v10389_v18 = vpop.f32.mrf.mxu1 }
 0x53b   : > { %v13763_v37 = vadd.f32 %v10389_v18, %v6820_v38  ;;  %v10350_v6 = vpop.f32.mrf.mxu0 }
 0x53c   : > { %v6821_v10 = vadd.f32 %v10350_v6, %v13669_v55  ;;  %v7077_v11 = vpop.f32.mrf.mxu1 }
 0x53d   : > { %v13766_v60 = vadd.f32 %v7077_v11, %v6818_v39  ;;  %v6742_v5 = vpop.f32.mrf.mxu0 }
 0x53e   : > { %v6819_v28 = vadd.f32 %v6742_v5, %v13674_v22  ;;  %v10390_v35 = vpop.f32.mrf.mxu1 }
 0x53f   : > { %v13769_v61 = vadd.f32 %v10390_v35, %v6821_v10  ;;  %v10353_v59 = vpop.f32.mrf.mxu0 }
 0x540   : > { %v6824_v17 = vadd.f32 %v10353_v59, %v13677_v4  ;;  %v7080_v43 = vpop.f32.mrf.mxu1 }
 0x541   : > { %v13772_v0 = vadd.f32 %v7080_v43, %v6819_v28  ;;  %v6755_v33 = vpop.f32.mrf.mxu0 }
 0x542   : > { %v6822_v27 = vadd.f32 %v6755_v33, %v13680_v24  ;;  %v10393_v44 = vpop.f32.mrf.mxu1 }
 0x543   : > { %v13775_v55 = vadd.f32 %v10393_v44, %v6824_v17  ;;  %v10354_v21 = vpop.f32.mrf.mxu0 }
 0x544   : > { %v6825_v30 = vadd.f32 %v10354_v21, %v13684_v62  ;;  %v7093_v41 = vpop.f32.mrf.mxu1 }
 0x545   : > { %v13778_v22 = vadd.f32 %v7093_v41, %v6822_v27  ;;  %v6758_v46 = vpop.f32.mrf.mxu0 }
 0x546   : > { %v6823_v7 = vadd.f32 %v6758_v46, %v13688_v52  ;;  %v10394_v2 = vpop.f32.mrf.mxu1 }
 0x547   : > { %v13781_v4 = vadd.f32 %v10394_v2, %v6825_v30  ;;  %v10357_v31 = vpop.f32.mrf.mxu0 }
 0x548   : > { %v6828_v45 = vadd.f32 %v10357_v31, %v13691_v56  ;;  %v7096_v40 = vpop.f32.mrf.mxu1 }
 0x549   : > { %14464 = vst [vmem:[#allocation83_spill] sm:$0xff] %v13781_v4  ;;  %v13784_v24 = vadd.f32 %v7096_v40, %v6823_v7  ;;  %v6771_v15 = vpop.f32.mrf.mxu0 }
 0x54a   : > { %v6826_v48 = vadd.f32 %v6771_v15, %v13694_v16  ;;  %v10397_v20 = vpop.f32.mrf.mxu1 }
 0x54b   : > { %14465 = vst [vmem:[#allocation80_spill] sm:$0xff] %v13784_v24  ;;  %v13787_v62 = vadd.f32 %v10397_v20, %v6828_v45  ;;  %v10358_v25 = vpop.f32.mrf.mxu0 }
 0x54c   : > { %v6829_v38 = vadd.f32 %v10358_v25, %v13697_v50  ;;  %v7109_v53 = vpop.f32.mrf.mxu1 }
 0x54d   : > { %v13790_v52 = vadd.f32 %v7109_v53, %v6826_v48  ;;  %v6774_v3 = vpop.f32.mrf.mxu0 }
 0x54e   : > { %v6827_v39 = vadd.f32 %v6774_v3, %v13700_v47  ;;  %v10398_v18 = vpop.f32.mrf.mxu1 }
 0x54f   : > { %v13793_v56 = vadd.f32 %v10398_v18, %v6829_v38  ;;  %v10361_v6 = vpop.f32.mrf.mxu0 }
 0x550   : > { %v6832_v10 = vadd.f32 %v10361_v6, %v13703_v12  ;;  %v7112_v11 = vpop.f32.mrf.mxu1 }
 0x551   : > { %14466 = vst [vmem:[#allocation72_spill] sm:$0xff] %v13793_v56  ;;  %v13796_v16 = vadd.f32 %v7112_v11, %v6827_v39  ;;  %v6787_v5 = vpop.f32.mrf.mxu0 }
 0x552   : > { %v6830_v28 = vadd.f32 %v6787_v5, %v13706_v29  ;;  %v10401_v35 = vpop.f32.mrf.mxu1 }
 0x553   : > { %14467 = vst [vmem:[#allocation51_spill] sm:$0xff] %v13796_v16  ;;  %v13799_v50 = vadd.f32 %v10401_v35, %v6832_v10  ;;  %v10362_v59 = vpop.f32.mrf.mxu0 }
 0x554   : > { %v6833_v17 = vadd.f32 %v10362_v59, %v13709_v23  ;;  %v7125_v43 = vpop.f32.mrf.mxu1 }
 0x555   : > { %v13802_v47 = vadd.f32 %v7125_v43, %v6830_v28  ;;  %v6790_v33 = vpop.f32.mrf.mxu0 }
 0x556   : > { %v6831_v27 = vadd.f32 %v6790_v33, %v13712_v34  ;;  %v10402_v44 = vpop.f32.mrf.mxu1 }
 0x557   : > { %v13805_v12 = vadd.f32 %v10402_v44, %v6833_v17  ;;  %v10413_v21 = vpop.f32.mrf.mxu0 }
 0x558   : > { %v7128_v30 = vpop.f32.mrf.mxu1  ;;  %v13808_v41 = vadd.f32 %v10413_v21, %v13715_v14 }
 0x559   : > { %v13810_v29 = vadd.f32 %v7128_v30, %v6831_v27  ;;  %v7351_v46 = vpop.f32.mrf.mxu0 }
 0x55a   : > { %v13813_v7 = vadd.f32 %v7351_v46, %v13718_v36  ;;  %v13815_v23 = vpop.f32.mrf.mxu1 }
 0x55b   : > { %v13817_v2 = vpop.f32.mrf.mxu0 }
 0x55c   : > { %v13819_v31 = vpop.f32.mrf.mxu1 }
 0x55d   : > { %v13821_v34 = vpop.f32.mrf.mxu0 }
 0x55e   : > { %v13823_v45 = vpop.f32.mrf.mxu1 }
 0x55f   : > { %v10417_v40 = vpop.f32.mrf.mxu0 }
 0x560   : > { %v7484_v14 = vadd.f32 %v10417_v40, %v13727_v58  ;;  %v13826_v15 = vpop.f32.mrf.mxu1 }
 0x561   : > { %v7367_v48 = vpop.f32.mrf.mxu0 }
 0x562   : > { %v7482_v20 = vadd.f32 %v7367_v48, %v13730_v51  ;;  %v10457_v36 = vpop.f32.mrf.mxu1 }
 0x563   : > { %v13829_v25 = vadd.f32 %v10457_v36, %v7484_v14  ;;  %v13831_v38 = vpop.f32.mrf.mxu0 }
 0x564   : > { %v7689_v53 = vpop.f32.mrf.mxu1 }
 0x565   : > { %v13833_v3 = vadd.f32 %v7689_v53, %v7482_v20  ;;  %v13835_v39 = vpop.f32.mrf.mxu0 }
 0x566   : > { %v13837_v18 = vpop.f32.mrf.mxu1 }
 0x567   : > { %v10421_v6 = vpop.f32.mrf.mxu0 }
 0x568   : > { %v7488_v58 = vadd.f32 %v10421_v6, %v13739_v26  ;;  %v13840_v10 = vpop.f32.mrf.mxu1 }
 0x569   : > { %v7383_v11 = vpop.f32.mrf.mxu0 }
 0x56a   : > { %v13843_v51 = vadd.f32 %v7383_v11, %v13742_v19  ;;  %v10461_v5 = vpop.f32.mrf.mxu1 }
 0x56b   : > { %v13845_v28 = vadd.f32 %v10461_v5, %v7488_v58  ;;  %v13847_v35 = vpop.f32.mrf.mxu0 }
 0x56c   : > { %v13849_v59 = vpop.f32.mrf.mxu1 }
 0x56d   : > { %v13851_v17 = vpop.f32.mrf.mxu0 }
 0x56e   : > { %v13853_v43 = vpop.f32.mrf.mxu1 }
 0x56f   : > { %v10425_v33 = vpop.f32.mrf.mxu0 }
 0x570   : > { %v13856_v26 = vadd.f32 %v10425_v33, %v13751_v49  ;;  %v13858_v27 = vpop.f32.mrf.mxu1 }
 0x571   : > { %v7399_v44 = vpop.f32.mrf.mxu0 }
 0x572   : > { %v7490_v19 = vadd.f32 %v7399_v44, %v13754_v32  ;;  %v13861_v21 = vpop.f32.mrf.mxu1 }
 0x573   : > { %v13863_v30 = vpop.f32.mrf.mxu0 }
 0x574   : > { %v7721_v46 = vpop.f32.mrf.mxu1 }
 0x575   : > { %v13865_v40 = vadd.f32 %v7721_v46, %v7490_v19  ;;  %v13867_v14 = vpop.f32.mrf.mxu0 }
 0x576   : > { %v13869_v48 = vpop.f32.mrf.mxu1 }
 0x577   : > { %v10429_v20 = vpop.f32.mrf.mxu0 }
 0x578   : > { %v13872_v49 = vadd.f32 %v10429_v20, %v13763_v37  ;;  %v13874_v36 = vpop.f32.mrf.mxu1 }
 0x579   : > { %v7415_v53 = vpop.f32.mrf.mxu0 }
 0x57a   : > { %v13877_v32 = vadd.f32 %v7415_v53, %v13766_v60  ;;  %v13879_v6 = vpop.f32.mrf.mxu1 }
 0x57b   : > { %v13881_v58 = vpop.f32.mrf.mxu0 }
 0x57c   : > { %v13883_v11 = vpop.f32.mrf.mxu1 }
 0x57d   : > { %v13885_v5 = vpop.f32.mrf.mxu0 }
 0x57e   : > { %v13887_v33 = vpop.f32.mrf.mxu1 }
 0x57f   : > { %14468 = vst [vmem:[#allocation56_spill] sm:$0xff] %v13887_v33  ;;  %v10433_v44 = vpop.f32.mrf.mxu0 }
 0x580   : > { %v13890_v37 = vadd.f32 %v10433_v44, %v13775_v55  ;;  %v13892_v19 = vpop.f32.mrf.mxu1 }
 0x581   : > { %v7431_v46 = vpop.f32.mrf.mxu0 }
 0x582   : > { %14469 = vst [vmem:[#allocation81_spill] sm:$0xff] %v13890_v37  ;;  %v7498_v60 = vadd.f32 %v7431_v46, %v13778_v22  ;;  %v13895_v20 = vpop.f32.mrf.mxu1 }
 0x583   : > { %14470 = vst [vmem:[#allocation49_spill] sm:$0xff] %v13895_v20  ;;  %v13897_v53 = vpop.f32.mrf.mxu0 }
 0x584   : > { %14471 = vst [vmem:[#allocation74_spill] sm:$0xff] %v13897_v53  ;;  %v7753_v16 = vpop.f32.mrf.mxu1 }
 0x585   : > { %v13899_v56 = vadd.f32 %v7753_v16, %v7498_v60  ;;  %v13901_v24 = vpop.f32.mrf.mxu0 }
 0x586   : > { %14473 = vst [vmem:[#allocation84_spill] sm:$0xff] %v13901_v24  ;;  %v13903_v4 = vpop.f32.mrf.mxu1 }
 0x587   : > { %14472 = vst [vmem:[#allocation82_spill] sm:$0xff] %v13899_v56  ;;  %14474 = vst [vmem:[#allocation87_spill] sm:$0xff] %v13903_v4  ;;  %v10437_v33 = vpop.f32.mrf.mxu0 }
 0x588   : > { %v13906_v55 = vadd.f32 %v10437_v33, %v13787_v62  ;;  %v13908_v44 = vpop.f32.mrf.mxu1 }
 0x589   : > { %14476 = vst [vmem:[#allocation76_spill] sm:$0xff] %v13908_v44  ;;  %v7447_v37 = vpop.f32.mrf.mxu0 }
 0x58a   : > { %14475 = vst [vmem:[#allocation85_spill] sm:$0xff] %v13906_v55  ;;  %v7502_v22 = vadd.f32 %v7447_v37, %v13790_v52  ;;  %v13911_v46 = vpop.f32.mrf.mxu1  ;;  %v7481_v52 = vadd.f32 %v13817_v2, %v13721_v42  ;;  %v13935_v42 = vld [vmem:[#allocation5 + $0x1] ss:$0 sm:$0xff] }
 0x58b   : > { %14477 = vst [vmem:[#allocation86_spill] sm:$0xff] %v13911_v46  ;;  %v13913_v20 = vpop.f32.mrf.mxu0 }
 0x58c   : > { %14478 = vst [vmem:[#allocation88_spill] sm:$0xff] %v13913_v20  ;;  %v7769_v53 = vpop.f32.mrf.mxu1 }
 0x58d   : > { %v13915_v16 = vadd.f32 %v7769_v53, %v7502_v22  ;;  %v13917_v60 = vpop.f32.mrf.mxu0  ;;  %v7802_v53 = vadd.f32 %v13815_v23, %v13808_v41  ;;  %v7479_v22 = vadd.f32 %v13821_v34, %v13724_v54  ;;  %v7803_v23 = vadd.f32 %v13823_v45, %v7481_v52 }
 0x58e   : > { %14480 = vst [vmem:[#allocation21_spill] sm:$0xff] %v13917_v60  ;;  %v13919_v56 = vpop.f32.mrf.mxu1 }
 0x58f   : > { %14479 = vst [vmem:[#allocation20_spill] sm:$0xff] %v13915_v16  ;;  %14481 = vst [vmem:[#allocation22_spill] sm:$0xff] %v13919_v56  ;;  %v10441_v4 = vpop.f32.mrf.mxu0  ;;  %v7485_v16 = vadd.f32 %v13831_v38, %v13733_v13  ;;  %v7483_v56 = vadd.f32 %v13835_v39, %v13736_v8  ;;  %v7801_v34 = vadd.f32 %v13826_v15, %v7479_v22 }
 0x590   : > { %v13921_v24 = vpop.f32.mrf.mxu1  ;;  %v7508_v37 = vadd.f32 %v10441_v4, %v13799_v50  ;;  %v7800_v4 = vadd.f32 %v13819_v31, %v13813_v7  ;;  %v13947_v7 = vadd.f32 %v13847_v35, %v13745_v9 }
 0x591   : > { %14482 = vst [vmem:[#allocation23_spill] sm:$0xff] %v13921_v24  ;;  %v7463_v62 = vpop.f32.mrf.mxu0  ;;  %v7807_v8 = vadd.f32 %v13837_v18, %v7485_v16  ;;  %v13953_v16 = vadd.f32 %v13849_v59, %v13843_v51 }
 0x592   : > { %v10481_v33 = vpop.f32.mrf.mxu1  ;;  %v7506_v60 = vadd.f32 %v7463_v62, %v13802_v47  ;;  %v7805_v62 = vadd.f32 %v13840_v10, %v7483_v56 }
 0x593   : > { %v10442_v55 = vpop.f32.mrf.mxu0  ;;  %v7830_v54 = vadd.f32 %v10481_v33, %v7508_v37 }
 0x594   : > { %v7785_v44 = vpop.f32.mrf.mxu1  ;;  %v7509_v2 = vadd.f32 %v10442_v55, %v13805_v12 }
 0x595   : > { %v7466_v20 = vpop.f32.mrf.mxu0  ;;  %v7828_v31 = vadd.f32 %v7785_v44, %v7506_v60 }
 0x596   : > { %v10482_v24 = vpop.f32.mrf.mxu1  ;;  %v7507_v12 = vadd.f32 %v7466_v20, %v13810_v29  ;;  %v7487_v20 = vadd.f32 %v13851_v17, %v13748_v1  ;;  %v14483_v1 = vld [vmem:[#allocation41_spill] sm:$0xff] }
 0x597   : > { %v10493_v46 = vpop.f32.mrf.mxu0  ;;  %v7831_v52 = vadd.f32 %v10482_v24, %v7509_v2 }
 0x598   : > { %v7788_v50 = vpop.f32.mrf.mxu1  ;;  %v8140_v41 = vadd.f32 %v10493_v46, %v7802_v53 }
 0x599   : > { %v8011_v13 = vpop.f32.mrf.mxu0  ;;  %v7829_v59 = vadd.f32 %v7788_v50, %v7507_v12  ;;  %v14485_v12 = vld [vmem:[#allocation77_spill] sm:$0xff] }
 0x59a   : > { %v8180_v47 = vadd.f32 %v13935_v42, %v8140_v41  ;;  %v8138_v38 = vadd.f32 %v8011_v13, %v7800_v4  ;;  %v10521_v39 = vpop.f32.mrf.mxu1 }
 0x59b   : > { %v8168_v45 = vadd.f32 %v10521_v39, %v7830_v54  ;;  %v10494_v46 = vpop.f32.mrf.mxu0 }
 0x59c   : > { %v8212_v55 = vmul.f32 0.1, %v8180_v47  ;;  %v8178_v15 = vadd.f32 %v13935_v42, %v8138_v38  ;;  %v8141_v33 = vadd.f32 %v10494_v46, %v7803_v23  ;;  %v8123_v18 = vpop.f32.mrf.mxu1  ;;  %v14484_v46 = vld [vmem:[#allocation61_spill] sm:$0xff] }
 0x59d   : > { %v8208_v56 = vadd.f32 %v13935_v42, %v8168_v45  ;;  %v8166_v10 = vadd.f32 %v8123_v18, %v7828_v31  ;;  %v8014_v9 = vpop.f32.mrf.mxu0 }
 0x59e   : > { %v8244_v35 = vmax.f32 %v8180_v47, %v8212_v55  ;;  %v8210_v44 = vmul.f32 0.1, %v8178_v15  ;;  %v8181_v60 = vadd.f32 %v13935_v42, %v8141_v33  ;;  %v8139_v37 = vadd.f32 %v8014_v9, %v7801_v34  ;;  %v10522_v29 = vpop.f32.mrf.mxu1 }
 0x59f   : > { %v8240_v53 = vmul.f32 0.1, %v8208_v56  ;;  %v8206_v22 = vadd.f32 %v13935_v42, %v8166_v10  ;;  %v8169_v4 = vadd.f32 %v10522_v29, %v7831_v52  ;;  %v10497_v51 = vpop.f32.mrf.mxu0  ;;  %v14486_v52 = vld [vmem:[#allocation58_spill] sm:$0xff] }
 0x5a0   : > { %v8242_v24 = vmax.f32 %v8178_v15, %v8210_v44  ;;  %v8213_v41 = vmul.f32 0.1, %v8181_v60  ;;  %v8179_v23 = vadd.f32 %v13935_v42, %v8139_v37  ;;  %v8126_v54 = vpop.f32.mrf.mxu1  ;;  %v8144_v34 = vadd.f32 %v10497_v51, %v13829_v25 }
 0x5a1   : > { %v8272_v2 = vmax.f32 %v8208_v56, %v8240_v53  ;;  %v8238_v13 = vmul.f32 0.1, %v8206_v22  ;;  %v8209_v47 = vadd.f32 %v13935_v42, %v8169_v4  ;;  %v8027_v38 = vpop.f32.mrf.mxu0  ;;  %v8276_v17 = vadd.f32 %v8244_v35, %v14483_v1  ;;  %v14487_v4 = vld [vmem:[#allocation55_spill] sm:$0xff] }
 0x5a2   : > { %v8245_v39 = vmax.f32 %v8181_v60, %v8213_v41  ;;  %v8211_v31 = vmul.f32 0.1, %v8179_v23  ;;  %v8167_v45 = vadd.f32 %v8126_v54, %v7829_v59  ;;  %v8274_v50 = vadd.f32 %v8242_v24, %v14484_v46  ;;  %v14488_v41 = vld [vmem:[#allocation79_spill] sm:$0xff] }
 0x5a3   : > { %v8304_v55 = vadd.f32 %v8272_v2, %v14485_v12  ;;  %v8241_v15 = vmul.f32 0.1, %v8209_v47  ;;  %v8184_v33 = vadd.f32 %v13935_v42, %v8144_v34  ;;  %v10498_v18 = vpop.f32.mrf.mxu0  ;;  %v8142_v25 = vadd.f32 %v8027_v38, %v13833_v3 }
 0x5a4   : > { %v8277_v56 = vadd.f32 %v8245_v39, %v14486_v52  ;;  %v8243_v10 = vmax.f32 %v8179_v23, %v8211_v31  ;;  %v8207_v9 = vadd.f32 %v13935_v42, %v8167_v45  ;;  %v8270_v35 = vmax.f32 %v8206_v22, %v8238_v13  ;;  %v14489_v45 = vld [vmem:[#allocation75_spill] sm:$0xff]  ;;  %v14491_v52 = vld [vmem:[#allocation60_spill] sm:$0xff] }
 0x5a5   : > { %v8273_v44 = vmax.f32 %v8209_v47, %v8241_v15  ;;  %v8216_v60 = vmul.f32 0.1, %v8184_v33  ;;  %v8145_v37 = vadd.f32 %v10498_v18, %v7807_v8  ;;  %v8030_v29 = vpop.f32.mrf.mxu0  ;;  %v8182_v24 = vadd.f32 %v13935_v42, %v8142_v25  ;;  %v14492_v25 = vld [vmem:[#allocation53_spill] sm:$0xff] }
 0x5a6   : > { %v9212_v53 = vpack.c.bf16 %v8277_v56, %v8276_v17  ;;  %v8275_v51 = vadd.f32 %v8243_v10, %v14487_v4  ;;  %v8239_v59 = vmul.f32 0.1, %v8207_v9  ;;  %v8143_v2 = vadd.f32 %v8030_v29, %v7805_v62  ;;  %v14490_v62 = vld [vmem:[#allocation78_spill] sm:$0xff]  ;;  %v14494_v4 = vld [vmem:[#allocation43_spill] sm:$0xff] }
 0x5a7   : > { %v8305_v3 = vadd.f32 %v8273_v44, %v14488_v41  ;;  %v8248_v23 = vmax.f32 %v8184_v33, %v8216_v60  ;;  %v8185_v54 = vadd.f32 %v13935_v42, %v8145_v37  ;;  %v10501_v34 = vpop.f32.mrf.mxu0  ;;  %v8214_v8 = vmul.f32 0.1, %v8182_v24 }
 0x5a8   : > { %9284 = vst [vmem:[%s13975_s16 + $0x8] sm:$0xff] %v9212_v53   ;;  %v9207_v22 = vpack.c.bf16 %v8275_v51, %v8274_v50  ;;  %v8271_v13 = vmax.f32 %v8207_v9, %v8239_v59  ;;  %v8148_v47 = vadd.f32 %v10501_v34, %v13845_v28  ;;  %v7811_v38 = vadd.f32 %v13853_v43, %v13947_v7  ;;  %v14493_v53 = vld [vmem:[#allocation67_spill] sm:$0xff] }
 0x5a9   : > { %v9282_v1 = vpack.c.bf16 %v8305_v3, %v8304_v55  ;;  %v8217_v17 = vmul.f32 0.1, %v8185_v54  ;;  %v8183_v39 = vadd.f32 %v13935_v42, %v8143_v2  ;;  %v8043_v31 = vpop.f32.mrf.mxu0  ;;  %v8302_v46 = vadd.f32 %v8270_v35, %v14489_v45  ;;  %v14495_v45 = vld [vmem:[#allocation63_spill] sm:$0xff] }
 0x5aa   : > { %9208 = vst [vmem:[%s13975_s16] sm:$0xff] %v9207_v22   ;;  %v8303_v12 = vadd.f32 %v8271_v13, %v14490_v62  ;;  %v8188_v15 = vadd.f32 %v13935_v42, %v8148_v47  ;;  %v8146_v50 = vadd.f32 %v8043_v31, %v13953_v16  ;;  %v7809_v33 = vadd.f32 %v13858_v27, %v7487_v20  ;;  %v14496_v62 = vld [vmem:[#allocation57_spill] sm:$0xff] }
 0x5ab   : > { %9298 = vst [vmem:[%s13975_s16 + $0x78] sm:$0xff] %v9282_v1   ;;  %v8246_v28 = vmax.f32 %v8182_v24, %v8214_v8  ;;  %v8249_v43 = vmax.f32 %v8185_v54, %v8217_v17  ;;  %v8215_v7 = vmul.f32 0.1, %v8183_v39  ;;  %v10502_v55 = vpop.f32.mrf.mxu0  ;;  %v7493_v18 = vadd.f32 %v13863_v30, %v13757_v57 }
 0x5ac   : > { %v8280_v56 = vadd.f32 %v8248_v23, %v14491_v52  ;;  %v9277_v10 = vpack.c.bf16 %v8303_v12, %v8302_v46  ;;  %v8186_v9 = vadd.f32 %v13935_v42, %v8146_v50  ;;  %v8220_v16 = vmul.f32 0.1, %v8188_v15  ;;  %v14497_v50 = vld [vmem:[#allocation42_spill] sm:$0xff] }
 0x5ad   : > { %v8281_v35 = vadd.f32 %v8249_v43, %v14492_v25  ;;  %v8247_v44 = vmax.f32 %v8183_v39, %v8215_v7  ;;  %v8149_v27 = vadd.f32 %v10502_v55, %v7811_v38  ;;  %v8046_v20 = vpop.f32.mrf.mxu0  ;;  %v7814_v60 = vadd.f32 %v13861_v21, %v13856_v26 }
 0x5ae   : > { %9297 = vst [vmem:[%s13975_s16 + $0x70] sm:$0xff] %v9277_v10   ;;  %v8218_v37 = vmul.f32 0.1, %v8186_v9  ;;  %v8147_v29 = vadd.f32 %v8046_v20, %v7809_v33  ;;  %v8278_v57 = vadd.f32 %v8246_v28, %v14493_v53  ;;  %v7491_v41 = vadd.f32 %v13867_v14, %v13760_v63  ;;  %v14498_v28 = vld [vmem:[#allocation59_spill] sm:$0xff] }
 0x5af   : > { %v9222_v30 = vpack.c.bf16 %v8281_v35, %v8280_v56  ;;  %v8279_v51 = vadd.f32 %v8247_v44, %v14494_v4  ;;  %v8189_v59 = vadd.f32 %v13935_v42, %v8149_v27  ;;  %v10505_v24 = vpop.f32.mrf.mxu0  ;;  %v7815_v26 = vadd.f32 %v13869_v48, %v7493_v18  ;;  %v14499_v35 = vld [vmem:[#allocation56_spill] sm:$0xff]  ;;  %v14502_v4 = vld [vmem:[#allocation81_spill] sm:$0xff] }
 0x5b0   : > { %v8187_v3 = vadd.f32 %v13935_v42, %v8147_v29  ;;  %v8152_v23 = vadd.f32 %v10505_v24, %v7814_v60  ;;  %v8252_v54 = vmax.f32 %v8188_v15, %v8220_v16  ;;  %v8250_v22 = vmax.f32 %v8186_v9, %v8218_v37  ;;  %v14501_v29 = vld [vmem:[#allocation45_spill] sm:$0xff]  ;;  %v14504_v24 = vld [vmem:[#allocation83_spill] sm:$0xff] }
 0x5b1   : > { %9286 = vst [vmem:[%s13975_s16 + $0x18] sm:$0xff] %v9222_v30   ;;  %v9217_v21 = vpack.c.bf16 %v8279_v51, %v8278_v57  ;;  %v8221_v2 = vmul.f32 0.1, %v8189_v59  ;;  %v8059_v34 = vpop.f32.mrf.mxu0  ;;  %v7813_v48 = vadd.f32 %v13874_v36, %v7491_v41  ;;  %v7818_v31 = vadd.f32 %v13879_v6, %v13872_v49  ;;  %v14503_v51 = vld [vmem:[#allocation49_spill] sm:$0xff]  ;;  %v14505_v41 = vld [vmem:[#allocation74_spill] sm:$0xff] }
 0x5b2   : > { %v8219_v13 = vmul.f32 0.1, %v8187_v3  ;;  %v8192_v8 = vadd.f32 %v13935_v42, %v8152_v23  ;;  %v8150_v47 = vadd.f32 %v8059_v34, %v13865_v40  ;;  %v8284_v46 = vadd.f32 %v8252_v54, %v14495_v45  ;;  %v14510_v45 = vld [vmem:[#allocation87_spill] sm:$0xff] }
 0x5b3   : > { %9285 = vst [vmem:[%s13975_s16 + $0x10] sm:$0xff] %v9217_v21   ;;  %v8253_v38 = vmax.f32 %v8189_v59, %v8221_v2  ;;  %v10506_v1 = vpop.f32.mrf.mxu0  ;;  %v7497_v40 = vadd.f32 %v13881_v58, %v13769_v61  ;;  %v8282_v33 = vadd.f32 %v8250_v22, %v14497_v50  ;;  %v7495_v36 = vadd.f32 %v13885_v5, %v13772_v0  ;;  %v14506_v22 = vld [vmem:[#allocation66_spill] sm:$0xff] }
 0x5b4   : > { %v8251_v63 = vmax.f32 %v8187_v3, %v8219_v13  ;;  %v8224_v14 = vmul.f32 0.1, %v8192_v8  ;;  %v8190_v17 = vadd.f32 %v13935_v42, %v8150_v47  ;;  %v8153_v39 = vadd.f32 %v10506_v1, %v7815_v26 }
 0x5b5   : > { %v8285_v12 = vadd.f32 %v8253_v38, %v14496_v62  ;;  %v8062_v15 = vpop.f32.mrf.mxu0  ;;  %v7816_v52 = vadd.f32 %v13883_v11, %v13877_v32  ;;  %v7819_v44 = vadd.f32 %v14499_v35, %v7497_v40  ;;  %v7817_v5 = vadd.f32 %v13892_v19, %v7495_v36  ;;  %v14500_v11 = vld [vmem:[#allocation69_spill] sm:$0xff]  ;;  %v14517_v35 = vld [vmem:[#allocation72_spill] sm:$0xff] }
 0x5b6   : > { %v8283_v43 = vadd.f32 %v8251_v63, %v14498_v28  ;;  %v8193_v7 = vadd.f32 %v13935_v42, %v8153_v39  ;;  %v8222_v6 = vmul.f32 0.1, %v8190_v17  ;;  %v8151_v55 = vadd.f32 %v8062_v15, %v7813_v48  ;;  %v14508_v39 = vld [vmem:[#allocation80_spill] sm:$0xff] }
 0x5b7   : > { %v9232_v49 = vpack.c.bf16 %v8285_v12, %v8284_v46  ;;  %v10509_v18 = vpop.f32.mrf.mxu0  ;;  %v8256_v10 = vmax.f32 %v8192_v8, %v8224_v14  ;;  %v7822_v59 = vadd.f32 %v14503_v51, %v14502_v4  ;;  %v7501_v3 = vadd.f32 %v14505_v41, %v14504_v24  ;;  %v14507_v8 = vld [vmem:[#allocation65_spill] sm:$0xff]  ;;  %v14509_v48 = vld [vmem:[#allocation84_spill] sm:$0xff]  ;;  %v14521_v24 = vld [vmem:[#allocation51_spill] sm:$0xff] }
 0x5b8   : > { %v9227_v56 = vpack.c.bf16 %v8283_v43, %v8282_v33  ;;  %v8225_v61 = vmul.f32 0.1, %v8193_v7  ;;  %v8191_v58 = vadd.f32 %v13935_v42, %v8151_v55  ;;  %v8156_v9 = vadd.f32 %v10509_v18, %v7818_v31  ;;  %v14511_v28 = vld [vmem:[#allocation44_spill] sm:$0xff]  ;;  %v14522_v41 = vld [vmem:[#allocation21_spill] sm:$0xff] }
 0x5b9   : > { %9288 = vst [vmem:[%s13975_s16 + $0x28] sm:$0xff] %v9232_v49   ;;  %v8075_v25 = vpop.f32.mrf.mxu0  ;;  %v8254_v27 = vmax.f32 %v8190_v17, %v8222_v6  ;;  %v8288_v37 = vadd.f32 %v8256_v10, %v14500_v11  ;;  %v7499_v31 = vadd.f32 %v14509_v48, %v14508_v39  ;;  %v7823_v46 = vadd.f32 %v14510_v45, %v7501_v3  ;;  %v14513_v6 = vld [vmem:[#allocation68_spill] sm:$0xff] }
 0x5ba   : > { %9287 = vst [vmem:[%s13975_s16 + $0x20] sm:$0xff] %v9227_v56   ;;  %v8257_v16 = vmax.f32 %v8193_v7, %v8225_v61  ;;  %v8154_v0 = vadd.f32 %v8075_v25, %v7816_v52  ;;  %v8223_v20 = vmul.f32 0.1, %v8191_v58  ;;  %v8196_v60 = vadd.f32 %v13935_v42, %v8156_v9  ;;  %v14512_v7 = vld [vmem:[#allocation82_spill] sm:$0xff]  ;;  %v14514_v10 = vld [vmem:[#allocation76_spill] sm:$0xff] }
 0x5bb   : > { %v10510_v32 = vpop.f32.mrf.mxu0  ;;  %v8286_v13 = vadd.f32 %v8254_v27, %v14506_v22  ;;  %v7821_v61 = vadd.f32 %v14514_v10, %v7499_v31  ;;  %v14516_v9 = vld [vmem:[#allocation86_spill] sm:$0xff]  ;;  %v7503_v3 = vadd.f32 %v14522_v41, %v14521_v24  ;;  %v14527_v31 = vld [vmem:[#allocation23_spill] sm:$0xff] }
 0x5bc   : > { %v8289_v53 = vadd.f32 %v8257_v16, %v14501_v29  ;;  %v8194_v57 = vadd.f32 %v13935_v42, %v8154_v0  ;;  %v8157_v30 = vadd.f32 %v10510_v32, %v7819_v44  ;;  %v8255_v19 = vmax.f32 %v8191_v58, %v8223_v20  ;;  %v14515_v58 = vld [vmem:[#allocation85_spill] sm:$0xff]  ;;  %v14518_v44 = vld [vmem:[#allocation88_spill] sm:$0xff]  ;;  %v14519_v27 = vld [vmem:[#allocation62_spill] sm:$0xff] }
 0x5bd   : > { %v8228_v23 = vmul.f32 0.1, %v8196_v60  ;;  %v8078_v26 = vpop.f32.mrf.mxu0  ;;  %v7826_v25 = vadd.f32 %v14516_v9, %v14515_v58  ;;  %v7505_v16 = vadd.f32 %v14518_v44, %v14517_v35  ;;  %v14520_v32 = vld [vmem:[#allocation47_spill] sm:$0xff]  ;;  %v7825_v45 = vadd.f32 %v14527_v31, %v7503_v3  ;;  %v14530_v10 = vld [vmem:[#allocation70_spill] sm:$0xff]  ;;  %v14531_v58 = vld [vmem:[#allocation64_spill] sm:$0xff] }
 0x5be   : > { %v9242_v21 = vpack.c.bf16 %v8289_v53, %v8288_v37  ;;  %v8226_v54 = vmul.f32 0.1, %v8194_v57  ;;  %v8197_v2 = vadd.f32 %v13935_v42, %v8157_v30  ;;  %v8155_v34 = vadd.f32 %v8078_v26, %v7817_v5  ;;  %v14523_v26 = vld [vmem:[#allocation22_spill] sm:$0xff] }
 0x5bf   : > { %v8287_v47 = vadd.f32 %v8255_v19, %v14507_v8  ;;  %v8260_v38 = vmax.f32 %v8196_v60, %v8228_v23  ;;  %v10513_v1 = vpop.f32.mrf.mxu0  ;;  %v14532_v44 = vld [vmem:[#allocation54_spill] sm:$0xff] }
 0x5c0   : > { %9290 = vst [vmem:[%s13975_s16 + $0x38] sm:$0xff] %v9242_v21   ;;  %v8229_v63 = vmul.f32 0.1, %v8197_v2  ;;  %v8195_v14 = vadd.f32 %v13935_v42, %v8155_v34  ;;  %v8160_v17 = vadd.f32 %v10513_v1, %v7822_v59  ;;  %v8258_v15 = vmax.f32 %v8194_v57, %v8226_v54  ;;  %v14524_v34 = vld [vmem:[#allocation20_spill] sm:$0xff] }
 0x5c1   : > { %v9237_v62 = vpack.c.bf16 %v8287_v47, %v8286_v13  ;;  %v8091_v12 = vpop.f32.mrf.mxu0  ;;  %v8292_v43 = vadd.f32 %v8260_v38, %v14511_v28  ;;  %v7827_v21 = vadd.f32 %v14523_v26, %v7505_v16  ;;  %v14525_v13 = vld [vmem:[#allocation52_spill] sm:$0xff] }
 0x5c2   : > { %v8261_v40 = vmax.f32 %v8197_v2, %v8229_v63  ;;  %v8227_v50 = vmul.f32 0.1, %v8195_v14  ;;  %v8200_v33 = vadd.f32 %v13935_v42, %v8160_v17  ;;  %v8158_v36 = vadd.f32 %v8091_v12, %v14512_v7  ;;  %v14526_v63 = vld [vmem:[#allocation71_spill] sm:$0xff] }
 0x5c3   : > { %9289 = vst [vmem:[%s13975_s16 + $0x30] sm:$0xff] %v9237_v62   ;;  %v10514_v49 = vpop.f32.mrf.mxu0  ;;  %v8290_v20 = vadd.f32 %v8258_v15, %v14519_v27 }
 0x5c4   : > { %v8293_v55 = vadd.f32 %v8261_v40, %v14513_v6  ;;  %v8259_v18 = vmax.f32 %v8195_v14, %v8227_v50  ;;  %v8232_v52 = vmul.f32 0.1, %v8200_v33  ;;  %v8161_v56 = vadd.f32 %v10514_v49, %v7823_v46  ;;  %v14528_v40 = vld [vmem:[#allocation48_spill] sm:$0xff] }
 0x5c5   : > { %v8198_v0 = vadd.f32 %v13935_v42, %v8158_v36  ;;  %v8094_v5 = vpop.f32.mrf.mxu0 }
 0x5c6   : > { %v9252_v60 = vpack.c.bf16 %v8293_v55, %v8292_v43  ;;  %v8291_v11 = vadd.f32 %v8259_v18, %v14520_v32  ;;  %v8201_v37 = vadd.f32 %v13935_v42, %v8161_v56  ;;  %v8264_v29 = vmax.f32 %v8200_v33, %v8232_v52  ;;  %v14529_v33 = vld [vmem:[#allocation73_spill] sm:$0xff] }
 0x5c7   : > { %v8230_v53 = vmul.f32 0.1, %v8198_v0  ;;  %v8159_v57 = vadd.f32 %v8094_v5, %v7821_v61  ;;  %v10517_v30 = vpop.f32.mrf.mxu0 }
 0x5c8   : > { %9292 = vst [vmem:[%s13975_s16 + $0x48] sm:$0xff] %v9252_v60   ;;  %v9247_v4 = vpack.c.bf16 %v8291_v11, %v8290_v20  ;;  %v8233_v51 = vmul.f32 0.1, %v8201_v37  ;;  %v8164_v59 = vadd.f32 %v10517_v30, %v7826_v25  ;;  %v8296_v8 = vadd.f32 %v8264_v29, %v14525_v13 }
 0x5c9   : > { %v8199_v19 = vadd.f32 %v13935_v42, %v8159_v57  ;;  %v8107_v23 = vpop.f32.mrf.mxu0  ;;  %v8262_v47 = vmax.f32 %v8198_v0, %v8230_v53  ;;  %v14533_v0 = vld [vmem:[#allocation46_spill] sm:$0xff] }
 0x5ca   : > { %9291 = vst [vmem:[%s13975_s16 + $0x40] sm:$0xff] %v9247_v4   ;;  %v8265_v54 = vmax.f32 %v8201_v37, %v8233_v51  ;;  %v8204_v2 = vadd.f32 %v13935_v42, %v8164_v59  ;;  %v8162_v22 = vadd.f32 %v8107_v23, %v14524_v34 }
 0x5cb   : > { %v8231_v38 = vmul.f32 0.1, %v8199_v19  ;;  %v10518_v1 = vpop.f32.mrf.mxu0  ;;  %v8294_v50 = vadd.f32 %v8262_v47, %v14528_v40 }
 0x5cc   : > { %v8297_v14 = vadd.f32 %v8265_v54, %v14526_v63  ;;  %v8236_v17 = vmul.f32 0.1, %v8204_v2  ;;  %v8202_v39 = vadd.f32 %v13935_v42, %v8162_v22  ;;  %v8165_v48 = vadd.f32 %v10518_v1, %v7827_v21 }
 0x5cd   : > { %v8263_v46 = vmax.f32 %v8199_v19, %v8231_v38  ;;  %v8110_v62 = vpop.f32.mrf.mxu0 }
 0x5ce   : > { %v9262_v12 = vpack.c.bf16 %v8297_v14, %v8296_v8  ;;  %v8205_v15 = vadd.f32 %v13935_v42, %v8165_v48  ;;  %v8234_v43 = vmul.f32 0.1, %v8202_v39  ;;  %v8163_v7 = vadd.f32 %v8110_v62, %v7825_v45 }
 0x5cf   : > { %v8295_v28 = vadd.f32 %v8263_v46, %v14529_v33  ;;  %v8268_v36 = vmax.f32 %v8204_v2, %v8236_v17 }
 0x5d0   : > { %9294 = vst [vmem:[%s13975_s16 + $0x58] sm:$0xff] %v9262_v12   ;;  %v8237_v49 = vmul.f32 0.1, %v8205_v15  ;;  %v8203_v55 = vadd.f32 %v13935_v42, %v8163_v7  ;;  %v8266_v52 = vmax.f32 %v8202_v39, %v8234_v43 }
 0x5d1   : > { %v9257_v6 = vpack.c.bf16 %v8295_v28, %v8294_v50  ;;  %v8300_v61 = vadd.f32 %v8268_v36, %v14530_v10 }
 0x5d2   : > { %v8269_v18 = vmax.f32 %v8205_v15, %v8237_v49  ;;  %v8235_v56 = vmul.f32 0.1, %v8203_v55  ;;  %v8298_v16 = vadd.f32 %v8266_v52, %v14532_v44 }
 0x5d3   : > { %9293 = vst [vmem:[%s13975_s16 + $0x50] sm:$0xff] %v9257_v6  }
 0x5d4   : > { %v8301_v9 = vadd.f32 %v8269_v18, %v14531_v58  ;;  %v8267_v25 = vmax.f32 %v8203_v55, %v8235_v56 }
 0x5d6   : > { %v9272_v35 = vpack.c.bf16 %v8301_v9, %v8300_v61  ;;  %v8299_v5 = vadd.f32 %v8267_v25, %v14533_v0 }
 0x5d8   : > { %9296 = vst [vmem:[%s13975_s16 + $0x68] sm:$0xff] %v9272_v35   ;;  %v9267_v27 = vpack.c.bf16 %v8299_v5, %v8298_v16 }
 0x5da   : > { %9295 = vst [vmem:[%s13975_s16 + $0x60] sm:$0xff] %v9267_v27  }
 0x5db PF: > { %s19_s24 = sadd.s32 1, %s10769_s24  }
 0x5dc   : > { %p16_p2 = scmp.ge.s32.totalorder %s19_s24, 4  }
 0x5de   :  { %18 = sbr.rel (!%p16_p2) target bundleno = 2 (0x2), region = 107 }
 0x5e3   :  { %8487 = vsyncpa [#allocation4], 1 }
 0x5e4   :  { %8489 = vsyncpa [#allocation4 + $0x1], 1 }
 0x5e5   :  { %8490 = vsyncpa [#allocation6], 1 }

</bundles_post_ra>
